<compile_context>
chip_gen: v6e
topology: v6e:2x2x1
jax: 0.10.0
libtpu: 0.0.40
codegen_flags: <defaults>
</compile_context>

<pallas_src>
import numpy as np
import jax
import jax.numpy as jnp
from jax.experimental import pallas as pl
from jax.experimental.pallas import tpu as pltpu

LANE = 128


def _round_up(x, m):
    return ((x + m - 1) // m) * m


# ----------------------------- Pallas kernels -----------------------------

def _conv_relu_pool_kernel(p_ref, w_ref, b_ref, o_ref):
    """Fused valid conv (matmul over im2col patches) + bias + ReLU + MaxPool2d(2,2).

    p_ref: (4, TM, K_pad) bf16 — one patch tile per 2x2 pooling-window corner.
    w_ref: (K_pad, Cout_pad) bf16.   b_ref: (1, Cout_pad) f32.
    o_ref: (TM, Cout_pad) bf16 — pooled output rows (lane-dense, 128-wide).
    Math: relu(max_c(p_c @ w) + b) == max_c(relu(p_c @ w + b)) since the bias is
    shared and bias-add / relu are monotone, but with ~half the VPU epilogue.
    """
    w = w_ref[...]
    acc = jnp.dot(p_ref[0], w, preferred_element_type=jnp.float32)
    acc = jnp.maximum(acc, jnp.dot(p_ref[1], w, preferred_element_type=jnp.float32))
    acc = jnp.maximum(acc, jnp.dot(p_ref[2], w, preferred_element_type=jnp.float32))
    acc = jnp.maximum(acc, jnp.dot(p_ref[3], w, preferred_element_type=jnp.float32))
    o_ref[...] = jnp.maximum(acc + b_ref[...], 0.0).astype(o_ref.dtype)


def _mlp_kernel(x_ref, w1_ref, b1_ref, w2_ref, b2_ref, w3_ref, b3_ref, o_ref):
    """relu(x@W1+b1) -> relu(.@W2+b2) -> .@W3+b3 fused; bf16 matmul inputs, f32 accum."""
    h = jnp.dot(x_ref[...].astype(jnp.bfloat16), w1_ref[...],
                preferred_element_type=jnp.float32) + b1_ref[...]
    h = jnp.maximum(h, 0.0)
    h = jnp.dot(h.astype(jnp.bfloat16), w2_ref[...],
                preferred_element_type=jnp.float32) + b2_ref[...]
    h = jnp.maximum(h, 0.0)
    o_ref[...] = jnp.dot(h.astype(jnp.bfloat16), w3_ref[...],
                         preferred_element_type=jnp.float32) + b3_ref[...]


_VMEM = pl.BlockSpec(memory_space=pltpu.MemorySpace.VMEM)


# ----------------------------- wrappers (glue + pallas_call) -----------------------------

def _pooled_corner_patches(x, kh, kw):
    """Glue: one (4, M, K) patch tensor; corner c = 2*di+dj holds the im2col rows
    for conv outputs at (2*ph+di, 2*pw+dj).  Row order (n, ph, pw), K order (i, j, cin)."""
    n, h, w, c = x.shape
    ho, wo = h - kh + 1, w - kw + 1
    ph, pw = ho // 2, wo // 2
    taps = [x[:, i:i + ho, j:j + wo, :] for i in range(kh) for j in range(kw)]
    p = jnp.stack(taps, axis=3)                          # (N, HO, WO, T, C)
    p = p[:, :2 * ph, :2 * pw]                           # drop odd pooling remainder
    p = p.reshape(n, ph, 2, pw, 2, kh * kw, c)
    p = jnp.transpose(p, (2, 4, 0, 1, 3, 5, 6))          # (2, 2, N, PH, PW, T, C)
    return p.reshape(4, n * ph * pw, kh * kw * c)


def _choose_tile(m, k_pad, tmax=512, vmem_budget=8 << 20):
    """M-tile choice: split 2-way (worth v7x's second TensorCore) only when each
    half is a worthwhile MXU tile (>= 128 rows); otherwise one grid step so
    single-core v5e/v6e pay no extra per-step overhead.  16-row (bf16) granules."""
    gr = 16
    bytes_per_row = 4 * k_pad * 2 * 2 + LANE * 2 * 2     # 4 bf16 corner tiles + bf16 out, 2x buffered
    cap = max(gr, min(tmax, (vmem_budget // bytes_per_row) // gr * gr))
    m_g = _round_up(m, gr)
    half = _round_up(-(-m // 2), gr)
    if m_g // 2 >= 128 and half <= cap:
        tm = half
    else:
        tm = min(cap, m_g)
    return tm, _round_up(m, tm)


def conv_relu_pool(x, w2d, b2d, kh, kw, cout):
    """x: (N,H,W,Cin) bf16; w2d: (K_pad, Cout_pad) bf16; b2d: (1, Cout_pad) f32.
    Valid conv (stride 1) + bias + ReLU + MaxPool2d(2,2).
    Returns (N, HO//2, WO//2, cout) bf16 — padded K rows / Cout columns sliced
    back off so the next stage's K is built from the real Cin."""
    n, h, w, c = x.shape
    ho, wo = h - kh + 1, w - kw + 1
    ph, pw = ho // 2, wo // 2
    k = kh * kw * c
    kp, coutp = w2d.shape
    m = n * ph * pw
    tm, mp = _choose_tile(m, kp)

    p = _pooled_corner_patches(x, kh, kw)
    p = jnp.pad(p, ((0, 0), (0, mp - m), (0, kp - k)))

    out = pl.pallas_call(
        _conv_relu_pool_kernel,
        out_shape=jax.ShapeDtypeStruct((mp, coutp), jnp.bfloat16),
        grid=(mp // tm,),
        in_specs=[pl.BlockSpec((4, tm, kp), lambda i: (0, i, 0)),
                  pl.BlockSpec((kp, coutp), lambda i: (0, 0)),
                  pl.BlockSpec((1, coutp), lambda i: (0, 0))],
        out_specs=pl.BlockSpec((tm, coutp), lambda i: (i, 0)),
        compiler_params=pltpu.CompilerParams(dimension_semantics=("parallel",)),
    )(p, w2d, b2d)
    return out[:m, :cout].reshape(n, ph, pw, cout)


def adaptive_avg_pool2d(x, out_size):
    """Glue: adaptive average pool with identity / divisible fast paths."""
    n, h, w, c = x.shape
    if h == out_size and w == out_size:
        return x                                          # identity (the case here)
    if h % out_size == 0 and w % out_size == 0:
        return jnp.mean(x.reshape(n, out_size, h // out_size, out_size, w // out_size, c),
                        axis=(2, 4))
    rows = []                                             # exact PyTorch bin formula fallback
    for i in range(out_size):
        hs, he = (i * h) // out_size, -((-(i + 1) * h) // out_size)
        cols = []
        for j in range(out_size):
            ws, we = (j * w) // out_size, -((-(j + 1) * w) // out_size)
            cols.append(jnp.mean(x[:, hs:he, ws:we, :], axis=(1, 2)))
        rows.append(jnp.stack(cols, axis=1))
    return jnp.stack(rows, axis=1)


def mlp_head(x, w1, b1, w2, b2, w3, b3):
    return pl.pallas_call(
        _mlp_kernel,
        out_shape=jax.ShapeDtypeStruct((x.shape[0], w3.shape[1]), jnp.float32),
        in_specs=[_VMEM] * 7,
        out_specs=_VMEM,
    )(x, w1, b1, w2, b2, w3, b3)


def dwg_keypoints_forward(x_nchw, params, *, max_points=100, num_features=6,
                          conv_couts=(32, 64, 128)):
    x = jnp.transpose(x_nchw, (0, 2, 3, 1)).astype(jnp.bfloat16)   # NCHW -> NHWC, bf16 MXU path
    x = conv_relu_pool(x, params["cw1"], params["cb1"], 5, 5, conv_couts[0])
    x = conv_relu_pool(x, params["cw2"], params["cb2"], 3, 3, conv_couts[1])
    x = conv_relu_pool(x, params["cw3"], params["cb3"], 3, 3, conv_couts[2])
    x = adaptive_avg_pool2d(x, 4)                         # identity: conv3 pooled output is 4x4
    bs = x.shape[0]
    # fw1's rows were pre-permuted to NHWC flatten order, so no runtime transpose here.
    x = x.reshape(bs, -1)
    y = mlp_head(x, params["fw1"], params["fb1"], params["fw2"], params["fb2"],
                 params["fw3"], params["fb3"])
    y = y[:, :max_points * num_features]                  # drop the 600 -> 640 padding
    return y.reshape(bs, max_points, num_features)


# ----------------------------- parameters -----------------------------

def init_params(key, num_img_channels=3, max_points=100, num_coordinates=2, num_pnt_classes=3):
    """Natural (PyTorch-equivalent) parameters in f32."""
    s = 16
    num_features = num_coordinates + num_pnt_classes + 1     # 6
    output_size = max_points * num_features                  # 600
    fc1_in = 128 * 4 * 4                                     # see TODO(synk) at top of file
    ks = jax.random.split(key, 12)

    def conv_w(k, cout, cin, kh, kw):
        # PyTorch layout (Cout, Cin, KH, KW), transposed to (KH, KW, Cin, Cout).
        w = jax.random.normal(k, (cout, cin, kh, kw), jnp.float32) / np.sqrt(cin * kh * kw)
        return jnp.transpose(w, (2, 3, 1, 0))

    def lin_w(k, cout, cin):
        w = jax.random.normal(k, (cout, cin), jnp.float32) / np.sqrt(cin)
        return jnp.transpose(w, (1, 0))                       # (in, out)

    return dict(
        w1=conv_w(ks[0], 2 * s, num_img_channels, 5, 5),
        b1=0.01 * jax.random.normal(ks[1], (2 * s,), jnp.float32),
        w2=conv_w(ks[2], 4 * s, 2 * s, 3, 3),
        b2=0.01 * jax.random.normal(ks[3], (4 * s,), jnp.float32),
        w3=conv_w(ks[4], 8 * s, 4 * s, 3, 3),
        b3=0.01 * jax.random.normal(ks[5], (8 * s,), jnp.float32),
        fw1=lin_w(ks[6], 512, fc1_in),
        fb1=0.01 * jax.random.normal(ks[7], (1, 512), jnp.float32),
        fw2=lin_w(ks[8], 128, 512),
        fb2=0.01 * jax.random.normal(ks[9], (1, 128), jnp.float32),
        fw3=lin_w(ks[10], output_size, 128),
        fb3=0.01 * jax.random.normal(ks[11], (1, output_size), jnp.float32),
    )


def prepare_params(p):
    """Pad / reshape / cast natural params into the kernel layout:
    conv weights -> (K_pad, Cout_pad) bf16, K built from the REAL Cin (no channel
    padding carried between stages), K order (kh, kw, cin); conv biases ->
    (1, Cout_pad) f32; fc1 rows pre-permuted from CHW to NHWC flatten order;
    FC weights bf16; fc3 output padded 600 -> 640 with zero columns."""
    def conv(w, b):
        kh, kw, cin, cout = w.shape
        coutp = _round_up(cout, LANE)
        k = kh * kw * cin
        kp = _round_up(k, LANE)
        w2d = jnp.pad(w.reshape(k, cout), ((0, kp - k), (0, coutp - cout))).astype(jnp.bfloat16)
        b2d = jnp.pad(b, (0, coutp - cout)).reshape(1, coutp).astype(jnp.float32)
        return w2d, b2d

    cw1, cb1 = conv(p["w1"], p["b1"])
    cw2, cb2 = conv(p["w2"], p["b2"])
    cw3, cb3 = conv(p["w3"], p["b3"])

    # fc1: PyTorch flatten order is (C, H, W); our flatten is NHWC (H, W, C).
    cout3 = p["w3"].shape[3]
    fw1 = p["fw1"]
    fc1_in, fc1_out = fw1.shape
    sp = int(round((fc1_in // cout3) ** 0.5))             # 4
    fw1 = jnp.transpose(fw1.reshape(cout3, sp, sp, fc1_out), (1, 2, 0, 3)).reshape(fc1_in, fc1_out)

    out_dim = p["fw3"].shape[1]
    outp = _round_up(out_dim, LANE)
    return dict(
        cw1=cw1, cb1=cb1, cw2=cw2, cb2=cb2, cw3=cw3, cb3=cb3,
        fw1=fw1.astype(jnp.bfloat16), fb1=p["fb1"].astype(jnp.float32),
        fw2=p["fw2"].astype(jnp.bfloat16), fb2=p["fb2"].astype(jnp.float32),
        fw3=jnp.pad(p["fw3"], ((0, 0), (0, outp - out_dim))).astype(jnp.bfloat16),
        fb3=jnp.pad(p["fb3"], ((0, 0), (0, outp - out_dim))).astype(jnp.float32),
    )


# ----------------------------- pure-JAX reference (mirrors the precision policy) -----------------------------

def _forward_ref(x_nchw, params, *, max_points=100, num_features=6, conv_couts=(32, 64, 128)):
    x = jnp.transpose(x_nchw, (0, 2, 3, 1)).astype(jnp.bfloat16)

    def conv_relu_pool_ref(x, w2d, b2d, kh, kw, cout):
        n, h, w, c = x.shape
        ho, wo = h - kh + 1, w - kw + 1
        cols = [x[:, i:i + ho, j:j + wo, :] for i in range(kh) for j in range(kw)]
        p = jnp.stack(cols, axis=3).reshape(n * ho * wo, kh * kw * c)
        kp, coutp = w2d.shape
        p = jnp.pad(p, ((0, 0), (0, kp - kh * kw * c)))
        y = jnp.dot(p, w2d, preferred_element_type=jnp.float32) + b2d
        y = jnp.maximum(y, 0.0).reshape(n, ho, wo, coutp)[..., :cout]
        y = y[:, :2 * (ho // 2), :2 * (wo // 2)]
        y = jnp.max(y.reshape(n, ho // 2, 2, wo // 2, 2, cout), axis=(2, 4))
        return y.astype(jnp.bfloat16)

    x = conv_relu_pool_ref(x, params["cw1"], params["cb1"], 5, 5, conv_couts[0])
    x = conv_relu_pool_ref(x, params["cw2"], params["cb2"], 3, 3, conv_couts[1])
    x = conv_relu_pool_ref(x, params["cw3"], params["cb3"], 3, 3, conv_couts[2])
    x = adaptive_avg_pool2d(x, 4)
    bs = x.shape[0]
    x = x.reshape(bs, -1)
    h = jnp.maximum(jnp.dot(x.astype(jnp.bfloat16), params["fw1"],
                            preferred_element_type=jnp.float32) + params["fb1"], 0.0)
    h = jnp.maximum(jnp.dot(h.astype(jnp.bfloat16), params["fw2"],
                            preferred_element_type=jnp.float32) + params["fb2"], 0.0)
    y = jnp.dot(h.astype(jnp.bfloat16), params["fw3"],
                preferred_element_type=jnp.float32) + params["fb3"]
    return y[:, :max_points * num_features].reshape(bs, max_points, num_features)


# ----------------------------- main -----------------------------

if __name__ == "__main__":
    key = jax.random.PRNGKey(0)
    pkey, xkey = jax.random.split(key)
    natural = init_params(pkey)
    params = prepare_params(natural)

    # Small NCHW input consistent with the module (3 image channels); 48x48 spatial
    # so conv/pool stages stay valid: 48 ->44->22 ->20->10 ->8->4 -> adaptive 4x4.
    x = jax.random.normal(xkey, (2, 3, 48, 48), jnp.float32)

    out = jax.jit(dwg_keypoints_forward)(x, params)
    out = jax.block_until_ready(out)
    assert out.shape == (2, 100, 6), out.shape

    ref = _forward_ref(x, params)
    np.testing.assert_allclose(np.asarray(out), np.asarray(ref), rtol=1e-2, atol=1e-2)

    print("KERNEL_OK")
</pallas_src>

<mosaic_0001>
module attributes {stable_mosaic.version = 11 : i64} {
  func.func @_conv_relu_pool_kernel(%arg0: i32, %arg1: memref<4x496x128xbf16, #tpu.memory_space<vmem>>, %arg2: memref<128x128xbf16, #tpu.memory_space<vmem>>, %arg3: memref<1x128xf32, #tpu.memory_space<vmem>>, %arg4: memref<496x128xbf16, #tpu.memory_space<vmem>>) attributes {dimension_semantics = [#tpu.dimension_semantics<parallel>], iteration_bounds = array<i64: 2>, scalar_prefetch = 0 : i64, scratch_operands = 0 : i64, tpu.core_type = #tpu.core_type<tc>, window_params = [{transform_indices = @transform_0, window_bounds = array<i64: 4, 496, 128>}, {pipeline_mode = #tpu.pipeline_mode<synchronous>, transform_indices = @transform_1, window_bounds = array<i64: 128, 128>}, {pipeline_mode = #tpu.pipeline_mode<synchronous>, transform_indices = @transform_2, window_bounds = array<i64: 1, 128>}, {transform_indices = @transform_3, window_bounds = array<i64: 496, 128>}]} {
    %c0 = arith.constant 0 : index
    %c0_0 = arith.constant 0 : index
    %0 = vector.load %arg2[%c0, %c0_0] : memref<128x128xbf16, #tpu.memory_space<vmem>>, vector<128x128xbf16>
    %c0_1 = arith.constant 0 : index
    %c0_2 = arith.constant 0 : index
    %c0_3 = arith.constant 0 : index
    %1 = vector.load %arg1[%c0_1, %c0_2, %c0_3] : memref<4x496x128xbf16, #tpu.memory_space<vmem>>, vector<1x496x128xbf16>
    %2 = vector.shape_cast %1 : vector<1x496x128xbf16> to vector<496x128xbf16>
    %cst = arith.constant dense<0.000000e+00> : vector<496x128xf32>
    %3 = tpu.matmul %2, %0, %cst {dimension_numbers = #tpu.dot_dimension_numbers<[1], [0], [0], [1], [0, 0, 1, 1], [], []>} : vector<496x128xbf16>, vector<128x128xbf16>, vector<496x128xf32> -> vector<496x128xf32>
    %c1 = arith.constant 1 : index
    %c0_4 = arith.constant 0 : index
    %c0_5 = arith.constant 0 : index
    %4 = vector.load %arg1[%c1, %c0_4, %c0_5] : memref<4x496x128xbf16, #tpu.memory_space<vmem>>, vector<1x496x128xbf16>
    %5 = vector.shape_cast %4 : vector<1x496x128xbf16> to vector<496x128xbf16>
    %cst_6 = arith.constant dense<0.000000e+00> : vector<496x128xf32>
    %6 = tpu.matmul %5, %0, %cst_6 {dimension_numbers = #tpu.dot_dimension_numbers<[1], [0], [0], [1], [0, 0, 1, 1], [], []>} : vector<496x128xbf16>, vector<128x128xbf16>, vector<496x128xf32> -> vector<496x128xf32>
    %7 = arith.maximumf %3, %6 : vector<496x128xf32>
    %c2 = arith.constant 2 : index
    %c0_7 = arith.constant 0 : index
    %c0_8 = arith.constant 0 : index
    %8 = vector.load %arg1[%c2, %c0_7, %c0_8] : memref<4x496x128xbf16, #tpu.memory_space<vmem>>, vector<1x496x128xbf16>
    %9 = vector.shape_cast %8 : vector<1x496x128xbf16> to vector<496x128xbf16>
    %cst_9 = arith.constant dense<0.000000e+00> : vector<496x128xf32>
    %10 = tpu.matmul %9, %0, %cst_9 {dimension_numbers = #tpu.dot_dimension_numbers<[1], [0], [0], [1], [0, 0, 1, 1], [], []>} : vector<496x128xbf16>, vector<128x128xbf16>, vector<496x128xf32> -> vector<496x128xf32>
    %11 = arith.maximumf %7, %10 : vector<496x128xf32>
    %c3 = arith.constant 3 : index
    %c0_10 = arith.constant 0 : index
    %c0_11 = arith.constant 0 : index
    %12 = vector.load %arg1[%c3, %c0_10, %c0_11] : memref<4x496x128xbf16, #tpu.memory_space<vmem>>, vector<1x496x128xbf16>
    %13 = vector.shape_cast %12 : vector<1x496x128xbf16> to vector<496x128xbf16>
    %cst_12 = arith.constant dense<0.000000e+00> : vector<496x128xf32>
    %14 = tpu.matmul %13, %0, %cst_12 {dimension_numbers = #tpu.dot_dimension_numbers<[1], [0], [0], [1], [0, 0, 1, 1], [], []>} : vector<496x128xbf16>, vector<128x128xbf16>, vector<496x128xf32> -> vector<496x128xf32>
    %15 = arith.maximumf %11, %14 : vector<496x128xf32>
    %c0_13 = arith.constant 0 : index
    %c0_14 = arith.constant 0 : index
    %16 = vector.load %arg3[%c0_13, %c0_14] : memref<1x128xf32, #tpu.memory_space<vmem>>, vector<1x128xf32>
    %17 = vector.broadcast %16 : vector<1x128xf32> to vector<496x128xf32>
    %18 = arith.addf %15, %17 : vector<496x128xf32>
    %cst_15 = arith.constant 0.000000e+00 : f32
    %19 = vector.broadcast %cst_15 : f32 to vector<496x128xf32>
    %20 = arith.maximumf %18, %19 : vector<496x128xf32>
    %21 = arith.truncf %20 : vector<496x128xf32> to vector<496x128xbf16>
    %c0_16 = arith.constant 0 : index
    %c0_17 = arith.constant 0 : index
    %22 = vector.load %arg4[%c0_16, %c0_17] : memref<496x128xbf16, #tpu.memory_space<vmem>>, vector<496x128xbf16>
    tpu.vector_store %arg4[%c0_16, %c0_17], %21 {strides = array<i32>} : memref<496x128xbf16, #tpu.memory_space<vmem>>, vector<496x128xbf16>,
    return
  }
  func.func @transform_0(%arg0: i32) -> (i32, i32, i32) {
    %c0_i32 = arith.constant 0 : i32
    %c0_i32_0 = arith.constant 0 : i32
    %c0_i32_1 = arith.constant 0 : i32
    return %c0_i32, %arg0, %c0_i32_0 : i32, i32, i32
  }
  func.func @transform_1(%arg0: i32) -> (i32, i32) {
    %c0_i32 = arith.constant 0 : i32
    %c0_i32_0 = arith.constant 0 : i32
    %c0_i32_1 = arith.constant 0 : i32
    return %c0_i32, %c0_i32_0 : i32, i32
  }
  func.func @transform_2(%arg0: i32) -> (i32, i32) {
    %c0_i32 = arith.constant 0 : i32
    %c0_i32_0 = arith.constant 0 : i32
    %c0_i32_1 = arith.constant 0 : i32
    return %c0_i32, %c0_i32_0 : i32, i32
  }
  func.func @transform_3(%arg0: i32) -> (i32, i32) {
    %c0_i32 = arith.constant 0 : i32
    %c0_i32_0 = arith.constant 0 : i32
    return %arg0, %c0_i32 : i32, i32
  }
}

module attributes {stable_mosaic.version = 11 : i64} {
  func.func @_conv_relu_pool_kernel(%arg0: i32, %arg1: memref<4x208x384xbf16, #tpu.memory_space<vmem>>, %arg2: memref<384x128xbf16, #tpu.memory_space<vmem>>, %arg3: memref<1x128xf32, #tpu.memory_space<vmem>>, %arg4: memref<208x128xbf16, #tpu.memory_space<vmem>>) attributes {dimension_semantics = [#tpu.dimension_semantics<parallel>], iteration_bounds = array<i64: 1>, scalar_prefetch = 0 : i64, scratch_operands = 0 : i64, tpu.core_type = #tpu.core_type<tc>, window_params = [{transform_indices = @transform_0, window_bounds = array<i64: 4, 208, 384>}, {pipeline_mode = #tpu.pipeline_mode<synchronous>, transform_indices = @transform_1, window_bounds = array<i64: 384, 128>}, {pipeline_mode = #tpu.pipeline_mode<synchronous>, transform_indices = @transform_2, window_bounds = array<i64: 1, 128>}, {transform_indices = @transform_3, window_bounds = array<i64: 208, 128>}]} {
    %c0 = arith.constant 0 : index
    %c0_0 = arith.constant 0 : index
    %0 = vector.load %arg2[%c0, %c0_0] : memref<384x128xbf16, #tpu.memory_space<vmem>>, vector<384x128xbf16>
    %c0_1 = arith.constant 0 : index
    %c0_2 = arith.constant 0 : index
    %c0_3 = arith.constant 0 : index
    %1 = vector.load %arg1[%c0_1, %c0_2, %c0_3] : memref<4x208x384xbf16, #tpu.memory_space<vmem>>, vector<1x208x384xbf16>
    %2 = vector.shape_cast %1 : vector<1x208x384xbf16> to vector<208x384xbf16>
    %cst = arith.constant dense<0.000000e+00> : vector<208x128xf32>
    %3 = tpu.matmul %2, %0, %cst {dimension_numbers = #tpu.dot_dimension_numbers<[1], [0], [0], [1], [0, 0, 1, 1], [], []>} : vector<208x384xbf16>, vector<384x128xbf16>, vector<208x128xf32> -> vector<208x128xf32>
    %c1 = arith.constant 1 : index
    %c0_4 = arith.constant 0 : index
    %c0_5 = arith.constant 0 : index
    %4 = vector.load %arg1[%c1, %c0_4, %c0_5] : memref<4x208x384xbf16, #tpu.memory_space<vmem>>, vector<1x208x384xbf16>
    %5 = vector.shape_cast %4 : vector<1x208x384xbf16> to vector<208x384xbf16>
    %cst_6 = arith.constant dense<0.000000e+00> : vector<208x128xf32>
    %6 = tpu.matmul %5, %0, %cst_6 {dimension_numbers = #tpu.dot_dimension_numbers<[1], [0], [0], [1], [0, 0, 1, 1], [], []>} : vector<208x384xbf16>, vector<384x128xbf16>, vector<208x128xf32> -> vector<208x128xf32>
    %7 = arith.maximumf %3, %6 : vector<208x128xf32>
    %c2 = arith.constant 2 : index
    %c0_7 = arith.constant 0 : index
    %c0_8 = arith.constant 0 : index
    %8 = vector.load %arg1[%c2, %c0_7, %c0_8] : memref<4x208x384xbf16, #tpu.memory_space<vmem>>, vector<1x208x384xbf16>
    %9 = vector.shape_cast %8 : vector<1x208x384xbf16> to vector<208x384xbf16>
    %cst_9 = arith.constant dense<0.000000e+00> : vector<208x128xf32>
    %10 = tpu.matmul %9, %0, %cst_9 {dimension_numbers = #tpu.dot_dimension_numbers<[1], [0], [0], [1], [0, 0, 1, 1], [], []>} : vector<208x384xbf16>, vector<384x128xbf16>, vector<208x128xf32> -> vector<208x128xf32>
    %11 = arith.maximumf %7, %10 : vector<208x128xf32>
    %c3 = arith.constant 3 : index
    %c0_10 = arith.constant 0 : index
    %c0_11 = arith.constant 0 : index
    %12 = vector.load %arg1[%c3, %c0_10, %c0_11] : memref<4x208x384xbf16, #tpu.memory_space<vmem>>, vector<1x208x384xbf16>
    %13 = vector.shape_cast %12 : vector<1x208x384xbf16> to vector<208x384xbf16>
    %cst_12 = arith.constant dense<0.000000e+00> : vector<208x128xf32>
    %14 = tpu.matmul %13, %0, %cst_12 {dimension_numbers = #tpu.dot_dimension_numbers<[1], [0], [0], [1], [0, 0, 1, 1], [], []>} : vector<208x384xbf16>, vector<384x128xbf16>, vector<208x128xf32> -> vector<208x128xf32>
    %15 = arith.maximumf %11, %14 : vector<208x128xf32>
    %c0_13 = arith.constant 0 : index
    %c0_14 = arith.constant 0 : index
    %16 = vector.load %arg3[%c0_13, %c0_14] : memref<1x128xf32, #tpu.memory_space<vmem>>, vector<1x128xf32>
    %17 = vector.broadcast %16 : vector<1x128xf32> to vector<208x128xf32>
    %18 = arith.addf %15, %17 : vector<208x128xf32>
    %cst_15 = arith.constant 0.000000e+00 : f32
    %19 = vector.broadcast %cst_15 : f32 to vector<208x128xf32>
    %20 = arith.maximumf %18, %19 : vector<208x128xf32>
    %21 = arith.truncf %20 : vector<208x128xf32> to vector<208x128xbf16>
    %c0_16 = arith.constant 0 : index
    %c0_17 = arith.constant 0 : index
    %22 = vector.load %arg4[%c0_16, %c0_17] : memref<208x128xbf16, #tpu.memory_space<vmem>>, vector<208x128xbf16>
    tpu.vector_store %arg4[%c0_16, %c0_17], %21 {strides = array<i32>} : memref<208x128xbf16, #tpu.memory_space<vmem>>, vector<208x128xbf16>,
    return
  }
  func.func @transform_0(%arg0: i32) -> (i32, i32, i32) {
    %c0_i32 = arith.constant 0 : i32
    %c0_i32_0 = arith.constant 0 : i32
    %c0_i32_1 = arith.constant 0 : i32
    return %c0_i32, %arg0, %c0_i32_0 : i32, i32, i32
  }
  func.func @transform_1(%arg0: i32) -> (i32, i32) {
    %c0_i32 = arith.constant 0 : i32
    %c0_i32_0 = arith.constant 0 : i32
    %c0_i32_1 = arith.constant 0 : i32
    return %c0_i32, %c0_i32_0 : i32, i32
  }
  func.func @transform_2(%arg0: i32) -> (i32, i32) {
    %c0_i32 = arith.constant 0 : i32
    %c0_i32_0 = arith.constant 0 : i32
    %c0_i32_1 = arith.constant 0 : i32
    return %c0_i32, %c0_i32_0 : i32, i32
  }
  func.func @transform_3(%arg0: i32) -> (i32, i32) {
    %c0_i32 = arith.constant 0 : i32
    %c0_i32_0 = arith.constant 0 : i32
    return %arg0, %c0_i32 : i32, i32
  }
}

module attributes {stable_mosaic.version = 11 : i64} {
  func.func @_conv_relu_pool_kernel(%arg0: i32, %arg1: memref<4x32x640xbf16, #tpu.memory_space<vmem>>, %arg2: memref<640x128xbf16, #tpu.memory_space<vmem>>, %arg3: memref<1x128xf32, #tpu.memory_space<vmem>>, %arg4: memref<32x128xbf16, #tpu.memory_space<vmem>>) attributes {dimension_semantics = [#tpu.dimension_semantics<parallel>], iteration_bounds = array<i64: 1>, scalar_prefetch = 0 : i64, scratch_operands = 0 : i64, tpu.core_type = #tpu.core_type<tc>, window_params = [{transform_indices = @transform_0, window_bounds = array<i64: 4, 32, 640>}, {pipeline_mode = #tpu.pipeline_mode<synchronous>, transform_indices = @transform_1, window_bounds = array<i64: 640, 128>}, {pipeline_mode = #tpu.pipeline_mode<synchronous>, transform_indices = @transform_2, window_bounds = array<i64: 1, 128>}, {transform_indices = @transform_3, window_bounds = array<i64: 32, 128>}]} {
    %c0 = arith.constant 0 : index
    %c0_0 = arith.constant 0 : index
    %0 = vector.load %arg2[%c0, %c0_0] : memref<640x128xbf16, #tpu.memory_space<vmem>>, vector<640x128xbf16>
    %c0_1 = arith.constant 0 : index
    %c0_2 = arith.constant 0 : index
    %c0_3 = arith.constant 0 : index
    %1 = vector.load %arg1[%c0_1, %c0_2, %c0_3] : memref<4x32x640xbf16, #tpu.memory_space<vmem>>, vector<1x32x640xbf16>
    %2 = vector.shape_cast %1 : vector<1x32x640xbf16> to vector<32x640xbf16>
    %cst = arith.constant dense<0.000000e+00> : vector<32x128xf32>
    %3 = tpu.matmul %2, %0, %cst {dimension_numbers = #tpu.dot_dimension_numbers<[1], [0], [0], [1], [0, 0, 1, 1], [], []>} : vector<32x640xbf16>, vector<640x128xbf16>, vector<32x128xf32> -> vector<32x128xf32>
    %c1 = arith.constant 1 : index
    %c0_4 = arith.constant 0 : index
    %c0_5 = arith.constant 0 : index
    %4 = vector.load %arg1[%c1, %c0_4, %c0_5] : memref<4x32x640xbf16, #tpu.memory_space<vmem>>, vector<1x32x640xbf16>
    %5 = vector.shape_cast %4 : vector<1x32x640xbf16> to vector<32x640xbf16>
    %cst_6 = arith.constant dense<0.000000e+00> : vector<32x128xf32>
    %6 = tpu.matmul %5, %0, %cst_6 {dimension_numbers = #tpu.dot_dimension_numbers<[1], [0], [0], [1], [0, 0, 1, 1], [], []>} : vector<32x640xbf16>, vector<640x128xbf16>, vector<32x128xf32> -> vector<32x128xf32>
    %7 = arith.maximumf %3, %6 : vector<32x128xf32>
    %c2 = arith.constant 2 : index
    %c0_7 = arith.constant 0 : index
    %c0_8 = arith.constant 0 : index
    %8 = vector.load %arg1[%c2, %c0_7, %c0_8] : memref<4x32x640xbf16, #tpu.memory_space<vmem>>, vector<1x32x640xbf16>
    %9 = vector.shape_cast %8 : vector<1x32x640xbf16> to vector<32x640xbf16>
    %cst_9 = arith.constant dense<0.000000e+00> : vector<32x128xf32>
    %10 = tpu.matmul %9, %0, %cst_9 {dimension_numbers = #tpu.dot_dimension_numbers<[1], [0], [0], [1], [0, 0, 1, 1], [], []>} : vector<32x640xbf16>, vector<640x128xbf16>, vector<32x128xf32> -> vector<32x128xf32>
    %11 = arith.maximumf %7, %10 : vector<32x128xf32>
    %c3 = arith.constant 3 : index
    %c0_10 = arith.constant 0 : index
    %c0_11 = arith.constant 0 : index
    %12 = vector.load %arg1[%c3, %c0_10, %c0_11] : memref<4x32x640xbf16, #tpu.memory_space<vmem>>, vector<1x32x640xbf16>
    %13 = vector.shape_cast %12 : vector<1x32x640xbf16> to vector<32x640xbf16>
    %cst_12 = arith.constant dense<0.000000e+00> : vector<32x128xf32>
    %14 = tpu.matmul %13, %0, %cst_12 {dimension_numbers = #tpu.dot_dimension_numbers<[1], [0], [0], [1], [0, 0, 1, 1], [], []>} : vector<32x640xbf16>, vector<640x128xbf16>, vector<32x128xf32> -> vector<32x128xf32>
    %15 = arith.maximumf %11, %14 : vector<32x128xf32>
    %c0_13 = arith.constant 0 : index
    %c0_14 = arith.constant 0 : index
    %16 = vector.load %arg3[%c0_13, %c0_14] : memref<1x128xf32, #tpu.memory_space<vmem>>, vector<1x128xf32>
    %17 = vector.broadcast %16 : vector<1x128xf32> to vector<32x128xf32>
    %18 = arith.addf %15, %17 : vector<32x128xf32>
    %cst_15 = arith.constant 0.000000e+00 : f32
    %19 = vector.broadcast %cst_15 : f32 to vector<32x128xf32>
    %20 = arith.maximumf %18, %19 : vector<32x128xf32>
    %21 = arith.truncf %20 : vector<32x128xf32> to vector<32x128xbf16>
    %c0_16 = arith.constant 0 : index
    %c0_17 = arith.constant 0 : index
    %22 = vector.load %arg4[%c0_16, %c0_17] : memref<32x128xbf16, #tpu.memory_space<vmem>>, vector<32x128xbf16>
    tpu.vector_store %arg4[%c0_16, %c0_17], %21 {strides = array<i32>} : memref<32x128xbf16, #tpu.memory_space<vmem>>, vector<32x128xbf16>,
    return
  }
  func.func @transform_0(%arg0: i32) -> (i32, i32, i32) {
    %c0_i32 = arith.constant 0 : i32
    %c0_i32_0 = arith.constant 0 : i32
    %c0_i32_1 = arith.constant 0 : i32
    return %c0_i32, %arg0, %c0_i32_0 : i32, i32, i32
  }
  func.func @transform_1(%arg0: i32) -> (i32, i32) {
    %c0_i32 = arith.constant 0 : i32
    %c0_i32_0 = arith.constant 0 : i32
    %c0_i32_1 = arith.constant 0 : i32
    return %c0_i32, %c0_i32_0 : i32, i32
  }
  func.func @transform_2(%arg0: i32) -> (i32, i32) {
    %c0_i32 = arith.constant 0 : i32
    %c0_i32_0 = arith.constant 0 : i32
    %c0_i32_1 = arith.constant 0 : i32
    return %c0_i32, %c0_i32_0 : i32, i32
  }
  func.func @transform_3(%arg0: i32) -> (i32, i32) {
    %c0_i32 = arith.constant 0 : i32
    %c0_i32_0 = arith.constant 0 : i32
    return %arg0, %c0_i32 : i32, i32
  }
}

module attributes {stable_mosaic.version = 11 : i64} {
  func.func @_mlp_kernel(%arg0: memref<2x2048xbf16, #tpu.memory_space<vmem>>, %arg1: memref<2048x512xbf16, #tpu.memory_space<vmem>>, %arg2: memref<1x512xf32, #tpu.memory_space<vmem>>, %arg3: memref<512x128xbf16, #tpu.memory_space<vmem>>, %arg4: memref<1x128xf32, #tpu.memory_space<vmem>>, %arg5: memref<128x640xbf16, #tpu.memory_space<vmem>>, %arg6: memref<1x640xf32, #tpu.memory_space<vmem>>, %arg7: memref<2x640xf32, #tpu.memory_space<vmem>>) attributes {dimension_semantics = [], scalar_prefetch = 0 : i64, scratch_operands = 0 : i64, tpu.core_type = #tpu.core_type<tc>} {
    %c0 = arith.constant 0 : index
    %c0_0 = arith.constant 0 : index
    %0 = vector.load %arg0[%c0, %c0_0] : memref<2x2048xbf16, #tpu.memory_space<vmem>>, vector<2x2048xbf16>
    %c0_1 = arith.constant 0 : index
    %c0_2 = arith.constant 0 : index
    %1 = vector.load %arg1[%c0_1, %c0_2] : memref<2048x512xbf16, #tpu.memory_space<vmem>>, vector<2048x512xbf16>
    %cst = arith.constant dense<0.000000e+00> : vector<2x512xf32>
    %2 = tpu.matmul %0, %1, %cst {dimension_numbers = #tpu.dot_dimension_numbers<[1], [0], [0], [1], [0, 0, 1, 1], [], []>} : vector<2x2048xbf16>, vector<2048x512xbf16>, vector<2x512xf32> -> vector<2x512xf32>
    %c0_3 = arith.constant 0 : index
    %c0_4 = arith.constant 0 : index
    %3 = vector.load %arg2[%c0_3, %c0_4] : memref<1x512xf32, #tpu.memory_space<vmem>>, vector<1x512xf32>
    %4 = vector.broadcast %3 : vector<1x512xf32> to vector<2x512xf32>
    %5 = arith.addf %2, %4 : vector<2x512xf32>
    %cst_5 = arith.constant 0.000000e+00 : f32
    %6 = vector.broadcast %cst_5 : f32 to vector<2x512xf32>
    %7 = arith.maximumf %5, %6 : vector<2x512xf32>
    %8 = arith.truncf %7 : vector<2x512xf32> to vector<2x512xbf16>
    %c0_6 = arith.constant 0 : index
    %c0_7 = arith.constant 0 : index
    %9 = vector.load %arg3[%c0_6, %c0_7] : memref<512x128xbf16, #tpu.memory_space<vmem>>, vector<512x128xbf16>
    %cst_8 = arith.constant dense<0.000000e+00> : vector<2x128xf32>
    %10 = tpu.matmul %8, %9, %cst_8 {dimension_numbers = #tpu.dot_dimension_numbers<[1], [0], [0], [1], [0, 0, 1, 1], [], []>} : vector<2x512xbf16>, vector<512x128xbf16>, vector<2x128xf32> -> vector<2x128xf32>
    %c0_9 = arith.constant 0 : index
    %c0_10 = arith.constant 0 : index
    %11 = vector.load %arg4[%c0_9, %c0_10] : memref<1x128xf32, #tpu.memory_space<vmem>>, vector<1x128xf32>
    %12 = vector.broadcast %11 : vector<1x128xf32> to vector<2x128xf32>
    %13 = arith.addf %10, %12 : vector<2x128xf32>
    %cst_11 = arith.constant 0.000000e+00 : f32
    %14 = vector.broadcast %cst_11 : f32 to vector<2x128xf32>
    %15 = arith.maximumf %13, %14 : vector<2x128xf32>
    %16 = arith.truncf %15 : vector<2x128xf32> to vector<2x128xbf16>
    %c0_12 = arith.constant 0 : index
    %c0_13 = arith.constant 0 : index
    %17 = vector.load %arg5[%c0_12, %c0_13] : memref<128x640xbf16, #tpu.memory_space<vmem>>, vector<128x640xbf16>
    %cst_14 = arith.constant dense<0.000000e+00> : vector<2x640xf32>
    %18 = tpu.matmul %16, %17, %cst_14 {dimension_numbers = #tpu.dot_dimension_numbers<[1], [0], [0], [1], [0, 0, 1, 1], [], []>} : vector<2x128xbf16>, vector<128x640xbf16>, vector<2x640xf32> -> vector<2x640xf32>
    %c0_15 = arith.constant 0 : index
    %c0_16 = arith.constant 0 : index
    %19 = vector.load %arg6[%c0_15, %c0_16] : memref<1x640xf32, #tpu.memory_space<vmem>>, vector<1x640xf32>
    %20 = vector.broadcast %19 : vector<1x640xf32> to vector<2x640xf32>
    %21 = arith.addf %18, %20 : vector<2x640xf32>
    %c0_17 = arith.constant 0 : index
    %c0_18 = arith.constant 0 : index
    %22 = vector.load %arg7[%c0_17, %c0_18] : memref<2x640xf32, #tpu.memory_space<vmem>>, vector<2x640xf32>
    tpu.vector_store %arg7[%c0_17, %c0_18], %21 {strides = array<i32>} : memref<2x640xf32, #tpu.memory_space<vmem>>, vector<2x640xf32>,
    return
  }
}

</mosaic_0001>

<bundles_post_ra>
// kernel: dwg_keypoints_forward.4
= control target key start
LH: loop header
LB: loop body
LE: loop exit
PB: predicated region body
PF: predicated region fallthrough
CT: control target
= control target key end

     0   :  { %s5639_s12 = smov 0   ;;  %s5641_s13 = smov 0   ;;  %s7036_s0 = inlined_call_operand.vmem [shape: bf16[4,992,128], index: 0, kind: input, shape index: {}]   ;;  %s7037_s1 = inlined_call_operand.vmem [shape: bf16[128,128], index: 1, kind: input, shape index: {}]   ;;  %s7038_s2 = inlined_call_operand.vmem [shape: f32[1,128], index: 2, kind: input, shape index: {}]   ;;  %s7039_s3 = inlined_call_operand.vmem [shape: bf16[992,128], index: 3, kind: output, shape index: {}]  }
   0x1   :  { %s5643_s14 = smov 0  }
   0x2 LB: > { %s4078_s15 = sadd.s32 4294967295, %s5615_s14   ;;  %s5656_s16 = sadd.s32 1, %s5615_s14   ;;  %s5615_s14 = sphi %s5643_s14, %s7332_s14   ;;  %s5611_s13 = sphi %s5641_s13, %s7331_s13   ;;  %s5607_s12 = sphi %s5639_s12, %s7330_s12  }
   0x3   : > { %s17_s17 = ssub.s32 %s5615_s14, %s5656_s16  ;;  %s20_s18 = sadd.s32 1, %s5611_s13 }
   0x4   : > { %p18_p0 = scmp.eq.s32.totalorder %s17_s17, 0  ;;  %p27_p1 = scmp.ne.s32.totalorder %s5611_s13, %s5607_s12 }
   0x5   : > { %p28_p2 = scmp.eq.s32.totalorder %s5615_s14, 0  ;;  %p4081_p4 = scmp.ge.s32.totalorder %s5615_s14, 2 }
   0x6   : > { %s5665_s19 = scalar_select %p18_p0, %s5611_s13, %s20_s18  }
   0x7   : > { %p29_p3 = por %p28_p2, %p27_p1  ;;  %127 = sbr.rel (%p4081_p4) target bundleno = 79 (0x4f), region = 24 }
   0xc   : > { %130 = sbr.rel (!%p29_p3) target bundleno = 79 (0x4f), region = 28  ;;  %s132_s20 = sand.u32 (%p29_p3), 1, %s5611_s13  }
   0xd   : > { %s4468_s21 = smul.u32 (%p29_p3), 248, %s5615_s14 }
   0xe   : > { %s5432_s22 = smul.u32 (%p29_p3), 992, %s132_s20 }
   0xf   : > { %s5673_s25 = scalar_lea.vmem (%p29_p3), %s7036_s0, %s4468_s21 }
  0x10   : > { %v154_v0 = vld [vmem:[%s5673_s25] sm:$0xff] (%p29_p3)   ;;  %v158_v1 = vld [vmem:[%s5673_s25 + $0x8] sm:$0xff] (%p29_p3)   ;;  %v162_v2 = vld [vmem:[%s5673_s25 + $0x10] sm:$0xff] (%p29_p3)   ;;  %s5678_s26 = scalar_lea.vmem (%p29_p3), [#allocation2], %s5432_s22 }
  0x11   : > { %155 = vst [vmem:[%s5678_s26] sm:$0xff] %v154_v0   ;;  %159 = vst [vmem:[%s5678_s26 + $0x8] sm:$0xff] %v158_v1   ;;  %v166_v3 = vld [vmem:[%s5673_s25 + $0x18] sm:$0xff]   ;;  %v170_v4 = vld [vmem:[%s5673_s25 + $0x20] sm:$0xff]  }
  0x12   : > { %163 = vst [vmem:[%s5678_s26 + $0x10] sm:$0xff] %v162_v2   ;;  %v174_v5 = vld [vmem:[%s5673_s25 + $0x28] sm:$0xff]   ;;  %167 = vst [vmem:[%s5678_s26 + $0x18] sm:$0xff] %v166_v3   ;;  %v178_v6 = vld [vmem:[%s5673_s25 + $0x30] sm:$0xff]  }
  0x13   : > { %171 = vst [vmem:[%s5678_s26 + $0x20] sm:$0xff] %v170_v4   ;;  %175 = vst [vmem:[%s5678_s26 + $0x28] sm:$0xff] %v174_v5   ;;  %v182_v7 = vld [vmem:[%s5673_s25 + $0x38] sm:$0xff]   ;;  %v186_v8 = vld [vmem:[%s5673_s25 + $0x40] sm:$0xff]  }
  0x14   : > { %179 = vst [vmem:[%s5678_s26 + $0x30] sm:$0xff] %v178_v6   ;;  %183 = vst [vmem:[%s5678_s26 + $0x38] sm:$0xff] %v182_v7   ;;  %v190_v9 = vld [vmem:[%s5673_s25 + $0x48] sm:$0xff]   ;;  %v194_v10 = vld [vmem:[%s5673_s25 + $0x50] sm:$0xff]  }
  0x15   : > { %187 = vst [vmem:[%s5678_s26 + $0x40] sm:$0xff] %v186_v8   ;;  %v198_v11 = vld [vmem:[%s5673_s25 + $0x58] sm:$0xff]   ;;  %191 = vst [vmem:[%s5678_s26 + $0x48] sm:$0xff] %v190_v9   ;;  %v202_v12 = vld [vmem:[%s5673_s25 + $0x60] sm:$0xff]  }
  0x16   : > { %195 = vst [vmem:[%s5678_s26 + $0x50] sm:$0xff] %v194_v10   ;;  %199 = vst [vmem:[%s5678_s26 + $0x58] sm:$0xff] %v198_v11   ;;  %v206_v13 = vld [vmem:[%s5673_s25 + $0x68] sm:$0xff]   ;;  %v210_v14 = vld [vmem:[%s5673_s25 + $0x70] sm:$0xff]  }
  0x17   : > { %203 = vst [vmem:[%s5678_s26 + $0x60] sm:$0xff] %v202_v12   ;;  %207 = vst [vmem:[%s5678_s26 + $0x68] sm:$0xff] %v206_v13   ;;  %v214_v15 = vld [vmem:[%s5673_s25 + $0x78] sm:$0xff]   ;;  %v218_v16 = vld [vmem:[%s5673_s25 + $0x80] sm:$0xff]  }
  0x18   : > { %211 = vst [vmem:[%s5678_s26 + $0x70] sm:$0xff] %v210_v14   ;;  %v222_v17 = vld [vmem:[%s5673_s25 + $0x88] sm:$0xff]   ;;  %215 = vst [vmem:[%s5678_s26 + $0x78] sm:$0xff] %v214_v15   ;;  %v226_v18 = vld [vmem:[%s5673_s25 + $0x90] sm:$0xff]  }
  0x19   : > { %219 = vst [vmem:[%s5678_s26 + $0x80] sm:$0xff] %v218_v16   ;;  %223 = vst [vmem:[%s5678_s26 + $0x88] sm:$0xff] %v222_v17   ;;  %v230_v19 = vld [vmem:[%s5673_s25 + $0x98] sm:$0xff]   ;;  %v234_v20 = vld [vmem:[%s5673_s25 + $0xa0] sm:$0xff]  }
  0x1a   : > { %227 = vst [vmem:[%s5678_s26 + $0x90] sm:$0xff] %v226_v18   ;;  %231 = vst [vmem:[%s5678_s26 + $0x98] sm:$0xff] %v230_v19   ;;  %v238_v21 = vld [vmem:[%s5673_s25 + $0xa8] sm:$0xff]   ;;  %v242_v22 = vld [vmem:[%s5673_s25 + $0xb0] sm:$0xff]  }
  0x1b   : > { %235 = vst [vmem:[%s5678_s26 + $0xa0] sm:$0xff] %v234_v20   ;;  %v246_v23 = vld [vmem:[%s5673_s25 + $0xb8] sm:$0xff]   ;;  %239 = vst [vmem:[%s5678_s26 + $0xa8] sm:$0xff] %v238_v21   ;;  %v250_v24 = vld [vmem:[%s5673_s25 + $0xc0] sm:$0xff]  }
  0x1c   : > { %243 = vst [vmem:[%s5678_s26 + $0xb0] sm:$0xff] %v242_v22   ;;  %247 = vst [vmem:[%s5678_s26 + $0xb8] sm:$0xff] %v246_v23   ;;  %v254_v25 = vld [vmem:[%s5673_s25 + $0xc8] sm:$0xff]   ;;  %v258_v26 = vld [vmem:[%s5673_s25 + $0xd0] sm:$0xff]  }
  0x1d   : > { %251 = vst [vmem:[%s5678_s26 + $0xc0] sm:$0xff] %v250_v24   ;;  %255 = vst [vmem:[%s5678_s26 + $0xc8] sm:$0xff] %v254_v25   ;;  %v262_v27 = vld [vmem:[%s5673_s25 + $0xd8] sm:$0xff]   ;;  %v266_v28 = vld [vmem:[%s5673_s25 + $0xe0] sm:$0xff]  }
  0x1e   : > { %259 = vst [vmem:[%s5678_s26 + $0xd0] sm:$0xff] %v258_v26   ;;  %v270_v29 = vld [vmem:[%s5673_s25 + $0xe8] sm:$0xff]   ;;  %263 = vst [vmem:[%s5678_s26 + $0xd8] sm:$0xff] %v262_v27   ;;  %v274_v30 = vld [vmem:[%s5673_s25 + $0xf0] sm:$0xff]  }
  0x1f   : > { %267 = vst [vmem:[%s5678_s26 + $0xe0] sm:$0xff] %v266_v28   ;;  %271 = vst [vmem:[%s5678_s26 + $0xe8] sm:$0xff] %v270_v29   ;;  %v278_v31 = vld [vmem:[%s5673_s25 + $0x1f0] sm:$0xff]   ;;  %v282_v32 = vld [vmem:[%s5673_s25 + $0x1f8] sm:$0xff]  }
  0x20   : > { %275 = vst [vmem:[%s5678_s26 + $0xf0] sm:$0xff] %v274_v30   ;;  %279 = vst [vmem:[%s5678_s26 + $0xf8] sm:$0xff] %v278_v31   ;;  %v286_v33 = vld [vmem:[%s5673_s25 + $0x200] sm:$0xff]   ;;  %v290_v34 = vld [vmem:[%s5673_s25 + $0x208] sm:$0xff]  }
  0x21   : > { %283 = vst [vmem:[%s5678_s26 + $0x100] sm:$0xff] %v282_v32   ;;  %v294_v35 = vld [vmem:[%s5673_s25 + $0x210] sm:$0xff]   ;;  %287 = vst [vmem:[%s5678_s26 + $0x108] sm:$0xff] %v286_v33   ;;  %v298_v36 = vld [vmem:[%s5673_s25 + $0x218] sm:$0xff]  }
  0x22   : > { %291 = vst [vmem:[%s5678_s26 + $0x110] sm:$0xff] %v290_v34   ;;  %295 = vst [vmem:[%s5678_s26 + $0x118] sm:$0xff] %v294_v35   ;;  %v302_v37 = vld [vmem:[%s5673_s25 + $0x220] sm:$0xff]   ;;  %v306_v38 = vld [vmem:[%s5673_s25 + $0x228] sm:$0xff]  }
  0x23   : > { %299 = vst [vmem:[%s5678_s26 + $0x120] sm:$0xff] %v298_v36   ;;  %303 = vst [vmem:[%s5678_s26 + $0x128] sm:$0xff] %v302_v37   ;;  %v310_v39 = vld [vmem:[%s5673_s25 + $0x230] sm:$0xff]   ;;  %v314_v40 = vld [vmem:[%s5673_s25 + $0x238] sm:$0xff]  }
  0x24   : > { %307 = vst [vmem:[%s5678_s26 + $0x130] sm:$0xff] %v306_v38   ;;  %v318_v41 = vld [vmem:[%s5673_s25 + $0x240] sm:$0xff]   ;;  %311 = vst [vmem:[%s5678_s26 + $0x138] sm:$0xff] %v310_v39   ;;  %v322_v42 = vld [vmem:[%s5673_s25 + $0x248] sm:$0xff]  }
  0x25   : > { %315 = vst [vmem:[%s5678_s26 + $0x140] sm:$0xff] %v314_v40   ;;  %319 = vst [vmem:[%s5678_s26 + $0x148] sm:$0xff] %v318_v41   ;;  %v326_v43 = vld [vmem:[%s5673_s25 + $0x250] sm:$0xff]   ;;  %v330_v44 = vld [vmem:[%s5673_s25 + $0x258] sm:$0xff]  }
  0x26   : > { %323 = vst [vmem:[%s5678_s26 + $0x150] sm:$0xff] %v322_v42   ;;  %327 = vst [vmem:[%s5678_s26 + $0x158] sm:$0xff] %v326_v43   ;;  %v334_v45 = vld [vmem:[%s5673_s25 + $0x260] sm:$0xff]   ;;  %v338_v46 = vld [vmem:[%s5673_s25 + $0x268] sm:$0xff]  }
  0x27   : > { %331 = vst [vmem:[%s5678_s26 + $0x160] sm:$0xff] %v330_v44   ;;  %v342_v47 = vld [vmem:[%s5673_s25 + $0x270] sm:$0xff]   ;;  %335 = vst [vmem:[%s5678_s26 + $0x168] sm:$0xff] %v334_v45   ;;  %v346_v48 = vld [vmem:[%s5673_s25 + $0x278] sm:$0xff]  }
  0x28   : > { %339 = vst [vmem:[%s5678_s26 + $0x170] sm:$0xff] %v338_v46   ;;  %343 = vst [vmem:[%s5678_s26 + $0x178] sm:$0xff] %v342_v47   ;;  %v350_v49 = vld [vmem:[%s5673_s25 + $0x280] sm:$0xff]   ;;  %v354_v50 = vld [vmem:[%s5673_s25 + $0x288] sm:$0xff]  }
  0x29   : > { %347 = vst [vmem:[%s5678_s26 + $0x180] sm:$0xff] %v346_v48   ;;  %351 = vst [vmem:[%s5678_s26 + $0x188] sm:$0xff] %v350_v49   ;;  %v358_v51 = vld [vmem:[%s5673_s25 + $0x290] sm:$0xff]   ;;  %v362_v52 = vld [vmem:[%s5673_s25 + $0x298] sm:$0xff]  }
  0x2a   : > { %355 = vst [vmem:[%s5678_s26 + $0x190] sm:$0xff] %v354_v50   ;;  %v366_v53 = vld [vmem:[%s5673_s25 + $0x2a0] sm:$0xff]   ;;  %359 = vst [vmem:[%s5678_s26 + $0x198] sm:$0xff] %v358_v51   ;;  %v370_v54 = vld [vmem:[%s5673_s25 + $0x2a8] sm:$0xff]  }
  0x2b   : > { %363 = vst [vmem:[%s5678_s26 + $0x1a0] sm:$0xff] %v362_v52   ;;  %367 = vst [vmem:[%s5678_s26 + $0x1a8] sm:$0xff] %v366_v53   ;;  %v374_v55 = vld [vmem:[%s5673_s25 + $0x2b0] sm:$0xff]   ;;  %v378_v56 = vld [vmem:[%s5673_s25 + $0x2b8] sm:$0xff]  }
  0x2c   : > { %371 = vst [vmem:[%s5678_s26 + $0x1b0] sm:$0xff] %v370_v54   ;;  %375 = vst [vmem:[%s5678_s26 + $0x1b8] sm:$0xff] %v374_v55   ;;  %v382_v57 = vld [vmem:[%s5673_s25 + $0x2c0] sm:$0xff]   ;;  %v386_v58 = vld [vmem:[%s5673_s25 + $0x2c8] sm:$0xff]  }
  0x2d   : > { %379 = vst [vmem:[%s5678_s26 + $0x1c0] sm:$0xff] %v378_v56   ;;  %v390_v59 = vld [vmem:[%s5673_s25 + $0x2d0] sm:$0xff]   ;;  %383 = vst [vmem:[%s5678_s26 + $0x1c8] sm:$0xff] %v382_v57   ;;  %v394_v60 = vld [vmem:[%s5673_s25 + $0x2d8] sm:$0xff]  }
  0x2e   : > { %387 = vst [vmem:[%s5678_s26 + $0x1d0] sm:$0xff] %v386_v58   ;;  %391 = vst [vmem:[%s5678_s26 + $0x1d8] sm:$0xff] %v390_v59   ;;  %v398_v61 = vld [vmem:[%s5673_s25 + $0x2e0] sm:$0xff]   ;;  %v406_v63 = vld [vmem:[%s5673_s25 + $0x3e8] sm:$0xff]  }
  0x2f   : > { %v402_v62 = vld [vmem:[%s5673_s25 + $0x3e0] sm:$0xff]   ;;  %395 = vst [vmem:[%s5678_s26 + $0x1e0] sm:$0xff] %v394_v60   ;;  %399 = vst [vmem:[%s5678_s26 + $0x1e8] sm:$0xff] %v398_v61   ;;  %v410_v0 = vld [vmem:[%s5673_s25 + $0x3f0] sm:$0xff]  }
  0x30   : > { %403 = vst [vmem:[%s5678_s26 + $0x1f0] sm:$0xff] %v402_v62   ;;  %v414_v1 = vld [vmem:[%s5673_s25 + $0x3f8] sm:$0xff]   ;;  %407 = vst [vmem:[%s5678_s26 + $0x1f8] sm:$0xff] %v406_v63   ;;  %v418_v2 = vld [vmem:[%s5673_s25 + $0x400] sm:$0xff]  }
  0x31   : > { %411 = vst [vmem:[%s5678_s26 + $0x200] sm:$0xff] %v410_v0   ;;  %415 = vst [vmem:[%s5678_s26 + $0x208] sm:$0xff] %v414_v1   ;;  %v422_v3 = vld [vmem:[%s5673_s25 + $0x408] sm:$0xff]   ;;  %v426_v4 = vld [vmem:[%s5673_s25 + $0x410] sm:$0xff]  }
  0x32   : > { %419 = vst [vmem:[%s5678_s26 + $0x210] sm:$0xff] %v418_v2   ;;  %423 = vst [vmem:[%s5678_s26 + $0x218] sm:$0xff] %v422_v3   ;;  %v430_v5 = vld [vmem:[%s5673_s25 + $0x418] sm:$0xff]   ;;  %v434_v6 = vld [vmem:[%s5673_s25 + $0x420] sm:$0xff]  }
  0x33   : > { %427 = vst [vmem:[%s5678_s26 + $0x220] sm:$0xff] %v426_v4   ;;  %v438_v7 = vld [vmem:[%s5673_s25 + $0x428] sm:$0xff]   ;;  %431 = vst [vmem:[%s5678_s26 + $0x228] sm:$0xff] %v430_v5   ;;  %v442_v8 = vld [vmem:[%s5673_s25 + $0x430] sm:$0xff]  }
  0x34   : > { %435 = vst [vmem:[%s5678_s26 + $0x230] sm:$0xff] %v434_v6   ;;  %439 = vst [vmem:[%s5678_s26 + $0x238] sm:$0xff] %v438_v7   ;;  %v446_v9 = vld [vmem:[%s5673_s25 + $0x438] sm:$0xff]   ;;  %v450_v10 = vld [vmem:[%s5673_s25 + $0x440] sm:$0xff]  }
  0x35   : > { %443 = vst [vmem:[%s5678_s26 + $0x240] sm:$0xff] %v442_v8   ;;  %447 = vst [vmem:[%s5678_s26 + $0x248] sm:$0xff] %v446_v9   ;;  %v454_v11 = vld [vmem:[%s5673_s25 + $0x448] sm:$0xff]   ;;  %v458_v12 = vld [vmem:[%s5673_s25 + $0x450] sm:$0xff]  }
  0x36   : > { %451 = vst [vmem:[%s5678_s26 + $0x250] sm:$0xff] %v450_v10   ;;  %v462_v13 = vld [vmem:[%s5673_s25 + $0x458] sm:$0xff]   ;;  %455 = vst [vmem:[%s5678_s26 + $0x258] sm:$0xff] %v454_v11   ;;  %v466_v14 = vld [vmem:[%s5673_s25 + $0x460] sm:$0xff]  }
  0x37   : > { %459 = vst [vmem:[%s5678_s26 + $0x260] sm:$0xff] %v458_v12   ;;  %463 = vst [vmem:[%s5678_s26 + $0x268] sm:$0xff] %v462_v13   ;;  %v470_v15 = vld [vmem:[%s5673_s25 + $0x468] sm:$0xff]   ;;  %v474_v16 = vld [vmem:[%s5673_s25 + $0x470] sm:$0xff]  }
  0x38   : > { %467 = vst [vmem:[%s5678_s26 + $0x270] sm:$0xff] %v466_v14   ;;  %471 = vst [vmem:[%s5678_s26 + $0x278] sm:$0xff] %v470_v15   ;;  %v478_v17 = vld [vmem:[%s5673_s25 + $0x478] sm:$0xff]   ;;  %v482_v18 = vld [vmem:[%s5673_s25 + $0x480] sm:$0xff]  }
  0x39   : > { %475 = vst [vmem:[%s5678_s26 + $0x280] sm:$0xff] %v474_v16   ;;  %v486_v19 = vld [vmem:[%s5673_s25 + $0x488] sm:$0xff]   ;;  %479 = vst [vmem:[%s5678_s26 + $0x288] sm:$0xff] %v478_v17   ;;  %v490_v20 = vld [vmem:[%s5673_s25 + $0x490] sm:$0xff]  }
  0x3a   : > { %483 = vst [vmem:[%s5678_s26 + $0x290] sm:$0xff] %v482_v18   ;;  %487 = vst [vmem:[%s5678_s26 + $0x298] sm:$0xff] %v486_v19   ;;  %v494_v21 = vld [vmem:[%s5673_s25 + $0x498] sm:$0xff]   ;;  %v498_v22 = vld [vmem:[%s5673_s25 + $0x4a0] sm:$0xff]  }
  0x3b   : > { %491 = vst [vmem:[%s5678_s26 + $0x2a0] sm:$0xff] %v490_v20   ;;  %495 = vst [vmem:[%s5678_s26 + $0x2a8] sm:$0xff] %v494_v21   ;;  %v502_v23 = vld [vmem:[%s5673_s25 + $0x4a8] sm:$0xff]   ;;  %v506_v24 = vld [vmem:[%s5673_s25 + $0x4b0] sm:$0xff]  }
  0x3c   : > { %499 = vst [vmem:[%s5678_s26 + $0x2b0] sm:$0xff] %v498_v22   ;;  %v510_v25 = vld [vmem:[%s5673_s25 + $0x4b8] sm:$0xff]   ;;  %503 = vst [vmem:[%s5678_s26 + $0x2b8] sm:$0xff] %v502_v23   ;;  %v514_v26 = vld [vmem:[%s5673_s25 + $0x4c0] sm:$0xff]  }
  0x3d   : > { %507 = vst [vmem:[%s5678_s26 + $0x2c0] sm:$0xff] %v506_v24   ;;  %511 = vst [vmem:[%s5678_s26 + $0x2c8] sm:$0xff] %v510_v25   ;;  %v518_v27 = vld [vmem:[%s5673_s25 + $0x4c8] sm:$0xff]   ;;  %v522_v28 = vld [vmem:[%s5673_s25 + $0x4d0] sm:$0xff]  }
  0x3e   : > { %515 = vst [vmem:[%s5678_s26 + $0x2d0] sm:$0xff] %v514_v26   ;;  %519 = vst [vmem:[%s5678_s26 + $0x2d8] sm:$0xff] %v518_v27   ;;  %v526_v29 = vld [vmem:[%s5673_s25 + $0x5d0] sm:$0xff]   ;;  %v530_v30 = vld [vmem:[%s5673_s25 + $0x5d8] sm:$0xff]  }
  0x3f   : > { %523 = vst [vmem:[%s5678_s26 + $0x2e0] sm:$0xff] %v522_v28   ;;  %v534_v31 = vld [vmem:[%s5673_s25 + $0x5e0] sm:$0xff]   ;;  %527 = vst [vmem:[%s5678_s26 + $0x2e8] sm:$0xff] %v526_v29   ;;  %v538_v32 = vld [vmem:[%s5673_s25 + $0x5e8] sm:$0xff]  }
  0x40   : > { %531 = vst [vmem:[%s5678_s26 + $0x2f0] sm:$0xff] %v530_v30   ;;  %535 = vst [vmem:[%s5678_s26 + $0x2f8] sm:$0xff] %v534_v31   ;;  %v542_v33 = vld [vmem:[%s5673_s25 + $0x5f0] sm:$0xff]   ;;  %v546_v34 = vld [vmem:[%s5673_s25 + $0x5f8] sm:$0xff]  }
  0x41   : > { %539 = vst [vmem:[%s5678_s26 + $0x300] sm:$0xff] %v538_v32   ;;  %543 = vst [vmem:[%s5678_s26 + $0x308] sm:$0xff] %v542_v33   ;;  %v550_v35 = vld [vmem:[%s5673_s25 + $0x600] sm:$0xff]   ;;  %v554_v36 = vld [vmem:[%s5673_s25 + $0x608] sm:$0xff]  }
  0x42   : > { %547 = vst [vmem:[%s5678_s26 + $0x310] sm:$0xff] %v546_v34   ;;  %v558_v37 = vld [vmem:[%s5673_s25 + $0x610] sm:$0xff]   ;;  %551 = vst [vmem:[%s5678_s26 + $0x318] sm:$0xff] %v550_v35   ;;  %v562_v38 = vld [vmem:[%s5673_s25 + $0x618] sm:$0xff]  }
  0x43   : > { %555 = vst [vmem:[%s5678_s26 + $0x320] sm:$0xff] %v554_v36   ;;  %559 = vst [vmem:[%s5678_s26 + $0x328] sm:$0xff] %v558_v37   ;;  %v566_v39 = vld [vmem:[%s5673_s25 + $0x620] sm:$0xff]   ;;  %v570_v40 = vld [vmem:[%s5673_s25 + $0x628] sm:$0xff]  }
  0x44   : > { %563 = vst [vmem:[%s5678_s26 + $0x330] sm:$0xff] %v562_v38   ;;  %567 = vst [vmem:[%s5678_s26 + $0x338] sm:$0xff] %v566_v39   ;;  %v574_v41 = vld [vmem:[%s5673_s25 + $0x630] sm:$0xff]   ;;  %v578_v42 = vld [vmem:[%s5673_s25 + $0x638] sm:$0xff]  }
  0x45   : > { %571 = vst [vmem:[%s5678_s26 + $0x340] sm:$0xff] %v570_v40   ;;  %v582_v43 = vld [vmem:[%s5673_s25 + $0x640] sm:$0xff]   ;;  %575 = vst [vmem:[%s5678_s26 + $0x348] sm:$0xff] %v574_v41   ;;  %v586_v44 = vld [vmem:[%s5673_s25 + $0x648] sm:$0xff]  }
  0x46   : > { %579 = vst [vmem:[%s5678_s26 + $0x350] sm:$0xff] %v578_v42   ;;  %583 = vst [vmem:[%s5678_s26 + $0x358] sm:$0xff] %v582_v43   ;;  %v590_v45 = vld [vmem:[%s5673_s25 + $0x650] sm:$0xff]   ;;  %v594_v46 = vld [vmem:[%s5673_s25 + $0x658] sm:$0xff]  }
  0x47   : > { %587 = vst [vmem:[%s5678_s26 + $0x360] sm:$0xff] %v586_v44   ;;  %591 = vst [vmem:[%s5678_s26 + $0x368] sm:$0xff] %v590_v45   ;;  %v598_v47 = vld [vmem:[%s5673_s25 + $0x660] sm:$0xff]   ;;  %v602_v48 = vld [vmem:[%s5673_s25 + $0x668] sm:$0xff]  }
  0x48   : > { %595 = vst [vmem:[%s5678_s26 + $0x370] sm:$0xff] %v594_v46   ;;  %v606_v49 = vld [vmem:[%s5673_s25 + $0x670] sm:$0xff]   ;;  %599 = vst [vmem:[%s5678_s26 + $0x378] sm:$0xff] %v598_v47   ;;  %v610_v50 = vld [vmem:[%s5673_s25 + $0x678] sm:$0xff]  }
  0x49   : > { %603 = vst [vmem:[%s5678_s26 + $0x380] sm:$0xff] %v602_v48   ;;  %607 = vst [vmem:[%s5678_s26 + $0x388] sm:$0xff] %v606_v49   ;;  %v614_v51 = vld [vmem:[%s5673_s25 + $0x680] sm:$0xff]   ;;  %v618_v52 = vld [vmem:[%s5673_s25 + $0x688] sm:$0xff]  }
  0x4a   : > { %611 = vst [vmem:[%s5678_s26 + $0x390] sm:$0xff] %v610_v50   ;;  %615 = vst [vmem:[%s5678_s26 + $0x398] sm:$0xff] %v614_v51   ;;  %v622_v53 = vld [vmem:[%s5673_s25 + $0x690] sm:$0xff]   ;;  %v626_v54 = vld [vmem:[%s5673_s25 + $0x698] sm:$0xff]  }
  0x4b   : > { %619 = vst [vmem:[%s5678_s26 + $0x3a0] sm:$0xff] %v618_v52   ;;  %v630_v55 = vld [vmem:[%s5673_s25 + $0x6a0] sm:$0xff]   ;;  %623 = vst [vmem:[%s5678_s26 + $0x3a8] sm:$0xff] %v622_v53   ;;  %v634_v56 = vld [vmem:[%s5673_s25 + $0x6a8] sm:$0xff]  }
  0x4c   : > { %627 = vst [vmem:[%s5678_s26 + $0x3b0] sm:$0xff] %v626_v54   ;;  %631 = vst [vmem:[%s5678_s26 + $0x3b8] sm:$0xff] %v630_v55   ;;  %v638_v57 = vld [vmem:[%s5673_s25 + $0x6b0] sm:$0xff]   ;;  %v642_v58 = vld [vmem:[%s5673_s25 + $0x6b8] sm:$0xff]  }
  0x4d   : > { %635 = vst [vmem:[%s5678_s26 + $0x3c0] sm:$0xff] %v634_v56   ;;  %639 = vst [vmem:[%s5678_s26 + $0x3c8] sm:$0xff] %v638_v57   ;;  %v646_v59 = vld [vmem:[%s5673_s25 + $0x6c0] sm:$0xff]  }
  0x4e   : > { %643 = vst [vmem:[%s5678_s26 + $0x3d0] sm:$0xff] %v642_v58   ;;  %647 = vst [vmem:[%s5678_s26 + $0x3d8] sm:$0xff] %v646_v59  }
  0x4f PF: > { %p4083_p5 = scmp.ge.s32.totalorder %s5615_s14, 1  ;;  %p1168_p6 = scmp.lt.s32.totalorder %s5615_s14, 3 }
  0x51   : > { %p1169_p7 = pnand %p4083_p5, %p1168_p6 }
  0x53   : > { %1172 = sbr.rel (%p1169_p7) target bundleno = 817 (0x331), region = 69 }
  0x58   : > { %v5460_v60 = vld [vmem:[%s7037_s1 + $0x38] sm:$0xff]   ;;  %v7109_v61 = vmov 0.0   ;;  %v5461_v62 = vld [vmem:[%s7037_s1 + $0x30] sm:$0xff]   ;;  %s1175_s4 = sand.u32 1, %s5607_s12   ;;  %vm5618_vm0 = vmmov 0   ;;  %v5462_v63 = vld [vmem:[%s7037_s1 + $0x28] sm:$0xff]  }
  0x59   : > { %4872 = vmatprep.subr.bf16.mxu0 %v7109_v61  ;;  %5012 = vmatprep.subr.bf16.mxu1 %v7109_v61  ;;  %s5433_s5 = smul.u32 992, %s1175_s4  ;;  %v5463_v0 = vld [vmem:[%s7037_s1 + $0x20] sm:$0xff]   ;;  %v5464_v1 = vld [vmem:[%s7037_s1 + $0x18] sm:$0xff]   ;;  %v5465_v2 = vld [vmem:[%s7037_s1 + $0x10] sm:$0xff]  }
  0x5a   : > { %4873 = vmatpush3.bf16.msra.mxu0 %v5460_v60  ;;  %5013 = vmatpush3.bf16.msra.mxu1 %v5460_v60  ;;  %v5466_v3 = vld [vmem:[%s7037_s1 + $0x8] sm:$0xff]   ;;  %v5467_v4 = vld [vmem:[%s7037_s1] sm:$0xff]   ;;  %s1199_s24 = smul.u32 62, %s4078_s15 }
  0x5b   : > { %4874 = vmatprep.subr.bf16.mxu0 %v7109_v61  ;;  %5014 = vmatprep.subr.bf16.mxu1 %v7109_v61  ;;  %s5947_s8 = scalar_lea.vmem [#allocation2], %s5433_s5 }
  0x5c   : > { %4888 = vmatprep.mubr.msk.bf16.mxu0 %vm5618_vm0, %v7109_v61  ;;  %5028 = vmatprep.mubr.msk.bf16.mxu1 %vm5618_vm0, %v7109_v61  ;;  %v5468_v5 = vld [vmem:[%s5947_s8] sm:$0xff]   ;;  %v5469_v6 = vld [vmem:[%s5947_s8 + $0xf8] sm:$0xff]   ;;  %v5470_v7 = vld [vmem:[%s5947_s8 + $0x8] sm:$0xff]   ;;  %p1200_p8 = scmp.lt.s32.totalorder %s1199_s24, 123 }
  0x5d   : > { %v5471_v8 = vld [vmem:[%s5947_s8 + $0x100] sm:$0xff]   ;;  %v5472_v9 = vld [vmem:[%s5947_s8 + $0x10] sm:$0xff]   ;;  %v5473_v10 = vld [vmem:[%s5947_s8 + $0x108] sm:$0xff]  }
  0x5e   : > { %4875 = vmatpush3.bf16.msra.mxu0 %v5461_v62  ;;  %5015 = vmatpush3.bf16.msra.mxu1 %v5461_v62  ;;  %v5474_v11 = vld [vmem:[%s5947_s8 + $0x18] sm:$0xff]   ;;  %v5475_v12 = vld [vmem:[%s5947_s8 + $0x110] sm:$0xff]   ;;  %v5476_v13 = vld [vmem:[%s5947_s8 + $0x20] sm:$0xff]   ;;  %s7334_s24 = smov (!%p1200_p8, %s1199_s24), 123 }
  0x5f   : > { %4876 = vmatprep.subr.bf16.mxu0 %v7109_v61  ;;  %5016 = vmatprep.subr.bf16.mxu1 %v7109_v61  ;;  %v5477_v14 = vld [vmem:[%s5947_s8 + $0x118] sm:$0xff]   ;;  %v5478_v15 = vld [vmem:[%s5947_s8 + $0x28] sm:$0xff]   ;;  %v5479_v16 = vld [vmem:[%s5947_s8 + $0x120] sm:$0xff]   ;;  %s4084_s25 = sshll.u32 %s7334_s24, 2 }
  0x60   : > { %v5480_v17 = vld [vmem:[%s5947_s8 + $0x30] sm:$0xff]   ;;  %v5481_v18 = vld [vmem:[%s5947_s8 + $0x128] sm:$0xff]   ;;  %v5482_v19 = vld [vmem:[%s5947_s8 + $0x38] sm:$0xff]   ;;  %s6725_s28 = scalar_lea.vmem %s7039_s3, %s4084_s25 }
  0x61   : > { %v5483_v20 = vld [vmem:[%s5947_s8 + $0x130] sm:$0xff]   ;;  %v5484_v21 = vld [vmem:[%s5947_s8 + $0x40] sm:$0xff]   ;;  %v5485_v22 = vld [vmem:[%s5947_s8 + $0x138] sm:$0xff]  }
  0x62   : > { %4877 = vmatpush3.bf16.msra.mxu0 %v5462_v63  ;;  %5017 = vmatpush3.bf16.msra.mxu1 %v5462_v63  ;;  %v5486_v23 = vld [vmem:[%s5947_s8 + $0x48] sm:$0xff]   ;;  %v5487_v24 = vld [vmem:[%s5947_s8 + $0x140] sm:$0xff]   ;;  %v5488_v25 = vld [vmem:[%s5947_s8 + $0x50] sm:$0xff]  }
  0x63   : > { %4878 = vmatprep.subr.bf16.mxu0 %v7109_v61  ;;  %5018 = vmatprep.subr.bf16.mxu1 %v7109_v61  ;;  %v5489_v26 = vld [vmem:[%s5947_s8 + $0x148] sm:$0xff]   ;;  %v5490_v27 = vld [vmem:[%s5947_s8 + $0x58] sm:$0xff]   ;;  %v5491_v28 = vld [vmem:[%s5947_s8 + $0x150] sm:$0xff]  }
  0x64   : > { %v5492_v29 = vld [vmem:[%s5947_s8 + $0x60] sm:$0xff]   ;;  %v5493_v30 = vld [vmem:[%s5947_s8 + $0x158] sm:$0xff]   ;;  %v5494_v31 = vld [vmem:[%s5947_s8 + $0x68] sm:$0xff]  }
  0x65   : > { %v5495_v32 = vld [vmem:[%s5947_s8 + $0x160] sm:$0xff]   ;;  %v5496_v33 = vld [vmem:[%s5947_s8 + $0x70] sm:$0xff]   ;;  %v5497_v34 = vld [vmem:[%s5947_s8 + $0x168] sm:$0xff]  }
  0x66   : > { %4879 = vmatpush3.bf16.msra.mxu0 %v5463_v0  ;;  %5019 = vmatpush3.bf16.msra.mxu1 %v5463_v0  ;;  %v5498_v35 = vld [vmem:[%s5947_s8 + $0x78] sm:$0xff]   ;;  %v5499_v36 = vld [vmem:[%s5947_s8 + $0x170] sm:$0xff]   ;;  %v5500_v37 = vld [vmem:[%s5947_s8 + $0x80] sm:$0xff]  }
  0x67   : > { %4880 = vmatprep.subr.bf16.mxu0 %v7109_v61  ;;  %5020 = vmatprep.subr.bf16.mxu1 %v7109_v61  ;;  %v5501_v38 = vld [vmem:[%s5947_s8 + $0x178] sm:$0xff]   ;;  %v5502_v39 = vld [vmem:[%s5947_s8 + $0x88] sm:$0xff]   ;;  %v5503_v40 = vld [vmem:[%s5947_s8 + $0x180] sm:$0xff]  }
  0x68   : > { %v5504_v41 = vld [vmem:[%s5947_s8 + $0x90] sm:$0xff]   ;;  %v5505_v42 = vld [vmem:[%s5947_s8 + $0x188] sm:$0xff]   ;;  %v5506_v43 = vld [vmem:[%s5947_s8 + $0x98] sm:$0xff]  }
  0x69   : > { %v5507_v44 = vld [vmem:[%s5947_s8 + $0x190] sm:$0xff]   ;;  %v5508_v45 = vld [vmem:[%s5947_s8 + $0xa0] sm:$0xff]   ;;  %v5509_v46 = vld [vmem:[%s5947_s8 + $0x198] sm:$0xff]  }
  0x6a   : > { %4881 = vmatpush3.bf16.msra.mxu0 %v5464_v1  ;;  %5021 = vmatpush3.bf16.msra.mxu1 %v5464_v1  ;;  %v5510_v47 = vld [vmem:[%s5947_s8 + $0xa8] sm:$0xff]   ;;  %v5511_v48 = vld [vmem:[%s5947_s8 + $0x1a0] sm:$0xff]   ;;  %v5512_v49 = vld [vmem:[%s5947_s8 + $0xb0] sm:$0xff]  }
  0x6b   : > { %4882 = vmatprep.subr.bf16.mxu0 %v7109_v61  ;;  %5022 = vmatprep.subr.bf16.mxu1 %v7109_v61  ;;  %v5513_v50 = vld [vmem:[%s5947_s8 + $0x1a8] sm:$0xff]   ;;  %v5514_v51 = vld [vmem:[%s5947_s8 + $0xb8] sm:$0xff]   ;;  %v5515_v52 = vld [vmem:[%s5947_s8 + $0x1b0] sm:$0xff]  }
  0x6c   : > { %v5516_v53 = vld [vmem:[%s5947_s8 + $0xc0] sm:$0xff]   ;;  %v5517_v54 = vld [vmem:[%s5947_s8 + $0x1b8] sm:$0xff]  }
  0x6d   : > { %v5545_v57 = vld [vmem:[%s5947_s8 + $0x320] sm:$0xff]  }
  0x6e   : > { %4883 = vmatpush3.bf16.msra.mxu0 %v5465_v2  ;;  %5023 = vmatpush3.bf16.msra.mxu1 %v5465_v2 }
  0x6f   : > { %4884 = vmatprep.subr.bf16.mxu0 %v7109_v61  ;;  %5024 = vmatprep.subr.bf16.mxu1 %v7109_v61 }
  0x72   : > { %4885 = vmatpush3.bf16.msra.mxu0 %v5466_v3  ;;  %5025 = vmatpush3.bf16.msra.mxu1 %v5466_v3 }
  0x73   : > { %4886 = vmatprep.subr.bf16.mxu0 %v7109_v61  ;;  %5026 = vmatprep.subr.bf16.mxu1 %v7109_v61 }
  0x76   : > { %4887 = vmatpush3.bf16.msra.mxu0 %v5467_v4  ;;  %5027 = vmatpush3.bf16.msra.mxu1 %v5467_v4 }
  0x77   : > { %5152 = vmatprep.subr.bf16.mxu0 %v7109_v61  ;;  %5292 = vmatprep.subr.bf16.mxu1 %v7109_v61 }
  0x79   : > { %4889 = vmatmul.mubr.bf16.vlgmr.msra.gmra.mxu0 %v5468_v5  ;;  %5029 = vmatmul.mubr.bf16.vlgmr.msra.gmra.mxu1 %v5469_v6 }
  0x7a   : > { %5153 = vmatpush3.bf16.msra.mxu0 %v5460_v60  ;;  %5293 = vmatpush3.bf16.msra.mxu1 %v5460_v60 }
  0x7b   : > { %4892 = vmatprep.mubr.msk.bf16.mxu0 %vm5618_vm0, %v7109_v61  ;;  %5032 = vmatprep.mubr.msk.bf16.mxu1 %vm5618_vm0, %v7109_v61 }
  0x7c   : > { %5154 = vmatprep.subr.bf16.mxu0 %v7109_v61  ;;  %5294 = vmatprep.subr.bf16.mxu1 %v7109_v61 }
  0x7e   : > { %5155 = vmatpush3.bf16.msra.mxu0 %v5461_v62  ;;  %5295 = vmatpush3.bf16.msra.mxu1 %v5461_v62 }
  0x7f   : > { %5156 = vmatprep.subr.bf16.mxu0 %v7109_v61  ;;  %5296 = vmatprep.subr.bf16.mxu1 %v7109_v61 }
  0x81   : > { %4893 = vmatmul.mubr.bf16.gmra.mxu0 %v5470_v7  ;;  %5033 = vmatmul.mubr.bf16.gmra.mxu1 %v5471_v8 }
  0x82   : > { %4896 = vmatprep.mubr.msk.bf16.mxu0 %vm5618_vm0, %v7109_v61  ;;  %5036 = vmatprep.mubr.msk.bf16.mxu1 %vm5618_vm0, %v7109_v61 }
  0x83   : > { %5157 = vmatpush3.bf16.msra.mxu0 %v5462_v63  ;;  %5297 = vmatpush3.bf16.msra.mxu1 %v5462_v63  ;;  %v5518_v63 = vld [vmem:[%s5947_s8 + $0xc8] sm:$0xff]  }
  0x84   : > { %5158 = vmatprep.subr.bf16.mxu0 %v7109_v61  ;;  %5298 = vmatprep.subr.bf16.mxu1 %v7109_v61 }
  0x87   : > { %5159 = vmatpush3.bf16.msra.mxu0 %v5463_v0  ;;  %5299 = vmatpush3.bf16.msra.mxu1 %v5463_v0  ;;  %v5519_v0 = vld [vmem:[%s5947_s8 + $0x1c0] sm:$0xff]  }
  0x88   : > { %5160 = vmatprep.subr.bf16.mxu0 %v7109_v61  ;;  %5300 = vmatprep.subr.bf16.mxu1 %v7109_v61 }
  0x89   : > { %4897 = vmatmul.mubr.bf16.gmra.mxu0 %v5472_v9  ;;  %5037 = vmatmul.mubr.bf16.gmra.mxu1 %v5473_v10 }
  0x8a   : > { %4900 = vmatprep.mubr.msk.bf16.mxu0 %vm5618_vm0, %v7109_v61  ;;  %5040 = vmatprep.mubr.msk.bf16.mxu1 %vm5618_vm0, %v7109_v61 }
  0x8b   : > { %5161 = vmatpush3.bf16.msra.mxu0 %v5464_v1  ;;  %5301 = vmatpush3.bf16.msra.mxu1 %v5464_v1 }
  0x8c   : > { %5162 = vmatprep.subr.bf16.mxu0 %v7109_v61  ;;  %5302 = vmatprep.subr.bf16.mxu1 %v7109_v61 }
  0x8f   : > { %5163 = vmatpush3.bf16.msra.mxu0 %v5465_v2  ;;  %5303 = vmatpush3.bf16.msra.mxu1 %v5465_v2 }
  0x90   : > { %5164 = vmatprep.subr.bf16.mxu0 %v7109_v61  ;;  %5304 = vmatprep.subr.bf16.mxu1 %v7109_v61 }
  0x91   : > { %4901 = vmatmul.mubr.bf16.gmra.mxu0 %v5474_v11  ;;  %5041 = vmatmul.mubr.bf16.gmra.mxu1 %v5475_v12  ;;  %v5520_v11 = vld [vmem:[%s5947_s8 + $0xd0] sm:$0xff]   ;;  %v5521_v12 = vld [vmem:[%s5947_s8 + $0x1c8] sm:$0xff]  }
  0x92   : > { %4904 = vmatprep.mubr.msk.bf16.mxu0 %vm5618_vm0, %v7109_v61  ;;  %5044 = vmatprep.mubr.msk.bf16.mxu1 %vm5618_vm0, %v7109_v61 }
  0x93   : > { %5165 = vmatpush3.bf16.msra.mxu0 %v5466_v3  ;;  %5305 = vmatpush3.bf16.msra.mxu1 %v5466_v3 }
  0x94   : > { %5166 = vmatprep.subr.bf16.mxu0 %v7109_v61  ;;  %5306 = vmatprep.subr.bf16.mxu1 %v7109_v61 }
  0x97   : > { %5167 = vmatpush3.bf16.msra.mxu0 %v5467_v4  ;;  %5307 = vmatpush3.bf16.msra.mxu1 %v5467_v4 }
  0x99   : > { %4905 = vmatmul.mubr.bf16.gmra.mxu0 %v5476_v13  ;;  %5045 = vmatmul.mubr.bf16.gmra.mxu1 %v5477_v14 }
  0x9a   : > { %4908 = vmatprep.mubr.msk.bf16.mxu0 %vm5618_vm0, %v7109_v61  ;;  %5048 = vmatprep.mubr.msk.bf16.mxu1 %vm5618_vm0, %v7109_v61 }
  0xa1   : > { %4909 = vmatmul.mubr.bf16.gmra.mxu0 %v5478_v15  ;;  %5049 = vmatmul.mubr.bf16.gmra.mxu1 %v5479_v16 }
  0xa2   : > { %4912 = vmatprep.mubr.msk.bf16.mxu0 %vm5618_vm0, %v7109_v61  ;;  %5052 = vmatprep.mubr.msk.bf16.mxu1 %vm5618_vm0, %v7109_v61 }
  0xa9   : > { %4913 = vmatmul.mubr.bf16.gmra.mxu0 %v5480_v17  ;;  %5053 = vmatmul.mubr.bf16.gmra.mxu1 %v5481_v18  ;;  %v5543_v18 = vld [vmem:[%s5947_s8 + $0x318] sm:$0xff]  }
  0xaa   : > { %4916 = vmatprep.mubr.msk.bf16.mxu0 %vm5618_vm0, %v7109_v61  ;;  %5056 = vmatprep.mubr.msk.bf16.mxu1 %vm5618_vm0, %v7109_v61 }
  0xb1   : > { %4917 = vmatmul.mubr.bf16.gmra.mxu0 %v5482_v19  ;;  %5057 = vmatmul.mubr.bf16.gmra.mxu1 %v5483_v20 }
  0xb2   : > { %4920 = vmatprep.mubr.msk.bf16.mxu0 %vm5618_vm0, %v7109_v61  ;;  %5060 = vmatprep.mubr.msk.bf16.mxu1 %vm5618_vm0, %v7109_v61 }
  0xb9   : > { %4921 = vmatmul.mubr.bf16.gmra.mxu0 %v5484_v21  ;;  %5061 = vmatmul.mubr.bf16.gmra.mxu1 %v5485_v22 }
  0xba   : > { %4924 = vmatprep.mubr.msk.bf16.mxu0 %vm5618_vm0, %v7109_v61  ;;  %5064 = vmatprep.mubr.msk.bf16.mxu1 %vm5618_vm0, %v7109_v61 }
  0xc1   : > { %4925 = vmatmul.mubr.bf16.gmra.mxu0 %v5486_v23  ;;  %5065 = vmatmul.mubr.bf16.gmra.mxu1 %v5487_v24  ;;  %v5522_v23 = vld [vmem:[%s5947_s8 + $0xd8] sm:$0xff]   ;;  %v5523_v24 = vld [vmem:[%s5947_s8 + $0x1d0] sm:$0xff]  }
  0xc2   : > { %4928 = vmatprep.mubr.msk.bf16.mxu0 %vm5618_vm0, %v7109_v61  ;;  %5068 = vmatprep.mubr.msk.bf16.mxu1 %vm5618_vm0, %v7109_v61 }
  0xc9   : > { %4929 = vmatmul.mubr.bf16.gmra.mxu0 %v5488_v25  ;;  %5069 = vmatmul.mubr.bf16.gmra.mxu1 %v5489_v26 }
  0xca   : > { %4932 = vmatprep.mubr.msk.bf16.mxu0 %vm5618_vm0, %v7109_v61  ;;  %5072 = vmatprep.mubr.msk.bf16.mxu1 %vm5618_vm0, %v7109_v61 }
  0xd1   : > { %4933 = vmatmul.mubr.bf16.gmra.mxu0 %v5490_v27  ;;  %5073 = vmatmul.mubr.bf16.gmra.mxu1 %v5491_v28 }
  0xd2   : > { %4936 = vmatprep.mubr.msk.bf16.mxu0 %vm5618_vm0, %v7109_v61  ;;  %5076 = vmatprep.mubr.msk.bf16.mxu1 %vm5618_vm0, %v7109_v61 }
  0xd9   : > { %4937 = vmatmul.mubr.bf16.gmra.mxu0 %v5492_v29  ;;  %5077 = vmatmul.mubr.bf16.gmra.mxu1 %v5493_v30 }
  0xda   : > { %4940 = vmatprep.mubr.msk.bf16.mxu0 %vm5618_vm0, %v7109_v61  ;;  %5080 = vmatprep.mubr.msk.bf16.mxu1 %vm5618_vm0, %v7109_v61 }
  0xe1   : > { %4941 = vmatmul.mubr.bf16.gmra.mxu0 %v5494_v31  ;;  %5081 = vmatmul.mubr.bf16.gmra.mxu1 %v5495_v32 }
  0xe2   : > { %4944 = vmatprep.mubr.msk.bf16.mxu0 %vm5618_vm0, %v7109_v61  ;;  %5084 = vmatprep.mubr.msk.bf16.mxu1 %vm5618_vm0, %v7109_v61 }
  0xe9   : > { %4945 = vmatmul.mubr.bf16.gmra.mxu0 %v5496_v33  ;;  %5085 = vmatmul.mubr.bf16.gmra.mxu1 %v5497_v34 }
  0xea   : > { %4948 = vmatprep.mubr.msk.bf16.mxu0 %vm5618_vm0, %v7109_v61  ;;  %5088 = vmatprep.mubr.msk.bf16.mxu1 %vm5618_vm0, %v7109_v61 }
  0xf1   : > { %4949 = vmatmul.mubr.bf16.gmra.mxu0 %v5498_v35  ;;  %5089 = vmatmul.mubr.bf16.gmra.mxu1 %v5499_v36  ;;  %v5524_v35 = vld [vmem:[%s5947_s8 + $0xe0] sm:$0xff]   ;;  %v5525_v36 = vld [vmem:[%s5947_s8 + $0x1d8] sm:$0xff]  }
  0xf2   : > { %4952 = vmatprep.mubr.msk.bf16.mxu0 %vm5618_vm0, %v7109_v61  ;;  %5092 = vmatprep.mubr.msk.bf16.mxu1 %vm5618_vm0, %v7109_v61 }
  0xf9   : > { %4953 = vmatmul.mubr.bf16.gmra.mxu0 %v5500_v37  ;;  %5093 = vmatmul.mubr.bf16.gmra.mxu1 %v5501_v38 }
  0xfa   : > { %4956 = vmatprep.mubr.msk.bf16.mxu0 %vm5618_vm0, %v7109_v61  ;;  %5096 = vmatprep.mubr.msk.bf16.mxu1 %vm5618_vm0, %v7109_v61 }
 0x101   : > { %4957 = vmatmul.mubr.bf16.gmra.mxu0 %v5502_v39  ;;  %5097 = vmatmul.mubr.bf16.gmra.mxu1 %v5503_v40 }
 0x102   : > { %4960 = vmatprep.mubr.msk.bf16.mxu0 %vm5618_vm0, %v7109_v61  ;;  %5100 = vmatprep.mubr.msk.bf16.mxu1 %vm5618_vm0, %v7109_v61 }
 0x109   : > { %4961 = vmatmul.mubr.bf16.gmra.mxu0 %v5504_v41  ;;  %5101 = vmatmul.mubr.bf16.gmra.mxu1 %v5505_v42  ;;  %v5541_v42 = vld [vmem:[%s5947_s8 + $0x310] sm:$0xff]  }
 0x10a   : > { %4964 = vmatprep.mubr.msk.bf16.mxu0 %vm5618_vm0, %v7109_v61  ;;  %5104 = vmatprep.mubr.msk.bf16.mxu1 %vm5618_vm0, %v7109_v61 }
 0x111   : > { %4965 = vmatmul.mubr.bf16.gmra.mxu0 %v5506_v43  ;;  %5105 = vmatmul.mubr.bf16.gmra.mxu1 %v5507_v44 }
 0x112   : > { %4968 = vmatprep.mubr.msk.bf16.mxu0 %vm5618_vm0, %v7109_v61  ;;  %5108 = vmatprep.mubr.msk.bf16.mxu1 %vm5618_vm0, %v7109_v61 }
 0x119   : > { %4969 = vmatmul.mubr.bf16.gmra.mxu0 %v5508_v45  ;;  %5109 = vmatmul.mubr.bf16.gmra.mxu1 %v5509_v46 }
 0x11a   : > { %4972 = vmatprep.mubr.msk.bf16.mxu0 %vm5618_vm0, %v7109_v61  ;;  %5112 = vmatprep.mubr.msk.bf16.mxu1 %vm5618_vm0, %v7109_v61 }
 0x121   : > { %4973 = vmatmul.mubr.bf16.gmra.mxu0 %v5510_v47  ;;  %5113 = vmatmul.mubr.bf16.gmra.mxu1 %v5511_v48  ;;  %v5526_v47 = vld [vmem:[%s5947_s8 + $0xe8] sm:$0xff]   ;;  %v5527_v48 = vld [vmem:[%s5947_s8 + $0x1e0] sm:$0xff]  }
 0x122   : > { %4976 = vmatprep.mubr.msk.bf16.mxu0 %vm5618_vm0, %v7109_v61  ;;  %5116 = vmatprep.mubr.msk.bf16.mxu1 %vm5618_vm0, %v7109_v61 }
 0x129   : > { %4977 = vmatmul.mubr.bf16.gmra.mxu0 %v5512_v49  ;;  %5117 = vmatmul.mubr.bf16.gmra.mxu1 %v5513_v50 }
 0x12a   : > { %4980 = vmatprep.mubr.msk.bf16.mxu0 %vm5618_vm0, %v7109_v61  ;;  %5120 = vmatprep.mubr.msk.bf16.mxu1 %vm5618_vm0, %v7109_v61 }
 0x131   : > { %4981 = vmatmul.mubr.bf16.gmra.mxu0 %v5514_v51  ;;  %5121 = vmatmul.mubr.bf16.gmra.mxu1 %v5515_v52 }
 0x132   : > { %4984 = vmatprep.mubr.msk.bf16.mxu0 %vm5618_vm0, %v7109_v61  ;;  %5124 = vmatprep.mubr.msk.bf16.mxu1 %vm5618_vm0, %v7109_v61 }
 0x139   : > { %v6136_v55 = vpop.f32.mrf.mxu0  ;;  %4985 = vmatmul.mubr.bf16.gmra.mxu0 %v5516_v53  ;;  %v6138_v56 = vpop.f32.mrf.mxu1  ;;  %5125 = vmatmul.mubr.bf16.gmra.mxu1 %v5517_v54 }
 0x13a   : > { %4988 = vmatprep.mubr.msk.bf16.mxu0 %vm5618_vm0, %v7109_v61  ;;  %5128 = vmatprep.mubr.msk.bf16.mxu1 %vm5618_vm0, %v7109_v61 }
 0x13b   : > { %v4890_v58 = vpop.f32.mrf.mxu0  ;;  %v5030_v59 = vpop.f32.mrf.mxu1 }
 0x13d   : > { %v6146_v60 = vpop.f32.mrf.mxu0  ;;  %v6148_v62 = vpop.f32.mrf.mxu1 }
 0x13f   : > { %v4891_v2 = vpop.f32.mrf.mxu0  ;;  %v5031_v3 = vpop.f32.mrf.mxu1 }
 0x140   : > { %v5528_v2 = vld [vmem:[%s5947_s8 + $0xf0] sm:$0xff]   ;;  %v5529_v3 = vld [vmem:[%s5947_s8 + $0x1e8] sm:$0xff]  }
 0x141   : > { %v6154_v4 = vpop.f32.mrf.mxu0  ;;  %4989 = vmatmul.mubr.bf16.gmra.mxu0 %v5518_v63  ;;  %v6156_v5 = vpop.f32.mrf.mxu1  ;;  %5129 = vmatmul.mubr.bf16.gmra.mxu1 %v5519_v0 }
 0x142   : > { %4992 = vmatprep.mubr.msk.bf16.mxu0 %vm5618_vm0, %v7109_v61  ;;  %5132 = vmatprep.mubr.msk.bf16.mxu1 %vm5618_vm0, %v7109_v61 }
 0x143   : > { %v4894_v7 = vpop.f32.mrf.mxu0  ;;  %v5034_v8 = vpop.f32.mrf.mxu1 }
 0x145   : > { %v6164_v9 = vpop.f32.mrf.mxu0  ;;  %v6166_v10 = vpop.f32.mrf.mxu1 }
 0x147   : > { %v4895_v14 = vpop.f32.mrf.mxu0  ;;  %v5035_v15 = vpop.f32.mrf.mxu1 }
 0x148   : > { %v5539_v15 = vld [vmem:[%s5947_s8 + $0x308] sm:$0xff]  }
 0x149   : > { %v6172_v16 = vpop.f32.mrf.mxu0  ;;  %4993 = vmatmul.mubr.bf16.gmra.mxu0 %v5520_v11  ;;  %v6174_v17 = vpop.f32.mrf.mxu1  ;;  %5133 = vmatmul.mubr.bf16.gmra.mxu1 %v5521_v12 }
 0x14a   : > { %4996 = vmatprep.mubr.msk.bf16.mxu0 %vm5618_vm0, %v7109_v61  ;;  %5136 = vmatprep.mubr.msk.bf16.mxu1 %vm5618_vm0, %v7109_v61 }
 0x14b   : > { %v4898_v19 = vpop.f32.mrf.mxu0  ;;  %v5038_v20 = vpop.f32.mrf.mxu1 }
 0x14d   : > { %v6182_v21 = vpop.f32.mrf.mxu0  ;;  %v6184_v22 = vpop.f32.mrf.mxu1 }
 0x14f   : > { %v4899_v26 = vpop.f32.mrf.mxu0  ;;  %v5039_v27 = vpop.f32.mrf.mxu1 }
 0x150   : > { %v5530_v26 = vld [vmem:[%s5947_s8 + $0x1f0] sm:$0xff]   ;;  %v5531_v27 = vld [vmem:[%s5947_s8 + $0x2e8] sm:$0xff]  }
 0x151   : > { %v6190_v28 = vpop.f32.mrf.mxu0  ;;  %4997 = vmatmul.mubr.bf16.gmra.mxu0 %v5522_v23  ;;  %v6192_v29 = vpop.f32.mrf.mxu1  ;;  %5137 = vmatmul.mubr.bf16.gmra.mxu1 %v5523_v24 }
 0x152   : > { %5000 = vmatprep.mubr.msk.bf16.mxu0 %vm5618_vm0, %v7109_v61  ;;  %5140 = vmatprep.mubr.msk.bf16.mxu1 %vm5618_vm0, %v7109_v61 }
 0x153   : > { %v4902_v31 = vpop.f32.mrf.mxu0  ;;  %v5042_v32 = vpop.f32.mrf.mxu1 }
 0x155   : > { %v6200_v33 = vpop.f32.mrf.mxu0  ;;  %v6202_v34 = vpop.f32.mrf.mxu1 }
 0x157   : > { %v4903_v38 = vpop.f32.mrf.mxu0  ;;  %v5043_v39 = vpop.f32.mrf.mxu1 }
 0x159   : > { %v6208_v40 = vpop.f32.mrf.mxu0  ;;  %5001 = vmatmul.mubr.bf16.gmra.mxu0 %v5524_v35  ;;  %v6210_v41 = vpop.f32.mrf.mxu1  ;;  %5141 = vmatmul.mubr.bf16.gmra.mxu1 %v5525_v36 }
 0x15a   : > { %5004 = vmatprep.mubr.msk.bf16.mxu0 %vm5618_vm0, %v7109_v61  ;;  %5144 = vmatprep.mubr.msk.bf16.mxu1 %vm5618_vm0, %v7109_v61 }
 0x15b   : > { %v4906_v43 = vpop.f32.mrf.mxu0  ;;  %v5046_v44 = vpop.f32.mrf.mxu1 }
 0x15d   : > { %v6218_v45 = vpop.f32.mrf.mxu0  ;;  %v6220_v46 = vpop.f32.mrf.mxu1 }
 0x15f   : > { %v4907_v50 = vpop.f32.mrf.mxu0  ;;  %v5047_v51 = vpop.f32.mrf.mxu1 }
 0x160   : > { %v5532_v50 = vld [vmem:[%s5947_s8 + $0x1f8] sm:$0xff]   ;;  %v5533_v51 = vld [vmem:[%s5947_s8 + $0x2f0] sm:$0xff]  }
 0x161   : > { %v6226_v52 = vpop.f32.mrf.mxu0  ;;  %5005 = vmatmul.mubr.bf16.gmra.mxu0 %v5526_v47  ;;  %v6228_v53 = vpop.f32.mrf.mxu1  ;;  %5145 = vmatmul.mubr.bf16.gmra.mxu1 %v5527_v48 }
 0x162   : > { %5008 = vmatprep.mubr.msk.bf16.mxu0 %vm5618_vm0, %v7109_v61  ;;  %5148 = vmatprep.mubr.msk.bf16.mxu1 %vm5618_vm0, %v7109_v61 }
 0x163   : > { %v4910_v58 = vpop.f32.mrf.mxu0  ;;  %v5050_v59 = vpop.f32.mrf.mxu1 }
 0x165   : > { %v6236_v63 = vpop.f32.mrf.mxu0  ;;  %v6238_v0 = vpop.f32.mrf.mxu1 }
 0x167   : > { %v4911_v8 = vpop.f32.mrf.mxu0  ;;  %v5051_v11 = vpop.f32.mrf.mxu1 }
 0x168   : > { %v5537_v11 = vld [vmem:[%s5947_s8 + $0x300] sm:$0xff]  }
 0x169   : > { %v6244_v12 = vpop.f32.mrf.mxu0  ;;  %5009 = vmatmul.mubr.bf16.gmra.mxu0 %v5528_v2  ;;  %v6246_v14 = vpop.f32.mrf.mxu1  ;;  %5149 = vmatmul.mubr.bf16.gmra.mxu1 %v5529_v3 }
 0x16a   : > { %5168 = vmatprep.mubr.msk.bf16.mxu0 %vm5618_vm0, %v7109_v61  ;;  %5308 = vmatprep.mubr.msk.bf16.mxu1 %vm5618_vm0, %v7109_v61 }
 0x16b   : > { %v4914_v19 = vpop.f32.mrf.mxu0  ;;  %v5054_v20 = vpop.f32.mrf.mxu1 }
 0x16d   : > { %v6254_v23 = vpop.f32.mrf.mxu0  ;;  %v6256_v24 = vpop.f32.mrf.mxu1 }
 0x16f   : > { %v4915_v32 = vpop.f32.mrf.mxu0  ;;  %v5055_v35 = vpop.f32.mrf.mxu1 }
 0x170   : > { %v5534_v32 = vld [vmem:[%s5947_s8 + $0x200] sm:$0xff]   ;;  %v5535_v35 = vld [vmem:[%s5947_s8 + $0x2f8] sm:$0xff]  }
 0x171   : > { %v6262_v36 = vpop.f32.mrf.mxu0  ;;  %v6264_v38 = vpop.f32.mrf.mxu1  ;;  %5169 = vmatmul.mubr.bf16.vlgmr.msra.gmra.mxu0 %v5530_v26  ;;  %5309 = vmatmul.mubr.bf16.vlgmr.msra.gmra.mxu1 %v5531_v27 }
 0x172   : > { %5172 = vmatprep.mubr.msk.bf16.mxu0 %vm5618_vm0, %v7109_v61  ;;  %5312 = vmatprep.mubr.msk.bf16.mxu1 %vm5618_vm0, %v7109_v61 }
 0x173   : > { %v4918_v43 = vpop.f32.mrf.mxu0  ;;  %v5058_v44 = vpop.f32.mrf.mxu1 }
 0x175   : > { %v6272_v47 = vpop.f32.mrf.mxu0  ;;  %v6274_v48 = vpop.f32.mrf.mxu1 }
 0x177   : > { %v4919_v59 = vpop.f32.mrf.mxu0  ;;  %v5059_v2 = vpop.f32.mrf.mxu1 }
 0x179   : > { %v6280_v3 = vpop.f32.mrf.mxu0  ;;  %v6282_v8 = vpop.f32.mrf.mxu1  ;;  %5173 = vmatmul.mubr.bf16.gmra.mxu0 %v5532_v50  ;;  %5313 = vmatmul.mubr.bf16.gmra.mxu1 %v5533_v51 }
 0x17a   : > { %5176 = vmatprep.mubr.msk.bf16.mxu0 %vm5618_vm0, %v7109_v61  ;;  %5316 = vmatprep.mubr.msk.bf16.mxu1 %vm5618_vm0, %v7109_v61 }
 0x17b   : > { %v4922_v19 = vpop.f32.mrf.mxu0  ;;  %v5062_v20 = vpop.f32.mrf.mxu1 }
 0x17d   : > { %v6290_v26 = vpop.f32.mrf.mxu0  ;;  %v6292_v27 = vpop.f32.mrf.mxu1 }
 0x17f   : > { %v4923_v44 = vpop.f32.mrf.mxu0  ;;  %v5063_v50 = vpop.f32.mrf.mxu1 }
 0x180   : > { %v5536_v50 = vld [vmem:[%s5947_s8 + $0x208] sm:$0xff]  }
 0x181   : > { %v6298_v51 = vpop.f32.mrf.mxu0  ;;  %v6300_v59 = vpop.f32.mrf.mxu1  ;;  %5177 = vmatmul.mubr.bf16.gmra.mxu0 %v5534_v32  ;;  %5317 = vmatmul.mubr.bf16.gmra.mxu1 %v5535_v35 }
 0x182   : > { %5180 = vmatprep.mubr.msk.bf16.mxu0 %vm5618_vm0, %v7109_v61  ;;  %5320 = vmatprep.mubr.msk.bf16.mxu1 %vm5618_vm0, %v7109_v61 }
 0x183   : > { %v4926_v19 = vpop.f32.mrf.mxu0  ;;  %v5066_v20 = vpop.f32.mrf.mxu1 }
 0x185   : > { %v6308_v43 = vpop.f32.mrf.mxu0  ;;  %v6310_v44 = vpop.f32.mrf.mxu1 }
 0x187   : > { %v4927_v35 = vpop.f32.mrf.mxu0  ;;  %v5067_v2 = vpop.f32.mrf.mxu1 }
 0x188   : > { %v5538_v35 = vld [vmem:[%s5947_s8 + $0x210] sm:$0xff]  }
 0x189   : > { %v6316_v58 = vpop.f32.mrf.mxu0  ;;  %v6318_v39 = vpop.f32.mrf.mxu1  ;;  %5181 = vmatmul.mubr.bf16.gmra.mxu0 %v5536_v50  ;;  %5321 = vmatmul.mubr.bf16.gmra.mxu1 %v5537_v11 }
 0x18a   : > { %5184 = vmatprep.mubr.msk.bf16.mxu0 %vm5618_vm0, %v7109_v61  ;;  %5324 = vmatprep.mubr.msk.bf16.mxu1 %vm5618_vm0, %v7109_v61 }
 0x18b   : > { %v4930_v20 = vpop.f32.mrf.mxu0  ;;  %v5070_v31 = vpop.f32.mrf.mxu1 }
 0x18d   : > { %v6326_v32 = vpop.f32.mrf.mxu0  ;;  %v6328_v2 = vpop.f32.mrf.mxu1 }
 0x18f   : > { %v4931_v50 = vpop.f32.mrf.mxu0  ;;  %v5071_v19 = vpop.f32.mrf.mxu1 }
 0x190   : > { %v5540_v50 = vld [vmem:[%s5947_s8 + $0x218] sm:$0xff]  }
 0x191   : > { %v6334_v7 = vpop.f32.mrf.mxu0  ;;  %v6336_v54 = vpop.f32.mrf.mxu1  ;;  %5185 = vmatmul.mubr.bf16.gmra.mxu0 %v5538_v35  ;;  %5325 = vmatmul.mubr.bf16.gmra.mxu1 %v5539_v15 }
 0x192   : > { %5188 = vmatprep.mubr.msk.bf16.mxu0 %vm5618_vm0, %v7109_v61  ;;  %5328 = vmatprep.mubr.msk.bf16.mxu1 %vm5618_vm0, %v7109_v61 }
 0x193   : > { %v4934_v20 = vpop.f32.mrf.mxu0  ;;  %v5074_v49 = vpop.f32.mrf.mxu1 }
 0x195   : > { %v6344_v11 = vpop.f32.mrf.mxu0  ;;  %v6346_v19 = vpop.f32.mrf.mxu1 }
 0x197   : > { %v4935_v35 = vpop.f32.mrf.mxu0  ;;  %v5075_v31 = vpop.f32.mrf.mxu1 }
 0x198   : > { %v5542_v35 = vld [vmem:[%s5947_s8 + $0x220] sm:$0xff]  }
 0x199   : > { %v6352_v37 = vpop.f32.mrf.mxu0  ;;  %v6354_v30 = vpop.f32.mrf.mxu1  ;;  %5189 = vmatmul.mubr.bf16.gmra.mxu0 %v5540_v50  ;;  %5329 = vmatmul.mubr.bf16.gmra.mxu1 %v5541_v42 }
 0x19a   : > { %7117 = vst [vmem:[#allocation3_spill] sm:$0xff] %v6354_v30  ;;  %5192 = vmatprep.mubr.msk.bf16.mxu0 %vm5618_vm0, %v7109_v61  ;;  %5332 = vmatprep.mubr.msk.bf16.mxu1 %vm5618_vm0, %v7109_v61  ;;  %v7195_v30 = vmax.f32 %v6154_v4, %v6156_v5  ;;  %v5582_v5 = vld [vmem:[%s5947_s8 + $0x2c0] sm:$0xff]  }
 0x19b   : > { %v4938_v20 = vpop.f32.mrf.mxu0  ;;  %v5078_v25 = vpop.f32.mrf.mxu1 }
 0x19d   : > { %v6362_v15 = vpop.f32.mrf.mxu0  ;;  %v6364_v31 = vpop.f32.mrf.mxu1 }
 0x19e   : > { %7118 = vst [vmem:[#allocation4_spill] sm:$0xff] %v6362_v15  ;;  %7119 = vst [vmem:[#allocation5_spill] sm:$0xff] %v6364_v31 }
 0x19f   : > { %v4939_v50 = vpop.f32.mrf.mxu0  ;;  %v5079_v49 = vpop.f32.mrf.mxu1 }
 0x1a0   : > { %v5544_v50 = vld [vmem:[%s5947_s8 + $0x228] sm:$0xff]  }
 0x1a1   : > { %v6370_v13 = vpop.f32.mrf.mxu0  ;;  %v6372_v6 = vpop.f32.mrf.mxu1  ;;  %5193 = vmatmul.mubr.bf16.gmra.mxu0 %v5542_v35  ;;  %5333 = vmatmul.mubr.bf16.gmra.mxu1 %v5543_v18 }
 0x1a2   : > { %7120 = vst [vmem:[#allocation6_spill] sm:$0xff] %v6370_v13  ;;  %7121 = vst [vmem:[#allocation7_spill] sm:$0xff] %v6372_v6  ;;  %5196 = vmatprep.mubr.msk.bf16.mxu0 %vm5618_vm0, %v7109_v61  ;;  %5336 = vmatprep.mubr.msk.bf16.mxu1 %vm5618_vm0, %v7109_v61 }
 0x1a3   : > { %v4942_v20 = vpop.f32.mrf.mxu0  ;;  %v5082_v1 = vpop.f32.mrf.mxu1 }
 0x1a5   : > { %v6380_v42 = vpop.f32.mrf.mxu0  ;;  %v6382_v49 = vpop.f32.mrf.mxu1 }
 0x1a6   : > { %7122 = vst [vmem:[#allocation8_spill] sm:$0xff] %v6380_v42  ;;  %7123 = vst [vmem:[#allocation9_spill] sm:$0xff] %v6382_v49  ;;  %v5547_v49 = vld [vmem:[%s5947_s8 + $0x328] sm:$0xff]  }
 0x1a7   : > { %v4943_v35 = vpop.f32.mrf.mxu0  ;;  %v5083_v25 = vpop.f32.mrf.mxu1 }
 0x1a8   : > { %v5546_v35 = vld [vmem:[%s5947_s8 + $0x230] sm:$0xff]  }
 0x1a9   : > { %v6388_v6 = vpop.f32.mrf.mxu0  ;;  %v6390_v13 = vpop.f32.mrf.mxu1  ;;  %5197 = vmatmul.mubr.bf16.gmra.mxu0 %v5544_v50  ;;  %5337 = vmatmul.mubr.bf16.gmra.mxu1 %v5545_v57 }
 0x1aa   : > { %7124 = vst [vmem:[#allocation10_spill] sm:$0xff] %v6388_v6  ;;  %7125 = vst [vmem:[#allocation11_spill] sm:$0xff] %v6390_v13  ;;  %5200 = vmatprep.mubr.msk.bf16.mxu0 %vm5618_vm0, %v7109_v61  ;;  %5340 = vmatprep.mubr.msk.bf16.mxu1 %vm5618_vm0, %v7109_v61 }
 0x1ab   : > { %v4946_v20 = vpop.f32.mrf.mxu0  ;;  %v5086_v31 = vpop.f32.mrf.mxu1 }
 0x1ad   : > { %v6398_v18 = vpop.f32.mrf.mxu0  ;;  %v6400_v25 = vpop.f32.mrf.mxu1 }
 0x1ae   : > { %7126 = vst [vmem:[#allocation12_spill] sm:$0xff] %v6398_v18  ;;  %7127 = vst [vmem:[#allocation13_spill] sm:$0xff] %v6400_v25  ;;  %v5549_v25 = vld [vmem:[%s5947_s8 + $0x330] sm:$0xff]  }
 0x1af   : > { %v4947_v50 = vpop.f32.mrf.mxu0  ;;  %v5087_v1 = vpop.f32.mrf.mxu1 }
 0x1b0   : > { %v5548_v50 = vld [vmem:[%s5947_s8 + $0x238] sm:$0xff]  }
 0x1b1   : > { %v6406_v13 = vpop.f32.mrf.mxu0  ;;  %v6408_v6 = vpop.f32.mrf.mxu1  ;;  %5201 = vmatmul.mubr.bf16.gmra.mxu0 %v5546_v35  ;;  %5341 = vmatmul.mubr.bf16.gmra.mxu1 %v5547_v49 }
 0x1b2   : > { %7128 = vst [vmem:[#allocation14_spill] sm:$0xff] %v6406_v13  ;;  %7129 = vst [vmem:[#allocation15_spill] sm:$0xff] %v6408_v6  ;;  %5204 = vmatprep.mubr.msk.bf16.mxu0 %vm5618_vm0, %v7109_v61  ;;  %5344 = vmatprep.mubr.msk.bf16.mxu1 %vm5618_vm0, %v7109_v61 }
 0x1b3   : > { %v4950_v20 = vpop.f32.mrf.mxu0  ;;  %v5090_v42 = vpop.f32.mrf.mxu1 }
 0x1b5   : > { %v6416_v57 = vpop.f32.mrf.mxu0  ;;  %v6418_v1 = vpop.f32.mrf.mxu1 }
 0x1b6   : > { %7130 = vst [vmem:[#allocation16_spill] sm:$0xff] %v6416_v57  ;;  %7131 = vst [vmem:[#allocation17_spill] sm:$0xff] %v6418_v1  ;;  %v5551_v1 = vld [vmem:[%s5947_s8 + $0x338] sm:$0xff]  }
 0x1b7   : > { %v4951_v35 = vpop.f32.mrf.mxu0  ;;  %v5091_v31 = vpop.f32.mrf.mxu1 }
 0x1b8   : > { %v5550_v35 = vld [vmem:[%s5947_s8 + $0x240] sm:$0xff]  }
 0x1b9   : > { %v6424_v6 = vpop.f32.mrf.mxu0  ;;  %v6426_v13 = vpop.f32.mrf.mxu1  ;;  %5205 = vmatmul.mubr.bf16.gmra.mxu0 %v5548_v50  ;;  %5345 = vmatmul.mubr.bf16.gmra.mxu1 %v5549_v25 }
 0x1ba   : > { %7132 = vst [vmem:[#allocation18_spill] sm:$0xff] %v6424_v6  ;;  %7133 = vst [vmem:[#allocation19_spill] sm:$0xff] %v6426_v13  ;;  %5208 = vmatprep.mubr.msk.bf16.mxu0 %vm5618_vm0, %v7109_v61  ;;  %5348 = vmatprep.mubr.msk.bf16.mxu1 %vm5618_vm0, %v7109_v61 }
 0x1bb   : > { %v4954_v20 = vpop.f32.mrf.mxu0  ;;  %v5094_v18 = vpop.f32.mrf.mxu1 }
 0x1bd   : > { %v6434_v49 = vpop.f32.mrf.mxu0  ;;  %v6436_v31 = vpop.f32.mrf.mxu1 }
 0x1be   : > { %7134 = vst [vmem:[#allocation20_spill] sm:$0xff] %v6434_v49  ;;  %7135 = vst [vmem:[#allocation21_spill] sm:$0xff] %v6436_v31  ;;  %v5553_v31 = vld [vmem:[%s5947_s8 + $0x340] sm:$0xff]  }
 0x1bf   : > { %v4955_v50 = vpop.f32.mrf.mxu0  ;;  %v5095_v42 = vpop.f32.mrf.mxu1 }
 0x1c0   : > { %v5552_v50 = vld [vmem:[%s5947_s8 + $0x248] sm:$0xff]  }
 0x1c1   : > { %v6442_v13 = vpop.f32.mrf.mxu0  ;;  %v6444_v6 = vpop.f32.mrf.mxu1  ;;  %5209 = vmatmul.mubr.bf16.gmra.mxu0 %v5550_v35  ;;  %5349 = vmatmul.mubr.bf16.gmra.mxu1 %v5551_v1 }
 0x1c2   : > { %7136 = vst [vmem:[#allocation22_spill] sm:$0xff] %v6442_v13  ;;  %7137 = vst [vmem:[#allocation23_spill] sm:$0xff] %v6444_v6  ;;  %5212 = vmatprep.mubr.msk.bf16.mxu0 %vm5618_vm0, %v7109_v61  ;;  %5352 = vmatprep.mubr.msk.bf16.mxu1 %vm5618_vm0, %v7109_v61 }
 0x1c3   : > { %v4958_v20 = vpop.f32.mrf.mxu0  ;;  %v5098_v57 = vpop.f32.mrf.mxu1 }
 0x1c5   : > { %v6452_v25 = vpop.f32.mrf.mxu0  ;;  %v6454_v42 = vpop.f32.mrf.mxu1 }
 0x1c6   : > { %7138 = vst [vmem:[#allocation24_spill] sm:$0xff] %v6452_v25  ;;  %7139 = vst [vmem:[#allocation25_spill] sm:$0xff] %v6454_v42  ;;  %v5555_v42 = vld [vmem:[%s5947_s8 + $0x348] sm:$0xff]  }
 0x1c7   : > { %v4959_v35 = vpop.f32.mrf.mxu0  ;;  %v5099_v18 = vpop.f32.mrf.mxu1 }
 0x1c8   : > { %v5554_v35 = vld [vmem:[%s5947_s8 + $0x250] sm:$0xff]  }
 0x1c9   : > { %v6460_v6 = vpop.f32.mrf.mxu0  ;;  %v6462_v13 = vpop.f32.mrf.mxu1  ;;  %5213 = vmatmul.mubr.bf16.gmra.mxu0 %v5552_v50  ;;  %5353 = vmatmul.mubr.bf16.gmra.mxu1 %v5553_v31 }
 0x1ca   : > { %7140 = vst [vmem:[#allocation26_spill] sm:$0xff] %v6460_v6  ;;  %7141 = vst [vmem:[#allocation27_spill] sm:$0xff] %v6462_v13  ;;  %5216 = vmatprep.mubr.msk.bf16.mxu0 %vm5618_vm0, %v7109_v61  ;;  %5356 = vmatprep.mubr.msk.bf16.mxu1 %vm5618_vm0, %v7109_v61 }
 0x1cb   : > { %v4962_v20 = vpop.f32.mrf.mxu0  ;;  %v5102_v49 = vpop.f32.mrf.mxu1 }
 0x1cd   : > { %v6470_v1 = vpop.f32.mrf.mxu0  ;;  %v6472_v18 = vpop.f32.mrf.mxu1 }
 0x1ce   : > { %7142 = vst [vmem:[#allocation28_spill] sm:$0xff] %v6470_v1  ;;  %7143 = vst [vmem:[#allocation29_spill] sm:$0xff] %v6472_v18  ;;  %v5557_v18 = vld [vmem:[%s5947_s8 + $0x350] sm:$0xff]  }
 0x1cf   : > { %v4963_v50 = vpop.f32.mrf.mxu0  ;;  %v5103_v57 = vpop.f32.mrf.mxu1 }
 0x1d0   : > { %v5556_v50 = vld [vmem:[%s5947_s8 + $0x258] sm:$0xff]  }
 0x1d1   : > { %v6478_v13 = vpop.f32.mrf.mxu0  ;;  %v6480_v6 = vpop.f32.mrf.mxu1  ;;  %5217 = vmatmul.mubr.bf16.gmra.mxu0 %v5554_v35  ;;  %5357 = vmatmul.mubr.bf16.gmra.mxu1 %v5555_v42 }
 0x1d2   : > { %7144 = vst [vmem:[#allocation30_spill] sm:$0xff] %v6478_v13  ;;  %7145 = vst [vmem:[#allocation31_spill] sm:$0xff] %v6480_v6  ;;  %5220 = vmatprep.mubr.msk.bf16.mxu0 %vm5618_vm0, %v7109_v61  ;;  %5360 = vmatprep.mubr.msk.bf16.mxu1 %vm5618_vm0, %v7109_v61 }
 0x1d3   : > { %v4966_v20 = vpop.f32.mrf.mxu0  ;;  %v5106_v25 = vpop.f32.mrf.mxu1 }
 0x1d5   : > { %v6488_v31 = vpop.f32.mrf.mxu0  ;;  %v6490_v57 = vpop.f32.mrf.mxu1 }
 0x1d6   : > { %7146 = vst [vmem:[#allocation32_spill] sm:$0xff] %v6488_v31  ;;  %7147 = vst [vmem:[#allocation33_spill] sm:$0xff] %v6490_v57  ;;  %v5559_v57 = vld [vmem:[%s5947_s8 + $0x358] sm:$0xff]  }
 0x1d7   : > { %v4967_v35 = vpop.f32.mrf.mxu0  ;;  %v5107_v49 = vpop.f32.mrf.mxu1 }
 0x1d8   : > { %v5558_v35 = vld [vmem:[%s5947_s8 + $0x260] sm:$0xff]  }
 0x1d9   : > { %v6496_v6 = vpop.f32.mrf.mxu0  ;;  %v6498_v13 = vpop.f32.mrf.mxu1  ;;  %5221 = vmatmul.mubr.bf16.gmra.mxu0 %v5556_v50  ;;  %5361 = vmatmul.mubr.bf16.gmra.mxu1 %v5557_v18 }
 0x1da   : > { %7148 = vst [vmem:[#allocation34_spill] sm:$0xff] %v6496_v6  ;;  %7149 = vst [vmem:[#allocation35_spill] sm:$0xff] %v6498_v13  ;;  %5224 = vmatprep.mubr.msk.bf16.mxu0 %vm5618_vm0, %v7109_v61  ;;  %5364 = vmatprep.mubr.msk.bf16.mxu1 %vm5618_vm0, %v7109_v61 }
 0x1db   : > { %v4970_v20 = vpop.f32.mrf.mxu0  ;;  %v5110_v1 = vpop.f32.mrf.mxu1 }
 0x1dd   : > { %v6506_v42 = vpop.f32.mrf.mxu0  ;;  %v6508_v49 = vpop.f32.mrf.mxu1 }
 0x1de   : > { %7150 = vst [vmem:[#allocation36_spill] sm:$0xff] %v6506_v42  ;;  %7151 = vst [vmem:[#allocation37_spill] sm:$0xff] %v6508_v49  ;;  %v5561_v49 = vld [vmem:[%s5947_s8 + $0x360] sm:$0xff]  }
 0x1df   : > { %v4971_v50 = vpop.f32.mrf.mxu0  ;;  %v5111_v25 = vpop.f32.mrf.mxu1 }
 0x1e0   : > { %v5560_v50 = vld [vmem:[%s5947_s8 + $0x268] sm:$0xff]  }
 0x1e1   : > { %v6514_v13 = vpop.f32.mrf.mxu0  ;;  %v6516_v6 = vpop.f32.mrf.mxu1  ;;  %5225 = vmatmul.mubr.bf16.gmra.mxu0 %v5558_v35  ;;  %5365 = vmatmul.mubr.bf16.gmra.mxu1 %v5559_v57 }
 0x1e2   : > { %7152 = vst [vmem:[#allocation38_spill] sm:$0xff] %v6514_v13  ;;  %7153 = vst [vmem:[#allocation39_spill] sm:$0xff] %v6516_v6  ;;  %5228 = vmatprep.mubr.msk.bf16.mxu0 %vm5618_vm0, %v7109_v61  ;;  %5368 = vmatprep.mubr.msk.bf16.mxu1 %vm5618_vm0, %v7109_v61 }
 0x1e3   : > { %v4974_v20 = vpop.f32.mrf.mxu0  ;;  %v5114_v31 = vpop.f32.mrf.mxu1 }
 0x1e5   : > { %v6524_v18 = vpop.f32.mrf.mxu0  ;;  %v6526_v25 = vpop.f32.mrf.mxu1 }
 0x1e6   : > { %7154 = vst [vmem:[#allocation40_spill] sm:$0xff] %v6524_v18  ;;  %7155 = vst [vmem:[#allocation41_spill] sm:$0xff] %v6526_v25  ;;  %v5563_v25 = vld [vmem:[%s5947_s8 + $0x368] sm:$0xff]  }
 0x1e7   : > { %v4975_v35 = vpop.f32.mrf.mxu0  ;;  %v5115_v1 = vpop.f32.mrf.mxu1 }
 0x1e8   : > { %v5562_v35 = vld [vmem:[%s5947_s8 + $0x270] sm:$0xff]  }
 0x1e9   : > { %v6532_v6 = vpop.f32.mrf.mxu0  ;;  %v6534_v13 = vpop.f32.mrf.mxu1  ;;  %5229 = vmatmul.mubr.bf16.gmra.mxu0 %v5560_v50  ;;  %5369 = vmatmul.mubr.bf16.gmra.mxu1 %v5561_v49 }
 0x1ea   : > { %7156 = vst [vmem:[#allocation42_spill] sm:$0xff] %v6532_v6  ;;  %7157 = vst [vmem:[#allocation43_spill] sm:$0xff] %v6534_v13  ;;  %5232 = vmatprep.mubr.msk.bf16.mxu0 %vm5618_vm0, %v7109_v61  ;;  %5372 = vmatprep.mubr.msk.bf16.mxu1 %vm5618_vm0, %v7109_v61 }
 0x1eb   : > { %v4978_v20 = vpop.f32.mrf.mxu0  ;;  %v5118_v42 = vpop.f32.mrf.mxu1 }
 0x1ed   : > { %v6542_v57 = vpop.f32.mrf.mxu0  ;;  %v6544_v1 = vpop.f32.mrf.mxu1 }
 0x1ee   : > { %7158 = vst [vmem:[#allocation44_spill] sm:$0xff] %v6542_v57  ;;  %7159 = vst [vmem:[#allocation45_spill] sm:$0xff] %v6544_v1  ;;  %v5565_v1 = vld [vmem:[%s5947_s8 + $0x370] sm:$0xff]  }
 0x1ef   : > { %v4979_v50 = vpop.f32.mrf.mxu0  ;;  %v5119_v31 = vpop.f32.mrf.mxu1 }
 0x1f0   : > { %v5564_v50 = vld [vmem:[%s5947_s8 + $0x278] sm:$0xff]  }
 0x1f1   : > { %v6550_v13 = vpop.f32.mrf.mxu0  ;;  %v6552_v6 = vpop.f32.mrf.mxu1  ;;  %5233 = vmatmul.mubr.bf16.gmra.mxu0 %v5562_v35  ;;  %5373 = vmatmul.mubr.bf16.gmra.mxu1 %v5563_v25 }
 0x1f2   : > { %7160 = vst [vmem:[#allocation46_spill] sm:$0xff] %v6550_v13  ;;  %7161 = vst [vmem:[#allocation47_spill] sm:$0xff] %v6552_v6  ;;  %5236 = vmatprep.mubr.msk.bf16.mxu0 %vm5618_vm0, %v7109_v61  ;;  %5376 = vmatprep.mubr.msk.bf16.mxu1 %vm5618_vm0, %v7109_v61 }
 0x1f3   : > { %v4982_v20 = vpop.f32.mrf.mxu0  ;;  %v5122_v18 = vpop.f32.mrf.mxu1 }
 0x1f5   : > { %v6560_v49 = vpop.f32.mrf.mxu0  ;;  %v6562_v31 = vpop.f32.mrf.mxu1 }
 0x1f6   : > { %7162 = vst [vmem:[#allocation48_spill] sm:$0xff] %v6560_v49  ;;  %7163 = vst [vmem:[#allocation49_spill] sm:$0xff] %v6562_v31  ;;  %v5567_v31 = vld [vmem:[%s5947_s8 + $0x378] sm:$0xff]  }
 0x1f7   : > { %v4983_v35 = vpop.f32.mrf.mxu0  ;;  %v5123_v42 = vpop.f32.mrf.mxu1 }
 0x1f8   : > { %v5566_v35 = vld [vmem:[%s5947_s8 + $0x280] sm:$0xff]  }
 0x1f9   : > { %v6568_v6 = vpop.f32.mrf.mxu0  ;;  %v6570_v13 = vpop.f32.mrf.mxu1  ;;  %5237 = vmatmul.mubr.bf16.gmra.mxu0 %v5564_v50  ;;  %5377 = vmatmul.mubr.bf16.gmra.mxu1 %v5565_v1 }
 0x1fa   : > { %7164 = vst [vmem:[#allocation50_spill] sm:$0xff] %v6568_v6  ;;  %7165 = vst [vmem:[#allocation51_spill] sm:$0xff] %v6570_v13  ;;  %5240 = vmatprep.mubr.msk.bf16.mxu0 %vm5618_vm0, %v7109_v61  ;;  %5380 = vmatprep.mubr.msk.bf16.mxu1 %vm5618_vm0, %v7109_v61 }
 0x1fb   : > { %v4986_v20 = vpop.f32.mrf.mxu0  ;;  %v5126_v57 = vpop.f32.mrf.mxu1 }
 0x1fd   : > { %v6578_v25 = vpop.f32.mrf.mxu0  ;;  %v6580_v42 = vpop.f32.mrf.mxu1 }
 0x1fe   : > { %7166 = vst [vmem:[#allocation52_spill] sm:$0xff] %v6578_v25  ;;  %7167 = vst [vmem:[#allocation53_spill] sm:$0xff] %v6580_v42  ;;  %v5569_v42 = vld [vmem:[%s5947_s8 + $0x380] sm:$0xff]  }
 0x1ff   : > { %v4987_v50 = vpop.f32.mrf.mxu0  ;;  %v5127_v18 = vpop.f32.mrf.mxu1 }
 0x200   : > { %v5568_v50 = vld [vmem:[%s5947_s8 + $0x288] sm:$0xff]  }
 0x201   : > { %v6586_v13 = vpop.f32.mrf.mxu0  ;;  %v6588_v6 = vpop.f32.mrf.mxu1  ;;  %5241 = vmatmul.mubr.bf16.gmra.mxu0 %v5566_v35  ;;  %5381 = vmatmul.mubr.bf16.gmra.mxu1 %v5567_v31 }
 0x202   : > { %7168 = vst [vmem:[#allocation54_spill] sm:$0xff] %v6586_v13  ;;  %7169 = vst [vmem:[#allocation55_spill] sm:$0xff] %v6588_v6  ;;  %5244 = vmatprep.mubr.msk.bf16.mxu0 %vm5618_vm0, %v7109_v61  ;;  %5384 = vmatprep.mubr.msk.bf16.mxu1 %vm5618_vm0, %v7109_v61 }
 0x203   : > { %v4990_v20 = vpop.f32.mrf.mxu0  ;;  %v5130_v49 = vpop.f32.mrf.mxu1 }
 0x205   : > { %v6596_v1 = vpop.f32.mrf.mxu0  ;;  %v6598_v18 = vpop.f32.mrf.mxu1 }
 0x206   : > { %7170 = vst [vmem:[#allocation56_spill] sm:$0xff] %v6596_v1  ;;  %7171 = vst [vmem:[#allocation57_spill] sm:$0xff] %v6598_v18  ;;  %v5571_v18 = vld [vmem:[%s5947_s8 + $0x388] sm:$0xff]  }
 0x207   : > { %v4991_v35 = vpop.f32.mrf.mxu0  ;;  %v5131_v57 = vpop.f32.mrf.mxu1 }
 0x208   : > { %v5570_v35 = vld [vmem:[%s5947_s8 + $0x290] sm:$0xff]  }
 0x209   : > { %v6604_v6 = vpop.f32.mrf.mxu0  ;;  %v6606_v13 = vpop.f32.mrf.mxu1  ;;  %5245 = vmatmul.mubr.bf16.gmra.mxu0 %v5568_v50  ;;  %5385 = vmatmul.mubr.bf16.gmra.mxu1 %v5569_v42 }
 0x20a   : > { %7172 = vst [vmem:[#allocation58_spill] sm:$0xff] %v6604_v6  ;;  %7173 = vst [vmem:[#allocation59_spill] sm:$0xff] %v6606_v13  ;;  %5248 = vmatprep.mubr.msk.bf16.mxu0 %vm5618_vm0, %v7109_v61  ;;  %5388 = vmatprep.mubr.msk.bf16.mxu1 %vm5618_vm0, %v7109_v61 }
 0x20b   : > { %v4994_v20 = vpop.f32.mrf.mxu0  ;;  %v5134_v25 = vpop.f32.mrf.mxu1 }
 0x20d   : > { %v6614_v31 = vpop.f32.mrf.mxu0  ;;  %v6616_v57 = vpop.f32.mrf.mxu1 }
 0x20e   : > { %7174 = vst [vmem:[#allocation60_spill] sm:$0xff] %v6614_v31  ;;  %7175 = vst [vmem:[#allocation61_spill] sm:$0xff] %v6616_v57  ;;  %v5573_v57 = vld [vmem:[%s5947_s8 + $0x390] sm:$0xff]  }
 0x20f   : > { %v4995_v50 = vpop.f32.mrf.mxu0  ;;  %v5135_v49 = vpop.f32.mrf.mxu1 }
 0x210   : > { %v5572_v50 = vld [vmem:[%s5947_s8 + $0x298] sm:$0xff]  }
 0x211   : > { %v6622_v13 = vpop.f32.mrf.mxu0  ;;  %v6624_v6 = vpop.f32.mrf.mxu1  ;;  %5249 = vmatmul.mubr.bf16.gmra.mxu0 %v5570_v35  ;;  %5389 = vmatmul.mubr.bf16.gmra.mxu1 %v5571_v18 }
 0x212   : > { %7176 = vst [vmem:[#allocation62_spill] sm:$0xff] %v6622_v13  ;;  %7177 = vst [vmem:[#allocation63_spill] sm:$0xff] %v6624_v6  ;;  %5252 = vmatprep.mubr.msk.bf16.mxu0 %vm5618_vm0, %v7109_v61  ;;  %5392 = vmatprep.mubr.msk.bf16.mxu1 %vm5618_vm0, %v7109_v61 }
 0x213   : > { %v4998_v20 = vpop.f32.mrf.mxu0  ;;  %v5138_v1 = vpop.f32.mrf.mxu1 }
 0x215   : > { %v6632_v42 = vpop.f32.mrf.mxu0  ;;  %v6634_v49 = vpop.f32.mrf.mxu1 }
 0x216   : > { %7178 = vst [vmem:[#allocation64_spill] sm:$0xff] %v6632_v42  ;;  %7179 = vst [vmem:[#allocation65_spill] sm:$0xff] %v6634_v49  ;;  %v5575_v49 = vld [vmem:[%s5947_s8 + $0x398] sm:$0xff]  }
 0x217   : > { %v4999_v35 = vpop.f32.mrf.mxu0  ;;  %v5139_v25 = vpop.f32.mrf.mxu1 }
 0x218   : > { %v5574_v35 = vld [vmem:[%s5947_s8 + $0x2a0] sm:$0xff]  }
 0x219   : > { %v6640_v6 = vpop.f32.mrf.mxu0  ;;  %v6642_v13 = vpop.f32.mrf.mxu1  ;;  %5253 = vmatmul.mubr.bf16.gmra.mxu0 %v5572_v50  ;;  %5393 = vmatmul.mubr.bf16.gmra.mxu1 %v5573_v57 }
 0x21a   : > { %7180 = vst [vmem:[#allocation66_spill] sm:$0xff] %v6640_v6  ;;  %7181 = vst [vmem:[#allocation67_spill] sm:$0xff] %v6642_v13  ;;  %5256 = vmatprep.mubr.msk.bf16.mxu0 %vm5618_vm0, %v7109_v61  ;;  %5396 = vmatprep.mubr.msk.bf16.mxu1 %vm5618_vm0, %v7109_v61 }
 0x21b   : > { %v5002_v20 = vpop.f32.mrf.mxu0  ;;  %v5142_v31 = vpop.f32.mrf.mxu1 }
 0x21d   : > { %v6650_v18 = vpop.f32.mrf.mxu0  ;;  %v6652_v25 = vpop.f32.mrf.mxu1 }
 0x21e   : > { %7182 = vst [vmem:[#allocation68_spill] sm:$0xff] %v6650_v18  ;;  %7183 = vst [vmem:[#allocation69_spill] sm:$0xff] %v6652_v25  ;;  %v5577_v25 = vld [vmem:[%s5947_s8 + $0x3a0] sm:$0xff]  }
 0x21f   : > { %v5003_v50 = vpop.f32.mrf.mxu0  ;;  %v5143_v1 = vpop.f32.mrf.mxu1 }
 0x220   : > { %v5576_v50 = vld [vmem:[%s5947_s8 + $0x2a8] sm:$0xff]  }
 0x221   : > { %v6658_v13 = vpop.f32.mrf.mxu0  ;;  %v6660_v6 = vpop.f32.mrf.mxu1  ;;  %5257 = vmatmul.mubr.bf16.gmra.mxu0 %v5574_v35  ;;  %5397 = vmatmul.mubr.bf16.gmra.mxu1 %v5575_v49 }
 0x222   : > { %7184 = vst [vmem:[#allocation70_spill] sm:$0xff] %v6658_v13  ;;  %7185 = vst [vmem:[#allocation71_spill] sm:$0xff] %v6660_v6  ;;  %5260 = vmatprep.mubr.msk.bf16.mxu0 %vm5618_vm0, %v7109_v61  ;;  %5400 = vmatprep.mubr.msk.bf16.mxu1 %vm5618_vm0, %v7109_v61 }
 0x223   : > { %v5006_v20 = vpop.f32.mrf.mxu0  ;;  %v5146_v42 = vpop.f32.mrf.mxu1 }
 0x225   : > { %v6668_v57 = vpop.f32.mrf.mxu0  ;;  %v6670_v1 = vpop.f32.mrf.mxu1 }
 0x226   : > { %7186 = vst [vmem:[#allocation72_spill] sm:$0xff] %v6668_v57  ;;  %7187 = vst [vmem:[#allocation73_spill] sm:$0xff] %v6670_v1  ;;  %v5578_v1 = vld [vmem:[%s5947_s8 + $0x2b0] sm:$0xff]   ;;  %v5579_v57 = vld [vmem:[%s5947_s8 + $0x3a8] sm:$0xff]  }
 0x227   : > { %v5007_v35 = vpop.f32.mrf.mxu0  ;;  %v5147_v31 = vpop.f32.mrf.mxu1 }
 0x229   : > { %v6676_v6 = vpop.f32.mrf.mxu0  ;;  %v6678_v13 = vpop.f32.mrf.mxu1  ;;  %5261 = vmatmul.mubr.bf16.gmra.mxu0 %v5576_v50  ;;  %5401 = vmatmul.mubr.bf16.gmra.mxu1 %v5577_v25 }
 0x22a   : > { %7188 = vst [vmem:[#allocation74_spill] sm:$0xff] %v6676_v6  ;;  %7189 = vst [vmem:[#allocation75_spill] sm:$0xff] %v6678_v13  ;;  %5264 = vmatprep.mubr.msk.bf16.mxu0 %vm5618_vm0, %v7109_v61  ;;  %5404 = vmatprep.mubr.msk.bf16.mxu1 %vm5618_vm0, %v7109_v61  ;;  %v7193_v6 = vmov 0.0  }
 0x22b   : > { %v5010_v20 = vpop.f32.mrf.mxu0  ;;  %v5150_v49 = vpop.f32.mrf.mxu1 }
 0x22c   : > { %v7192_v49 = vmax.f32 %v6136_v55, %v6138_v56  ;;  %v5581_v55 = vld [vmem:[%s5947_s8 + $0x3b0] sm:$0xff]   ;;  %v7194_v56 = vmax.f32 %v6146_v60, %v6148_v62 }
 0x22d   : > { %v6686_v35 = vpop.f32.mrf.mxu0  ;;  %v6688_v31 = vpop.f32.mrf.mxu1 }
 0x22e   : > { %7190 = vst [vmem:[#allocation76_spill] sm:$0xff] %v6686_v35  ;;  %7191 = vst [vmem:[#allocation77_spill] sm:$0xff] %v6688_v31  ;;  %v5580_v35 = vld [vmem:[%s5947_s8 + $0x2b8] sm:$0xff]  }
 0x22f   : > { %v5011_v50 = vpop.f32.mrf.mxu0  ;;  %v5151_v42 = vpop.f32.mrf.mxu1 }
 0x231   : > { %v2674_v13 = vpop.f32.mrf.mxu0  ;;  %5265 = vmatmul.mubr.bf16.gmra.mxu0 %v5578_v1  ;;  %v3266_v61 = vpop.f32.mrf.mxu1  ;;  %5405 = vmatmul.mubr.bf16.gmra.mxu1 %v5579_v57  ;;  %v6706_v1 = vld [vmem:[%s7038_s2] ss:$0 sm:$0xff] }
 0x232   : > { %v2921_v20 = vmax.f32 %v7192_v49, %v2674_v13  ;;  %5268 = vmatprep.mubr.msk.bf16.mxu0 %vm5618_vm0, %v7193_v6  ;;  %5408 = vmatprep.mubr.msk.bf16.mxu1 %vm5618_vm0, %v7193_v6 }
 0x233   : > { %v5170_v25 = vpop.f32.mrf.mxu0  ;;  %v5310_v50 = vpop.f32.mrf.mxu1 }
 0x234   : > { %v3513_v31 = vmax.f32 %v2921_v20, %v3266_v61 }
 0x235   : > { %v2677_v57 = vpop.f32.mrf.mxu0  ;;  %v3269_v42 = vpop.f32.mrf.mxu1 }
 0x236   : > { %v2922_v13 = vmax.f32 %v7194_v56, %v2677_v57  ;;  %v3582_v25 = vadd.f32 %v6706_v1, %v3513_v31  ;;  %v7196_v56 = vmax.f32 %v6164_v9, %v6166_v10 }
 0x237   : > { %v5171_v49 = vpop.f32.mrf.mxu0  ;;  %v5311_v18 = vpop.f32.mrf.mxu1 }
 0x238   : > { %v3514_v50 = vmax.f32 %v2922_v13, %v3269_v42 }
 0x239   : > { %v2682_v61 = vpop.f32.mrf.mxu0  ;;  %5269 = vmatmul.mubr.bf16.gmra.mxu0 %v5580_v35  ;;  %v3274_v20 = vpop.f32.mrf.mxu1  ;;  %5409 = vmatmul.mubr.bf16.gmra.mxu1 %v5581_v55  ;;  %v3644_v35 = vmax.f32 %v3582_v25, 0.0 }
 0x23a   : > { %v3583_v15 = vadd.f32 %v6706_v1, %v3514_v50  ;;  %v2923_v60 = vmax.f32 %v7195_v30, %v2682_v61  ;;  %5272 = vmatprep.mubr.msk.bf16.mxu0 %vm5618_vm0, %v7193_v6  ;;  %5412 = vmatprep.mubr.msk.bf16.mxu1 %vm5618_vm0, %v7193_v6  ;;  %v5583_v30 = vld [vmem:[%s5947_s8 + $0x3b8] sm:$0xff]  }
 0x23b   : > { %v5174_v62 = vpop.f32.mrf.mxu0  ;;  %v5314_v18 = vpop.f32.mrf.mxu1 }
 0x23c   : > { %v3645_v31 = vmax.f32 %v3583_v15, 0.0  ;;  %v3515_v57 = vmax.f32 %v2923_v60, %v3274_v20  ;;  %v7197_v62 = vmax.f32 %v6172_v16, %v6174_v17  ;;  %v7198_v16 = vmax.f32 %v6182_v21, %v6184_v22 }
 0x23d   : > { %v2685_v42 = vpop.f32.mrf.mxu0  ;;  %v3277_v4 = vpop.f32.mrf.mxu1 }
 0x23e   : > { %v4534_v55 = vpack.c.bf16 %v3645_v31, %v3644_v35  ;;  %v2924_v13 = vmax.f32 %v7196_v56, %v2685_v42  ;;  %v3584_v15 = vadd.f32 %v6706_v1, %v3515_v57 }
 0x23f   : > { %v5175_v49 = vpop.f32.mrf.mxu0  ;;  %v5315_v50 = vpop.f32.mrf.mxu1 }
 0x240   : > { %4535 = vst [vmem:[%s6725_s28] sm:$0xff] %v4534_v55   ;;  %v3516_v25 = vmax.f32 %v2924_v13, %v3277_v4  ;;  %v3646_v35 = vmax.f32 %v3584_v15, 0.0 }
 0x241   : > { %v2690_v61 = vpop.f32.mrf.mxu0  ;;  %5273 = vmatmul.mubr.bf16.gmra.mxu0 %v5582_v5  ;;  %v3282_v20 = vpop.f32.mrf.mxu1  ;;  %5413 = vmatmul.mubr.bf16.gmra.mxu1 %v5583_v30  ;;  %v5584_v5 = vld [vmem:[%s5947_s8 + $0x2c8] sm:$0xff]   ;;  %v5585_v30 = vld [vmem:[%s5947_s8 + $0x3c0] sm:$0xff]  }
 0x242   : > { %v3585_v60 = vadd.f32 %v6706_v1, %v3516_v25  ;;  %v2925_v18 = vmax.f32 %v7197_v62, %v2690_v61  ;;  %5276 = vmatprep.mubr.msk.bf16.mxu0 %vm5618_vm0, %v7193_v6  ;;  %5416 = vmatprep.mubr.msk.bf16.mxu1 %vm5618_vm0, %v7193_v6 }
 0x243   : > { %v5178_v9 = vpop.f32.mrf.mxu0  ;;  %v5318_v10 = vpop.f32.mrf.mxu1 }
 0x244   : > { %v3647_v31 = vmax.f32 %v3585_v60, 0.0  ;;  %v3517_v57 = vmax.f32 %v2925_v18, %v3282_v20  ;;  %v7199_v20 = vmax.f32 %v6190_v28, %v6192_v29  ;;  %v7200_v28 = vmax.f32 %v6200_v33, %v6202_v34 }
 0x245   : > { %v2693_v42 = vpop.f32.mrf.mxu0  ;;  %v3285_v4 = vpop.f32.mrf.mxu1 }
 0x246   : > { %v4539_v55 = vpack.c.bf16 %v3647_v31, %v3646_v35  ;;  %v2926_v17 = vmax.f32 %v7198_v16, %v2693_v42  ;;  %v3586_v49 = vadd.f32 %v6706_v1, %v3517_v57  ;;  %v5586_v31 = vld [vmem:[%s5947_s8 + $0x2d0] sm:$0xff]   ;;  %v5587_v57 = vld [vmem:[%s5947_s8 + $0x3c8] sm:$0xff]  }
 0x247   : > { %v5179_v56 = vpop.f32.mrf.mxu0  ;;  %v5319_v13 = vpop.f32.mrf.mxu1 }
 0x248   : > { %4686 = vst [vmem:[%s6725_s28 + $0x8] sm:$0xff] %v4539_v55   ;;  %v3518_v50 = vmax.f32 %v2926_v17, %v3285_v4  ;;  %v3648_v62 = vmax.f32 %v3586_v49, 0.0  ;;  %v7201_v13 = vmax.f32 %v6208_v40, %v6210_v41  ;;  %v7202_v40 = vmax.f32 %v6218_v45, %v6220_v46 }
 0x249   : > { %v2698_v25 = vpop.f32.mrf.mxu0  ;;  %5277 = vmatmul.mubr.bf16.gmra.mxu0 %v5584_v5  ;;  %v3290_v15 = vpop.f32.mrf.mxu1  ;;  %5417 = vmatmul.mubr.bf16.gmra.mxu1 %v5585_v30 }
 0x24a   : > { %v3587_v61 = vadd.f32 %v6706_v1, %v3518_v50  ;;  %v2927_v60 = vmax.f32 %v7199_v20, %v2698_v25  ;;  %5280 = vmatprep.mubr.msk.bf16.mxu0 %vm5618_vm0, %v7193_v6  ;;  %5420 = vmatprep.mubr.msk.bf16.mxu1 %vm5618_vm0, %v7193_v6 }
 0x24b   : > { %v5182_v21 = vpop.f32.mrf.mxu0  ;;  %v5322_v22 = vpop.f32.mrf.mxu1 }
 0x24c   : > { %v3649_v18 = vmax.f32 %v3587_v61, 0.0  ;;  %v3519_v9 = vmax.f32 %v2927_v60, %v3290_v15  ;;  %v5588_v60 = vld [vmem:[%s5947_s8 + $0x2d8] sm:$0xff]   ;;  %v5589_v21 = vld [vmem:[%s5947_s8 + $0x3d0] sm:$0xff]  }
 0x24d   : > { %v2701_v10 = vpop.f32.mrf.mxu0  ;;  %v3293_v35 = vpop.f32.mrf.mxu1 }
 0x24e   : > { %v4544_v42 = vpack.c.bf16 %v3649_v18, %v3648_v62  ;;  %v2928_v29 = vmax.f32 %v7200_v28, %v2701_v10  ;;  %v3588_v30 = vadd.f32 %v6706_v1, %v3519_v9 }
 0x24f   : > { %v5183_v4 = vpop.f32.mrf.mxu0  ;;  %v5323_v5 = vpop.f32.mrf.mxu1 }
 0x250   : > { %4687 = vst [vmem:[%s6725_s28 + $0x10] sm:$0xff] %v4544_v42   ;;  %v3520_v55 = vmax.f32 %v2928_v29, %v3293_v35  ;;  %v3650_v50 = vmax.f32 %v3588_v30, 0.0  ;;  %v7203_v42 = vmax.f32 %v6226_v52, %v6228_v53  ;;  %v7204_v52 = vmax.f32 %v6236_v63, %v6238_v0 }
 0x251   : > { %v2706_v16 = vpop.f32.mrf.mxu0  ;;  %5281 = vmatmul.mubr.bf16.gmra.mxu0 %v5586_v31  ;;  %v3298_v17 = vpop.f32.mrf.mxu1  ;;  %5421 = vmatmul.mubr.bf16.gmra.mxu1 %v5587_v57 }
 0x252   : > { %v3589_v56 = vadd.f32 %v6706_v1, %v3520_v55  ;;  %v2929_v49 = vmax.f32 %v7201_v13, %v2706_v16  ;;  %5284 = vmatprep.mubr.msk.bf16.mxu0 %vm5618_vm0, %v7193_v6  ;;  %5424 = vmatprep.mubr.msk.bf16.mxu1 %vm5618_vm0, %v7193_v6  ;;  %v5590_v16 = vld [vmem:[%s5947_s8 + $0x2e0] sm:$0xff]  }
 0x253   : > { %v5186_v33 = vpop.f32.mrf.mxu0  ;;  %v5326_v34 = vpop.f32.mrf.mxu1 }
 0x254   : > { %v3651_v25 = vmax.f32 %v3589_v56, 0.0  ;;  %v3521_v15 = vmax.f32 %v2929_v49, %v3298_v17  ;;  %v5591_v17 = vld [vmem:[%s5947_s8 + $0x3d8] sm:$0xff]  }
 0x255   : > { %v2709_v61 = vpop.f32.mrf.mxu0  ;;  %v3301_v20 = vpop.f32.mrf.mxu1 }
 0x256   : > { %v4549_v22 = vpack.c.bf16 %v3651_v25, %v3650_v50  ;;  %v2930_v41 = vmax.f32 %v7202_v40, %v2709_v61  ;;  %v3590_v9 = vadd.f32 %v6706_v1, %v3521_v15  ;;  %v7205_v15 = vmax.f32 %v6244_v12, %v6246_v14 }
 0x257   : > { %v5187_v62 = vpop.f32.mrf.mxu0  ;;  %v5327_v18 = vpop.f32.mrf.mxu1 }
 0x258   : > { %4688 = vst [vmem:[%s6725_s28 + $0x18] sm:$0xff] %v4549_v22   ;;  %v3522_v10 = vmax.f32 %v2930_v41, %v3301_v20  ;;  %v3652_v29 = vmax.f32 %v3590_v9, 0.0  ;;  %v7206_v62 = vmax.f32 %v6254_v23, %v6256_v24 }
 0x259   : > { %v2714_v35 = vpop.f32.mrf.mxu0  ;;  %5285 = vmatmul.mubr.bf16.gmra.mxu0 %v5588_v60  ;;  %v3306_v31 = vpop.f32.mrf.mxu1  ;;  %5425 = vmatmul.mubr.bf16.gmra.mxu1 %v5589_v21 }
 0x25a   : > { %v3591_v57 = vadd.f32 %v6706_v1, %v3522_v10  ;;  %v2931_v28 = vmax.f32 %v7203_v42, %v2714_v35  ;;  %5288 = vmatprep.mubr.msk.bf16.mxu0 %vm5618_vm0, %v7193_v6  ;;  %5428 = vmatprep.mubr.msk.bf16.mxu1 %vm5618_vm0, %v7193_v6  ;;  %v7207_v42 = vmax.f32 %v6262_v36, %v6264_v38 }
 0x25b   : > { %v5190_v45 = vpop.f32.mrf.mxu0  ;;  %v5330_v46 = vpop.f32.mrf.mxu1 }
 0x25c   : > { %v3653_v4 = vmax.f32 %v3591_v57, 0.0  ;;  %v3523_v5 = vmax.f32 %v2931_v28, %v3306_v31 }
 0x25d   : > { %v2717_v30 = vpop.f32.mrf.mxu0  ;;  %v3309_v55 = vpop.f32.mrf.mxu1 }
 0x25e   : > { %v4554_v56 = vpack.c.bf16 %v3653_v4, %v3652_v29  ;;  %v2932_v53 = vmax.f32 %v7204_v52, %v2717_v30  ;;  %v3592_v33 = vadd.f32 %v6706_v1, %v3523_v5 }
 0x25f   : > { %v5191_v13 = vpop.f32.mrf.mxu0  ;;  %v5331_v49 = vpop.f32.mrf.mxu1 }
 0x260   : > { %4689 = vst [vmem:[%s6725_s28 + $0x20] sm:$0xff] %v4554_v56   ;;  %v3524_v6 = vmax.f32 %v2932_v53, %v3309_v55  ;;  %v3654_v0 = vmax.f32 %v3592_v33, 0.0  ;;  %v7208_v55 = vmax.f32 %v6272_v47, %v6274_v48  ;;  %v7209_v49 = vmax.f32 %v6280_v3, %v6282_v8 }
 0x261   : > { %v2722_v34 = vpop.f32.mrf.mxu0  ;;  %5289 = vmatmul.mubr.bf16.gmra.mxu0 %v5590_v16  ;;  %v3314_v50 = vpop.f32.mrf.mxu1  ;;  %5429 = vmatmul.mubr.bf16.gmra.mxu1 %v5591_v17 }
 0x262   : > { %v3593_v25 = vadd.f32 %v6706_v1, %v3524_v6  ;;  %v2933_v61 = vmax.f32 %v7205_v15, %v2722_v34 }
 0x263   : > { %v5194_v20 = vpop.f32.mrf.mxu0  ;;  %v5334_v63 = vpop.f32.mrf.mxu1 }
 0x264   : > { %v3655_v60 = vmax.f32 %v3593_v25, 0.0  ;;  %v3525_v21 = vmax.f32 %v2933_v61, %v3314_v50  ;;  %v7210_v20 = vmax.f32 %v6290_v26, %v6292_v27 }
 0x265   : > { %v2725_v22 = vpop.f32.mrf.mxu0  ;;  %v3317_v40 = vpop.f32.mrf.mxu1 }
 0x266   : > { %v4559_v41 = vpack.c.bf16 %v3655_v60, %v3654_v0  ;;  %v2934_v18 = vmax.f32 %v7206_v62, %v2725_v22  ;;  %v3594_v35 = vadd.f32 %v6706_v1, %v3525_v21 }
 0x267   : > { %v5195_v9 = vpop.f32.mrf.mxu0  ;;  %v5335_v10 = vpop.f32.mrf.mxu1 }
 0x268   : > { %4690 = vst [vmem:[%s6725_s28 + $0x28] sm:$0xff] %v4559_v41   ;;  %v3526_v31 = vmax.f32 %v2934_v18, %v3317_v40  ;;  %v3656_v29 = vmax.f32 %v3594_v35, 0.0  ;;  %v7211_v41 = vmax.f32 %v6298_v51, %v6300_v59 }
 0x269   : > { %v2730_v12 = vpop.f32.mrf.mxu0  ;;  %v3322_v14 = vpop.f32.mrf.mxu1 }
 0x26a   : > { %v3595_v57 = vadd.f32 %v6706_v1, %v3526_v31  ;;  %v2935_v28 = vmax.f32 %v7207_v42, %v2730_v12 }
 0x26b   : > { %v5198_v45 = vpop.f32.mrf.mxu0  ;;  %v5338_v46 = vpop.f32.mrf.mxu1 }
 0x26c   : > { %v3657_v23 = vmax.f32 %v3595_v57, 0.0  ;;  %v3527_v24 = vmax.f32 %v2935_v28, %v3322_v14  ;;  %v7212_v14 = vmax.f32 %v6308_v43, %v6310_v44 }
 0x26d   : > { %v2733_v4 = vpop.f32.mrf.mxu0  ;;  %v3325_v5 = vpop.f32.mrf.mxu1 }
 0x26e   : > { %v4564_v30 = vpack.c.bf16 %v3657_v23, %v3656_v29  ;;  %v2936_v16 = vmax.f32 %v7208_v55, %v2733_v4  ;;  %v3596_v52 = vadd.f32 %v6706_v1, %v3527_v24  ;;  %v7213_v23 = vmax.f32 %v6316_v58, %v6318_v39 }
 0x26f   : > { %v5199_v17 = vpop.f32.mrf.mxu0  ;;  %v5339_v56 = vpop.f32.mrf.mxu1 }
 0x270   : > { %4691 = vst [vmem:[%s6725_s28 + $0x30] sm:$0xff] %v4564_v30   ;;  %v3528_v53 = vmax.f32 %v2936_v16, %v3325_v5  ;;  %v3658_v50 = vmax.f32 %v3596_v52, 0.0  ;;  %v7214_v56 = vmax.f32 %v6326_v32, %v6328_v2 }
 0x271   : > { %v2738_v36 = vpop.f32.mrf.mxu0  ;;  %v3330_v38 = vpop.f32.mrf.mxu1 }
 0x272   : > { %v3597_v13 = vadd.f32 %v6706_v1, %v3528_v53  ;;  %v2937_v33 = vmax.f32 %v7209_v49, %v2738_v36 }
 0x273   : > { %v5202_v6 = vpop.f32.mrf.mxu0  ;;  %v5342_v34 = vpop.f32.mrf.mxu1 }
 0x274   : > { %v3659_v47 = vmax.f32 %v3597_v13, 0.0  ;;  %v3529_v48 = vmax.f32 %v2937_v33, %v3330_v38  ;;  %v7215_v33 = vmax.f32 %v6334_v7, %v6336_v54 }
 0x275   : > { %v2741_v25 = vpop.f32.mrf.mxu0  ;;  %v3333_v15 = vpop.f32.mrf.mxu1 }
 0x276   : > { %v4569_v61 = vpack.c.bf16 %v3659_v47, %v3658_v50  ;;  %v2938_v63 = vmax.f32 %v7210_v20, %v2741_v25  ;;  %v3598_v21 = vadd.f32 %v6706_v1, %v3529_v48 }
 0x277   : > { %v5203_v0 = vpop.f32.mrf.mxu0  ;;  %v5343_v60 = vpop.f32.mrf.mxu1 }
 0x278   : > { %4692 = vst [vmem:[%s6725_s28 + $0x38] sm:$0xff] %v4569_v61   ;;  %v3530_v22 = vmax.f32 %v2938_v63, %v3333_v15  ;;  %v3660_v10 = vmax.f32 %v3598_v21, 0.0  ;;  %v7216_v61 = vmax.f32 %v6344_v11, %v6346_v19 }
 0x279   : > { %v2746_v3 = vpop.f32.mrf.mxu0  ;;  %v3338_v8 = vpop.f32.mrf.mxu1 }
 0x27a   : > { %v3599_v40 = vadd.f32 %v6706_v1, %v3530_v22  ;;  %v2939_v62 = vmax.f32 %v7211_v41, %v2746_v3  ;;  %v7217_v3 = vld [vmem:[#allocation3_spill] sm:$0xff] }
 0x27b   : > { %v5206_v18 = vpop.f32.mrf.mxu0  ;;  %v5346_v9 = vpop.f32.mrf.mxu1 }
 0x27c   : > { %v3661_v26 = vmax.f32 %v3599_v40, 0.0  ;;  %v3531_v27 = vmax.f32 %v2939_v62, %v3338_v8  ;;  %v7218_v8 = vmax.f32 %v6352_v37, %v7217_v3 }
 0x27d   : > { %v2749_v35 = vpop.f32.mrf.mxu0  ;;  %v3341_v31 = vpop.f32.mrf.mxu1 }
 0x27e   : > { %v4574_v12 = vpack.c.bf16 %v3661_v26, %v3660_v10  ;;  %v2940_v57 = vmax.f32 %v7212_v14, %v2749_v35  ;;  %v3600_v45 = vadd.f32 %v6706_v1, %v3531_v27  ;;  %v7219_v27 = vld [vmem:[#allocation4_spill] sm:$0xff]  ;;  %v7220_v35 = vld [vmem:[#allocation5_spill] sm:$0xff] }
 0x27f   : > { %v5207_v42 = vpop.f32.mrf.mxu0  ;;  %v5347_v28 = vpop.f32.mrf.mxu1 }
 0x280   : > { %4693 = vst [vmem:[%s6725_s28 + $0x40] sm:$0xff] %v4574_v12   ;;  %v3532_v46 = vmax.f32 %v2940_v57, %v3341_v31  ;;  %v3662_v30 = vmax.f32 %v3600_v45, 0.0  ;;  %v7221_v31 = vmax.f32 %v7219_v27, %v7220_v35 }
 0x281   : > { %v2754_v51 = vpop.f32.mrf.mxu0  ;;  %v3346_v59 = vpop.f32.mrf.mxu1 }
 0x282   : > { %v3601_v29 = vadd.f32 %v6706_v1, %v3532_v46  ;;  %v2941_v24 = vmax.f32 %v7213_v23, %v2754_v51  ;;  %v7222_v51 = vld [vmem:[#allocation6_spill] sm:$0xff] }
 0x283   : > { %v5210_v4 = vpop.f32.mrf.mxu0  ;;  %v5350_v5 = vpop.f32.mrf.mxu1 }
 0x284   : > { %v3663_v43 = vmax.f32 %v3601_v29, 0.0  ;;  %v3533_v44 = vmax.f32 %v2941_v24, %v3346_v59  ;;  %v7223_v59 = vld [vmem:[#allocation7_spill] sm:$0xff] }
 0x285   : > { %v2757_v55 = vpop.f32.mrf.mxu0  ;;  %v3349_v16 = vpop.f32.mrf.mxu1  ;;  %v7224_v29 = vmax.f32 %v7222_v51, %v7223_v59 }
 0x286   : > { %v4579_v17 = vpack.c.bf16 %v3663_v43, %v3662_v30  ;;  %v2942_v52 = vmax.f32 %v7214_v56, %v2757_v55  ;;  %v3602_v38 = vadd.f32 %v6706_v1, %v3533_v44  ;;  %v7226_v56 = vld [vmem:[#allocation9_spill] sm:$0xff] }
 0x287   : > { %v5211_v53 = vpop.f32.mrf.mxu0  ;;  %v5351_v36 = vpop.f32.mrf.mxu1 }
 0x288   : > { %4694 = vst [vmem:[%s6725_s28 + $0x48] sm:$0xff] %v4579_v17   ;;  %v3534_v13 = vmax.f32 %v2942_v52, %v3349_v16  ;;  %v3664_v47 = vmax.f32 %v3602_v38, 0.0  ;;  %v7225_v17 = vld [vmem:[#allocation8_spill] sm:$0xff] }
 0x289   : > { %v2762_v39 = vpop.f32.mrf.mxu0  ;;  %v3354_v58 = vpop.f32.mrf.mxu1  ;;  %v7227_v52 = vmax.f32 %v7225_v17, %v7226_v56 }
 0x28a   : > { %v3603_v49 = vadd.f32 %v6706_v1, %v3534_v13  ;;  %v2943_v6 = vmax.f32 %v7215_v33, %v2762_v39 }
 0x28b   : > { %v5214_v34 = vpop.f32.mrf.mxu0  ;;  %v5354_v50 = vpop.f32.mrf.mxu1 }
 0x28c   : > { %v3665_v32 = vmax.f32 %v3603_v49, 0.0  ;;  %v3535_v2 = vmax.f32 %v2943_v6, %v3354_v58  ;;  %v7228_v6 = vld [vmem:[#allocation10_spill] sm:$0xff]  ;;  %v7229_v34 = vld [vmem:[#allocation11_spill] sm:$0xff] }
 0x28d   : > { %v2765_v48 = vpop.f32.mrf.mxu0  ;;  %v3357_v25 = vpop.f32.mrf.mxu1  ;;  %v7230_v50 = vmax.f32 %v7228_v6, %v7229_v34 }
 0x28e   : > { %v4584_v15 = vpack.c.bf16 %v3665_v32, %v3664_v47  ;;  %v2944_v20 = vmax.f32 %v7216_v61, %v2765_v48  ;;  %v3604_v60 = vadd.f32 %v6706_v1, %v3535_v2 }
 0x28f   : > { %v5215_v63 = vpop.f32.mrf.mxu0  ;;  %v5355_v0 = vpop.f32.mrf.mxu1 }
 0x290   : > { %4695 = vst [vmem:[%s6725_s28 + $0x50] sm:$0xff] %v4584_v15   ;;  %v3536_v21 = vmax.f32 %v2944_v20, %v3357_v25  ;;  %v3666_v18 = vmax.f32 %v3604_v60, 0.0  ;;  %v7231_v0 = vld [vmem:[#allocation12_spill] sm:$0xff]  ;;  %v7232_v60 = vld [vmem:[#allocation13_spill] sm:$0xff] }
 0x291   : > { %v2770_v54 = vpop.f32.mrf.mxu0  ;;  %v3362_v7 = vpop.f32.mrf.mxu1 }
 0x292   : > { %v3605_v22 = vadd.f32 %v6706_v1, %v3536_v21  ;;  %v2945_v40 = vmax.f32 %v7218_v8, %v2770_v54  ;;  %v7233_v21 = vmax.f32 %v7231_v0, %v7232_v60 }
 0x293   : > { %v5218_v41 = vpop.f32.mrf.mxu0  ;;  %v5358_v62 = vpop.f32.mrf.mxu1 }
 0x294   : > { %v3667_v11 = vmax.f32 %v3605_v22, 0.0  ;;  %v3537_v19 = vmax.f32 %v2945_v40, %v3362_v7 }
 0x295   : > { %v2773_v9 = vpop.f32.mrf.mxu0  ;;  %v3365_v10 = vpop.f32.mrf.mxu1 }
 0x296   : > { %v4589_v26 = vpack.c.bf16 %v3667_v11, %v3666_v18  ;;  %v2946_v12 = vmax.f32 %v7221_v31, %v2773_v9  ;;  %v3606_v42 = vadd.f32 %v6706_v1, %v3537_v19  ;;  %v7234_v18 = vld [vmem:[#allocation14_spill] sm:$0xff]  ;;  %v7235_v11 = vld [vmem:[#allocation15_spill] sm:$0xff] }
 0x297   : > { %v5219_v14 = vpop.f32.mrf.mxu0  ;;  %v5359_v57 = vpop.f32.mrf.mxu1  ;;  %v7236_v19 = vmax.f32 %v7234_v18, %v7235_v11 }
 0x298   : > { %4696 = vst [vmem:[%s6725_s28 + $0x58] sm:$0xff] %v4589_v26   ;;  %v3538_v28 = vmax.f32 %v2946_v12, %v3365_v10  ;;  %v3668_v5 = vmax.f32 %v3606_v42, 0.0  ;;  %v7237_v42 = vld [vmem:[#allocation16_spill] sm:$0xff] }
 0x299   : > { %v2778_v37 = vpop.f32.mrf.mxu0  ;;  %v3370_v45 = vpop.f32.mrf.mxu1 }
 0x29a   : > { %v3607_v46 = vadd.f32 %v6706_v1, %v3538_v28  ;;  %v2947_v23 = vmax.f32 %v7224_v29, %v2778_v37  ;;  %v7238_v28 = vld [vmem:[#allocation17_spill] sm:$0xff] }
 0x29b   : > { %v5222_v24 = vpop.f32.mrf.mxu0  ;;  %v5362_v4 = vpop.f32.mrf.mxu1  ;;  %v7239_v37 = vmax.f32 %v7237_v42, %v7238_v28 }
 0x29c   : > { %v3669_v30 = vmax.f32 %v3607_v46, 0.0  ;;  %v3539_v43 = vmax.f32 %v2947_v23, %v3370_v45 }
 0x29d   : > { %v2781_v44 = vpop.f32.mrf.mxu0  ;;  %v3373_v55 = vpop.f32.mrf.mxu1 }
 0x29e   : > { %v4594_v16 = vpack.c.bf16 %v3669_v30, %v3668_v5  ;;  %v2948_v53 = vmax.f32 %v7227_v52, %v2781_v44  ;;  %v3608_v13 = vadd.f32 %v6706_v1, %v3539_v43  ;;  %v7240_v5 = vld [vmem:[#allocation18_spill] sm:$0xff]  ;;  %v7241_v30 = vld [vmem:[#allocation19_spill] sm:$0xff] }
 0x29f   : > { %v5223_v36 = vpop.f32.mrf.mxu0  ;;  %v5363_v38 = vpop.f32.mrf.mxu1  ;;  %v7242_v43 = vmax.f32 %v7240_v5, %v7241_v30 }
 0x2a0   : > { %4697 = vst [vmem:[%s6725_s28 + $0x60] sm:$0xff] %v4594_v16   ;;  %v3540_v39 = vmax.f32 %v2948_v53, %v3373_v55  ;;  %v3670_v48 = vmax.f32 %v3608_v13, 0.0  ;;  %v7243_v13 = vld [vmem:[#allocation20_spill] sm:$0xff] }
 0x2a1   : > { %v2786_v58 = vpop.f32.mrf.mxu0  ;;  %v3378_v49 = vpop.f32.mrf.mxu1 }
 0x2a2   : > { %v3609_v33 = vadd.f32 %v6706_v1, %v3540_v39  ;;  %v2949_v47 = vmax.f32 %v7230_v50, %v2786_v58  ;;  %v7244_v39 = vld [vmem:[#allocation21_spill] sm:$0xff] }
 0x2a3   : > { %v5226_v32 = vpop.f32.mrf.mxu0  ;;  %v5366_v2 = vpop.f32.mrf.mxu1  ;;  %v7245_v58 = vmax.f32 %v7243_v13, %v7244_v39 }
 0x2a4   : > { %v3671_v25 = vmax.f32 %v3609_v33, 0.0  ;;  %v3541_v15 = vmax.f32 %v2949_v47, %v3378_v49 }
 0x2a5   : > { %v2789_v61 = vpop.f32.mrf.mxu0  ;;  %v3381_v20 = vpop.f32.mrf.mxu1 }
 0x2a6   : > { %v4599_v63 = vpack.c.bf16 %v3671_v25, %v3670_v48  ;;  %v2950_v54 = vmax.f32 %v7233_v21, %v2789_v61  ;;  %v3610_v3 = vadd.f32 %v6706_v1, %v3541_v15  ;;  %v7246_v48 = vld [vmem:[#allocation22_spill] sm:$0xff]  ;;  %v7247_v25 = vld [vmem:[#allocation23_spill] sm:$0xff] }
 0x2a7   : > { %v5227_v7 = vpop.f32.mrf.mxu0  ;;  %v5367_v22 = vpop.f32.mrf.mxu1  ;;  %v7248_v15 = vmax.f32 %v7246_v48, %v7247_v25 }
 0x2a8   : > { %4698 = vst [vmem:[%s6725_s28 + $0x68] sm:$0xff] %v4599_v63   ;;  %v3542_v8 = vmax.f32 %v2950_v54, %v3381_v20  ;;  %v3672_v27 = vmax.f32 %v3610_v3, 0.0  ;;  %v7249_v3 = vld [vmem:[#allocation24_spill] sm:$0xff] }
 0x2a9   : > { %v2794_v40 = vpop.f32.mrf.mxu0  ;;  %v3386_v41 = vpop.f32.mrf.mxu1 }
 0x2aa   : > { %v3611_v62 = vadd.f32 %v6706_v1, %v3542_v8  ;;  %v2951_v9 = vmax.f32 %v7236_v19, %v2794_v40  ;;  %v7250_v8 = vld [vmem:[#allocation25_spill] sm:$0xff] }
 0x2ab   : > { %v5230_v10 = vpop.f32.mrf.mxu0  ;;  %v5370_v26 = vpop.f32.mrf.mxu1  ;;  %v7251_v40 = vmax.f32 %v7249_v3, %v7250_v8 }
 0x2ac   : > { %v3673_v35 = vmax.f32 %v3611_v62, 0.0  ;;  %v3543_v31 = vmax.f32 %v2951_v9, %v3386_v41 }
 0x2ad   : > { %v2797_v12 = vpop.f32.mrf.mxu0  ;;  %v3389_v14 = vpop.f32.mrf.mxu1 }
 0x2ae   : > { %v4604_v57 = vpack.c.bf16 %v3673_v35, %v3672_v27  ;;  %v2952_v45 = vmax.f32 %v7239_v37, %v2797_v12  ;;  %v3612_v59 = vadd.f32 %v6706_v1, %v3543_v31  ;;  %v7252_v27 = vld [vmem:[#allocation26_spill] sm:$0xff]  ;;  %v7253_v35 = vld [vmem:[#allocation27_spill] sm:$0xff] }
 0x2af   : > { %v5231_v46 = vpop.f32.mrf.mxu0  ;;  %v5371_v51 = vpop.f32.mrf.mxu1  ;;  %v7254_v31 = vmax.f32 %v7252_v27, %v7253_v35 }
 0x2b0   : > { %4699 = vst [vmem:[%s6725_s28 + $0x70] sm:$0xff] %v4604_v57   ;;  %v3544_v29 = vmax.f32 %v2952_v45, %v3389_v14  ;;  %v3674_v17 = vmax.f32 %v3612_v59, 0.0  ;;  %v7255_v59 = vld [vmem:[#allocation28_spill] sm:$0xff] }
 0x2b1   : > { %v2802_v23 = vpop.f32.mrf.mxu0  ;;  %v3394_v24 = vpop.f32.mrf.mxu1 }
 0x2b2   : > { %v3613_v4 = vadd.f32 %v6706_v1, %v3544_v29  ;;  %v2953_v44 = vmax.f32 %v7242_v43, %v2802_v23  ;;  %v7256_v29 = vld [vmem:[#allocation29_spill] sm:$0xff] }
 0x2b3   : > { %v5234_v55 = vpop.f32.mrf.mxu0  ;;  %v5374_v16 = vpop.f32.mrf.mxu1  ;;  %v7257_v23 = vmax.f32 %v7255_v59, %v7256_v29 }
 0x2b4   : > { %v3675_v56 = vmax.f32 %v3613_v4, 0.0  ;;  %v3545_v52 = vmax.f32 %v2953_v44, %v3394_v24 }
 0x2b5   : > { %v2805_v53 = vpop.f32.mrf.mxu0  ;;  %v3397_v36 = vpop.f32.mrf.mxu1 }
 0x2b6   : > { %v4609_v38 = vpack.c.bf16 %v3675_v56, %v3674_v17  ;;  %v2954_v49 = vmax.f32 %v7245_v58, %v2805_v53  ;;  %v3614_v34 = vadd.f32 %v6706_v1, %v3545_v52  ;;  %v7258_v17 = vld [vmem:[#allocation30_spill] sm:$0xff]  ;;  %v7259_v56 = vld [vmem:[#allocation31_spill] sm:$0xff] }
 0x2b7   : > { %v5235_v33 = vpop.f32.mrf.mxu0  ;;  %v5375_v6 = vpop.f32.mrf.mxu1  ;;  %v7260_v52 = vmax.f32 %v7258_v17, %v7259_v56 }
 0x2b8   : > { %4700 = vst [vmem:[%s6725_s28 + $0x78] sm:$0xff] %v4609_v38   ;;  %v3546_v50 = vmax.f32 %v2954_v49, %v3397_v36  ;;  %v3676_v0 = vmax.f32 %v3614_v34, 0.0  ;;  %v7261_v34 = vld [vmem:[#allocation32_spill] sm:$0xff] }
 0x2b9   : > { %v2810_v47 = vpop.f32.mrf.mxu0  ;;  %v3402_v32 = vpop.f32.mrf.mxu1 }
 0x2ba   : > { %v3615_v2 = vadd.f32 %v6706_v1, %v3546_v50  ;;  %v2955_v61 = vmax.f32 %v7248_v15, %v2810_v47  ;;  %v7262_v50 = vld [vmem:[#allocation33_spill] sm:$0xff] }
 0x2bb   : > { %v5238_v20 = vpop.f32.mrf.mxu0  ;;  %v5378_v63 = vpop.f32.mrf.mxu1  ;;  %v7263_v47 = vmax.f32 %v7261_v34, %v7262_v50 }
 0x2bc   : > { %v3677_v60 = vmax.f32 %v3615_v2, 0.0  ;;  %v3547_v21 = vmax.f32 %v2955_v61, %v3402_v32 }
 0x2bd   : > { %v2813_v54 = vpop.f32.mrf.mxu0  ;;  %v3405_v7 = vpop.f32.mrf.mxu1 }
 0x2be   : > { %v4614_v22 = vpack.c.bf16 %v3677_v60, %v3676_v0  ;;  %v2956_v41 = vmax.f32 %v7251_v40, %v2813_v54  ;;  %v3616_v11 = vadd.f32 %v6706_v1, %v3547_v21  ;;  %v7264_v0 = vld [vmem:[#allocation34_spill] sm:$0xff]  ;;  %v7265_v60 = vld [vmem:[#allocation35_spill] sm:$0xff] }
 0x2bf   : > { %v5239_v62 = vpop.f32.mrf.mxu0  ;;  %v5379_v18 = vpop.f32.mrf.mxu1  ;;  %v7266_v21 = vmax.f32 %v7264_v0, %v7265_v60 }
 0x2c0   : > { %4701 = vst [vmem:[%s6725_s28 + $0x80] sm:$0xff] %v4614_v22   ;;  %v3548_v19 = vmax.f32 %v2956_v41, %v3405_v7  ;;  %v3678_v42 = vmax.f32 %v3616_v11, 0.0  ;;  %v7267_v11 = vld [vmem:[#allocation36_spill] sm:$0xff] }
 0x2c1   : > { %v2818_v9 = vpop.f32.mrf.mxu0  ;;  %v3410_v10 = vpop.f32.mrf.mxu1 }
 0x2c2   : > { %v3617_v26 = vadd.f32 %v6706_v1, %v3548_v19  ;;  %v2957_v12 = vmax.f32 %v7254_v31, %v2818_v9  ;;  %v7268_v19 = vld [vmem:[#allocation37_spill] sm:$0xff] }
 0x2c3   : > { %v5242_v14 = vpop.f32.mrf.mxu0  ;;  %v5382_v57 = vpop.f32.mrf.mxu1  ;;  %v7269_v9 = vmax.f32 %v7267_v11, %v7268_v19 }
 0x2c4   : > { %v3679_v28 = vmax.f32 %v3617_v26, 0.0  ;;  %v3549_v37 = vmax.f32 %v2957_v12, %v3410_v10 }
 0x2c5   : > { %v2821_v45 = vpop.f32.mrf.mxu0  ;;  %v3413_v46 = vpop.f32.mrf.mxu1 }
 0x2c6   : > { %v4619_v51 = vpack.c.bf16 %v3679_v28, %v3678_v42  ;;  %v2958_v24 = vmax.f32 %v7257_v23, %v2821_v45  ;;  %v3618_v30 = vadd.f32 %v6706_v1, %v3549_v37  ;;  %v7270_v42 = vld [vmem:[#allocation38_spill] sm:$0xff]  ;;  %v7271_v28 = vld [vmem:[#allocation39_spill] sm:$0xff] }
 0x2c7   : > { %v5243_v4 = vpop.f32.mrf.mxu0  ;;  %v5383_v5 = vpop.f32.mrf.mxu1  ;;  %v7272_v37 = vmax.f32 %v7270_v42, %v7271_v28 }
 0x2c8   : > { %4702 = vst [vmem:[%s6725_s28 + $0x88] sm:$0xff] %v4619_v51   ;;  %v3550_v43 = vmax.f32 %v2958_v24, %v3413_v46  ;;  %v3680_v13 = vmax.f32 %v3618_v30, 0.0  ;;  %v7273_v30 = vld [vmem:[#allocation40_spill] sm:$0xff] }
 0x2c9   : > { %v2826_v44 = vpop.f32.mrf.mxu0  ;;  %v3418_v55 = vpop.f32.mrf.mxu1 }
 0x2ca   : > { %v3619_v16 = vadd.f32 %v6706_v1, %v3550_v43  ;;  %v2959_v53 = vmax.f32 %v7260_v52, %v2826_v44  ;;  %v7274_v43 = vld [vmem:[#allocation41_spill] sm:$0xff] }
 0x2cb   : > { %v5246_v36 = vpop.f32.mrf.mxu0  ;;  %v5386_v38 = vpop.f32.mrf.mxu1  ;;  %v7275_v44 = vmax.f32 %v7273_v30, %v7274_v43 }
 0x2cc   : > { %v3681_v39 = vmax.f32 %v3619_v16, 0.0  ;;  %v3551_v58 = vmax.f32 %v2959_v53, %v3418_v55 }
 0x2cd   : > { %v2829_v49 = vpop.f32.mrf.mxu0  ;;  %v3421_v33 = vpop.f32.mrf.mxu1 }
 0x2ce   : > { %v4624_v6 = vpack.c.bf16 %v3681_v39, %v3680_v13  ;;  %v2960_v32 = vmax.f32 %v7263_v47, %v2829_v49  ;;  %v3620_v25 = vadd.f32 %v6706_v1, %v3551_v58  ;;  %v7276_v13 = vld [vmem:[#allocation42_spill] sm:$0xff]  ;;  %v7277_v39 = vld [vmem:[#allocation43_spill] sm:$0xff] }
 0x2cf   : > { %v5247_v2 = vpop.f32.mrf.mxu0  ;;  %v5387_v48 = vpop.f32.mrf.mxu1  ;;  %v7278_v58 = vmax.f32 %v7276_v13, %v7277_v39 }
 0x2d0   : > { %4703 = vst [vmem:[%s6725_s28 + $0x90] sm:$0xff] %v4624_v6   ;;  %v3552_v15 = vmax.f32 %v2960_v32, %v3421_v33  ;;  %v3682_v3 = vmax.f32 %v3620_v25, 0.0  ;;  %v7279_v25 = vld [vmem:[#allocation44_spill] sm:$0xff] }
 0x2d1   : > { %v2834_v61 = vpop.f32.mrf.mxu0  ;;  %v3426_v20 = vpop.f32.mrf.mxu1 }
 0x2d2   : > { %v3621_v63 = vadd.f32 %v6706_v1, %v3552_v15  ;;  %v2961_v54 = vmax.f32 %v7266_v21, %v2834_v61  ;;  %v7280_v15 = vld [vmem:[#allocation45_spill] sm:$0xff] }
 0x2d3   : > { %v5250_v7 = vpop.f32.mrf.mxu0  ;;  %v5390_v22 = vpop.f32.mrf.mxu1  ;;  %v7281_v61 = vmax.f32 %v7279_v25, %v7280_v15 }
 0x2d4   : > { %v3683_v8 = vmax.f32 %v3621_v63, 0.0  ;;  %v3553_v40 = vmax.f32 %v2961_v54, %v3426_v20 }
 0x2d5   : > { %v2837_v41 = vpop.f32.mrf.mxu0  ;;  %v3429_v62 = vpop.f32.mrf.mxu1 }
 0x2d6   : > { %v4629_v18 = vpack.c.bf16 %v3683_v8, %v3682_v3  ;;  %v2962_v10 = vmax.f32 %v7269_v9, %v2837_v41  ;;  %v3622_v35 = vadd.f32 %v6706_v1, %v3553_v40  ;;  %v7282_v3 = vld [vmem:[#allocation46_spill] sm:$0xff]  ;;  %v7283_v8 = vld [vmem:[#allocation47_spill] sm:$0xff] }
 0x2d7   : > { %v5251_v26 = vpop.f32.mrf.mxu0  ;;  %v5391_v27 = vpop.f32.mrf.mxu1  ;;  %v7284_v40 = vmax.f32 %v7282_v3, %v7283_v8 }
 0x2d8   : > { %4704 = vst [vmem:[%s6725_s28 + $0x98] sm:$0xff] %v4629_v18   ;;  %v3554_v31 = vmax.f32 %v2962_v10, %v3429_v62  ;;  %v3684_v59 = vmax.f32 %v3622_v35, 0.0  ;;  %v7285_v35 = vld [vmem:[#allocation48_spill] sm:$0xff] }
 0x2d9   : > { %v2842_v12 = vpop.f32.mrf.mxu0  ;;  %v3434_v14 = vpop.f32.mrf.mxu1 }
 0x2da   : > { %v3623_v57 = vadd.f32 %v6706_v1, %v3554_v31  ;;  %v2963_v45 = vmax.f32 %v7272_v37, %v2842_v12  ;;  %v7286_v31 = vld [vmem:[#allocation49_spill] sm:$0xff] }
 0x2db   : > { %v5254_v46 = vpop.f32.mrf.mxu0  ;;  %v5394_v51 = vpop.f32.mrf.mxu1  ;;  %v7287_v12 = vmax.f32 %v7285_v35, %v7286_v31 }
 0x2dc   : > { %v3685_v29 = vmax.f32 %v3623_v57, 0.0  ;;  %v3555_v23 = vmax.f32 %v2963_v45, %v3434_v14 }
 0x2dd   : > { %v2845_v24 = vpop.f32.mrf.mxu0  ;;  %v3437_v4 = vpop.f32.mrf.mxu1 }
 0x2de   : > { %v4634_v5 = vpack.c.bf16 %v3685_v29, %v3684_v59  ;;  %v2964_v55 = vmax.f32 %v7275_v44, %v2845_v24  ;;  %v3624_v56 = vadd.f32 %v6706_v1, %v3555_v23  ;;  %v7288_v59 = vld [vmem:[#allocation50_spill] sm:$0xff]  ;;  %v7289_v29 = vld [vmem:[#allocation51_spill] sm:$0xff] }
 0x2df   : > { %v5255_v16 = vpop.f32.mrf.mxu0  ;;  %v5395_v17 = vpop.f32.mrf.mxu1  ;;  %v7290_v23 = vmax.f32 %v7288_v59, %v7289_v29 }
 0x2e0   : > { %4705 = vst [vmem:[%s6725_s28 + $0xa0] sm:$0xff] %v4634_v5   ;;  %v3556_v52 = vmax.f32 %v2964_v55, %v3437_v4  ;;  %v3686_v34 = vmax.f32 %v3624_v56, 0.0  ;;  %v7291_v56 = vld [vmem:[#allocation52_spill] sm:$0xff] }
 0x2e1   : > { %v2850_v53 = vpop.f32.mrf.mxu0  ;;  %v3442_v36 = vpop.f32.mrf.mxu1 }
 0x2e2   : > { %v3625_v38 = vadd.f32 %v6706_v1, %v3556_v52  ;;  %v2965_v49 = vmax.f32 %v7278_v58, %v2850_v53  ;;  %v7292_v52 = vld [vmem:[#allocation53_spill] sm:$0xff] }
 0x2e3   : > { %v5258_v33 = vpop.f32.mrf.mxu0  ;;  %v5398_v6 = vpop.f32.mrf.mxu1  ;;  %v7293_v53 = vmax.f32 %v7291_v56, %v7292_v52 }
 0x2e4   : > { %v3687_v50 = vmax.f32 %v3625_v38, 0.0  ;;  %v3557_v47 = vmax.f32 %v2965_v49, %v3442_v36 }
 0x2e5   : > { %v2853_v32 = vpop.f32.mrf.mxu0  ;;  %v3445_v2 = vpop.f32.mrf.mxu1 }
 0x2e6   : > { %v4639_v48 = vpack.c.bf16 %v3687_v50, %v3686_v34  ;;  %v2966_v20 = vmax.f32 %v7281_v61, %v2853_v32  ;;  %v3626_v60 = vadd.f32 %v6706_v1, %v3557_v47  ;;  %v7294_v34 = vld [vmem:[#allocation54_spill] sm:$0xff]  ;;  %v7295_v50 = vld [vmem:[#allocation55_spill] sm:$0xff] }
 0x2e7   : > { %v5259_v63 = vpop.f32.mrf.mxu0  ;;  %v5399_v0 = vpop.f32.mrf.mxu1  ;;  %v7296_v47 = vmax.f32 %v7294_v34, %v7295_v50 }
 0x2e8   : > { %4706 = vst [vmem:[%s6725_s28 + $0xa8] sm:$0xff] %v4639_v48   ;;  %v3558_v21 = vmax.f32 %v2966_v20, %v3445_v2  ;;  %v3688_v11 = vmax.f32 %v3626_v60, 0.0  ;;  %v7297_v60 = vld [vmem:[#allocation56_spill] sm:$0xff] }
 0x2e9   : > { %v2858_v54 = vpop.f32.mrf.mxu0  ;;  %v3450_v7 = vpop.f32.mrf.mxu1 }
 0x2ea   : > { %v3627_v22 = vadd.f32 %v6706_v1, %v3558_v21  ;;  %v2967_v41 = vmax.f32 %v7284_v40, %v2858_v54  ;;  %v7298_v21 = vld [vmem:[#allocation57_spill] sm:$0xff] }
 0x2eb   : > { %v5262_v62 = vpop.f32.mrf.mxu0  ;;  %v5402_v18 = vpop.f32.mrf.mxu1  ;;  %v7299_v54 = vmax.f32 %v7297_v60, %v7298_v21 }
 0x2ec   : > { %v3689_v19 = vmax.f32 %v3627_v22, 0.0  ;;  %v3559_v9 = vmax.f32 %v2967_v41, %v3450_v7 }
 0x2ed   : > { %v2861_v10 = vpop.f32.mrf.mxu0  ;;  %v3453_v26 = vpop.f32.mrf.mxu1 }
 0x2ee   : > { %v4644_v27 = vpack.c.bf16 %v3689_v19, %v3688_v11  ;;  %v2968_v14 = vmax.f32 %v7287_v12, %v2861_v10  ;;  %v3628_v28 = vadd.f32 %v6706_v1, %v3559_v9  ;;  %v7300_v11 = vld [vmem:[#allocation58_spill] sm:$0xff]  ;;  %v7301_v19 = vld [vmem:[#allocation59_spill] sm:$0xff] }
 0x2ef   : > { %v5263_v57 = vpop.f32.mrf.mxu0  ;;  %v5403_v42 = vpop.f32.mrf.mxu1  ;;  %v7302_v9 = vmax.f32 %v7300_v11, %v7301_v19 }
 0x2f0   : > { %4707 = vst [vmem:[%s6725_s28 + $0xb0] sm:$0xff] %v4644_v27   ;;  %v3560_v37 = vmax.f32 %v2968_v14, %v3453_v26  ;;  %v3690_v30 = vmax.f32 %v3628_v28, 0.0  ;;  %v7303_v28 = vld [vmem:[#allocation60_spill] sm:$0xff] }
 0x2f1   : > { %v2866_v45 = vpop.f32.mrf.mxu0  ;;  %v3458_v46 = vpop.f32.mrf.mxu1 }
 0x2f2   : > { %v3629_v51 = vadd.f32 %v6706_v1, %v3560_v37  ;;  %v2969_v24 = vmax.f32 %v7290_v23, %v2866_v45  ;;  %v7304_v37 = vld [vmem:[#allocation61_spill] sm:$0xff] }
 0x2f3   : > { %v5266_v4 = vpop.f32.mrf.mxu0  ;;  %v5406_v5 = vpop.f32.mrf.mxu1  ;;  %v7305_v45 = vmax.f32 %v7303_v28, %v7304_v37 }
 0x2f4   : > { %v3691_v43 = vmax.f32 %v3629_v51, 0.0  ;;  %v3561_v44 = vmax.f32 %v2969_v24, %v3458_v46  ;;  %v6986_v5 = vld [vmem:[%s7038_s2] ss:$0 sm:$0xff] }
 0x2f5   : > { %v2869_v55 = vpop.f32.mrf.mxu0  ;;  %v3461_v16 = vpop.f32.mrf.mxu1 }
 0x2f6   : > { %v4649_v17 = vpack.c.bf16 %v3691_v43, %v3690_v30  ;;  %v2970_v36 = vmax.f32 %v7293_v53, %v2869_v55  ;;  %v3630_v39 = vadd.f32 %v6706_v1, %v3561_v44  ;;  %v7306_v43 = vld [vmem:[#allocation62_spill] sm:$0xff]  ;;  %v7307_v44 = vld [vmem:[#allocation63_spill] sm:$0xff] }
 0x2f7   : > { %v5267_v38 = vpop.f32.mrf.mxu0  ;;  %v5407_v13 = vpop.f32.mrf.mxu1  ;;  %v7308_v55 = vmax.f32 %v7306_v43, %v7307_v44 }
 0x2f8   : > { %4708 = vst [vmem:[%s6725_s28 + $0xb8] sm:$0xff] %v4649_v17   ;;  %v3562_v58 = vmax.f32 %v2970_v36, %v3461_v16  ;;  %v3692_v25 = vmax.f32 %v3630_v39, 0.0  ;;  %v7309_v39 = vld [vmem:[#allocation64_spill] sm:$0xff] }
 0x2f9   : > { %v2874_v49 = vpop.f32.mrf.mxu0  ;;  %v3466_v33 = vpop.f32.mrf.mxu1 }
 0x2fa   : > { %v3631_v6 = vadd.f32 %v6706_v1, %v3562_v58  ;;  %v2971_v32 = vmax.f32 %v7296_v47, %v2874_v49  ;;  %v7310_v58 = vld [vmem:[#allocation65_spill] sm:$0xff] }
 0x2fb   : > { %v5270_v2 = vpop.f32.mrf.mxu0  ;;  %v5410_v48 = vpop.f32.mrf.mxu1  ;;  %v7311_v49 = vmax.f32 %v7309_v39, %v7310_v58 }
 0x2fc   : > { %v3693_v15 = vmax.f32 %v3631_v6, 0.0  ;;  %v3563_v61 = vmax.f32 %v2971_v32, %v3466_v33 }
 0x2fd   : > { %v2877_v20 = vpop.f32.mrf.mxu0  ;;  %v3469_v63 = vpop.f32.mrf.mxu1 }
 0x2fe   : > { %v4654_v0 = vpack.c.bf16 %v3693_v15, %v3692_v25  ;;  %v2972_v7 = vmax.f32 %v7299_v54, %v2877_v20  ;;  %v3632_v8 = vadd.f32 %v6706_v1, %v3563_v61  ;;  %v7312_v25 = vld [vmem:[#allocation66_spill] sm:$0xff]  ;;  %v7313_v15 = vld [vmem:[#allocation67_spill] sm:$0xff] }
 0x2ff   : > { %v5271_v22 = vpop.f32.mrf.mxu0  ;;  %v5411_v3 = vpop.f32.mrf.mxu1  ;;  %v7314_v61 = vmax.f32 %v7312_v25, %v7313_v15 }
 0x300   : > { %4709 = vst [vmem:[%s6725_s28 + $0xc0] sm:$0xff] %v4654_v0   ;;  %v3564_v40 = vmax.f32 %v2972_v7, %v3469_v63  ;;  %v3694_v35 = vmax.f32 %v3632_v8, 0.0  ;;  %v7315_v8 = vld [vmem:[#allocation68_spill] sm:$0xff] }
 0x301   : > { %v2882_v41 = vpop.f32.mrf.mxu0  ;;  %v3474_v62 = vpop.f32.mrf.mxu1 }
 0x302   : > { %v3633_v18 = vadd.f32 %v6706_v1, %v3564_v40  ;;  %v2973_v10 = vmax.f32 %v7302_v9, %v2882_v41  ;;  %v7316_v40 = vld [vmem:[#allocation69_spill] sm:$0xff] }
 0x303   : > { %v5274_v26 = vpop.f32.mrf.mxu0  ;;  %v5414_v27 = vpop.f32.mrf.mxu1  ;;  %v7317_v41 = vmax.f32 %v7315_v8, %v7316_v40 }
 0x304   : > { %v3695_v31 = vmax.f32 %v3633_v18, 0.0  ;;  %v3565_v12 = vmax.f32 %v2973_v10, %v3474_v62 }
 0x305   : > { %v2885_v14 = vpop.f32.mrf.mxu0  ;;  %v3477_v57 = vpop.f32.mrf.mxu1 }
 0x306   : > { %v4659_v42 = vpack.c.bf16 %v3695_v31, %v3694_v35  ;;  %v2974_v46 = vmax.f32 %v7305_v45, %v2885_v14  ;;  %v3634_v29 = vadd.f32 %v6706_v1, %v3565_v12  ;;  %v7318_v35 = vld [vmem:[#allocation70_spill] sm:$0xff]  ;;  %v7319_v31 = vld [vmem:[#allocation71_spill] sm:$0xff] }
 0x307   : > { %v5275_v51 = vpop.f32.mrf.mxu0  ;;  %v5415_v59 = vpop.f32.mrf.mxu1  ;;  %v7320_v12 = vmax.f32 %v7318_v35, %v7319_v31 }
 0x308   : > { %4710 = vst [vmem:[%s6725_s28 + $0xc8] sm:$0xff] %v4659_v42   ;;  %v3566_v23 = vmax.f32 %v2974_v46, %v3477_v57  ;;  %v3696_v52 = vmax.f32 %v3634_v29, 0.0  ;;  %v7321_v29 = vld [vmem:[#allocation72_spill] sm:$0xff] }
 0x309   : > { %v2890_v24 = vpop.f32.mrf.mxu0  ;;  %v3482_v4 = vpop.f32.mrf.mxu1 }
 0x30a   : > { %v3635_v30 = vadd.f32 %v6986_v5, %v3566_v23  ;;  %v2975_v16 = vmax.f32 %v7308_v55, %v2890_v24  ;;  %v7322_v23 = vld [vmem:[#allocation73_spill] sm:$0xff] }
 0x30b   : > { %v5278_v17 = vpop.f32.mrf.mxu0  ;;  %v5418_v56 = vpop.f32.mrf.mxu1  ;;  %v7323_v24 = vmax.f32 %v7321_v29, %v7322_v23 }
 0x30c   : > { %v3697_v53 = vmax.f32 %v3635_v30, 0.0  ;;  %v3567_v1 = vmax.f32 %v2975_v16, %v3482_v4 }
 0x30d   : > { %v2893_v36 = vpop.f32.mrf.mxu0  ;;  %v3485_v38 = vpop.f32.mrf.mxu1 }
 0x30e   : > { %v4664_v13 = vpack.c.bf16 %v3697_v53, %v3696_v52  ;;  %v2976_v33 = vmax.f32 %v7311_v49, %v2893_v36  ;;  %v3636_v50 = vadd.f32 %v6986_v5, %v3567_v1  ;;  %v7324_v52 = vld [vmem:[#allocation74_spill] sm:$0xff]  ;;  %v7325_v53 = vld [vmem:[#allocation75_spill] sm:$0xff] }
 0x30f   : > { %v5279_v6 = vpop.f32.mrf.mxu0  ;;  %v5419_v34 = vpop.f32.mrf.mxu1  ;;  %v7326_v1 = vmax.f32 %v7324_v52, %v7325_v53 }
 0x310   : > { %4711 = vst [vmem:[%s6725_s28 + $0xd0] sm:$0xff] %v4664_v13   ;;  %v3568_v47 = vmax.f32 %v2976_v33, %v3485_v38  ;;  %v3698_v60 = vmax.f32 %v3636_v50, 0.0  ;;  %v7327_v50 = vld [vmem:[#allocation76_spill] sm:$0xff] }
 0x311   : > { %v2898_v32 = vpop.f32.mrf.mxu0  ;;  %v3490_v2 = vpop.f32.mrf.mxu1 }
 0x312   : > { %v3637_v48 = vadd.f32 %v6986_v5, %v3568_v47  ;;  %v2977_v20 = vmax.f32 %v7314_v61, %v2898_v32  ;;  %v7328_v47 = vld [vmem:[#allocation77_spill] sm:$0xff] }
 0x313   : > { %v5282_v63 = vpop.f32.mrf.mxu0  ;;  %v5422_v0 = vpop.f32.mrf.mxu1  ;;  %v7329_v32 = vmax.f32 %v7327_v50, %v7328_v47 }
 0x314   : > { %v3699_v21 = vmax.f32 %v3637_v48, 0.0  ;;  %v3569_v54 = vmax.f32 %v2977_v20, %v3490_v2 }
 0x315   : > { %v2901_v7 = vpop.f32.mrf.mxu0  ;;  %v3493_v22 = vpop.f32.mrf.mxu1 }
 0x316   : > { %v4669_v3 = vpack.c.bf16 %v3699_v21, %v3698_v60  ;;  %v2978_v62 = vmax.f32 %v7317_v41, %v2901_v7  ;;  %v3638_v19 = vadd.f32 %v6986_v5, %v3569_v54 }
 0x317   : > { %v5283_v18 = vpop.f32.mrf.mxu0  ;;  %v5423_v11 = vpop.f32.mrf.mxu1 }
 0x318   : > { %4712 = vst [vmem:[%s6725_s28 + $0xd8] sm:$0xff] %v4669_v3   ;;  %v3570_v9 = vmax.f32 %v2978_v62, %v3493_v22  ;;  %v3700_v28 = vmax.f32 %v3638_v19, 0.0 }
 0x319   : > { %v2906_v10 = vpop.f32.mrf.mxu0  ;;  %v3498_v26 = vpop.f32.mrf.mxu1 }
 0x31a   : > { %v3639_v27 = vadd.f32 %v6986_v5, %v3570_v9  ;;  %v2979_v14 = vmax.f32 %v7320_v12, %v2906_v10 }
 0x31b   : > { %v5286_v57 = vpop.f32.mrf.mxu0  ;;  %v5426_v42 = vpop.f32.mrf.mxu1 }
 0x31c   : > { %v3701_v37 = vmax.f32 %v3639_v27, 0.0  ;;  %v3571_v45 = vmax.f32 %v2979_v14, %v3498_v26 }
 0x31d   : > { %v2909_v46 = vpop.f32.mrf.mxu0  ;;  %v3501_v51 = vpop.f32.mrf.mxu1 }
 0x31e   : > { %v4674_v59 = vpack.c.bf16 %v3701_v37, %v3700_v28  ;;  %v2980_v4 = vmax.f32 %v7323_v24, %v2909_v46  ;;  %v3640_v44 = vadd.f32 %v6986_v5, %v3571_v45 }
 0x31f   : > { %v5287_v30 = vpop.f32.mrf.mxu0  ;;  %v5427_v43 = vpop.f32.mrf.mxu1 }
 0x320   : > { %4713 = vst [vmem:[%s6725_s28 + $0xe0] sm:$0xff] %v4674_v59   ;;  %v3572_v55 = vmax.f32 %v2980_v4, %v3501_v51  ;;  %v3702_v39 = vmax.f32 %v3640_v44, 0.0 }
 0x321   : > { %v2914_v16 = vpop.f32.mrf.mxu0  ;;  %v3506_v17 = vpop.f32.mrf.mxu1 }
 0x322   : > { %v3641_v56 = vadd.f32 %v6986_v5, %v3572_v55  ;;  %v2981_v36 = vmax.f32 %v7326_v1, %v2914_v16 }
 0x323   : > { %v5290_v38 = vpop.f32.mrf.mxu0  ;;  %v5430_v13 = vpop.f32.mrf.mxu1 }
 0x324   : > { %v3703_v58 = vmax.f32 %v3641_v56, 0.0  ;;  %v3573_v49 = vmax.f32 %v2981_v36, %v3506_v17 }
 0x325   : > { %v2917_v33 = vpop.f32.mrf.mxu0  ;;  %v3509_v6 = vpop.f32.mrf.mxu1 }
 0x326   : > { %v4679_v34 = vpack.c.bf16 %v3703_v58, %v3702_v39  ;;  %v2982_v2 = vmax.f32 %v7329_v32, %v2917_v33  ;;  %v3642_v15 = vadd.f32 %v6986_v5, %v3573_v49 }
 0x327   : > { %v5291_v48 = vpop.f32.mrf.mxu0  ;;  %v5431_v25 = vpop.f32.mrf.mxu1 }
 0x328   : > { %4714 = vst [vmem:[%s6725_s28 + $0xe8] sm:$0xff] %v4679_v34   ;;  %v3574_v61 = vmax.f32 %v2982_v2, %v3509_v6  ;;  %v3704_v63 = vmax.f32 %v3642_v15, 0.0 }
 0x32a   : > { %v3643_v20 = vadd.f32 %v6986_v5, %v3574_v61 }
 0x32c   : > { %v3705_v0 = vmax.f32 %v3643_v20, 0.0 }
 0x32e   : > { %v4684_v60 = vpack.c.bf16 %v3705_v0, %v3704_v63 }
 0x330   : > { %4715 = vst [vmem:[%s6725_s28 + $0xf0] sm:$0xff] %v4684_v60  }
 0x331 PF: > { %p10_p9 = scmp.ge.s32.totalorder %s5656_s16, 4   ;;  %s7330_s12 = smov %s5611_s13 }
 0x332   : > { %s7331_s13 = smov %s5665_s19  ;;  %s7332_s14 = smov %s5656_s16 }
 0x333   :  { %12 = sbr.rel (!%p10_p9) target bundleno = 2 (0x2), region = 111 }

// kernel: dwg_keypoints_forward.5
= control target key start
LH: loop header
LB: loop body
LE: loop exit
PB: predicated region body
PF: predicated region fallthrough
CT: control target
= control target key end

     0   :  { %v4072_v0 = vmov 0.0   ;;  %vm4073_vm0 = vmmov 0   ;;  %s5342_s1 = inlined_call_operand.vmem [shape: bf16[384,128], index: 1, kind: input, shape index: {}]   ;;  %s5343_s0 = inlined_call_operand.vmem [shape: bf16[4,208,384], index: 0, kind: input, shape index: {}]   ;;  %s5344_s2 = inlined_call_operand.vmem [shape: f32[1,128], index: 2, kind: input, shape index: {}]   ;;  %s5345_s3 = inlined_call_operand.vmem [shape: bf16[208,128], index: 3, kind: output, shape index: {}]  }
   0x1   :  { %3543 = vmatprep.subr.bf16.mxu1 %v4072_v0  ;;  %v4098_v1 = vld [vmem:[%s5342_s1 + $0x78] sm:$0xff]   ;;  %3559 = vmatprep.mubr.msk.bf16.mxu1 %vm4073_vm0, %v4072_v0  ;;  %v4117_v4 = vld [vmem:[%s5342_s1 + $0x70] sm:$0xff]   ;;  %v4135_v7 = vld [vmem:[%s5342_s1 + $0x68] sm:$0xff]  }
   0x2   :  { %v4105_v2 = vld [vmem:[%s5342_s1 + $0xb8] sm:$0xff]   ;;  %3083 = vmatprep.subr.bf16.mxu0 %v4098_v1  ;;  %v4124_v5 = vld [vmem:[%s5342_s1 + $0xb0] sm:$0xff]   ;;  %v4141_v8 = vld [vmem:[%s5342_s1 + $0xa8] sm:$0xff]  }
   0x3   :  { %v4111_v3 = vld [vmem:[%s5342_s1 + $0x38] sm:$0xff]   ;;  %3544 = vmatpush3.bf16.msra.mxu1 %v4105_v2  ;;  %v4130_v6 = vld [vmem:[%s5342_s1 + $0x30] sm:$0xff]   ;;  %v4148_v9 = vld [vmem:[%s5342_s1 + $0x28] sm:$0xff]  }
   0x4   :  { %3084 = vmatpush3.bf16.msra.mxu0 %v4111_v3  ;;  %3545 = vmatprep.subr.bf16.mxu1 %v4072_v0  ;;  %v4154_v10 = vld [vmem:[%s5342_s1 + $0x60] sm:$0xff]   ;;  %v4173_v13 = vld [vmem:[%s5342_s1 + $0x58] sm:$0xff]   ;;  %v4192_v16 = vld [vmem:[%s5342_s1 + $0x50] sm:$0xff]  }
   0x5   :  { %3085 = vmatprep.subr.bf16.mxu0 %v4117_v4  ;;  %v4160_v11 = vld [vmem:[%s5342_s1 + $0xa0] sm:$0xff]   ;;  %v4179_v14 = vld [vmem:[%s5342_s1 + $0x98] sm:$0xff]   ;;  %v4198_v17 = vld [vmem:[%s5342_s1 + $0x90] sm:$0xff]  }
   0x6   :  { %v4167_v12 = vld [vmem:[%s5342_s1 + $0x20] sm:$0xff]   ;;  %v4186_v15 = vld [vmem:[%s5342_s1 + $0x18] sm:$0xff]   ;;  %v4205_v18 = vld [vmem:[%s5342_s1 + $0x10] sm:$0xff]  }
   0x7   :  { %3546 = vmatpush3.bf16.msra.mxu1 %v4124_v5  ;;  %v4211_v19 = vld [vmem:[%s5342_s1 + $0x48] sm:$0xff]   ;;  %v4229_v22 = vld [vmem:[%s5342_s1 + $0x40] sm:$0xff]   ;;  %v3852_v33 = vld [vmem:[%s5343_s0 + $0x30] ss:$12 sps:$4 sm:$0xff]  }
   0x8   :  { %3086 = vmatpush3.bf16.msra.mxu0 %v4130_v6  ;;  %3547 = vmatprep.subr.bf16.mxu1 %v4072_v0  ;;  %v4216_v20 = vld [vmem:[%s5342_s1 + $0x88] sm:$0xff]   ;;  %v3843_v23 = vld [vmem:[%s5343_s0 + $0x4] ss:$12 sps:$4 sm:$0xff]   ;;  %v3849_v31 = vld [vmem:[%s5343_s0 + $0x34] ss:$12 sps:$4 sm:$0xff]  }
   0x9   :  { %3087 = vmatprep.subr.bf16.mxu0 %v4135_v7  ;;  %v4222_v21 = vld [vmem:[%s5342_s1 + $0x8] sm:$0xff]   ;;  %v4239_v24 = vld [vmem:[%s5342_s1 + $0x80] sm:$0xff]   ;;  %499 = vmatprep.mubr.bf16.mxu0 %v3843_v23  ;;  %v3855_v35 = vld [vmem:[%s5343_s0 + $0x50] ss:$12 sps:$4 sm:$0xff]  }
   0xa   :  { %v4246_v25 = vld [vmem:[%s5342_s1] sm:$0xff]   ;;  %v3844_v26 = vld [vmem:[%s5343_s0 + $0x8] ss:$12 sps:$4 sm:$0xff]   ;;  %v3853_v34 = vld [vmem:[%s5343_s0 + $0x4c] ss:$12 sps:$4 sm:$0xff]  }
   0xb   :  { %3548 = vmatpush3.bf16.msra.mxu1 %v4141_v8  ;;  %v3841_v27 = vld [vmem:[%s5343_s0] ss:$12 sps:$4 sm:$0xff]   ;;  %v3845_v28 = vld [vmem:[%s5343_s0 + $0x1c] ss:$12 sps:$4 sm:$0xff]   ;;  %v3848_v30 = vld [vmem:[%s5343_s0 + $0x18] ss:$12 sps:$4 sm:$0xff]  }
   0xc   :  { %3088 = vmatpush3.bf16.msra.mxu0 %v4148_v9  ;;  %3549 = vmatprep.subr.bf16.mxu1 %v4072_v0  ;;  %v3847_v29 = vld [vmem:[%s5343_s0 + $0x20] ss:$12 sps:$4 sm:$0xff]   ;;  %v3851_v32 = vld [vmem:[%s5343_s0 + $0x38] ss:$12 sps:$4 sm:$0xff]   ;;  %v3856_v36 = vld [vmem:[%s5343_s0 + $0x48] ss:$12 sps:$4 sm:$0xff]  }
   0xd   :  { %3089 = vmatprep.subr.bf16.mxu0 %v4154_v10  ;;  %v3857_v37 = vld [vmem:[%s5343_s0 + $0x64] ss:$12 sps:$4 sm:$0xff]   ;;  %v3859_v38 = vld [vmem:[%s5343_s0 + $0x68] ss:$12 sps:$4 sm:$0xff]   ;;  %v3860_v39 = vld [vmem:[%s5343_s0 + $0x60] ss:$12 sps:$4 sm:$0xff]  }
   0xe   :  { %v3861_v40 = vld [vmem:[%s5343_s0 + $0x7c] ss:$12 sps:$4 sm:$0xff]   ;;  %v3863_v41 = vld [vmem:[%s5343_s0 + $0x80] ss:$12 sps:$4 sm:$0xff]   ;;  %v3864_v42 = vld [vmem:[%s5343_s0 + $0x78] ss:$12 sps:$4 sm:$0xff]  }
   0xf   :  { %3550 = vmatpush3.bf16.msra.mxu1 %v4160_v11  ;;  %v3865_v43 = vld [vmem:[%s5343_s0 + $0x94] ss:$12 sps:$4 sm:$0xff]   ;;  %v3867_v44 = vld [vmem:[%s5343_s0 + $0x98] ss:$12 sps:$4 sm:$0xff]   ;;  %v3868_v45 = vld [vmem:[%s5343_s0 + $0x90] ss:$12 sps:$4 sm:$0xff]  }
  0x10   :  { %3090 = vmatpush3.bf16.msra.mxu0 %v4167_v12  ;;  %3551 = vmatprep.subr.bf16.mxu1 %v4072_v0  ;;  %v3869_v46 = vld [vmem:[%s5343_s0 + $0xac] ss:$12 sps:$4 sm:$0xff]   ;;  %v3871_v47 = vld [vmem:[%s5343_s0 + $0xb0] ss:$12 sps:$4 sm:$0xff]   ;;  %v3872_v48 = vld [vmem:[%s5343_s0 + $0xa8] ss:$12 sps:$4 sm:$0xff]  }
  0x11   :  { %3091 = vmatprep.subr.bf16.mxu0 %v4173_v13  ;;  %v3873_v49 = vld [vmem:[%s5343_s0 + $0xc4] ss:$12 sps:$4 sm:$0xff]   ;;  %v3875_v50 = vld [vmem:[%s5343_s0 + $0xc8] ss:$12 sps:$4 sm:$0xff]   ;;  %v3876_v51 = vld [vmem:[%s5343_s0 + $0xc0] ss:$12 sps:$4 sm:$0xff]  }
  0x12   :  { %v3877_v52 = vld [vmem:[%s5343_s0 + $0xdc] ss:$12 sps:$4 sm:$0xff]   ;;  %v3879_v53 = vld [vmem:[%s5343_s0 + $0xe0] ss:$12 sps:$4 sm:$0xff]   ;;  %v3880_v54 = vld [vmem:[%s5343_s0 + $0xd8] ss:$12 sps:$4 sm:$0xff]  }
  0x13   :  { %3552 = vmatpush3.bf16.msra.mxu1 %v4179_v14  ;;  %v3881_v55 = vld [vmem:[%s5343_s0 + $0xf4] ss:$12 sps:$4 sm:$0xff]   ;;  %v3883_v56 = vld [vmem:[%s5343_s0 + $0xf8] ss:$12 sps:$4 sm:$0xff]   ;;  %v3884_v57 = vld [vmem:[%s5343_s0 + $0xf0] ss:$12 sps:$4 sm:$0xff]  }
  0x14   :  { %3092 = vmatpush3.bf16.msra.mxu0 %v4186_v15  ;;  %3553 = vmatprep.subr.bf16.mxu1 %v4072_v0  ;;  %v3885_v58 = vld [vmem:[%s5343_s0 + $0x10c] ss:$12 sps:$4 sm:$0xff]   ;;  %v3887_v59 = vld [vmem:[%s5343_s0 + $0x110] ss:$12 sps:$4 sm:$0xff]   ;;  %v3888_v60 = vld [vmem:[%s5343_s0 + $0x108] ss:$12 sps:$4 sm:$0xff]  }
  0x15   :  { %3093 = vmatprep.subr.bf16.mxu0 %v4192_v16  ;;  %v3889_v61 = vld [vmem:[%s5343_s0 + $0x124] ss:$12 sps:$4 sm:$0xff]   ;;  %v3891_v62 = vld [vmem:[%s5343_s0 + $0x128] ss:$12 sps:$4 sm:$0xff]   ;;  %v3892_v63 = vld [vmem:[%s5343_s0 + $0x120] ss:$12 sps:$4 sm:$0xff]  }
  0x16   :  { %v3895_v23 = vld [vmem:[%s5343_s0 + $0x13c] ss:$12 sps:$4 sm:$0xff]  }
  0x17   :  { %3554 = vmatpush3.bf16.msra.mxu1 %v4198_v17 }
  0x18   :  { %3094 = vmatpush3.bf16.msra.mxu0 %v4205_v18  ;;  %3555 = vmatprep.subr.bf16.mxu1 %v4072_v0 }
  0x19   :  { %3095 = vmatprep.subr.bf16.mxu0 %v4211_v19 }
  0x1b   :  { %3556 = vmatpush3.bf16.msra.mxu1 %v4216_v20 }
  0x1c   :  { %3096 = vmatpush3.bf16.msra.mxu0 %v4222_v21  ;;  %3557 = vmatprep.subr.bf16.mxu1 %v4072_v0 }
  0x1d   :  { %3097 = vmatprep.subr.bf16.mxu0 %v4229_v22 }
  0x1f   :  { %3558 = vmatpush3.bf16.msra.mxu1 %v4239_v24 }
  0x20   :  { %3098 = vmatpush3.bf16.msra.mxu0 %v4246_v25  ;;  %3611 = vmatprep.subr.bf16.mxu1 %v4072_v0 }
  0x21   :  { %3198 = vmatprep.subr.bf16.mxu0 %v4098_v1 }
  0x22   :  { %3560 = vmatmul.mubr.bf16.vlgmr.msra.gmra.mxu1 %v3844_v26  ;;  %v3896_v26 = vld [vmem:[%s5343_s0 + $0x140] ss:$12 sps:$4 sm:$0xff]  }
  0x23   :  { %500 = vmatmul.mubr.bf16.vlgmr.msra.gmra.mxu0 %v3841_v27  ;;  %3612 = vmatpush3.bf16.msra.mxu1 %v4105_v2  ;;  %v3893_v27 = vld [vmem:[%s5343_s0 + $0x138] ss:$12 sps:$4 sm:$0xff]  }
  0x24   :  { %3199 = vmatpush3.bf16.msra.mxu0 %v4111_v3  ;;  %3563 = vmatprep.mubr.msk.bf16.mxu1 %vm4073_vm0, %v4072_v0 }
  0x25   :  { %507 = vmatprep.mubr.bf16.mxu0 %v3845_v28  ;;  %3200 = vmatprep.subr.bf16.mxu0 %v4117_v4  ;;  %v3897_v28 = vld [vmem:[%s5343_s0 + $0x154] ss:$12 sps:$4 sm:$0xff]  }
  0x26   :  { %3613 = vmatprep.subr.bf16.mxu1 %v4072_v0 }
  0x27   :  { %3614 = vmatpush3.bf16.msra.mxu1 %v4124_v5 }
  0x28   :  { %3201 = vmatpush3.bf16.msra.mxu0 %v4130_v6  ;;  %3615 = vmatprep.subr.bf16.mxu1 %v4072_v0 }
  0x29   :  { %3202 = vmatprep.subr.bf16.mxu0 %v4135_v7 }
  0x2a   :  { %3564 = vmatmul.mubr.bf16.gmra.mxu1 %v3847_v29  ;;  %v3899_v29 = vld [vmem:[%s5343_s0 + $0x158] ss:$12 sps:$4 sm:$0xff]  }
  0x2b   :  { %508 = vmatmul.mubr.bf16.gmra.mxu0 %v3848_v30  ;;  %3567 = vmatprep.mubr.msk.bf16.mxu1 %vm4073_vm0, %v4072_v0  ;;  %v3900_v30 = vld [vmem:[%s5343_s0 + $0x150] ss:$12 sps:$4 sm:$0xff]  }
  0x2c   :  { %515 = vmatprep.mubr.bf16.mxu0 %v3849_v31  ;;  %3203 = vmatpush3.bf16.msra.mxu0 %v4148_v9  ;;  %v3933_v31 = vld [vmem:[%s5343_s0 + $0x22c] ss:$12 sps:$4 sm:$0xff]  }
  0x2d   :  { %3616 = vmatpush3.bf16.msra.mxu1 %v4141_v8  ;;  %3204 = vmatprep.subr.bf16.mxu0 %v4154_v10 }
  0x2e   :  { %3617 = vmatprep.subr.bf16.mxu1 %v4072_v0 }
  0x30   :  { %3205 = vmatpush3.bf16.msra.mxu0 %v4167_v12 }
  0x31   :  { %3618 = vmatpush3.bf16.msra.mxu1 %v4160_v11  ;;  %3206 = vmatprep.subr.bf16.mxu0 %v4173_v13 }
  0x32   :  { %3568 = vmatmul.mubr.bf16.gmra.mxu1 %v3851_v32  ;;  %3619 = vmatprep.subr.bf16.mxu1 %v4072_v0  ;;  %v3935_v32 = vld [vmem:[%s5343_s0 + $0x230] ss:$12 sps:$4 sm:$0xff]  }
  0x33   :  { %516 = vmatmul.mubr.bf16.gmra.mxu0 %v3852_v33  ;;  %3571 = vmatprep.mubr.msk.bf16.mxu1 %vm4073_vm0, %v4072_v0  ;;  %v3936_v33 = vld [vmem:[%s5343_s0 + $0x228] ss:$12 sps:$4 sm:$0xff]  }
  0x34   :  { %523 = vmatprep.mubr.bf16.mxu0 %v3853_v34  ;;  %3207 = vmatpush3.bf16.msra.mxu0 %v4186_v15  ;;  %v3937_v34 = vld [vmem:[%s5343_s0 + $0x244] ss:$12 sps:$4 sm:$0xff]  }
  0x35   :  { %3620 = vmatpush3.bf16.msra.mxu1 %v4179_v14  ;;  %3208 = vmatprep.subr.bf16.mxu0 %v4192_v16 }
  0x36   :  { %3621 = vmatprep.subr.bf16.mxu1 %v4072_v0 }
  0x38   :  { %3209 = vmatpush3.bf16.msra.mxu0 %v4205_v18 }
  0x39   :  { %3622 = vmatpush3.bf16.msra.mxu1 %v4198_v17  ;;  %3210 = vmatprep.subr.bf16.mxu0 %v4211_v19 }
  0x3a   :  { %3572 = vmatmul.mubr.bf16.gmra.mxu1 %v3855_v35  ;;  %3623 = vmatprep.subr.bf16.mxu1 %v4072_v0  ;;  %v3939_v35 = vld [vmem:[%s5343_s0 + $0x248] ss:$12 sps:$4 sm:$0xff]  }
  0x3b   :  { %524 = vmatmul.mubr.bf16.gmra.mxu0 %v3856_v36  ;;  %3575 = vmatprep.mubr.msk.bf16.mxu1 %vm4073_vm0, %v4072_v0  ;;  %v3940_v36 = vld [vmem:[%s5343_s0 + $0x240] ss:$12 sps:$4 sm:$0xff]  }
  0x3c   :  { %531 = vmatprep.mubr.bf16.mxu0 %v3857_v37  ;;  %3211 = vmatpush3.bf16.msra.mxu0 %v4222_v21  ;;  %v3941_v37 = vld [vmem:[%s5343_s0 + $0x25c] ss:$12 sps:$4 sm:$0xff]  }
  0x3d   :  { %3624 = vmatpush3.bf16.msra.mxu1 %v4216_v20  ;;  %3212 = vmatprep.subr.bf16.mxu0 %v4229_v22 }
  0x3e   :  { %3625 = vmatprep.subr.bf16.mxu1 %v4072_v0 }
  0x40   :  { %3213 = vmatpush3.bf16.msra.mxu0 %v4246_v25 }
  0x41   :  { %3626 = vmatpush3.bf16.msra.mxu1 %v4239_v24  ;;  %3313 = vmatprep.subr.bf16.mxu0 %v4098_v1 }
  0x42   :  { %3576 = vmatmul.mubr.bf16.gmra.mxu1 %v3859_v38  ;;  %3679 = vmatprep.subr.bf16.mxu1 %v4072_v0 }
  0x43   :  { %532 = vmatmul.mubr.bf16.gmra.mxu0 %v3860_v39  ;;  %3579 = vmatprep.mubr.msk.bf16.mxu1 %vm4073_vm0, %v4072_v0 }
  0x44   :  { %539 = vmatprep.mubr.bf16.mxu0 %v3861_v40 }
  0x4a   :  { %3580 = vmatmul.mubr.bf16.gmra.mxu1 %v3863_v41 }
  0x4b   :  { %540 = vmatmul.mubr.bf16.gmra.mxu0 %v3864_v42  ;;  %3583 = vmatprep.mubr.msk.bf16.mxu1 %vm4073_vm0, %v4072_v0 }
  0x4c   :  { %547 = vmatprep.mubr.bf16.mxu0 %v3865_v43 }
  0x52   :  { %3584 = vmatmul.mubr.bf16.gmra.mxu1 %v3867_v44  ;;  %v3943_v44 = vld [vmem:[%s5343_s0 + $0x260] ss:$12 sps:$4 sm:$0xff]  }
  0x53   :  { %548 = vmatmul.mubr.bf16.gmra.mxu0 %v3868_v45  ;;  %3587 = vmatprep.mubr.msk.bf16.mxu1 %vm4073_vm0, %v4072_v0 }
  0x54   :  { %555 = vmatprep.mubr.bf16.mxu0 %v3869_v46  ;;  %v3944_v46 = vld [vmem:[%s5343_s0 + $0x258] ss:$12 sps:$4 sm:$0xff]  }
  0x5a   :  { %3588 = vmatmul.mubr.bf16.gmra.mxu1 %v3871_v47 }
  0x5b   :  { %556 = vmatmul.mubr.bf16.gmra.mxu0 %v3872_v48  ;;  %3591 = vmatprep.mubr.msk.bf16.mxu1 %vm4073_vm0, %v4072_v0 }
  0x5c   :  { %563 = vmatprep.mubr.bf16.mxu0 %v3873_v49  ;;  %v3947_v49 = vld [vmem:[%s5343_s0 + $0x274] ss:$12 sps:$4 sm:$0xff]  }
  0x62   :  { %3592 = vmatmul.mubr.bf16.gmra.mxu1 %v3875_v50 }
  0x63   :  { %564 = vmatmul.mubr.bf16.gmra.mxu0 %v3876_v51  ;;  %3595 = vmatprep.mubr.msk.bf16.mxu1 %vm4073_vm0, %v4072_v0 }
  0x64   :  { %571 = vmatprep.mubr.bf16.mxu0 %v3877_v52 }
  0x6a   :  { %3596 = vmatmul.mubr.bf16.gmra.mxu1 %v3879_v53 }
  0x6b   :  { %572 = vmatmul.mubr.bf16.gmra.mxu0 %v3880_v54  ;;  %3599 = vmatprep.mubr.msk.bf16.mxu1 %vm4073_vm0, %v4072_v0 }
  0x6c   :  { %579 = vmatprep.mubr.bf16.mxu0 %v3881_v55 }
  0x72   :  { %3600 = vmatmul.mubr.bf16.gmra.mxu1 %v3883_v56 }
  0x73   :  { %580 = vmatmul.mubr.bf16.gmra.mxu0 %v3884_v57  ;;  %3603 = vmatprep.mubr.msk.bf16.mxu1 %vm4073_vm0, %v4072_v0 }
  0x74   :  { %587 = vmatprep.mubr.bf16.mxu0 %v3885_v58 }
  0x7a   :  { %3604 = vmatmul.mubr.bf16.gmra.mxu1 %v3887_v59  ;;  %v3948_v59 = vld [vmem:[%s5343_s0 + $0x278] ss:$12 sps:$4 sm:$0xff]  }
  0x7b   :  { %588 = vmatmul.mubr.bf16.gmra.mxu0 %v3888_v60  ;;  %3607 = vmatprep.mubr.msk.bf16.mxu1 %vm4073_vm0, %v4072_v0 }
  0x7c   :  { %595 = vmatprep.mubr.bf16.mxu0 %v3889_v61  ;;  %v3945_v61 = vld [vmem:[%s5343_s0 + $0x270] ss:$12 sps:$4 sm:$0xff]  }
  0x82   :  { %3608 = vmatmul.mubr.bf16.gmra.mxu1 %v3891_v62 }
  0x83   :  { %596 = vmatmul.mubr.bf16.gmra.mxu0 %v3892_v63  ;;  %3627 = vmatprep.mubr.msk.bf16.mxu1 %vm4073_vm0, %v4072_v0 }
  0x84   :  { %1034 = vmatprep.mubr.bf16.mxu0 %v3895_v23 }
  0x8a   :  { %3628 = vmatmul.mubr.bf16.vlgmr.msra.gmra.mxu1 %v3896_v26  ;;  %v3949_v26 = vld [vmem:[%s5343_s0 + $0x28c] ss:$12 sps:$4 sm:$0xff]  }
  0x8b   :  { %1035 = vmatmul.mubr.bf16.vlgmr.msra.gmra.mxu0 %v3893_v27  ;;  %3680 = vmatpush3.bf16.msra.mxu1 %v4105_v2  ;;  %v3901_v2 = vld [vmem:[%s5343_s0 + $0x16c] ss:$12 sps:$4 sm:$0xff]  }
  0x8c   :  { %3314 = vmatpush3.bf16.msra.mxu0 %v4111_v3  ;;  %3631 = vmatprep.mubr.msk.bf16.mxu1 %vm4073_vm0, %v4072_v0  ;;  %v3903_v3 = vld [vmem:[%s5343_s0 + $0x170] ss:$12 sps:$4 sm:$0xff]  }
  0x8d   :  { %1042 = vmatprep.mubr.bf16.mxu0 %v3897_v28  ;;  %3315 = vmatprep.subr.bf16.mxu0 %v4117_v4  ;;  %v3904_v4 = vld [vmem:[%s5343_s0 + $0x168] ss:$12 sps:$4 sm:$0xff]  }
  0x8e   :  { %3681 = vmatprep.subr.bf16.mxu1 %v4072_v0 }
  0x8f   :  { %3682 = vmatpush3.bf16.msra.mxu1 %v4124_v5  ;;  %v3905_v5 = vld [vmem:[%s5343_s0 + $0x184] ss:$12 sps:$4 sm:$0xff]  }
  0x90   :  { %3316 = vmatpush3.bf16.msra.mxu0 %v4130_v6  ;;  %3683 = vmatprep.subr.bf16.mxu1 %v4072_v0  ;;  %v3907_v6 = vld [vmem:[%s5343_s0 + $0x188] ss:$12 sps:$4 sm:$0xff]  }
  0x91   :  { %3317 = vmatprep.subr.bf16.mxu0 %v4135_v7  ;;  %v3908_v7 = vld [vmem:[%s5343_s0 + $0x180] ss:$12 sps:$4 sm:$0xff]  }
  0x92   :  { %3632 = vmatmul.mubr.bf16.gmra.mxu1 %v3899_v29 }
  0x93   :  { %1043 = vmatmul.mubr.bf16.gmra.mxu0 %v3900_v30  ;;  %3635 = vmatprep.mubr.msk.bf16.mxu1 %vm4073_vm0, %v4072_v0  ;;  %v4049_v30 = vld [vmem:[%s5342_s1 + $0xb8] sm:$0xff]  }
  0x94   :  { %1050 = vmatprep.mubr.bf16.mxu0 %v3901_v2  ;;  %3318 = vmatpush3.bf16.msra.mxu0 %v4148_v9  ;;  %v3911_v9 = vld [vmem:[%s5343_s0 + $0x1a0] ss:$12 sps:$4 sm:$0xff]  }
  0x95   :  { %3684 = vmatpush3.bf16.msra.mxu1 %v4141_v8  ;;  %3319 = vmatprep.subr.bf16.mxu0 %v4154_v10  ;;  %v3909_v8 = vld [vmem:[%s5343_s0 + $0x19c] ss:$12 sps:$4 sm:$0xff]   ;;  %v3912_v10 = vld [vmem:[%s5343_s0 + $0x198] ss:$12 sps:$4 sm:$0xff]  }
  0x96   :  { %3685 = vmatprep.subr.bf16.mxu1 %v4072_v0 }
  0x98   :  { %3320 = vmatpush3.bf16.msra.mxu0 %v4167_v12  ;;  %v3915_v12 = vld [vmem:[%s5343_s0 + $0x1b8] ss:$12 sps:$4 sm:$0xff]  }
  0x99   :  { %3686 = vmatpush3.bf16.msra.mxu1 %v4160_v11  ;;  %3321 = vmatprep.subr.bf16.mxu0 %v4173_v13  ;;  %v3913_v11 = vld [vmem:[%s5343_s0 + $0x1b4] ss:$12 sps:$4 sm:$0xff]   ;;  %v3916_v13 = vld [vmem:[%s5343_s0 + $0x1b0] ss:$12 sps:$4 sm:$0xff]  }
  0x9a   :  { %3636 = vmatmul.mubr.bf16.gmra.mxu1 %v3903_v3  ;;  %3687 = vmatprep.subr.bf16.mxu1 %v4072_v0 }
  0x9b   :  { %1051 = vmatmul.mubr.bf16.gmra.mxu0 %v3904_v4  ;;  %3639 = vmatprep.mubr.msk.bf16.mxu1 %vm4073_vm0, %v4072_v0  ;;  %v4050_v4 = vld [vmem:[%s5342_s1 + $0x38] sm:$0xff]  }
  0x9c   :  { %1058 = vmatprep.mubr.bf16.mxu0 %v3905_v5  ;;  %3322 = vmatpush3.bf16.msra.mxu0 %v4186_v15  ;;  %v3920_v15 = vld [vmem:[%s5343_s0 + $0x1c8] ss:$12 sps:$4 sm:$0xff]  }
  0x9d   :  { %3688 = vmatpush3.bf16.msra.mxu1 %v4179_v14  ;;  %3323 = vmatprep.subr.bf16.mxu0 %v4192_v16  ;;  %v3919_v14 = vld [vmem:[%s5343_s0 + $0x1d0] ss:$12 sps:$4 sm:$0xff]  }
  0x9e   :  { %3689 = vmatprep.subr.bf16.mxu1 %v4072_v0  ;;  %v3921_v16 = vld [vmem:[%s5343_s0 + $0x1e4] ss:$12 sps:$4 sm:$0xff]  }
  0xa0   :  { %3324 = vmatpush3.bf16.msra.mxu0 %v4205_v18  ;;  %v3924_v18 = vld [vmem:[%s5343_s0 + $0x1e0] ss:$12 sps:$4 sm:$0xff]  }
  0xa1   :  { %3690 = vmatpush3.bf16.msra.mxu1 %v4198_v17  ;;  %3325 = vmatprep.subr.bf16.mxu0 %v4211_v19  ;;  %v3923_v17 = vld [vmem:[%s5343_s0 + $0x1e8] ss:$12 sps:$4 sm:$0xff]  }
  0xa2   :  { %3640 = vmatmul.mubr.bf16.gmra.mxu1 %v3907_v6  ;;  %3691 = vmatprep.subr.bf16.mxu1 %v4072_v0  ;;  %v3925_v19 = vld [vmem:[%s5343_s0 + $0x1fc] ss:$12 sps:$4 sm:$0xff]   ;;  %v4051_v6 = vld [vmem:[%s5342_s1 + $0x70] sm:$0xff]  }
  0xa3   :  { %1059 = vmatmul.mubr.bf16.gmra.mxu0 %v3908_v7  ;;  %3643 = vmatprep.mubr.msk.bf16.mxu1 %vm4073_vm0, %v4072_v0 }
  0xa4   :  { %1066 = vmatprep.mubr.bf16.mxu0 %v3909_v8  ;;  %3326 = vmatpush3.bf16.msra.mxu0 %v4222_v21  ;;  %v3928_v21 = vld [vmem:[%s5343_s0 + $0x1f8] ss:$12 sps:$4 sm:$0xff]  }
  0xa5   :  { %3692 = vmatpush3.bf16.msra.mxu1 %v4216_v20  ;;  %3327 = vmatprep.subr.bf16.mxu0 %v4229_v22  ;;  %v3927_v20 = vld [vmem:[%s5343_s0 + $0x200] ss:$12 sps:$4 sm:$0xff]  }
  0xa6   :  { %3693 = vmatprep.subr.bf16.mxu1 %v4072_v0  ;;  %v3929_v22 = vld [vmem:[%s5343_s0 + $0x214] ss:$12 sps:$4 sm:$0xff]  }
  0xa8   :  { %3328 = vmatpush3.bf16.msra.mxu0 %v4246_v25  ;;  %v3932_v25 = vld [vmem:[%s5343_s0 + $0x210] ss:$12 sps:$4 sm:$0xff]  }
  0xa9   :  { %3694 = vmatpush3.bf16.msra.mxu1 %v4239_v24  ;;  %3428 = vmatprep.subr.bf16.mxu0 %v4098_v1  ;;  %v3917_v1 = vld [vmem:[%s5343_s0 + $0x1cc] ss:$12 sps:$4 sm:$0xff]  }
  0xaa   :  { %3644 = vmatmul.mubr.bf16.gmra.mxu1 %v3911_v9  ;;  %3747 = vmatprep.subr.bf16.mxu1 %v4072_v0  ;;  %v3931_v24 = vld [vmem:[%s5343_s0 + $0x218] ss:$12 sps:$4 sm:$0xff]   ;;  %v3951_v9 = vld [vmem:[%s5343_s0 + $0x290] ss:$12 sps:$4 sm:$0xff]  }
  0xab   :  { %1067 = vmatmul.mubr.bf16.gmra.mxu0 %v3912_v10  ;;  %3647 = vmatprep.mubr.msk.bf16.mxu1 %vm4073_vm0, %v4072_v0 }
  0xac   :  { %1074 = vmatprep.mubr.bf16.mxu0 %v3913_v11  ;;  %v3952_v11 = vld [vmem:[%s5343_s0 + $0x288] ss:$12 sps:$4 sm:$0xff]  }
  0xb2   :  { %3648 = vmatmul.mubr.bf16.gmra.mxu1 %v3915_v12  ;;  %v4052_v12 = vld [vmem:[%s5342_s1 + $0xb0] sm:$0xff]  }
  0xb3   :  { %1075 = vmatmul.mubr.bf16.gmra.mxu0 %v3916_v13  ;;  %3651 = vmatprep.mubr.msk.bf16.mxu1 %vm4073_vm0, %v4072_v0 }
  0xb4   :  { %1082 = vmatprep.mubr.bf16.mxu0 %v3917_v1 }
  0xba   :  { %3652 = vmatmul.mubr.bf16.gmra.mxu1 %v3919_v14  ;;  %v4053_v14 = vld [vmem:[%s5342_s1 + $0x30] sm:$0xff]  }
  0xbb   :  { %1083 = vmatmul.mubr.bf16.gmra.mxu0 %v3920_v15  ;;  %3655 = vmatprep.mubr.msk.bf16.mxu1 %vm4073_vm0, %v4072_v0  ;;  %v3955_v15 = vld [vmem:[%s5343_s0 + $0x2a4] ss:$12 sps:$4 sm:$0xff]  }
  0xbc   :  { %1090 = vmatprep.mubr.bf16.mxu0 %v3921_v16 }
  0xc2   :  { %3656 = vmatmul.mubr.bf16.gmra.mxu1 %v3923_v17  ;;  %v4054_v17 = vld [vmem:[%s5342_s1 + $0x68] sm:$0xff]  }
  0xc3   :  { %1091 = vmatmul.mubr.bf16.gmra.mxu0 %v3924_v18  ;;  %3659 = vmatprep.mubr.msk.bf16.mxu1 %vm4073_vm0, %v4072_v0 }
  0xc4   :  { %1098 = vmatprep.mubr.bf16.mxu0 %v3925_v19 }
  0xca   :  { %3660 = vmatmul.mubr.bf16.gmra.mxu1 %v3927_v20 }
  0xcb   :  { %1099 = vmatmul.mubr.bf16.gmra.mxu0 %v3928_v21  ;;  %3663 = vmatprep.mubr.msk.bf16.mxu1 %vm4073_vm0, %v4072_v0 }
  0xcc   :  { %1106 = vmatprep.mubr.bf16.mxu0 %v3929_v22 }
  0xd2   :  { %3664 = vmatmul.mubr.bf16.gmra.mxu1 %v3931_v24  ;;  %v4055_v24 = vld [vmem:[%s5342_s1 + $0x28] sm:$0xff]  }
  0xd3   :  { %1107 = vmatmul.mubr.bf16.gmra.mxu0 %v3932_v25  ;;  %3667 = vmatprep.mubr.msk.bf16.mxu1 %vm4073_vm0, %v4072_v0 }
  0xd4   :  { %1114 = vmatprep.mubr.bf16.mxu0 %v3933_v31  ;;  %v4056_v31 = vld [vmem:[%s5342_s1 + $0xa8] sm:$0xff]  }
  0xda   :  { %3668 = vmatmul.mubr.bf16.gmra.mxu1 %v3935_v32  ;;  %v4057_v32 = vld [vmem:[%s5342_s1 + $0x60] sm:$0xff]  }
  0xdb   :  { %1115 = vmatmul.mubr.bf16.gmra.mxu0 %v3936_v33  ;;  %3671 = vmatprep.mubr.msk.bf16.mxu1 %vm4073_vm0, %v4072_v0 }
  0xdc   :  { %1122 = vmatprep.mubr.bf16.mxu0 %v3937_v34 }
  0xe2   :  { %v638_v38 = vpop.f32.mrf.mxu1  ;;  %3672 = vmatmul.mubr.bf16.gmra.mxu1 %v3939_v35  ;;  %v3956_v35 = vld [vmem:[%s5343_s0 + $0x2a8] ss:$12 sps:$4 sm:$0xff]  }
  0xe3   :  { %v3099_v39 = vpop.f32.mrf.mxu0  ;;  %1123 = vmatmul.mubr.bf16.gmra.mxu0 %v3940_v36  ;;  %3675 = vmatprep.mubr.msk.bf16.mxu1 %vm4073_vm0, %v4072_v0 }
  0xe4   :  { %v3561_v40 = vpop.f32.mrf.mxu1  ;;  %1130 = vmatprep.mubr.bf16.mxu0 %v3941_v37  ;;  %v3953_v37 = vld [vmem:[%s5343_s0 + $0x2a0] ss:$12 sps:$4 sm:$0xff]  }
  0xe5   :  { %v3100_v41 = vpop.f32.mrf.mxu0  ;;  %v3959_v40 = vld [vmem:[%s5343_s0 + $0x2bc] ss:$12 sps:$4 sm:$0xff]  }
  0xe6   :  { %v3101_v42 = vadd.f32 %v3100_v41, %v3099_v39  ;;  %v641_v43 = vpop.f32.mrf.mxu1  ;;  %v4058_v41 = vld [vmem:[%s5342_s1 + $0x20] sm:$0xff]  }
  0xe7   :  { %v3102_v45 = vpop.f32.mrf.mxu0 }
  0xe8   :  { %v4598_v47 = vadd.f32 %v3101_v42, %v638_v38  ;;  %v3562_v48 = vpop.f32.mrf.mxu1 }
  0xe9   :  { %v3103_v50 = vpop.f32.mrf.mxu0 }
  0xea   :  { %v3104_v51 = vadd.f32 %v3103_v50, %v3102_v45  ;;  %v646_v52 = vpop.f32.mrf.mxu1  ;;  %3676 = vmatmul.mubr.bf16.gmra.mxu1 %v3943_v44  ;;  %v4060_v44 = vld [vmem:[%s5342_s1 + $0x58] sm:$0xff]  }
  0xeb   :  { %v3105_v53 = vpop.f32.mrf.mxu0  ;;  %1131 = vmatmul.mubr.bf16.gmra.mxu0 %v3944_v46  ;;  %3695 = vmatprep.mubr.msk.bf16.mxu1 %vm4073_vm0, %v4072_v0 }
  0xec   :  { %v4605_v54 = vadd.f32 %v3104_v51, %v641_v43  ;;  %v3565_v55 = vpop.f32.mrf.mxu1  ;;  %1595 = vmatprep.mubr.bf16.mxu0 %v3947_v49  ;;  %v4059_v43 = vld [vmem:[%s5342_s1 + $0xa0] sm:$0xff]   ;;  %v4061_v51 = vld [vmem:[%s5342_s1 + $0x18] sm:$0xff]  }
  0xed   :  { %v3106_v56 = vpop.f32.mrf.mxu0  ;;  %v4063_v55 = vld [vmem:[%s5342_s1 + $0x50] sm:$0xff]  }
  0xee   :  { %v3107_v57 = vadd.f32 %v3106_v56, %v3105_v53  ;;  %v649_v58 = vpop.f32.mrf.mxu1  ;;  %v4062_v53 = vld [vmem:[%s5342_s1 + $0x98] sm:$0xff]  }
  0xef   :  { %v3108_v60 = vpop.f32.mrf.mxu0 }
  0xf0   :  { %v4613_v62 = vadd.f32 %v3107_v57, %v646_v52  ;;  %v3566_v63 = vpop.f32.mrf.mxu1 }
  0xf1   :  { %v3109_v23 = vpop.f32.mrf.mxu0 }
  0xf2   :  { %v3110_v27 = vadd.f32 %v3109_v23, %v3108_v60  ;;  %v654_v28 = vpop.f32.mrf.mxu1  ;;  %3696 = vmatmul.mubr.bf16.vlgmr.msra.gmra.mxu1 %v3948_v59  ;;  %v3957_v60 = vld [vmem:[%s5343_s0 + $0x2b8] ss:$12 sps:$4 sm:$0xff]   ;;  %v3963_v23 = vld [vmem:[%s5343_s0 + $0x2d4] ss:$12 sps:$4 sm:$0xff]  }
  0xf3   :  { %v3111_v29 = vpop.f32.mrf.mxu0  ;;  %1596 = vmatmul.mubr.bf16.vlgmr.msra.gmra.mxu0 %v3945_v61  ;;  %3748 = vmatpush3.bf16.msra.mxu1 %v4049_v30 }
  0xf4   :  { %v4621_v2 = vadd.f32 %v3110_v27, %v649_v58  ;;  %v3569_v3 = vpop.f32.mrf.mxu1  ;;  %3429 = vmatpush3.bf16.msra.mxu0 %v4050_v4  ;;  %3699 = vmatprep.mubr.msk.bf16.mxu1 %vm4073_vm0, %v4072_v0  ;;  %v3960_v58 = vld [vmem:[%s5343_s0 + $0x2c0] ss:$12 sps:$4 sm:$0xff]  }
  0xf5   :  { %v3112_v5 = vpop.f32.mrf.mxu0  ;;  %1603 = vmatprep.mubr.bf16.mxu0 %v3949_v26  ;;  %3430 = vmatprep.subr.bf16.mxu0 %v4051_v6  ;;  %v4064_v26 = vld [vmem:[%s5342_s1 + $0x10] sm:$0xff]  }
  0xf6   :  { %v3113_v7 = vadd.f32 %v3112_v5, %v3111_v29  ;;  %v657_v8 = vpop.f32.mrf.mxu1  ;;  %3749 = vmatprep.subr.bf16.mxu1 %v4072_v0  ;;  %v4066_v29 = vld [vmem:[%s5342_s1 + $0x48] sm:$0xff]  }
  0xf7   :  { %v3114_v10 = vpop.f32.mrf.mxu0  ;;  %3750 = vmatpush3.bf16.msra.mxu1 %v4052_v12 }
  0xf8   :  { %v4641_v13 = vadd.f32 %v3113_v7, %v654_v28  ;;  %v3570_v1 = vpop.f32.mrf.mxu1  ;;  %3431 = vmatpush3.bf16.msra.mxu0 %v4053_v14  ;;  %3751 = vmatprep.subr.bf16.mxu1 %v4072_v0  ;;  %v4065_v28 = vld [vmem:[%s5342_s1 + $0x90] sm:$0xff]   ;;  %v4067_v7 = vld [vmem:[%s5342_s1 + $0x8] sm:$0xff]  }
  0xf9   :  { %v3115_v16 = vpop.f32.mrf.mxu0  ;;  %3432 = vmatprep.subr.bf16.mxu0 %v4054_v17  ;;  %v3964_v1 = vld [vmem:[%s5343_s0 + $0x2d8] ss:$12 sps:$4 sm:$0xff]  }
  0xfa   :  { %v3116_v18 = vadd.f32 %v3115_v16, %v3114_v10  ;;  %v662_v19 = vpop.f32.mrf.mxu1  ;;  %3700 = vmatmul.mubr.bf16.gmra.mxu1 %v3951_v9  ;;  %v4068_v9 = vld [vmem:[%s5342_s1 + $0x88] sm:$0xff]   ;;  %v4069_v10 = vld [vmem:[%s5342_s1 + $0x40] sm:$0xff]  }
  0xfb   :  { %v3117_v20 = vpop.f32.mrf.mxu0  ;;  %1604 = vmatmul.mubr.bf16.gmra.mxu0 %v3952_v11  ;;  %3703 = vmatprep.mubr.msk.bf16.mxu1 %vm4073_vm0, %v4072_v0 }
  0xfc   :  { %v4655_v21 = vadd.f32 %v3116_v18, %v657_v8  ;;  %v3573_v22 = vpop.f32.mrf.mxu1  ;;  %1611 = vmatprep.mubr.bf16.mxu0 %v3955_v15  ;;  %3433 = vmatpush3.bf16.msra.mxu0 %v4055_v24  ;;  %v3961_v15 = vld [vmem:[%s5343_s0 + $0x2d0] ss:$12 sps:$4 sm:$0xff]   ;;  %v3967_v18 = vld [vmem:[%s5343_s0 + $0x2ec] ss:$12 sps:$4 sm:$0xff]  }
  0xfd   :  { %v3118_v25 = vpop.f32.mrf.mxu0  ;;  %3752 = vmatpush3.bf16.msra.mxu1 %v4056_v31  ;;  %3434 = vmatprep.subr.bf16.mxu0 %v4057_v32  ;;  %v4071_v22 = vld [vmem:[%s5342_s1 + $0x80] sm:$0xff]  }
  0xfe   :  { %v3119_v33 = vadd.f32 %v3118_v25, %v3117_v20  ;;  %v665_v34 = vpop.f32.mrf.mxu1  ;;  %3753 = vmatprep.subr.bf16.mxu1 %v4072_v0 }
  0xff   :  { %v3120_v36 = vpop.f32.mrf.mxu0 }
 0x100   :  { %v4673_v38 = vadd.f32 %v3119_v33, %v662_v19  ;;  %v3574_v39 = vpop.f32.mrf.mxu1  ;;  %3435 = vmatpush3.bf16.msra.mxu0 %v4058_v41  ;;  %v4070_v19 = vld [vmem:[%s5342_s1] sm:$0xff]  }
 0x101   :  { %v3121_v42 = vpop.f32.mrf.mxu0  ;;  %3754 = vmatpush3.bf16.msra.mxu1 %v4059_v43  ;;  %3436 = vmatprep.subr.bf16.mxu0 %v4060_v44  ;;  %v3971_v43 = vld [vmem:[%s5343_s0 + $0x304] ss:$12 sps:$4 sm:$0xff]  }
 0x102   :  { %v3122_v45 = vadd.f32 %v3121_v42, %v3120_v36  ;;  %v670_v46 = vpop.f32.mrf.mxu1  ;;  %3704 = vmatmul.mubr.bf16.gmra.mxu1 %v3956_v35  ;;  %3755 = vmatprep.subr.bf16.mxu1 %v4072_v0 }
 0x103   :  { %v3123_v48 = vpop.f32.mrf.mxu0  ;;  %1612 = vmatmul.mubr.bf16.gmra.mxu0 %v3953_v37  ;;  %3707 = vmatprep.mubr.msk.bf16.mxu1 %vm4073_vm0, %v4072_v0  ;;  %v3968_v37 = vld [vmem:[%s5343_s0 + $0x2f0] ss:$12 sps:$4 sm:$0xff]  }
 0x104   :  { %v4690_v49 = vadd.f32 %v3122_v45, %v665_v34  ;;  %v3577_v50 = vpop.f32.mrf.mxu1  ;;  %1619 = vmatprep.mubr.bf16.mxu0 %v3959_v40  ;;  %3437 = vmatpush3.bf16.msra.mxu0 %v4061_v51  ;;  %v3965_v40 = vld [vmem:[%s5343_s0 + $0x2e8] ss:$12 sps:$4 sm:$0xff]  }
 0x105   :  { %v3124_v52 = vpop.f32.mrf.mxu0  ;;  %3756 = vmatpush3.bf16.msra.mxu1 %v4062_v53  ;;  %3438 = vmatprep.subr.bf16.mxu0 %v4063_v55 }
 0x106   :  { %v3125_v56 = vadd.f32 %v3124_v52, %v3123_v48  ;;  %v673_v57 = vpop.f32.mrf.mxu1  ;;  %3757 = vmatprep.subr.bf16.mxu1 %v4072_v0 }
 0x107   :  { %v3126_v59 = vpop.f32.mrf.mxu0 }
 0x108   :  { %v4708_v61 = vadd.f32 %v3125_v56, %v670_v46  ;;  %v3578_v63 = vpop.f32.mrf.mxu1  ;;  %3439 = vmatpush3.bf16.msra.mxu0 %v4064_v26  ;;  %v3972_v56 = vld [vmem:[%s5343_s0 + $0x308] ss:$12 sps:$4 sm:$0xff]  }
 0x109   :  { %v3127_v27 = vpop.f32.mrf.mxu0  ;;  %3758 = vmatpush3.bf16.msra.mxu1 %v4065_v28  ;;  %3440 = vmatprep.subr.bf16.mxu0 %v4066_v29  ;;  %v3975_v63 = vld [vmem:[%s5343_s0 + $0x31c] ss:$12 sps:$4 sm:$0xff]  }
 0x10a   :  { %v3128_v30 = vadd.f32 %v3127_v27, %v3126_v59  ;;  %v678_v3 = vpop.f32.mrf.mxu1  ;;  %3708 = vmatmul.mubr.bf16.gmra.mxu1 %v3960_v58  ;;  %3759 = vmatprep.subr.bf16.mxu1 %v4072_v0  ;;  %v3969_v58 = vld [vmem:[%s5343_s0 + $0x300] ss:$12 sps:$4 sm:$0xff]  }
 0x10b   :  { %v3129_v4 = vpop.f32.mrf.mxu0  ;;  %1620 = vmatmul.mubr.bf16.gmra.mxu0 %v3957_v60  ;;  %3711 = vmatprep.mubr.msk.bf16.mxu1 %vm4073_vm0, %v4072_v0 }
 0x10c   :  { %v4725_v5 = vadd.f32 %v3128_v30, %v673_v57  ;;  %v3581_v6 = vpop.f32.mrf.mxu1  ;;  %1627 = vmatprep.mubr.bf16.mxu0 %v3963_v23  ;;  %3441 = vmatpush3.bf16.msra.mxu0 %v4067_v7  ;;  %v3976_v7 = vld [vmem:[%s5343_s0 + $0x320] ss:$12 sps:$4 sm:$0xff]  }
 0x10d   :  { %v3130_v8 = vpop.f32.mrf.mxu0  ;;  %3760 = vmatpush3.bf16.msra.mxu1 %v4068_v9  ;;  %3442 = vmatprep.subr.bf16.mxu0 %v4069_v10  ;;  %v3973_v9 = vld [vmem:[%s5343_s0 + $0x318] ss:$12 sps:$4 sm:$0xff]  }
 0x10e   :  { %v3131_v11 = vadd.f32 %v3130_v8, %v3129_v4  ;;  %v681_v12 = vpop.f32.mrf.mxu1  ;;  %3761 = vmatprep.subr.bf16.mxu1 %v4072_v0 }
 0x10f   :  { %v3132_v14 = vpop.f32.mrf.mxu0 }
 0x110   :  { %v4743_v16 = vadd.f32 %v3131_v11, %v678_v3  ;;  %v3582_v17 = vpop.f32.mrf.mxu1  ;;  %3443 = vmatpush3.bf16.msra.mxu0 %v4070_v19 }
 0x111   :  { %v3133_v20 = vpop.f32.mrf.mxu0  ;;  %3762 = vmatpush3.bf16.msra.mxu1 %v4071_v22 }
 0x112   :  { %v3134_v24 = vadd.f32 %v3133_v20, %v3132_v14  ;;  %v686_v25 = vpop.f32.mrf.mxu1  ;;  %3712 = vmatmul.mubr.bf16.gmra.mxu1 %v3964_v1 }
 0x113   :  { %v3135_v31 = vpop.f32.mrf.mxu0  ;;  %1628 = vmatmul.mubr.bf16.gmra.mxu0 %v3961_v15  ;;  %3715 = vmatprep.mubr.msk.bf16.mxu1 %vm4073_vm0, %v4072_v0 }
 0x114   :  { %v4756_v32 = vadd.f32 %v3134_v24, %v681_v12  ;;  %v3585_v33 = vpop.f32.mrf.mxu1  ;;  %1635 = vmatprep.mubr.bf16.mxu0 %v3967_v18  ;;  %v3979_v12 = vld [vmem:[%s5343_s0 + $0x334] ss:$12 sps:$4 sm:$0xff]  }
 0x115   :  { %v3136_v34 = vpop.f32.mrf.mxu0  ;;  %v3977_v33 = vld [vmem:[%s5343_s0 + $0x330] ss:$12 sps:$4 sm:$0xff]  }
 0x116   :  { %v3137_v35 = vadd.f32 %v3136_v34, %v3135_v31  ;;  %v689_v36 = vpop.f32.mrf.mxu1 }
 0x117   :  { %v3138_v39 = vpop.f32.mrf.mxu0 }
 0x118   :  { %v4764_v41 = vadd.f32 %v3137_v35, %v686_v25  ;;  %v3586_v42 = vpop.f32.mrf.mxu1  ;;  %v3980_v25 = vld [vmem:[%s5343_s0 + $0x338] ss:$12 sps:$4 sm:$0xff]  }
 0x119   :  { %v3139_v44 = vpop.f32.mrf.mxu0 }
 0x11a   :  { %v3140_v45 = vadd.f32 %v3139_v44, %v3138_v39  ;;  %v694_v46 = vpop.f32.mrf.mxu1  ;;  %3716 = vmatmul.mubr.bf16.gmra.mxu1 %v3968_v37 }
 0x11b   :  { %v3141_v48 = vpop.f32.mrf.mxu0  ;;  %1636 = vmatmul.mubr.bf16.gmra.mxu0 %v3965_v40  ;;  %3719 = vmatprep.mubr.msk.bf16.mxu1 %vm4073_vm0, %v4072_v0 }
 0x11c   :  { %v4771_v50 = vadd.f32 %v3140_v45, %v689_v36  ;;  %v3589_v51 = vpop.f32.mrf.mxu1  ;;  %1643 = vmatprep.mubr.bf16.mxu0 %v3971_v43  ;;  %v3983_v36 = vld [vmem:[%s5343_s0 + $0x34c] ss:$12 sps:$4 sm:$0xff]  }
 0x11d   :  { %v3142_v52 = vpop.f32.mrf.mxu0  ;;  %v3984_v51 = vld [vmem:[%s5343_s0 + $0x350] ss:$12 sps:$4 sm:$0xff]  }
 0x11e   :  { %v3143_v53 = vadd.f32 %v3142_v52, %v3141_v48  ;;  %v697_v55 = vpop.f32.mrf.mxu1 }
 0x11f   :  { %v3144_v57 = vpop.f32.mrf.mxu0 }
 0x120   :  { %v4779_v59 = vadd.f32 %v3143_v53, %v694_v46  ;;  %v3590_v60 = vpop.f32.mrf.mxu1  ;;  %v3981_v53 = vld [vmem:[%s5343_s0 + $0x348] ss:$12 sps:$4 sm:$0xff]  }
 0x121   :  { %v3145_v23 = vpop.f32.mrf.mxu0 }
 0x122   :  { %v3146_v26 = vadd.f32 %v3145_v23, %v3144_v57  ;;  %v702_v27 = vpop.f32.mrf.mxu1  ;;  %3720 = vmatmul.mubr.bf16.gmra.mxu1 %v3972_v56  ;;  %v3987_v57 = vld [vmem:[%s5343_s0 + $0x364] ss:$12 sps:$4 sm:$0xff]  }
 0x123   :  { %v3147_v28 = vpop.f32.mrf.mxu0  ;;  %1644 = vmatmul.mubr.bf16.gmra.mxu0 %v3969_v58  ;;  %3723 = vmatprep.mubr.msk.bf16.mxu1 %vm4073_vm0, %v4072_v0 }
 0x124   :  { %v4786_v29 = vadd.f32 %v3146_v26, %v697_v55  ;;  %v3593_v30 = vpop.f32.mrf.mxu1  ;;  %1651 = vmatprep.mubr.bf16.mxu0 %v3975_v63 }
 0x125   :  { %v3148_v3 = vpop.f32.mrf.mxu0 }
 0x126   :  { %v3149_v4 = vadd.f32 %v3148_v3, %v3147_v28  ;;  %v705_v6 = vpop.f32.mrf.mxu1 }
 0x127   :  { %v3150_v8 = vpop.f32.mrf.mxu0 }
 0x128   :  { %v4794_v10 = vadd.f32 %v3149_v4, %v702_v27  ;;  %v3594_v11 = vpop.f32.mrf.mxu1  ;;  %v3988_v4 = vld [vmem:[%s5343_s0 + $0x368] ss:$12 sps:$4 sm:$0xff]  }
 0x129   :  { %v3151_v1 = vpop.f32.mrf.mxu0  ;;  %v3991_v11 = vld [vmem:[%s5343_s0 + $0x37c] ss:$12 sps:$4 sm:$0xff]  }
 0x12a   :  { %v3152_v14 = vadd.f32 %v3151_v1, %v3150_v8  ;;  %v710_v15 = vpop.f32.mrf.mxu1  ;;  %3724 = vmatmul.mubr.bf16.gmra.mxu1 %v3976_v7  ;;  %v3985_v7 = vld [vmem:[%s5343_s0 + $0x360] ss:$12 sps:$4 sm:$0xff]  }
 0x12b   :  { %v3153_v17 = vpop.f32.mrf.mxu0  ;;  %1652 = vmatmul.mubr.bf16.gmra.mxu0 %v3973_v9  ;;  %3727 = vmatprep.mubr.msk.bf16.mxu1 %vm4073_vm0, %v4072_v0 }
 0x12c   :  { %v4801_v18 = vadd.f32 %v3152_v14, %v705_v6  ;;  %v3597_v19 = vpop.f32.mrf.mxu1  ;;  %1659 = vmatprep.mubr.bf16.mxu0 %v3979_v12 }
 0x12d   :  { %v3154_v20 = vpop.f32.mrf.mxu0 }
 0x12e   :  { %v3155_v22 = vadd.f32 %v3154_v20, %v3153_v17  ;;  %v713_v24 = vpop.f32.mrf.mxu1 }
 0x12f   :  { %v3156_v31 = vpop.f32.mrf.mxu0 }
 0x130   :  { %v4809_v34 = vadd.f32 %v3155_v22, %v710_v15  ;;  %v3598_v35 = vpop.f32.mrf.mxu1 }
 0x131   :  { %v3157_v37 = vpop.f32.mrf.mxu0 }
 0x132   :  { %v3158_v39 = vadd.f32 %v3157_v37, %v3156_v31  ;;  %v718_v40 = vpop.f32.mrf.mxu1  ;;  %3728 = vmatmul.mubr.bf16.gmra.mxu1 %v3980_v25  ;;  %v3992_v25 = vld [vmem:[%s5343_s0 + $0x380] ss:$12 sps:$4 sm:$0xff]  }
 0x133   :  { %v3159_v42 = vpop.f32.mrf.mxu0  ;;  %1660 = vmatmul.mubr.bf16.gmra.mxu0 %v3977_v33  ;;  %3731 = vmatprep.mubr.msk.bf16.mxu1 %vm4073_vm0, %v4072_v0  ;;  %v3989_v33 = vld [vmem:[%s5343_s0 + $0x378] ss:$12 sps:$4 sm:$0xff]   ;;  %v3995_v37 = vld [vmem:[%s5343_s0 + $0x394] ss:$12 sps:$4 sm:$0xff]  }
 0x134   :  { %v4816_v43 = vadd.f32 %v3158_v39, %v713_v24  ;;  %v3601_v44 = vpop.f32.mrf.mxu1  ;;  %1667 = vmatprep.mubr.bf16.mxu0 %v3983_v36 }
 0x135   :  { %v3160_v45 = vpop.f32.mrf.mxu0 }
 0x136   :  { %v3161_v46 = vadd.f32 %v3160_v45, %v3159_v42  ;;  %v721_v48 = vpop.f32.mrf.mxu1 }
 0x137   :  { %v3162_v52 = vpop.f32.mrf.mxu0 }
 0x138   :  { %v4824_v55 = vadd.f32 %v3161_v46, %v718_v40  ;;  %v3602_v56 = vpop.f32.mrf.mxu1 }
 0x139   :  { %v3163_v58 = vpop.f32.mrf.mxu0 }
 0x13a   :  { %v3164_v60 = vadd.f32 %v3163_v58, %v3162_v52  ;;  %v726_v63 = vpop.f32.mrf.mxu1  ;;  %3732 = vmatmul.mubr.bf16.gmra.mxu1 %v3984_v51 }
 0x13b   :  { %v3165_v23 = vpop.f32.mrf.mxu0  ;;  %1668 = vmatmul.mubr.bf16.gmra.mxu0 %v3981_v53  ;;  %3735 = vmatprep.mubr.msk.bf16.mxu1 %vm4073_vm0, %v4072_v0  ;;  %v3996_v53 = vld [vmem:[%s5343_s0 + $0x398] ss:$12 sps:$4 sm:$0xff]  }
 0x13c   :  { %v4831_v26 = vadd.f32 %v3164_v60, %v721_v48  ;;  %v3605_v27 = vpop.f32.mrf.mxu1  ;;  %1675 = vmatprep.mubr.bf16.mxu0 %v3987_v57  ;;  %v3993_v57 = vld [vmem:[%s5343_s0 + $0x390] ss:$12 sps:$4 sm:$0xff]  }
 0x13d   :  { %v3166_v28 = vpop.f32.mrf.mxu0 }
 0x13e   :  { %5354 = vst [vmem:[#allocation2_spill] sm:$0xff] %v4831_v26  ;;  %v3167_v30 = vadd.f32 %v3166_v28, %v3165_v23  ;;  %v729_v3 = vpop.f32.mrf.mxu1 }
 0x13f   :  { %v3168_v6 = vpop.f32.mrf.mxu0 }
 0x140   :  { %v4839_v8 = vadd.f32 %v3167_v30, %v726_v63  ;;  %v3606_v9 = vpop.f32.mrf.mxu1  ;;  %v3999_v63 = vld [vmem:[%s5343_s0 + $0x3ac] ss:$12 sps:$4 sm:$0xff]  }
 0x141   :  { %v3169_v12 = vpop.f32.mrf.mxu0 }
 0x142   :  { %v3170_v1 = vadd.f32 %v3169_v12, %v3168_v6  ;;  %v734_v14 = vpop.f32.mrf.mxu1  ;;  %3736 = vmatmul.mubr.bf16.gmra.mxu1 %v3988_v4 }
 0x143   :  { %v3171_v15 = vpop.f32.mrf.mxu0  ;;  %1676 = vmatmul.mubr.bf16.gmra.mxu0 %v3985_v7  ;;  %3739 = vmatprep.mubr.msk.bf16.mxu1 %vm4073_vm0, %v4072_v0 }
 0x144   :  { %v4846_v17 = vadd.f32 %v3170_v1, %v729_v3  ;;  %v3609_v19 = vpop.f32.mrf.mxu1  ;;  %1683 = vmatprep.mubr.bf16.mxu0 %v3991_v11  ;;  %v4000_v1 = vld [vmem:[%s5343_s0 + $0x3b0] ss:$12 sps:$4 sm:$0xff]  }
 0x145   :  { %v3172_v20 = vpop.f32.mrf.mxu0 }
 0x146   :  { %5355 = vst [vmem:[#allocation3_spill] sm:$0xff] %v4846_v17  ;;  %v3173_v22 = vadd.f32 %v3172_v20, %v3171_v15  ;;  %v737_v24 = vpop.f32.mrf.mxu1  ;;  %v3997_v15 = vld [vmem:[%s5343_s0 + $0x3a8] ss:$12 sps:$4 sm:$0xff]  }
 0x147   :  { %v3174_v31 = vpop.f32.mrf.mxu0 }
 0x148   :  { %v4854_v35 = vadd.f32 %v3173_v22, %v734_v14  ;;  %v3610_v36 = vpop.f32.mrf.mxu1  ;;  %v4003_v22 = vld [vmem:[%s5343_s0 + $0x3c4] ss:$12 sps:$4 sm:$0xff]  }
 0x149   :  { %v3175_v39 = vpop.f32.mrf.mxu0 }
 0x14a   :  { %5356 = vst [vmem:[#allocation4_spill] sm:$0xff] %v4854_v35  ;;  %v3176_v40 = vadd.f32 %v3175_v39, %v3174_v31  ;;  %v1173_v42 = vpop.f32.mrf.mxu1  ;;  %3740 = vmatmul.mubr.bf16.gmra.mxu1 %v3992_v25 }
 0x14b   :  { %v3214_v44 = vpop.f32.mrf.mxu0  ;;  %1684 = vmatmul.mubr.bf16.gmra.mxu0 %v3989_v33  ;;  %3743 = vmatprep.mubr.msk.bf16.mxu1 %vm4073_vm0, %v4072_v0 }
 0x14c   :  { %v4861_v45 = vadd.f32 %v3176_v40, %v737_v24  ;;  %v3629_v46 = vpop.f32.mrf.mxu1  ;;  %1691 = vmatprep.mubr.bf16.mxu0 %v3995_v37 }
 0x14d   :  { %v3215_v48 = vpop.f32.mrf.mxu0 }
 0x14e   :  { %5357 = vst [vmem:[#allocation5_spill] sm:$0xff] %v4861_v45  ;;  %v3216_v51 = vadd.f32 %v3215_v48, %v3214_v44  ;;  %v1176_v52 = vpop.f32.mrf.mxu1  ;;  %v4004_v48 = vld [vmem:[%s5343_s0 + $0x3c8] ss:$12 sps:$4 sm:$0xff]  }
 0x14f   :  { %v3217_v56 = vpop.f32.mrf.mxu0 }
 0x150   :  { %v4869_v58 = vadd.f32 %v3216_v51, %v1173_v42  ;;  %v3630_v60 = vpop.f32.mrf.mxu1 }
 0x151   :  { %v3218_v23 = vpop.f32.mrf.mxu0 }
 0x152   :  { %v3219_v28 = vadd.f32 %v3218_v23, %v3217_v56  ;;  %v1181_v30 = vpop.f32.mrf.mxu1  ;;  %3744 = vmatmul.mubr.bf16.gmra.mxu1 %v3996_v53 }
 0x153   :  { %v3220_v3 = vpop.f32.mrf.mxu0  ;;  %1692 = vmatmul.mubr.bf16.gmra.mxu0 %v3993_v57  ;;  %3763 = vmatprep.mubr.msk.bf16.mxu1 %vm4073_vm0, %v4072_v0  ;;  %v4007_v57 = vld [vmem:[%s5343_s0 + $0x3dc] ss:$12 sps:$4 sm:$0xff]  }
 0x154   :  { %v4878_v4 = vadd.f32 %v3219_v28, %v1176_v52  ;;  %v3633_v6 = vpop.f32.mrf.mxu1  ;;  %2156 = vmatprep.mubr.bf16.mxu0 %v3999_v63  ;;  %v4001_v52 = vld [vmem:[%s5343_s0 + $0x3c0] ss:$12 sps:$4 sm:$0xff]  }
 0x155   :  { %v3221_v7 = vpop.f32.mrf.mxu0 }
 0x156   :  { %v3222_v11 = vadd.f32 %v3221_v7, %v3220_v3  ;;  %v1184_v12 = vpop.f32.mrf.mxu1  ;;  %v5363_v45 = vmax.f32 %v4605_v54, %v4878_v4 }
 0x157   :  { %v3223_v14 = vpop.f32.mrf.mxu0 }
 0x158   :  { %v4888_v19 = vadd.f32 %v3222_v11, %v1181_v30  ;;  %v3634_v20 = vpop.f32.mrf.mxu1 }
 0x159   :  { %v3224_v24 = vpop.f32.mrf.mxu0  ;;  %v4005_v20 = vld [vmem:[%s5343_s0 + $0x3d8] ss:$12 sps:$4 sm:$0xff]  }
 0x15a   :  { %v3225_v31 = vadd.f32 %v3224_v24, %v3223_v14  ;;  %v1189_v33 = vpop.f32.mrf.mxu1  ;;  %3764 = vmatmul.mubr.bf16.vlgmr.msra.gmra.mxu1 %v4000_v1  ;;  %v4008_v14 = vld [vmem:[%s5343_s0 + $0x3e0] ss:$12 sps:$4 sm:$0xff]  }
 0x15b   :  { %v3226_v36 = vpop.f32.mrf.mxu0  ;;  %2157 = vmatmul.mubr.bf16.vlgmr.msra.gmra.mxu0 %v3997_v15  ;;  %3767 = vmatprep.mubr.msk.bf16.mxu1 %vm4073_vm0, %v4072_v0 }
 0x15c   :  { %v4897_v37 = vadd.f32 %v3225_v31, %v1184_v12  ;;  %v3637_v39 = vpop.f32.mrf.mxu1  ;;  %2164 = vmatprep.mubr.bf16.mxu0 %v4003_v22  ;;  %v4011_v31 = vld [vmem:[%s5343_s0 + $0x3f4] ss:$12 sps:$4 sm:$0xff]  }
 0x15d   :  { %v3227_v40 = vpop.f32.mrf.mxu0 }
 0x15e   :  { %v3228_v44 = vadd.f32 %v3227_v40, %v3226_v36  ;;  %v1192_v46 = vpop.f32.mrf.mxu1  ;;  %v5365_v54 = vmax.f32 %v4621_v2, %v4897_v37 }
 0x15f   :  { %v3229_v51 = vpop.f32.mrf.mxu0 }
 0x160   :  { %v4907_v53 = vadd.f32 %v3228_v44, %v1189_v33  ;;  %v3638_v56 = vpop.f32.mrf.mxu1 }
 0x161   :  { %v3230_v60 = vpop.f32.mrf.mxu0 }
 0x162   :  { %v3231_v23 = vadd.f32 %v3230_v60, %v3229_v51  ;;  %v1197_v28 = vpop.f32.mrf.mxu1  ;;  %3768 = vmatmul.mubr.bf16.gmra.mxu1 %v4004_v48  ;;  %v4012_v60 = vld [vmem:[%s5343_s0 + $0x3f8] ss:$12 sps:$4 sm:$0xff]  }
 0x163   :  { %v3232_v30 = vpop.f32.mrf.mxu0  ;;  %2165 = vmatmul.mubr.bf16.gmra.mxu0 %v4001_v52  ;;  %3771 = vmatprep.mubr.msk.bf16.mxu1 %vm4073_vm0, %v4072_v0 }
 0x164   :  { %v4916_v3 = vadd.f32 %v3231_v23, %v1192_v46  ;;  %v3641_v6 = vpop.f32.mrf.mxu1  ;;  %2172 = vmatprep.mubr.bf16.mxu0 %v4007_v57 }
 0x165   :  { %v3233_v7 = vpop.f32.mrf.mxu0 }
 0x166   :  { %v3234_v12 = vadd.f32 %v3233_v7, %v3232_v30  ;;  %v1200_v1 = vpop.f32.mrf.mxu1  ;;  %v4015_v7 = vld [vmem:[%s5343_s0 + $0x40c] ss:$12 sps:$4 sm:$0xff]   ;;  %v5367_v2 = vmax.f32 %v4655_v21, %v4916_v3 }
 0x167   :  { %v3235_v15 = vpop.f32.mrf.mxu0 }
 0x168   :  { %v4926_v22 = vadd.f32 %v3234_v12, %v1197_v28  ;;  %v3642_v24 = vpop.f32.mrf.mxu1  ;;  %v4009_v28 = vld [vmem:[%s5343_s0 + $0x3f0] ss:$12 sps:$4 sm:$0xff]  }
 0x169   :  { %v3236_v33 = vpop.f32.mrf.mxu0 }
 0x16a   :  { %v3237_v39 = vadd.f32 %v3236_v33, %v3235_v15  ;;  %v1205_v40 = vpop.f32.mrf.mxu1  ;;  %3772 = vmatmul.mubr.bf16.gmra.mxu1 %v4008_v14 }
 0x16b   :  { %v3238_v44 = vpop.f32.mrf.mxu0  ;;  %2173 = vmatmul.mubr.bf16.gmra.mxu0 %v4005_v20  ;;  %3775 = vmatprep.mubr.msk.bf16.mxu1 %vm4073_vm0, %v4072_v0 }
 0x16c   :  { %v4935_v46 = vadd.f32 %v3237_v39, %v1200_v1  ;;  %v3645_v48 = vpop.f32.mrf.mxu1  ;;  %2180 = vmatprep.mubr.bf16.mxu0 %v4011_v31 }
 0x16d   :  { %v3239_v51 = vpop.f32.mrf.mxu0  ;;  %v4016_v48 = vld [vmem:[%s5343_s0 + $0x410] ss:$12 sps:$4 sm:$0xff]  }
 0x16e   :  { %v3240_v56 = vadd.f32 %v3239_v51, %v3238_v44  ;;  %v1208_v57 = vpop.f32.mrf.mxu1  ;;  %v5369_v21 = vmax.f32 %v4690_v49, %v4935_v46 }
 0x16f   :  { %v3241_v23 = vpop.f32.mrf.mxu0 }
 0x170   :  { %v4945_v30 = vadd.f32 %v3240_v56, %v1205_v40  ;;  %v3646_v6 = vpop.f32.mrf.mxu1  ;;  %v4013_v56 = vld [vmem:[%s5343_s0 + $0x408] ss:$12 sps:$4 sm:$0xff]  }
 0x171   :  { %v3242_v12 = vpop.f32.mrf.mxu0 }
 0x172   :  { %v3243_v14 = vadd.f32 %v3242_v12, %v3241_v23  ;;  %v1213_v15 = vpop.f32.mrf.mxu1  ;;  %3776 = vmatmul.mubr.bf16.gmra.mxu1 %v4012_v60  ;;  %v4019_v23 = vld [vmem:[%s5343_s0 + $0x424] ss:$12 sps:$4 sm:$0xff]  }
 0x173   :  { %v3244_v20 = vpop.f32.mrf.mxu0  ;;  %2181 = vmatmul.mubr.bf16.gmra.mxu0 %v4009_v28  ;;  %3779 = vmatprep.mubr.msk.bf16.mxu1 %vm4073_vm0, %v4072_v0 }
 0x174   :  { %v4954_v24 = vadd.f32 %v3243_v14, %v1208_v57  ;;  %v3649_v31 = vpop.f32.mrf.mxu1  ;;  %2188 = vmatprep.mubr.bf16.mxu0 %v4015_v7 }
 0x175   :  { %v3245_v33 = vpop.f32.mrf.mxu0 }
 0x176   :  { %v3246_v40 = vadd.f32 %v3245_v33, %v3244_v20  ;;  %v1216_v44 = vpop.f32.mrf.mxu1  ;;  %v5371_v49 = vmax.f32 %v4725_v5, %v4954_v24 }
 0x177   :  { %v3247_v51 = vpop.f32.mrf.mxu0 }
 0x178   :  { %v4964_v60 = vadd.f32 %v3246_v40, %v1213_v15  ;;  %v3650_v57 = vpop.f32.mrf.mxu1 }
 0x179   :  { %v3248_v28 = vpop.f32.mrf.mxu0 }
 0x17a   :  { %v3249_v7 = vadd.f32 %v3248_v28, %v3247_v51  ;;  %v1221_v12 = vpop.f32.mrf.mxu1  ;;  %3780 = vmatmul.mubr.bf16.gmra.mxu1 %v4016_v48  ;;  %v4020_v51 = vld [vmem:[%s5343_s0 + $0x428] ss:$12 sps:$4 sm:$0xff]  }
 0x17b   :  { %v3250_v14 = vpop.f32.mrf.mxu0  ;;  %2189 = vmatmul.mubr.bf16.gmra.mxu0 %v4013_v56  ;;  %3783 = vmatprep.mubr.msk.bf16.mxu1 %vm4073_vm0, %v4072_v0  ;;  %v4017_v56 = vld [vmem:[%s5343_s0 + $0x420] ss:$12 sps:$4 sm:$0xff]  }
 0x17c   :  { %v4973_v20 = vadd.f32 %v3249_v7, %v1216_v44  ;;  %v3653_v15 = vpop.f32.mrf.mxu1  ;;  %2196 = vmatprep.mubr.bf16.mxu0 %v4019_v23  ;;  %v4023_v23 = vld [vmem:[%s5343_s0 + $0x43c] ss:$12 sps:$4 sm:$0xff]  }
 0x17d   :  { %v3251_v31 = vpop.f32.mrf.mxu0 }
 0x17e   :  { %v3252_v40 = vadd.f32 %v3251_v31, %v3250_v14  ;;  %v1224_v57 = vpop.f32.mrf.mxu1  ;;  %v5373_v5 = vmax.f32 %v4756_v32, %v4973_v20 }
 0x17f   :  { %v3253_v48 = vpop.f32.mrf.mxu0 }
 0x180   :  { %v4983_v28 = vadd.f32 %v3252_v40, %v1221_v12  ;;  %v3654_v44 = vpop.f32.mrf.mxu1 }
 0x181   :  { %v3254_v7 = vpop.f32.mrf.mxu0 }
 0x182   :  { %v3255_v15 = vadd.f32 %v3254_v7, %v3253_v48  ;;  %v1229_v31 = vpop.f32.mrf.mxu1  ;;  %3784 = vmatmul.mubr.bf16.gmra.mxu1 %v4020_v51  ;;  %v4024_v48 = vld [vmem:[%s5343_s0 + $0x440] ss:$12 sps:$4 sm:$0xff]  }
 0x183   :  { %v3256_v33 = vpop.f32.mrf.mxu0  ;;  %2197 = vmatmul.mubr.bf16.gmra.mxu0 %v4017_v56  ;;  %3787 = vmatprep.mubr.msk.bf16.mxu1 %vm4073_vm0, %v4072_v0  ;;  %v4021_v56 = vld [vmem:[%s5343_s0 + $0x438] ss:$12 sps:$4 sm:$0xff]  }
 0x184   :  { %v4992_v6 = vadd.f32 %v3255_v15, %v1224_v57  ;;  %v3657_v12 = vpop.f32.mrf.mxu1  ;;  %2204 = vmatprep.mubr.bf16.mxu0 %v4023_v23  ;;  %v4027_v23 = vld [vmem:[%s5343_s0 + $0x454] ss:$12 sps:$4 sm:$0xff]  }
 0x185   :  { %v3257_v40 = vpop.f32.mrf.mxu0 }
 0x186   :  { %v3258_v39 = vadd.f32 %v3257_v40, %v3256_v33  ;;  %v1232_v1 = vpop.f32.mrf.mxu1  ;;  %v5375_v32 = vmax.f32 %v4771_v50, %v4992_v6 }
 0x187   :  { %v3259_v51 = vpop.f32.mrf.mxu0 }
 0x188   :  { %v5002_v7 = vadd.f32 %v3258_v39, %v1229_v31  ;;  %v3658_v57 = vpop.f32.mrf.mxu1 }
 0x189   :  { %v3260_v15 = vpop.f32.mrf.mxu0 }
 0x18a   :  { %v3261_v12 = vadd.f32 %v3260_v15, %v3259_v51  ;;  %v1237_v40 = vpop.f32.mrf.mxu1  ;;  %3788 = vmatmul.mubr.bf16.gmra.mxu1 %v4024_v48  ;;  %v4028_v51 = vld [vmem:[%s5343_s0 + $0x458] ss:$12 sps:$4 sm:$0xff]  }
 0x18b   :  { %v3262_v44 = vpop.f32.mrf.mxu0  ;;  %2205 = vmatmul.mubr.bf16.gmra.mxu0 %v4021_v56  ;;  %3791 = vmatprep.mubr.msk.bf16.mxu1 %vm4073_vm0, %v4072_v0  ;;  %v4025_v56 = vld [vmem:[%s5343_s0 + $0x450] ss:$12 sps:$4 sm:$0xff]  }
 0x18c   :  { %v5011_v14 = vadd.f32 %v3261_v12, %v1232_v1  ;;  %v3661_v39 = vpop.f32.mrf.mxu1  ;;  %2212 = vmatprep.mubr.bf16.mxu0 %v4027_v23  ;;  %v4031_v23 = vld [vmem:[%s5343_s0 + $0x46c] ss:$12 sps:$4 sm:$0xff]  }
 0x18d   :  { %v3263_v31 = vpop.f32.mrf.mxu0 }
 0x18e   :  { %v3264_v52 = vadd.f32 %v3263_v31, %v3262_v44  ;;  %v1240_v36 = vpop.f32.mrf.mxu1  ;;  %v5377_v50 = vmax.f32 %v4786_v29, %v5011_v14 }
 0x18f   :  { %v3265_v48 = vpop.f32.mrf.mxu0 }
 0x190   :  { %v5021_v15 = vadd.f32 %v3264_v52, %v1237_v40  ;;  %v3662_v1 = vpop.f32.mrf.mxu1 }
 0x191   :  { %v3266_v12 = vpop.f32.mrf.mxu0 }
 0x192   :  { %v3267_v39 = vadd.f32 %v3266_v12, %v3265_v48  ;;  %v1245_v31 = vpop.f32.mrf.mxu1  ;;  %3792 = vmatmul.mubr.bf16.gmra.mxu1 %v4028_v51  ;;  %v4032_v48 = vld [vmem:[%s5343_s0 + $0x470] ss:$12 sps:$4 sm:$0xff]  }
 0x193   :  { %v3268_v57 = vpop.f32.mrf.mxu0  ;;  %2213 = vmatmul.mubr.bf16.gmra.mxu0 %v4025_v56  ;;  %3795 = vmatprep.mubr.msk.bf16.mxu1 %vm4073_vm0, %v4072_v0  ;;  %v4029_v56 = vld [vmem:[%s5343_s0 + $0x468] ss:$12 sps:$4 sm:$0xff]  }
 0x194   :  { %v5030_v33 = vadd.f32 %v3267_v39, %v1240_v36  ;;  %v3665_v52 = vpop.f32.mrf.mxu1  ;;  %2220 = vmatprep.mubr.bf16.mxu0 %v4031_v23  ;;  %v4035_v23 = vld [vmem:[%s5343_s0 + $0x484] ss:$12 sps:$4 sm:$0xff]  }
 0x195   :  { %v3269_v40 = vpop.f32.mrf.mxu0 }
 0x196   :  { %v3270_v11 = vadd.f32 %v3269_v40, %v3268_v57  ;;  %v1248_v63 = vpop.f32.mrf.mxu1  ;;  %v5379_v29 = vmax.f32 %v4801_v18, %v5030_v33 }
 0x197   :  { %v3271_v51 = vpop.f32.mrf.mxu0 }
 0x198   :  { %v5040_v12 = vadd.f32 %v3270_v11, %v1245_v31  ;;  %v3666_v36 = vpop.f32.mrf.mxu1 }
 0x199   :  { %v3272_v39 = vpop.f32.mrf.mxu0 }
 0x19a   :  { %v3273_v52 = vadd.f32 %v3272_v39, %v3271_v51  ;;  %v1253_v40 = vpop.f32.mrf.mxu1  ;;  %3796 = vmatmul.mubr.bf16.gmra.mxu1 %v4032_v48  ;;  %v4036_v51 = vld [vmem:[%s5343_s0 + $0x488] ss:$12 sps:$4 sm:$0xff]  }
 0x19b   :  { %v3274_v1 = vpop.f32.mrf.mxu0  ;;  %2221 = vmatmul.mubr.bf16.gmra.mxu0 %v4029_v56  ;;  %3799 = vmatprep.mubr.msk.bf16.mxu1 %vm4073_vm0, %v4072_v0  ;;  %v4033_v56 = vld [vmem:[%s5343_s0 + $0x480] ss:$12 sps:$4 sm:$0xff]  }
 0x19c   :  { %v5049_v44 = vadd.f32 %v3273_v52, %v1248_v63  ;;  %v3669_v11 = vpop.f32.mrf.mxu1  ;;  %2228 = vmatprep.mubr.bf16.mxu0 %v4035_v23  ;;  %v4039_v23 = vld [vmem:[%s5343_s0 + $0x49c] ss:$12 sps:$4 sm:$0xff]  }
 0x19d   :  { %v3275_v31 = vpop.f32.mrf.mxu0 }
 0x19e   :  { %v3276_v42 = vadd.f32 %v3275_v31, %v3274_v1  ;;  %v1256_v25 = vpop.f32.mrf.mxu1  ;;  %v5381_v18 = vmax.f32 %v4816_v43, %v5049_v44  ;;  %v5383_v43 = vld [vmem:[#allocation2_spill] sm:$0xff] }
 0x19f   :  { %v3277_v48 = vpop.f32.mrf.mxu0 }
 0x1a0   :  { %v5059_v39 = vadd.f32 %v3276_v42, %v1253_v40  ;;  %v3670_v63 = vpop.f32.mrf.mxu1 }
 0x1a1   :  { %v3278_v52 = vpop.f32.mrf.mxu0 }
 0x1a2   :  { %v3279_v11 = vadd.f32 %v3278_v52, %v3277_v48  ;;  %v1261_v31 = vpop.f32.mrf.mxu1  ;;  %3800 = vmatmul.mubr.bf16.gmra.mxu1 %v4036_v51  ;;  %v4040_v48 = vld [vmem:[%s5343_s0 + $0x4a0] ss:$12 sps:$4 sm:$0xff]  }
 0x1a3   :  { %v3280_v36 = vpop.f32.mrf.mxu0  ;;  %2229 = vmatmul.mubr.bf16.gmra.mxu0 %v4033_v56  ;;  %3803 = vmatprep.mubr.msk.bf16.mxu1 %vm4073_vm0, %v4072_v0  ;;  %v4037_v56 = vld [vmem:[%s5343_s0 + $0x498] ss:$12 sps:$4 sm:$0xff]  }
 0x1a4   :  { %v5068_v57 = vadd.f32 %v3279_v11, %v1256_v25  ;;  %v3673_v42 = vpop.f32.mrf.mxu1  ;;  %2236 = vmatprep.mubr.bf16.mxu0 %v4039_v23  ;;  %v4043_v23 = vld [vmem:[%s5343_s0 + $0x4b4] ss:$12 sps:$4 sm:$0xff]  }
 0x1a5   :  { %v3281_v40 = vpop.f32.mrf.mxu0 }
 0x1a6   :  { %5358 = vst [vmem:[#allocation6_spill] sm:$0xff] %v5068_v57  ;;  %v3282_v9 = vadd.f32 %v3281_v40, %v3280_v36  ;;  %v1264_v27 = vpop.f32.mrf.mxu1 }
 0x1a7   :  { %v3283_v51 = vpop.f32.mrf.mxu0 }
 0x1a8   :  { %v5078_v52 = vadd.f32 %v3282_v9, %v1261_v31  ;;  %v3674_v25 = vpop.f32.mrf.mxu1 }
 0x1a9   :  { %v3284_v11 = vpop.f32.mrf.mxu0 }
 0x1aa   :  { %v3285_v42 = vadd.f32 %v3284_v11, %v3283_v51  ;;  %v1269_v40 = vpop.f32.mrf.mxu1  ;;  %3804 = vmatmul.mubr.bf16.gmra.mxu1 %v4040_v48  ;;  %v4044_v51 = vld [vmem:[%s5343_s0 + $0x4b8] ss:$12 sps:$4 sm:$0xff]  }
 0x1ab   :  { %v3286_v63 = vpop.f32.mrf.mxu0  ;;  %2237 = vmatmul.mubr.bf16.gmra.mxu0 %v4037_v56  ;;  %3807 = vmatprep.mubr.msk.bf16.mxu1 %vm4073_vm0, %v4072_v0  ;;  %v4041_v56 = vld [vmem:[%s5343_s0 + $0x4b0] ss:$12 sps:$4 sm:$0xff]  }
 0x1ac   :  { %v5087_v1 = vadd.f32 %v3285_v42, %v1264_v27  ;;  %v3677_v9 = vpop.f32.mrf.mxu1  ;;  %2244 = vmatprep.mubr.bf16.mxu0 %v4043_v23  ;;  %v4047_v23 = vld [vmem:[%s5343_s0 + $0x4cc] ss:$12 sps:$4 sm:$0xff]  }
 0x1ad   :  { %v3287_v31 = vpop.f32.mrf.mxu0  ;;  %v5384_v44 = vld [vmem:[#allocation6_spill] sm:$0xff] }
 0x1ae   :  { %5359 = vst [vmem:[#allocation7_spill] sm:$0xff] %v5087_v1  ;;  %v3288_v57 = vadd.f32 %v3287_v31, %v3286_v63  ;;  %v1272_v26 = vpop.f32.mrf.mxu1 }
 0x1af   :  { %v3289_v48 = vpop.f32.mrf.mxu0 }
 0x1b0   :  { %v5097_v11 = vadd.f32 %v3288_v57, %v1269_v40  ;;  %v3678_v27 = vpop.f32.mrf.mxu1 }
 0x1b1   :  { %v3290_v42 = vpop.f32.mrf.mxu0 }
 0x1b2   :  { %5360 = vst [vmem:[#allocation8_spill] sm:$0xff] %v5097_v11  ;;  %v3291_v9 = vadd.f32 %v3290_v42, %v3289_v48  ;;  %v1734_v31 = vpop.f32.mrf.mxu1  ;;  %3808 = vmatmul.mubr.bf16.gmra.mxu1 %v4044_v51  ;;  %v4048_v48 = vld [vmem:[%s5343_s0 + $0x4d0] ss:$12 sps:$4 sm:$0xff]  }
 0x1b3   :  { %v3329_v25 = vpop.f32.mrf.mxu0  ;;  %2245 = vmatmul.mubr.bf16.gmra.mxu0 %v4041_v56  ;;  %3811 = vmatprep.mubr.msk.bf16.mxu1 %vm4073_vm0, %v4072_v0  ;;  %v4045_v56 = vld [vmem:[%s5343_s0 + $0x4c8] ss:$12 sps:$4 sm:$0xff]  }
 0x1b4   :  { %v5106_v36 = vadd.f32 %v3291_v9, %v1272_v26  ;;  %v3697_v57 = vpop.f32.mrf.mxu1  ;;  %2252 = vmatprep.mubr.bf16.mxu0 %v4047_v23  ;;  %v5362_v23 = vmax.f32 %v4598_v47, %v4869_v58 }
 0x1b5   :  { %v3330_v40 = vpop.f32.mrf.mxu0 }
 0x1b6   :  { %5361 = vst [vmem:[#allocation9_spill] sm:$0xff] %v5106_v36  ;;  %v3331_v1 = vadd.f32 %v3330_v40, %v3329_v25  ;;  %v1737_v17 = vpop.f32.mrf.mxu1 }
 0x1b7   :  { %v3332_v51 = vpop.f32.mrf.mxu0 }
 0x1b8   :  { %v1735_v0 = vadd.f32 %v3331_v1, %v1734_v31  ;;  %v3698_v26 = vpop.f32.mrf.mxu1 }
 0x1b9   :  { %v3333_v42 = vpop.f32.mrf.mxu0 }
 0x1ba   :  { %v5119_v9 = vmax.f32 %v5362_v23, %v1735_v0  ;;  %v3334_v57 = vadd.f32 %v3333_v42, %v3332_v51  ;;  %v1742_v25 = vpop.f32.mrf.mxu1  ;;  %3812 = vmatmul.mubr.bf16.gmra.mxu1 %v4048_v48  ;;  %v5364_v51 = vmax.f32 %v4613_v62, %v4888_v19  ;;  %v5366_v62 = vmax.f32 %v4641_v13, %v4907_v53 }
 0x1bb   :  { %v3335_v40 = vpop.f32.mrf.mxu0  ;;  %2253 = vmatmul.mubr.bf16.gmra.mxu0 %v4045_v56  ;;  %v5368_v13 = vmax.f32 %v4673_v38, %v4926_v22  ;;  %v5370_v38 = vmax.f32 %v4708_v61, %v4945_v30  ;;  %v5372_v61 = vmax.f32 %v4743_v16, %v4964_v60  ;;  %v5374_v16 = vmax.f32 %v4764_v41, %v4983_v28 }
 0x1bc   :  { %v1738_v27 = vadd.f32 %v3334_v57, %v1737_v17  ;;  %v3701_v63 = vpop.f32.mrf.mxu1  ;;  %v5376_v41 = vmax.f32 %v4779_v59, %v5002_v7  ;;  %v5378_v59 = vmax.f32 %v4794_v10, %v5021_v15  ;;  %v5380_v10 = vmax.f32 %v4809_v34, %v5040_v12 }
 0x1bd   :  { %v3336_v36 = vpop.f32.mrf.mxu0  ;;  %v5382_v34 = vmax.f32 %v4824_v55, %v5059_v39  ;;  %v5386_v55 = vmax.f32 %v4839_v8, %v5078_v52  ;;  %v5390_v8 = vld [vmem:[#allocation4_spill] sm:$0xff] }
 0x1be   :  { %v5124_v11 = vmax.f32 %v5363_v45, %v1738_v27  ;;  %v3337_v1 = vadd.f32 %v3336_v36, %v3335_v40  ;;  %v1745_v31 = vpop.f32.mrf.mxu1  ;;  %v5391_v52 = vld [vmem:[#allocation8_spill] sm:$0xff] }
 0x1bf   :  { %v3338_v26 = vpop.f32.mrf.mxu0 }
 0x1c0   :  { %v1743_v35 = vadd.f32 %v3337_v1, %v1742_v25  ;;  %v3702_v47 = vpop.f32.mrf.mxu1 }
 0x1c1   :  { %v3339_v58 = vpop.f32.mrf.mxu0 }
 0x1c2   :  { %v5129_v48 = vmax.f32 %v5364_v51, %v1743_v35  ;;  %v3340_v56 = vadd.f32 %v3339_v58, %v3338_v26  ;;  %v1750_v17 = vpop.f32.mrf.mxu1 }
 0x1c3   :  { %v3341_v63 = vpop.f32.mrf.mxu0 }
 0x1c4   :  { %v1746_v0 = vadd.f32 %v3340_v56, %v1745_v31  ;;  %v3705_v42 = vpop.f32.mrf.mxu1 }
 0x1c5   :  { %v3342_v23 = vpop.f32.mrf.mxu0 }
 0x1c6   :  { %v5134_v45 = vmax.f32 %v5365_v54, %v1746_v0  ;;  %v3343_v4 = vadd.f32 %v3342_v23, %v3341_v63  ;;  %v1753_v36 = vpop.f32.mrf.mxu1 }
 0x1c7   :  { %v3344_v27 = vpop.f32.mrf.mxu0 }
 0x1c8   :  { %v1751_v57 = vadd.f32 %v3343_v4, %v1750_v17  ;;  %v3706_v25 = vpop.f32.mrf.mxu1 }
 0x1c9   :  { %v3345_v40 = vpop.f32.mrf.mxu0 }
 0x1ca   :  { %v5139_v35 = vmax.f32 %v5366_v62, %v1751_v57  ;;  %v3346_v19 = vadd.f32 %v3345_v40, %v3344_v27  ;;  %v1758_v1 = vpop.f32.mrf.mxu1 }
 0x1cb   :  { %v3347_v31 = vpop.f32.mrf.mxu0 }
 0x1cc   :  { %v1754_v26 = vadd.f32 %v3346_v19, %v1753_v36  ;;  %v3709_v47 = vpop.f32.mrf.mxu1 }
 0x1cd   :  { %v3348_v58 = vpop.f32.mrf.mxu0 }
 0x1ce   :  { %v5144_v37 = vmax.f32 %v5367_v2, %v1754_v26  ;;  %v3349_v51 = vadd.f32 %v3348_v58, %v3347_v31  ;;  %v1761_v56 = vpop.f32.mrf.mxu1 }
 0x1cf   :  { %v3350_v17 = vpop.f32.mrf.mxu0 }
 0x1d0   :  { %v1759_v63 = vadd.f32 %v3349_v51, %v1758_v1  ;;  %v3710_v0 = vpop.f32.mrf.mxu1 }
 0x1d1   :  { %v3351_v42 = vpop.f32.mrf.mxu0 }
 0x1d2   :  { %v5149_v53 = vmax.f32 %v5368_v13, %v1759_v63  ;;  %v3352_v23 = vadd.f32 %v3351_v42, %v3350_v17  ;;  %v1766_v54 = vpop.f32.mrf.mxu1 }
 0x1d3   :  { %v3353_v4 = vpop.f32.mrf.mxu0 }
 0x1d4   :  { %v1762_v36 = vadd.f32 %v3352_v23, %v1761_v56  ;;  %v3713_v27 = vpop.f32.mrf.mxu1 }
 0x1d5   :  { %v3354_v57 = vpop.f32.mrf.mxu0 }
 0x1d6   :  { %v5154_v3 = vmax.f32 %v5369_v21, %v1762_v36  ;;  %v3355_v25 = vadd.f32 %v3354_v57, %v3353_v4  ;;  %v1769_v40 = vpop.f32.mrf.mxu1 }
 0x1d7   :  { %v3356_v62 = vpop.f32.mrf.mxu0 }
 0x1d8   :  { %v1767_v19 = vadd.f32 %v3355_v25, %v1766_v54  ;;  %v3714_v1 = vpop.f32.mrf.mxu1 }
 0x1d9   :  { %v3357_v31 = vpop.f32.mrf.mxu0 }
 0x1da   :  { %v5159_v22 = vmax.f32 %v5370_v38, %v1767_v19  ;;  %v3358_v26 = vadd.f32 %v3357_v31, %v3356_v62  ;;  %v1774_v47 = vpop.f32.mrf.mxu1 }
 0x1db   :  { %v3359_v58 = vpop.f32.mrf.mxu0 }
 0x1dc   :  { %v1770_v2 = vadd.f32 %v3358_v26, %v1769_v40  ;;  %v3717_v51 = vpop.f32.mrf.mxu1 }
 0x1dd   :  { %v3360_v56 = vpop.f32.mrf.mxu0 }
 0x1de   :  { %v5164_v46 = vmax.f32 %v5371_v49, %v1770_v2  ;;  %v3361_v17 = vadd.f32 %v3360_v56, %v3359_v58  ;;  %v1777_v63 = vpop.f32.mrf.mxu1 }
 0x1df   :  { %v3362_v0 = vpop.f32.mrf.mxu0 }
 0x1e0   :  { %v1775_v42 = vadd.f32 %v3361_v17, %v1774_v47  ;;  %v3718_v13 = vpop.f32.mrf.mxu1 }
 0x1e1   :  { %v3363_v23 = vpop.f32.mrf.mxu0 }
 0x1e2   :  { %v5169_v30 = vmax.f32 %v5372_v61, %v1775_v42  ;;  %v3364_v54 = vadd.f32 %v3363_v23, %v3362_v0  ;;  %v1782_v4 = vpop.f32.mrf.mxu1 }
 0x1e3   :  { %v3365_v36 = vpop.f32.mrf.mxu0 }
 0x1e4   :  { %v1778_v27 = vadd.f32 %v3364_v54, %v1777_v63  ;;  %v3721_v57 = vpop.f32.mrf.mxu1 }
 0x1e5   :  { %v3366_v21 = vpop.f32.mrf.mxu0 }
 0x1e6   :  { %v5174_v24 = vmax.f32 %v5373_v5, %v1778_v27  ;;  %v3367_v25 = vadd.f32 %v3366_v21, %v3365_v36  ;;  %v1785_v40 = vpop.f32.mrf.mxu1 }
 0x1e7   :  { %v3368_v62 = vpop.f32.mrf.mxu0 }
 0x1e8   :  { %v1783_v19 = vadd.f32 %v3367_v25, %v1782_v4  ;;  %v3722_v1 = vpop.f32.mrf.mxu1 }
 0x1e9   :  { %v3369_v31 = vpop.f32.mrf.mxu0 }
 0x1ea   :  { %v5179_v60 = vmax.f32 %v5374_v16, %v1783_v19  ;;  %v3370_v38 = vadd.f32 %v3369_v31, %v3368_v62  ;;  %v1790_v26 = vpop.f32.mrf.mxu1 }
 0x1eb   :  { %v3371_v47 = vpop.f32.mrf.mxu0 }
 0x1ec   :  { %v1786_v58 = vadd.f32 %v3370_v38, %v1785_v40  ;;  %v3725_v2 = vpop.f32.mrf.mxu1 }
 0x1ed   :  { %v3372_v51 = vpop.f32.mrf.mxu0 }
 0x1ee   :  { %v5184_v20 = vmax.f32 %v5375_v32, %v1786_v58  ;;  %v3373_v56 = vadd.f32 %v3372_v51, %v3371_v47  ;;  %v1793_v49 = vpop.f32.mrf.mxu1 }
 0x1ef   :  { %v3374_v17 = vpop.f32.mrf.mxu0 }
 0x1f0   :  { %v1791_v63 = vadd.f32 %v3373_v56, %v1790_v26  ;;  %v3726_v0 = vpop.f32.mrf.mxu1 }
 0x1f1   :  { %v3375_v42 = vpop.f32.mrf.mxu0 }
 0x1f2   :  { %v5189_v28 = vmax.f32 %v5376_v41, %v1791_v63  ;;  %v3376_v13 = vadd.f32 %v3375_v42, %v3374_v17  ;;  %v1798_v23 = vpop.f32.mrf.mxu1 }
 0x1f3   :  { %v3377_v61 = vpop.f32.mrf.mxu0 }
 0x1f4   :  { %v1794_v54 = vadd.f32 %v3376_v13, %v1793_v49  ;;  %v3729_v4 = vpop.f32.mrf.mxu1 }
 0x1f5   :  { %v3378_v36 = vpop.f32.mrf.mxu0 }
 0x1f6   :  { %v5194_v6 = vmax.f32 %v5377_v50, %v1794_v54  ;;  %v3379_v27 = vadd.f32 %v3378_v36, %v3377_v61  ;;  %v1801_v57 = vpop.f32.mrf.mxu1 }
 0x1f7   :  { %v3380_v21 = vpop.f32.mrf.mxu0 }
 0x1f8   :  { %v1799_v5 = vadd.f32 %v3379_v27, %v1798_v23  ;;  %v3730_v25 = vpop.f32.mrf.mxu1 }
 0x1f9   :  { %v3381_v40 = vpop.f32.mrf.mxu0  ;;  %v5385_v25 = vmax.f32 %v5383_v43, %v5384_v44 }
 0x1fa   :  { %v5199_v7 = vmax.f32 %v5378_v59, %v1799_v5  ;;  %v3382_v62 = vadd.f32 %v3381_v40, %v3380_v21  ;;  %v1806_v19 = vpop.f32.mrf.mxu1 }
 0x1fb   :  { %v3383_v1 = vpop.f32.mrf.mxu0 }
 0x1fc   :  { %v1802_v31 = vadd.f32 %v3382_v62, %v1801_v57  ;;  %v3733_v16 = vpop.f32.mrf.mxu1 }
 0x1fd   :  { %v3384_v38 = vpop.f32.mrf.mxu0 }
 0x1fe   :  { %v5204_v14 = vmax.f32 %v5379_v29, %v1802_v31  ;;  %v3385_v26 = vadd.f32 %v3384_v38, %v3383_v1  ;;  %v1809_v47 = vpop.f32.mrf.mxu1 }
 0x1ff   :  { %v3386_v58 = vpop.f32.mrf.mxu0 }
 0x200   :  { %v1807_v2 = vadd.f32 %v3385_v26, %v1806_v19  ;;  %v3734_v51 = vpop.f32.mrf.mxu1 }
 0x201   :  { %v3387_v32 = vpop.f32.mrf.mxu0  ;;  %v5387_v51 = vld [vmem:[#allocation3_spill] sm:$0xff] }
 0x202   :  { %v5209_v15 = vmax.f32 %v5380_v10, %v1807_v2  ;;  %v3388_v56 = vadd.f32 %v3387_v32, %v3386_v58  ;;  %v1814_v49 = vpop.f32.mrf.mxu1  ;;  %v5388_v32 = vld [vmem:[#allocation7_spill] sm:$0xff] }
 0x203   :  { %v3389_v17 = vpop.f32.mrf.mxu0  ;;  %v5389_v10 = vmax.f32 %v5387_v51, %v5388_v32 }
 0x204   :  { %v1810_v63 = vadd.f32 %v3388_v56, %v1809_v47  ;;  %v3737_v0 = vpop.f32.mrf.mxu1 }
 0x205   :  { %v3390_v42 = vpop.f32.mrf.mxu0 }
 0x206   :  { %v5214_v33 = vmax.f32 %v5381_v18, %v1810_v63  ;;  %v3391_v41 = vadd.f32 %v3390_v42, %v3389_v17  ;;  %v1817_v13 = vpop.f32.mrf.mxu1 }
 0x207   :  { %v3392_v23 = vpop.f32.mrf.mxu0 }
 0x208   :  { %v1815_v61 = vadd.f32 %v3391_v41, %v1814_v49  ;;  %v3738_v54 = vpop.f32.mrf.mxu1  ;;  %v5392_v41 = vmax.f32 %v5390_v8, %v5391_v52 }
 0x209   :  { %v3393_v4 = vpop.f32.mrf.mxu0 }
 0x20a   :  { %v5219_v12 = vmax.f32 %v5382_v34, %v1815_v61  ;;  %v3394_v36 = vadd.f32 %v3393_v4, %v3392_v23  ;;  %v1822_v50 = vpop.f32.mrf.mxu1 }
 0x20b   :  { %v3395_v27 = vpop.f32.mrf.mxu0 }
 0x20c   :  { %v1818_v57 = vadd.f32 %v3394_v36, %v1817_v13  ;;  %v3741_v21 = vpop.f32.mrf.mxu1 }
 0x20d   :  { %v3396_v5 = vpop.f32.mrf.mxu0 }
 0x20e   :  { %v5224_v40 = vmax.f32 %v5385_v25, %v1818_v57  ;;  %v3397_v59 = vadd.f32 %v3396_v5, %v3395_v27  ;;  %v1825_v62 = vpop.f32.mrf.mxu1  ;;  %v5394_v27 = vld [vmem:[#allocation9_spill] sm:$0xff] }
 0x20f   :  { %v3398_v19 = vpop.f32.mrf.mxu0 }
 0x210   :  { %v1823_v1 = vadd.f32 %v3397_v59, %v1822_v50  ;;  %v3742_v31 = vpop.f32.mrf.mxu1  ;;  %v5393_v50 = vld [vmem:[#allocation5_spill] sm:$0xff] }
 0x211   :  { %v3399_v16 = vpop.f32.mrf.mxu0  ;;  %v5395_v57 = vmax.f32 %v5393_v50, %v5394_v27 }
 0x212   :  { %v5229_v39 = vmax.f32 %v5386_v55, %v1823_v1  ;;  %v3400_v38 = vadd.f32 %v3399_v16, %v3398_v19  ;;  %v1830_v29 = vpop.f32.mrf.mxu1  ;;  %v5250_v16 = vld [vmem:[%s5344_s2] ss:$0 sm:$0xff] }
 0x213   :  { %v3401_v26 = vpop.f32.mrf.mxu0 }
 0x214   :  { %v1826_v47 = vadd.f32 %v3400_v38, %v1825_v62  ;;  %v3745_v58 = vpop.f32.mrf.mxu1 }
 0x215   :  { %v3402_v2 = vpop.f32.mrf.mxu0 }
 0x216   :  { %v5234_v56 = vmax.f32 %v5389_v10, %v1826_v47  ;;  %v3403_v49 = vadd.f32 %v3402_v2, %v3401_v26  ;;  %v1833_v17 = vpop.f32.mrf.mxu1 }
 0x217   :  { %v3404_v63 = vpop.f32.mrf.mxu0 }
 0x218   :  { %v1831_v0 = vadd.f32 %v3403_v49, %v1830_v29  ;;  %v3746_v42 = vpop.f32.mrf.mxu1 }
 0x219   :  { %v3405_v18 = vpop.f32.mrf.mxu0 }
 0x21a   :  { %v5239_v13 = vmax.f32 %v5392_v41, %v1831_v0  ;;  %v3406_v23 = vadd.f32 %v3405_v18, %v3404_v63  ;;  %v2295_v61 = vpop.f32.mrf.mxu1 }
 0x21b   :  { %v3444_v54 = vpop.f32.mrf.mxu0 }
 0x21c   :  { %v1834_v4 = vadd.f32 %v3406_v23, %v1833_v17  ;;  %v3765_v34 = vpop.f32.mrf.mxu1 }
 0x21d   :  { %v3445_v36 = vpop.f32.mrf.mxu0 }
 0x21e   :  { %v5244_v21 = vmax.f32 %v5395_v57, %v1834_v4  ;;  %v3446_v5 = vadd.f32 %v3445_v36, %v3444_v54  ;;  %v2298_v43 = vpop.f32.mrf.mxu1 }
 0x21f   :  { %v3447_v44 = vpop.f32.mrf.mxu0 }
 0x220   :  { %v2296_v25 = vadd.f32 %v3446_v5, %v2295_v61  ;;  %v3766_v59 = vpop.f32.mrf.mxu1 }
 0x221   :  { %v3448_v62 = vpop.f32.mrf.mxu0 }
 0x222   :  { %v2398_v19 = vmax.f32 %v5119_v9, %v2296_v25  ;;  %v3449_v1 = vadd.f32 %v3448_v62, %v3447_v44  ;;  %v2303_v31 = vpop.f32.mrf.mxu1 }
 0x223   :  { %v3450_v55 = vpop.f32.mrf.mxu0 }
 0x224   :  { %v2299_v38 = vadd.f32 %v3449_v1, %v2298_v43  ;;  %v3769_v29 = vpop.f32.mrf.mxu1  ;;  %v2431_v47 = vadd.f32 %v5250_v16, %v2398_v19 }
 0x225   :  { %v3451_v26 = vpop.f32.mrf.mxu0 }
 0x226   :  { %v2399_v58 = vmax.f32 %v5124_v11, %v2299_v38  ;;  %v3452_v2 = vadd.f32 %v3451_v26, %v3450_v55  ;;  %v2306_v51 = vpop.f32.mrf.mxu1  ;;  %v2457_v63 = vmax.f32 %v2431_v47, 0.0 }
 0x227   :  { %v3453_v32 = vpop.f32.mrf.mxu0 }
 0x228   :  { %v2432_v9 = vadd.f32 %v5250_v16, %v2399_v58  ;;  %v2304_v10 = vadd.f32 %v3452_v2, %v2303_v31  ;;  %v3770_v49 = vpop.f32.mrf.mxu1 }
 0x229   :  { %v3454_v17 = vpop.f32.mrf.mxu0 }
 0x22a   :  { %v2458_v0 = vmax.f32 %v2432_v9, 0.0  ;;  %v2400_v42 = vmax.f32 %v5129_v48, %v2304_v10  ;;  %v3455_v18 = vadd.f32 %v3454_v17, %v3453_v32  ;;  %v2311_v8 = vpop.f32.mrf.mxu1 }
 0x22b   :  { %v3456_v52 = vpop.f32.mrf.mxu0 }
 0x22c   :  { %v3009_v41 = vpack.c.bf16 %v2458_v0, %v2457_v63  ;;  %v2307_v23 = vadd.f32 %v3455_v18, %v2306_v51  ;;  %v3773_v61 = vpop.f32.mrf.mxu1  ;;  %v2433_v11 = vadd.f32 %v5250_v16, %v2400_v42 }
 0x22d   :  { %v3457_v54 = vpop.f32.mrf.mxu0 }
 0x22e   :  { %3010 = vst [vmem:[%s5345_s3] sm:$0xff] %v3009_v41   ;;  %v2401_v4 = vmax.f32 %v5134_v45, %v2307_v23  ;;  %v3458_v34 = vadd.f32 %v3457_v54, %v3456_v52  ;;  %v2314_v36 = vpop.f32.mrf.mxu1  ;;  %v2459_v43 = vmax.f32 %v2433_v11, 0.0 }
 0x22f   :  { %v3459_v50 = vpop.f32.mrf.mxu0 }
 0x230   :  { %v2434_v48 = vadd.f32 %v5250_v16, %v2401_v4  ;;  %v2312_v27 = vadd.f32 %v3458_v34, %v2311_v8  ;;  %v3774_v57 = vpop.f32.mrf.mxu1 }
 0x231   :  { %v3460_v5 = vpop.f32.mrf.mxu0 }
 0x232   :  { %v2460_v44 = vmax.f32 %v2434_v48, 0.0  ;;  %v2402_v25 = vmax.f32 %v5139_v35, %v2312_v27  ;;  %v3461_v59 = vadd.f32 %v3460_v5, %v3459_v50  ;;  %v2319_v62 = vpop.f32.mrf.mxu1 }
 0x233   :  { %v3462_v19 = vpop.f32.mrf.mxu0 }
 0x234   :  { %v3014_v1 = vpack.c.bf16 %v2460_v44, %v2459_v43  ;;  %v2315_v31 = vadd.f32 %v3461_v59, %v2314_v36  ;;  %v3777_v55 = vpop.f32.mrf.mxu1  ;;  %v2435_v45 = vadd.f32 %v5250_v16, %v2402_v25 }
 0x235   :  { %v3463_v38 = vpop.f32.mrf.mxu0 }
 0x236   :  { %3071 = vst [vmem:[%s5345_s3 + $0x8] sm:$0xff] %v3014_v1   ;;  %v2403_v29 = vmax.f32 %v5144_v37, %v2315_v31  ;;  %v3464_v26 = vadd.f32 %v3463_v38, %v3462_v19  ;;  %v2322_v47 = vpop.f32.mrf.mxu1  ;;  %v2461_v9 = vmax.f32 %v2435_v45, 0.0 }
 0x237   :  { %v3465_v58 = vpop.f32.mrf.mxu0 }
 0x238   :  { %v2436_v35 = vadd.f32 %v5250_v16, %v2403_v29  ;;  %v2320_v2 = vadd.f32 %v3464_v26, %v2319_v62  ;;  %v3778_v51 = vpop.f32.mrf.mxu1 }
 0x239   :  { %v3466_v32 = vpop.f32.mrf.mxu0 }
 0x23a   :  { %v2462_v10 = vmax.f32 %v2436_v35, 0.0  ;;  %v2404_v49 = vmax.f32 %v5149_v53, %v2320_v2  ;;  %v3467_v17 = vadd.f32 %v3466_v32, %v3465_v58  ;;  %v2327_v63 = vpop.f32.mrf.mxu1 }
 0x23b   :  { %v3468_v0 = vpop.f32.mrf.mxu0 }
 0x23c   :  { %v3019_v42 = vpack.c.bf16 %v2462_v10, %v2461_v9  ;;  %v2323_v18 = vadd.f32 %v3467_v17, %v2322_v47  ;;  %v3781_v8 = vpop.f32.mrf.mxu1  ;;  %v2437_v37 = vadd.f32 %v5250_v16, %v2404_v49 }
 0x23d   :  { %v3469_v52 = vpop.f32.mrf.mxu0 }
 0x23e   :  { %3072 = vst [vmem:[%s5345_s3 + $0x10] sm:$0xff] %v3019_v42   ;;  %v2405_v41 = vmax.f32 %v5154_v3, %v2323_v18  ;;  %v3470_v23 = vadd.f32 %v3469_v52, %v3468_v0  ;;  %v2330_v61 = vpop.f32.mrf.mxu1  ;;  %v2463_v36 = vmax.f32 %v2437_v37, 0.0 }
 0x23f   :  { %v3471_v54 = vpop.f32.mrf.mxu0 }
 0x240   :  { %v2438_v53 = vadd.f32 %v5250_v16, %v2405_v41  ;;  %v2328_v11 = vadd.f32 %v3470_v23, %v2327_v63  ;;  %v3782_v4 = vpop.f32.mrf.mxu1 }
 0x241   :  { %v3472_v34 = vpop.f32.mrf.mxu0 }
 0x242   :  { %v2464_v50 = vmax.f32 %v2438_v53, 0.0  ;;  %v2406_v48 = vmax.f32 %v5159_v22, %v2328_v11  ;;  %v3473_v27 = vadd.f32 %v3472_v34, %v3471_v54  ;;  %v2335_v57 = vpop.f32.mrf.mxu1 }
 0x243   :  { %v3474_v5 = vpop.f32.mrf.mxu0 }
 0x244   :  { %v3024_v43 = vpack.c.bf16 %v2464_v50, %v2463_v36  ;;  %v2331_v44 = vadd.f32 %v3473_v27, %v2330_v61  ;;  %v3785_v25 = vpop.f32.mrf.mxu1  ;;  %v2439_v3 = vadd.f32 %v5250_v16, %v2406_v48 }
 0x245   :  { %v3475_v59 = vpop.f32.mrf.mxu0 }
 0x246   :  { %3073 = vst [vmem:[%s5345_s3 + $0x18] sm:$0xff] %v3024_v43   ;;  %v2407_v62 = vmax.f32 %v5164_v46, %v2331_v44  ;;  %v3476_v19 = vadd.f32 %v3475_v59, %v3474_v5  ;;  %v2338_v1 = vpop.f32.mrf.mxu1  ;;  %v2465_v29 = vmax.f32 %v2439_v3, 0.0 }
 0x247   :  { %v3477_v31 = vpop.f32.mrf.mxu0 }
 0x248   :  { %v2440_v22 = vadd.f32 %v5250_v16, %v2407_v62  ;;  %v2336_v55 = vadd.f32 %v3476_v19, %v2335_v57  ;;  %v3786_v38 = vpop.f32.mrf.mxu1 }
 0x249   :  { %v3478_v45 = vpop.f32.mrf.mxu0 }
 0x24a   :  { %v2466_v26 = vmax.f32 %v2440_v22, 0.0  ;;  %v2408_v47 = vmax.f32 %v5169_v30, %v2336_v55  ;;  %v3479_v58 = vadd.f32 %v3478_v45, %v3477_v31  ;;  %v2343_v35 = vpop.f32.mrf.mxu1 }
 0x24b   :  { %v3480_v2 = vpop.f32.mrf.mxu0 }
 0x24c   :  { %v3029_v51 = vpack.c.bf16 %v2466_v26, %v2465_v29  ;;  %v2339_v32 = vadd.f32 %v3479_v58, %v2338_v1  ;;  %v3789_v9 = vpop.f32.mrf.mxu1  ;;  %v2441_v46 = vadd.f32 %v5250_v16, %v2408_v47 }
 0x24d   :  { %v3481_v10 = vpop.f32.mrf.mxu0 }
 0x24e   :  { %3074 = vst [vmem:[%s5345_s3 + $0x20] sm:$0xff] %v3029_v51   ;;  %v2409_v49 = vmax.f32 %v5174_v24, %v2339_v32  ;;  %v3482_v17 = vadd.f32 %v3481_v10, %v3480_v2  ;;  %v2346_v63 = vpop.f32.mrf.mxu1  ;;  %v2467_v52 = vmax.f32 %v2441_v46, 0.0 }
 0x24f   :  { %v3483_v0 = vpop.f32.mrf.mxu0 }
 0x250   :  { %v2442_v30 = vadd.f32 %v5250_v16, %v2409_v49  ;;  %v2344_v42 = vadd.f32 %v3482_v17, %v2343_v35  ;;  %v3790_v18 = vpop.f32.mrf.mxu1 }
 0x251   :  { %v3484_v8 = vpop.f32.mrf.mxu0 }
 0x252   :  { %v2468_v37 = vmax.f32 %v2442_v30, 0.0  ;;  %v2410_v41 = vmax.f32 %v5179_v60, %v2344_v42  ;;  %v3485_v23 = vadd.f32 %v3484_v8, %v3483_v0  ;;  %v2351_v61 = vpop.f32.mrf.mxu1 }
 0x253   :  { %v3486_v54 = vpop.f32.mrf.mxu0 }
 0x254   :  { %v3034_v53 = vpack.c.bf16 %v2468_v37, %v2467_v52  ;;  %v2347_v11 = vadd.f32 %v3485_v23, %v2346_v63  ;;  %v3793_v4 = vpop.f32.mrf.mxu1  ;;  %v2443_v24 = vadd.f32 %v5250_v16, %v2410_v41 }
 0x255   :  { %v3487_v34 = vpop.f32.mrf.mxu0 }
 0x256   :  { %3075 = vst [vmem:[%s5345_s3 + $0x28] sm:$0xff] %v3034_v53   ;;  %v2411_v36 = vmax.f32 %v5184_v20, %v2347_v11  ;;  %v3488_v50 = vadd.f32 %v3487_v34, %v3486_v54  ;;  %v2354_v48 = vpop.f32.mrf.mxu1  ;;  %v2469_v44 = vmax.f32 %v2443_v24, 0.0 }
 0x257   :  { %v3489_v27 = vpop.f32.mrf.mxu0 }
 0x258   :  { %v2444_v60 = vadd.f32 %v5250_v16, %v2411_v36  ;;  %v2352_v57 = vadd.f32 %v3488_v50, %v2351_v61  ;;  %v3794_v5 = vpop.f32.mrf.mxu1 }
 0x259   :  { %v3490_v43 = vpop.f32.mrf.mxu0 }
 0x25a   :  { %v2470_v25 = vmax.f32 %v2444_v60, 0.0  ;;  %v2412_v59 = vmax.f32 %v5189_v28, %v2352_v57  ;;  %v3491_v3 = vadd.f32 %v3490_v43, %v3489_v27  ;;  %v2359_v62 = vpop.f32.mrf.mxu1 }
 0x25b   :  { %v3492_v19 = vpop.f32.mrf.mxu0 }
 0x25c   :  { %v3039_v1 = vpack.c.bf16 %v2470_v25, %v2469_v44  ;;  %v2355_v31 = vadd.f32 %v3491_v3, %v2354_v48  ;;  %v3797_v22 = vpop.f32.mrf.mxu1  ;;  %v2445_v20 = vadd.f32 %v5250_v16, %v2412_v59 }
 0x25d   :  { %v3493_v55 = vpop.f32.mrf.mxu0 }
 0x25e   :  { %3076 = vst [vmem:[%s5345_s3 + $0x30] sm:$0xff] %v3039_v1   ;;  %v2413_v38 = vmax.f32 %v5194_v6, %v2355_v31  ;;  %v3494_v45 = vadd.f32 %v3493_v55, %v3492_v19  ;;  %v2362_v29 = vpop.f32.mrf.mxu1  ;;  %v2471_v2 = vmax.f32 %v2445_v20, 0.0 }
 0x25f   :  { %v3495_v26 = vpop.f32.mrf.mxu0 }
 0x260   :  { %v2446_v28 = vadd.f32 %v5250_v16, %v2413_v38  ;;  %v2360_v47 = vadd.f32 %v3494_v45, %v2359_v62  ;;  %v3798_v58 = vpop.f32.mrf.mxu1 }
 0x261   :  { %v3496_v35 = vpop.f32.mrf.mxu0 }
 0x262   :  { %v2472_v51 = vmax.f32 %v2446_v28, 0.0  ;;  %v2414_v32 = vmax.f32 %v5199_v7, %v2360_v47  ;;  %v3497_v9 = vadd.f32 %v3496_v35, %v3495_v26  ;;  %v2367_v10 = vpop.f32.mrf.mxu1 }
 0x263   :  { %v3498_v46 = vpop.f32.mrf.mxu0 }
 0x264   :  { %v3044_v49 = vpack.c.bf16 %v2472_v51, %v2471_v2  ;;  %v2363_v17 = vadd.f32 %v3497_v9, %v2362_v29  ;;  %v3801_v63 = vpop.f32.mrf.mxu1  ;;  %v2447_v6 = vadd.f32 %v5250_v16, %v2414_v32 }
 0x265   :  { %v3499_v0 = vpop.f32.mrf.mxu0 }
 0x266   :  { %3077 = vst [vmem:[%s5345_s3 + $0x38] sm:$0xff] %v3044_v49   ;;  %v2415_v30 = vmax.f32 %v5204_v14, %v2363_v17  ;;  %v3500_v42 = vadd.f32 %v3499_v0, %v3498_v46  ;;  %v2370_v18 = vpop.f32.mrf.mxu1  ;;  %v2473_v23 = vmax.f32 %v2447_v6, 0.0 }
 0x267   :  { %v3501_v8 = vpop.f32.mrf.mxu0 }
 0x268   :  { %v2448_v7 = vadd.f32 %v5250_v16, %v2415_v30  ;;  %v2368_v52 = vadd.f32 %v3500_v42, %v2367_v10  ;;  %v3802_v37 = vpop.f32.mrf.mxu1 }
 0x269   :  { %v3502_v41 = vpop.f32.mrf.mxu0 }
 0x26a   :  { %v2474_v61 = vmax.f32 %v2448_v7, 0.0  ;;  %v2416_v54 = vmax.f32 %v5209_v15, %v2368_v52  ;;  %v3503_v53 = vadd.f32 %v3502_v41, %v3501_v8  ;;  %v2375_v11 = vpop.f32.mrf.mxu1 }
 0x26b   :  { %v3504_v4 = vpop.f32.mrf.mxu0 }
 0x26c   :  { %v3049_v34 = vpack.c.bf16 %v2474_v61, %v2473_v23  ;;  %v2371_v24 = vadd.f32 %v3503_v53, %v2370_v18  ;;  %v3805_v36 = vpop.f32.mrf.mxu1  ;;  %v2449_v14 = vadd.f32 %v5250_v16, %v2416_v54 }
 0x26d   :  { %v3505_v50 = vpop.f32.mrf.mxu0 }
 0x26e   :  { %3078 = vst [vmem:[%s5345_s3 + $0x40] sm:$0xff] %v3049_v34   ;;  %v2417_v48 = vmax.f32 %v5214_v33, %v2371_v24  ;;  %v3506_v27 = vadd.f32 %v3505_v50, %v3504_v4  ;;  %v2378_v60 = vpop.f32.mrf.mxu1  ;;  %v2475_v25 = vmax.f32 %v2449_v14, 0.0 }
 0x26f   :  { %v3507_v57 = vpop.f32.mrf.mxu0 }
 0x270   :  { %v2450_v15 = vadd.f32 %v5250_v16, %v2417_v48  ;;  %v2376_v5 = vadd.f32 %v3506_v27, %v2375_v11  ;;  %v3806_v43 = vpop.f32.mrf.mxu1 }
 0x271   :  { %v3508_v44 = vpop.f32.mrf.mxu0 }
 0x272   :  { %v2476_v59 = vmax.f32 %v2450_v15, 0.0  ;;  %v2418_v3 = vmax.f32 %v5219_v12, %v2376_v5  ;;  %v3509_v62 = vadd.f32 %v3508_v44, %v3507_v57  ;;  %v2383_v19 = vpop.f32.mrf.mxu1 }
 0x273   :  { %v3510_v1 = vpop.f32.mrf.mxu0 }
 0x274   :  { %v3054_v31 = vpack.c.bf16 %v2476_v59, %v2475_v25  ;;  %v2379_v22 = vadd.f32 %v3509_v62, %v2378_v60  ;;  %v3809_v55 = vpop.f32.mrf.mxu1  ;;  %v2451_v33 = vadd.f32 %v5250_v16, %v2418_v3 }
 0x275   :  { %v3511_v20 = vpop.f32.mrf.mxu0 }
 0x276   :  { %3079 = vst [vmem:[%s5345_s3 + $0x48] sm:$0xff] %v3054_v31   ;;  %v2419_v38 = vmax.f32 %v5224_v40, %v2379_v22  ;;  %v3512_v45 = vadd.f32 %v3511_v20, %v3510_v1  ;;  %v2386_v29 = vpop.f32.mrf.mxu1  ;;  %v2477_v35 = vmax.f32 %v2451_v33, 0.0 }
 0x277   :  { %v3513_v26 = vpop.f32.mrf.mxu0 }
 0x278   :  { %v2452_v12 = vadd.f32 %v5250_v16, %v2419_v38  ;;  %v2384_v28 = vadd.f32 %v3512_v45, %v2383_v19  ;;  %v3810_v47 = vpop.f32.mrf.mxu1 }
 0x279   :  { %v3514_v58 = vpop.f32.mrf.mxu0 }
 0x27a   :  { %v2478_v2 = vmax.f32 %v2452_v12, 0.0  ;;  %v2420_v51 = vmax.f32 %v5229_v39, %v2384_v28  ;;  %v3515_v32 = vadd.f32 %v3514_v58, %v3513_v26  ;;  %v2391_v9 = vpop.f32.mrf.mxu1 }
 0x27b   :  { %v3516_v10 = vpop.f32.mrf.mxu0 }
 0x27c   :  { %v3059_v46 = vpack.c.bf16 %v2478_v2, %v2477_v35  ;;  %v2387_v49 = vadd.f32 %v3515_v32, %v2386_v29  ;;  %v3813_v17 = vpop.f32.mrf.mxu1  ;;  %v2453_v40 = vadd.f32 %v5250_v16, %v2420_v51 }
 0x27d   :  { %v3517_v63 = vpop.f32.mrf.mxu0 }
 0x27e   :  { %3080 = vst [vmem:[%s5345_s3 + $0x50] sm:$0xff] %v3059_v46   ;;  %v2421_v0 = vmax.f32 %v5234_v56, %v2387_v49  ;;  %v3518_v6 = vadd.f32 %v3517_v63, %v3516_v10  ;;  %v2394_v30 = vpop.f32.mrf.mxu1  ;;  %v2479_v52 = vmax.f32 %v2453_v40, 0.0 }
 0x27f   :  { %v3519_v42 = vpop.f32.mrf.mxu0 }
 0x280   :  { %v2454_v39 = vadd.f32 %v5250_v16, %v2421_v0  ;;  %v2392_v18 = vadd.f32 %v3518_v6, %v2391_v9  ;;  %v3814_v8 = vpop.f32.mrf.mxu1 }
 0x281   :  { %v3520_v7 = vpop.f32.mrf.mxu0 }
 0x282   :  { %v2480_v37 = vmax.f32 %v2454_v39, 0.0  ;;  %v2422_v41 = vmax.f32 %v5239_v13, %v2392_v18  ;;  %v3521_v23 = vadd.f32 %v3520_v7, %v3519_v42 }
 0x284   :  { %v3064_v61 = vpack.c.bf16 %v2480_v37, %v2479_v52  ;;  %v2395_v54 = vadd.f32 %v3521_v23, %v2394_v30  ;;  %v2455_v56 = vadd.f32 %v5250_v16, %v2422_v41 }
 0x286   :  { %3081 = vst [vmem:[%s5345_s3 + $0x58] sm:$0xff] %v3064_v61   ;;  %v2423_v53 = vmax.f32 %v5244_v21, %v2395_v54  ;;  %v2481_v4 = vmax.f32 %v2455_v56, 0.0 }
 0x288   :  { %v2456_v11 = vadd.f32 %v5250_v16, %v2423_v53 }
 0x28a   :  { %v2482_v34 = vmax.f32 %v2456_v11, 0.0 }
 0x28c   :  { %v3069_v24 = vpack.c.bf16 %v2482_v34, %v2481_v4 }
 0x28e   :  { %3082 = vst [vmem:[%s5345_s3 + $0x60] sm:$0xff] %v3069_v24  }

// kernel: dwg_keypoints_forward.6
= control target key start
LH: loop header
LB: loop body
LE: loop exit
PB: predicated region body
PF: predicated region fallthrough
CT: control target
= control target key end

     0   :  { %s2419_s1 = inlined_call_operand.vmem [shape: bf16[640,128], index: 1, kind: input, shape index: {}]   ;;  %s2420_s0 = inlined_call_operand.vmem [shape: bf16[4,32,640], index: 0, kind: input, shape index: {}]   ;;  %s2421_s2 = inlined_call_operand.vmem [shape: f32[1,128], index: 2, kind: input, shape index: {}]   ;;  %s2422_s3 = inlined_call_operand.vmem [shape: bf16[32,128], index: 3, kind: output, shape index: {}]  }
   0x1   :  { %v1832_v0 = vld [vmem:[%s2419_s1 + $0x78] sm:$0xff]   ;;  %v1855_v4 = vld [vmem:[%s2419_s1 + $0x70] sm:$0xff]   ;;  %v1879_v8 = vld [vmem:[%s2419_s1 + $0x68] sm:$0xff]  }
   0x2   :  { %v1837_v1 = vld [vmem:[%s2419_s1 + $0xf8] sm:$0xff]   ;;  %1369 = vmatprep.subr.bf16.mxu0 %v1832_v0  ;;  %v1861_v5 = vld [vmem:[%s2419_s1 + $0xf0] sm:$0xff]   ;;  %v1885_v9 = vld [vmem:[%s2419_s1 + $0xe8] sm:$0xff]  }
   0x3   :  { %v1843_v2 = vld [vmem:[%s2419_s1 + $0x38] sm:$0xff]   ;;  %1397 = vmatprep.subr.bf16.mxu1 %v1837_v1  ;;  %v1867_v6 = vld [vmem:[%s2419_s1 + $0x30] sm:$0xff]   ;;  %v1891_v10 = vld [vmem:[%s2419_s1 + $0x28] sm:$0xff]  }
   0x4   :  { %v1849_v3 = vld [vmem:[%s2419_s1 + $0xb8] sm:$0xff]   ;;  %1370 = vmatpush3.bf16.msra.mxu0 %v1843_v2  ;;  %v1873_v7 = vld [vmem:[%s2419_s1 + $0xb0] sm:$0xff]   ;;  %v1897_v11 = vld [vmem:[%s2419_s1 + $0xa8] sm:$0xff]  }
   0x5   :  { %1398 = vmatpush3.bf16.msra.mxu1 %v1849_v3  ;;  %1371 = vmatprep.subr.bf16.mxu0 %v1855_v4  ;;  %v1903_v12 = vld [vmem:[%s2419_s1 + $0x60] sm:$0xff]   ;;  %v1927_v16 = vld [vmem:[%s2419_s1 + $0x58] sm:$0xff]   ;;  %v1951_v20 = vld [vmem:[%s2419_s1 + $0x50] sm:$0xff]  }
   0x6   :  { %1399 = vmatprep.subr.bf16.mxu1 %v1861_v5  ;;  %v1909_v13 = vld [vmem:[%s2419_s1 + $0xe0] sm:$0xff]   ;;  %v1933_v17 = vld [vmem:[%s2419_s1 + $0xd8] sm:$0xff]   ;;  %v1957_v21 = vld [vmem:[%s2419_s1 + $0xd0] sm:$0xff]  }
   0x7   :  { %v1915_v14 = vld [vmem:[%s2419_s1 + $0x20] sm:$0xff]   ;;  %v1939_v18 = vld [vmem:[%s2419_s1 + $0x18] sm:$0xff]   ;;  %v1963_v22 = vld [vmem:[%s2419_s1 + $0x10] sm:$0xff]  }
   0x8   :  { %1372 = vmatpush3.bf16.msra.mxu0 %v1867_v6  ;;  %v1921_v15 = vld [vmem:[%s2419_s1 + $0xa0] sm:$0xff]   ;;  %v1945_v19 = vld [vmem:[%s2419_s1 + $0x98] sm:$0xff]   ;;  %v1969_v23 = vld [vmem:[%s2419_s1 + $0x90] sm:$0xff]  }
   0x9   :  { %1400 = vmatpush3.bf16.msra.mxu1 %v1873_v7  ;;  %1373 = vmatprep.subr.bf16.mxu0 %v1879_v8  ;;  %v1975_v24 = vld [vmem:[%s2419_s1 + $0x48] sm:$0xff]   ;;  %v1999_v28 = vld [vmem:[%s2419_s1 + $0x40] sm:$0xff]   ;;  %v2037_v36 = vld [vmem:[%s2419_s1 + $0x138] sm:$0xff]  }
   0xa   :  { %1401 = vmatprep.subr.bf16.mxu1 %v1885_v9  ;;  %v1981_v25 = vld [vmem:[%s2419_s1 + $0xc8] sm:$0xff]   ;;  %v2005_v29 = vld [vmem:[%s2419_s1 + $0xc0] sm:$0xff]   ;;  %v2042_v37 = vld [vmem:[%s2419_s1 + $0x130] sm:$0xff]  }
   0xb   :  { %v1987_v26 = vld [vmem:[%s2419_s1 + $0x8] sm:$0xff]   ;;  %v2011_v30 = vld [vmem:[%s2419_s1] sm:$0xff]   ;;  %v2085_v45 = vld [vmem:[%s2419_s1 + $0x118] sm:$0xff]  }
   0xc   :  { %1374 = vmatpush3.bf16.msra.mxu0 %v1891_v10  ;;  %v1993_v27 = vld [vmem:[%s2419_s1 + $0x88] sm:$0xff]   ;;  %v2017_v31 = vld [vmem:[%s2419_s1 + $0x80] sm:$0xff]   ;;  %v2097_v47 = vld [vmem:[%s2419_s1 + $0x110] sm:$0xff]  }
   0xd   :  { %1402 = vmatpush3.bf16.msra.mxu1 %v1897_v11  ;;  %1375 = vmatprep.subr.bf16.mxu0 %v1903_v12  ;;  %v1745_v32 = vld [vmem:[%s2420_s0] ss:$20 sps:$4 sm:$0xff]   ;;  %v1747_v33 = vld [vmem:[%s2420_s0 + $0x4] ss:$20 sps:$4 sm:$0xff]   ;;  %v1748_v34 = vld [vmem:[%s2420_s0 + $0x8] ss:$20 sps:$4 sm:$0xff]  }
   0xe   :  { %1403 = vmatprep.subr.bf16.mxu1 %v1909_v13  ;;  %v1750_v35 = vld [vmem:[%s2420_s0 + $0xc] ss:$20 sps:$4 sm:$0xff]   ;;  %431 = vmatprep.mubr.bf16.mxu0 %v1747_v33  ;;  %v1758_v40 = vld [vmem:[%s2420_s0 + $0x34] ss:$20 sps:$4 sm:$0xff]   ;;  %v1761_v42 = vld [vmem:[%s2420_s0 + $0x30] ss:$20 sps:$4 sm:$0xff]  }
   0xf   :  { %480 = vmatprep.mubr.bf16.mxu1 %v1750_v35  ;;  %v2052_v38 = vld [vmem:[%s2419_s1 + $0x128] sm:$0xff]   ;;  %v2073_v43 = vld [vmem:[%s2419_s1 + $0x120] sm:$0xff]   ;;  %v1770_v52 = vld [vmem:[%s2420_s0 + $0x7c] ss:$20 sps:$4 sm:$0xff]  }
  0x10   :  { %1376 = vmatpush3.bf16.msra.mxu0 %v1915_v14  ;;  %v1756_v39 = vld [vmem:[%s2420_s0 + $0x2c] ss:$20 sps:$4 sm:$0xff]   ;;  %v1760_v41 = vld [vmem:[%s2420_s0 + $0x28] ss:$20 sps:$4 sm:$0xff]   ;;  %v1765_v44 = vld [vmem:[%s2420_s0 + $0x10] ss:$20 sps:$4 sm:$0xff]  }
  0x11   :  { %1404 = vmatpush3.bf16.msra.mxu1 %v1921_v15  ;;  %1377 = vmatprep.subr.bf16.mxu0 %v1927_v16  ;;  %v1769_v46 = vld [vmem:[%s2420_s0 + $0x54] ss:$20 sps:$4 sm:$0xff]   ;;  %v2115_v49 = vld [vmem:[%s2419_s1 + $0x100] sm:$0xff]   ;;  %v1766_v50 = vld [vmem:[%s2420_s0 + $0x38] ss:$20 sps:$4 sm:$0xff]  }
  0x12   :  { %1405 = vmatprep.subr.bf16.mxu1 %v1933_v17  ;;  %v2106_v48 = vld [vmem:[%s2419_s1 + $0x108] sm:$0xff]   ;;  %v1767_v51 = vld [vmem:[%s2420_s0 + $0x50] ss:$20 sps:$4 sm:$0xff]   ;;  %v1776_v55 = vld [vmem:[%s2420_s0 + $0x60] ss:$20 sps:$4 sm:$0xff]  }
  0x13   :  { %v1775_v53 = vld [vmem:[%s2420_s0 + $0x5c] ss:$20 sps:$4 sm:$0xff]   ;;  %v1772_v54 = vld [vmem:[%s2420_s0 + $0x78] ss:$20 sps:$4 sm:$0xff]   ;;  %v1780_v60 = vld [vmem:[%s2420_s0 + $0x80] ss:$20 sps:$4 sm:$0xff]  }
  0x14   :  { %1378 = vmatpush3.bf16.msra.mxu0 %v1939_v18  ;;  %v1773_v56 = vld [vmem:[%s2420_s0 + $0x58] ss:$20 sps:$4 sm:$0xff]   ;;  %v1777_v57 = vld [vmem:[%s2420_s0 + $0x88] ss:$20 sps:$4 sm:$0xff]   ;;  %v1781_v62 = vld [vmem:[%s2420_s0 + $0xa0] ss:$20 sps:$4 sm:$0xff]  }
  0x15   :  { %1406 = vmatpush3.bf16.msra.mxu1 %v1945_v19  ;;  %1379 = vmatprep.subr.bf16.mxu0 %v1951_v20  ;;  %v1778_v58 = vld [vmem:[%s2420_s0 + $0x84] ss:$20 sps:$4 sm:$0xff]   ;;  %v1786_v59 = vld [vmem:[%s2420_s0 + $0xac] ss:$20 sps:$4 sm:$0xff]   ;;  %v1784_v63 = vld [vmem:[%s2420_s0 + $0xa8] ss:$20 sps:$4 sm:$0xff]  }
  0x16   :  { %1407 = vmatprep.subr.bf16.mxu1 %v1957_v21  ;;  %v1783_v61 = vld [vmem:[%s2420_s0 + $0xa4] ss:$20 sps:$4 sm:$0xff]   ;;  %v1789_v33 = vld [vmem:[%s2420_s0 + $0xd4] ss:$20 sps:$4 sm:$0xff]  }
  0x18   :  { %1380 = vmatpush3.bf16.msra.mxu0 %v1963_v22 }
  0x19   :  { %1408 = vmatpush3.bf16.msra.mxu1 %v1969_v23  ;;  %1381 = vmatprep.subr.bf16.mxu0 %v1975_v24 }
  0x1a   :  { %1409 = vmatprep.subr.bf16.mxu1 %v1981_v25 }
  0x1c   :  { %1382 = vmatpush3.bf16.msra.mxu0 %v1987_v26 }
  0x1d   :  { %1410 = vmatpush3.bf16.msra.mxu1 %v1993_v27  ;;  %1383 = vmatprep.subr.bf16.mxu0 %v1999_v28 }
  0x1e   :  { %1411 = vmatprep.subr.bf16.mxu1 %v2005_v29 }
  0x20   :  { %1384 = vmatpush3.bf16.msra.mxu0 %v2011_v30 }
  0x21   :  { %1412 = vmatpush3.bf16.msra.mxu1 %v2017_v31  ;;  %1633 = vmatprep.subr.bf16.mxu0 %v2037_v36 }
  0x22   :  { %1435 = vmatprep.subr.bf16.mxu1 %v1832_v0 }
  0x23   :  { %432 = vmatmul.mubr.bf16.vlgmr.msra.gmra.mxu0 %v1745_v32  ;;  %v1787_v32 = vld [vmem:[%s2420_s0 + $0xcc] ss:$20 sps:$4 sm:$0xff]  }
  0x24   :  { %481 = vmatmul.mubr.bf16.vlgmr.msra.gmra.mxu1 %v1748_v34  ;;  %1634 = vmatpush3.bf16.msra.mxu0 %v2037_v36  ;;  %v1792_v34 = vld [vmem:[%s2420_s0 + $0xd0] ss:$20 sps:$4 sm:$0xff]  }
  0x25   :  { %1436 = vmatpush3.bf16.msra.mxu1 %v1843_v2  ;;  %1635 = vmatprep.subr.bf16.mxu0 %v2042_v37 }
  0x26   :  { %1437 = vmatprep.subr.bf16.mxu1 %v1855_v4  ;;  %439 = vmatprep.mubr.bf16.mxu0 %v1756_v39 }
  0x27   :  { %488 = vmatprep.mubr.bf16.mxu1 %v1758_v40 }
  0x28   :  { %1636 = vmatpush3.bf16.msra.mxu0 %v2042_v37 }
  0x29   :  { %1438 = vmatpush3.bf16.msra.mxu1 %v1867_v6  ;;  %1637 = vmatprep.subr.bf16.mxu0 %v2052_v38 }
  0x2a   :  { %1439 = vmatprep.subr.bf16.mxu1 %v1879_v8 }
  0x2b   :  { %440 = vmatmul.mubr.bf16.gmra.mxu0 %v1760_v41 }
  0x2c   :  { %489 = vmatmul.mubr.bf16.gmra.mxu1 %v1761_v42  ;;  %1638 = vmatpush3.bf16.msra.mxu0 %v2052_v38 }
  0x2d   :  { %1440 = vmatpush3.bf16.msra.mxu1 %v1891_v10  ;;  %1639 = vmatprep.subr.bf16.mxu0 %v2073_v43 }
  0x2e   :  { %1441 = vmatprep.subr.bf16.mxu1 %v1903_v12  ;;  %1649 = vmatprep.mubr.bf16.mxu0 %v1765_v44 }
  0x2f   :  { %643 = vmatprep.mubr.bf16.mxu1 %v1769_v46 }
  0x30   :  { %1640 = vmatpush3.bf16.msra.mxu0 %v2073_v43 }
  0x31   :  { %1442 = vmatpush3.bf16.msra.mxu1 %v1915_v14  ;;  %1641 = vmatprep.subr.bf16.mxu0 %v2085_v45 }
  0x32   :  { %1443 = vmatprep.subr.bf16.mxu1 %v1927_v16 }
  0x34   :  { %1642 = vmatpush3.bf16.msra.mxu0 %v2085_v45 }
  0x35   :  { %1444 = vmatpush3.bf16.msra.mxu1 %v1939_v18  ;;  %1643 = vmatprep.subr.bf16.mxu0 %v2097_v47 }
  0x36   :  { %1445 = vmatprep.subr.bf16.mxu1 %v1951_v20 }
  0x38   :  { %1644 = vmatpush3.bf16.msra.mxu0 %v2097_v47 }
  0x39   :  { %1446 = vmatpush3.bf16.msra.mxu1 %v1963_v22  ;;  %1645 = vmatprep.subr.bf16.mxu0 %v2106_v48 }
  0x3a   :  { %1447 = vmatprep.subr.bf16.mxu1 %v1975_v24 }
  0x3c   :  { %1646 = vmatpush3.bf16.msra.mxu0 %v2106_v48 }
  0x3d   :  { %1448 = vmatpush3.bf16.msra.mxu1 %v1987_v26  ;;  %1647 = vmatprep.subr.bf16.mxu0 %v2115_v49 }
  0x3e   :  { %1449 = vmatprep.subr.bf16.mxu1 %v1999_v28 }
  0x40   :  { %1648 = vmatpush3.bf16.msra.mxu0 %v2115_v49 }
  0x41   :  { %1450 = vmatpush3.bf16.msra.mxu1 %v2011_v30  ;;  %1463 = vmatprep.subr.bf16.mxu0 %v1837_v1 }
  0x42   :  { %1653 = vmatprep.subr.bf16.mxu1 %v2037_v36 }
  0x43   :  { %1650 = vmatmul.mubr.bf16.vlgmr.msra.gmra.mxu0 %v1766_v50 }
  0x44   :  { %644 = vmatmul.mubr.bf16.vlgmr.msra.gmra.mxu1 %v1767_v51  ;;  %1464 = vmatpush3.bf16.msra.mxu0 %v1849_v3 }
  0x45   :  { %1654 = vmatpush3.bf16.msra.mxu1 %v2037_v36  ;;  %1465 = vmatprep.subr.bf16.mxu0 %v1861_v5 }
  0x46   :  { %1655 = vmatprep.subr.bf16.mxu1 %v2042_v37  ;;  %651 = vmatprep.mubr.bf16.mxu1 %v1770_v52 }
  0x47   :  { %692 = vmatprep.mubr.bf16.mxu0 %v1775_v53 }
  0x48   :  { %1466 = vmatpush3.bf16.msra.mxu0 %v1873_v7 }
  0x49   :  { %1656 = vmatpush3.bf16.msra.mxu1 %v2042_v37  ;;  %1467 = vmatprep.subr.bf16.mxu0 %v1885_v9 }
  0x4a   :  { %1657 = vmatprep.subr.bf16.mxu1 %v2052_v38 }
  0x4c   :  { %652 = vmatmul.mubr.bf16.gmra.mxu1 %v1772_v54  ;;  %1468 = vmatpush3.bf16.msra.mxu0 %v1897_v11 }
  0x4d   :  { %1658 = vmatpush3.bf16.msra.mxu1 %v2052_v38  ;;  %1469 = vmatprep.subr.bf16.mxu0 %v1909_v13 }
  0x4e   :  { %1659 = vmatprep.subr.bf16.mxu1 %v2073_v43  ;;  %1669 = vmatprep.mubr.bf16.mxu1 %v1776_v55 }
  0x50   :  { %1470 = vmatpush3.bf16.msra.mxu0 %v1921_v15 }
  0x51   :  { %1660 = vmatpush3.bf16.msra.mxu1 %v2073_v43  ;;  %1471 = vmatprep.subr.bf16.mxu0 %v1933_v17 }
  0x52   :  { %1661 = vmatprep.subr.bf16.mxu1 %v2085_v45 }
  0x54   :  { %1472 = vmatpush3.bf16.msra.mxu0 %v1945_v19 }
  0x55   :  { %1662 = vmatpush3.bf16.msra.mxu1 %v2085_v45  ;;  %1473 = vmatprep.subr.bf16.mxu0 %v1957_v21 }
  0x56   :  { %1663 = vmatprep.subr.bf16.mxu1 %v2097_v47 }
  0x58   :  { %1474 = vmatpush3.bf16.msra.mxu0 %v1969_v23 }
  0x59   :  { %1664 = vmatpush3.bf16.msra.mxu1 %v2097_v47  ;;  %1475 = vmatprep.subr.bf16.mxu0 %v1981_v25 }
  0x5a   :  { %1665 = vmatprep.subr.bf16.mxu1 %v2106_v48 }
  0x5c   :  { %1476 = vmatpush3.bf16.msra.mxu0 %v1993_v27 }
  0x5d   :  { %1666 = vmatpush3.bf16.msra.mxu1 %v2106_v48  ;;  %1477 = vmatprep.subr.bf16.mxu0 %v2005_v29 }
  0x5e   :  { %1667 = vmatprep.subr.bf16.mxu1 %v2115_v49 }
  0x60   :  { %1478 = vmatpush3.bf16.msra.mxu0 %v2017_v31 }
  0x61   :  { %1668 = vmatpush3.bf16.msra.mxu1 %v2115_v49  ;;  %1501 = vmatprep.subr.bf16.mxu0 %v1832_v0 }
  0x62   :  { %1529 = vmatprep.subr.bf16.mxu1 %v1837_v1 }
  0x63   :  { %693 = vmatmul.mubr.bf16.vlgmr.msra.gmra.mxu0 %v1773_v56 }
  0x64   :  { %1670 = vmatmul.mubr.bf16.vlgmr.msra.gmra.mxu1 %v1777_v57  ;;  %1502 = vmatpush3.bf16.msra.mxu0 %v1843_v2 }
  0x65   :  { %1530 = vmatpush3.bf16.msra.mxu1 %v1849_v3  ;;  %1503 = vmatprep.subr.bf16.mxu0 %v1855_v4 }
  0x66   :  { %1531 = vmatprep.subr.bf16.mxu1 %v1861_v5  ;;  %700 = vmatprep.mubr.bf16.mxu0 %v1778_v58 }
  0x67   :  { %908 = vmatprep.mubr.bf16.mxu1 %v1786_v59 }
  0x68   :  { %1504 = vmatpush3.bf16.msra.mxu0 %v1867_v6 }
  0x69   :  { %1532 = vmatpush3.bf16.msra.mxu1 %v1873_v7  ;;  %1505 = vmatprep.subr.bf16.mxu0 %v1879_v8 }
  0x6a   :  { %1533 = vmatprep.subr.bf16.mxu1 %v1885_v9 }
  0x6b   :  { %701 = vmatmul.mubr.bf16.gmra.mxu0 %v1780_v60 }
  0x6c   :  { %1506 = vmatpush3.bf16.msra.mxu0 %v1891_v10  ;;  %859 = vmatprep.mubr.bf16.mxu0 %v1783_v61 }
  0x6d   :  { %1534 = vmatpush3.bf16.msra.mxu1 %v1897_v11  ;;  %1507 = vmatprep.subr.bf16.mxu0 %v1903_v12 }
  0x6e   :  { %1535 = vmatprep.subr.bf16.mxu1 %v1909_v13 }
  0x70   :  { %1508 = vmatpush3.bf16.msra.mxu0 %v1915_v14 }
  0x71   :  { %1536 = vmatpush3.bf16.msra.mxu1 %v1921_v15  ;;  %1509 = vmatprep.subr.bf16.mxu0 %v1927_v16 }
  0x72   :  { %1537 = vmatprep.subr.bf16.mxu1 %v1933_v17 }
  0x74   :  { %1510 = vmatpush3.bf16.msra.mxu0 %v1939_v18 }
  0x75   :  { %1538 = vmatpush3.bf16.msra.mxu1 %v1945_v19  ;;  %1511 = vmatprep.subr.bf16.mxu0 %v1951_v20 }
  0x76   :  { %1539 = vmatprep.subr.bf16.mxu1 %v1957_v21 }
  0x78   :  { %1512 = vmatpush3.bf16.msra.mxu0 %v1963_v22 }
  0x79   :  { %1540 = vmatpush3.bf16.msra.mxu1 %v1969_v23  ;;  %1513 = vmatprep.subr.bf16.mxu0 %v1975_v24 }
  0x7a   :  { %1541 = vmatprep.subr.bf16.mxu1 %v1981_v25 }
  0x7c   :  { %1514 = vmatpush3.bf16.msra.mxu0 %v1987_v26 }
  0x7d   :  { %1542 = vmatpush3.bf16.msra.mxu1 %v1993_v27  ;;  %1515 = vmatprep.subr.bf16.mxu0 %v1999_v28 }
  0x7e   :  { %1543 = vmatprep.subr.bf16.mxu1 %v2005_v29 }
  0x80   :  { %1516 = vmatpush3.bf16.msra.mxu0 %v2011_v30 }
  0x81   :  { %1544 = vmatpush3.bf16.msra.mxu1 %v2017_v31  ;;  %1673 = vmatprep.subr.bf16.mxu0 %v2037_v36 }
  0x82   :  { %1567 = vmatprep.subr.bf16.mxu1 %v1832_v0  ;;  %v1791_v0 = vld [vmem:[%s2420_s0 + $0xc8] ss:$20 sps:$4 sm:$0xff]  }
  0x83   :  { %860 = vmatmul.mubr.bf16.vlgmr.msra.gmra.mxu0 %v1781_v62 }
  0x84   :  { %909 = vmatmul.mubr.bf16.vlgmr.msra.gmra.mxu1 %v1784_v63  ;;  %1674 = vmatpush3.bf16.msra.mxu0 %v2037_v36 }
  0x85   :  { %1568 = vmatpush3.bf16.msra.mxu1 %v1843_v2  ;;  %1675 = vmatprep.subr.bf16.mxu0 %v2042_v37  ;;  %v1793_v2 = vld [vmem:[%s2420_s0 + $0xb0] ss:$20 sps:$4 sm:$0xff]  }
  0x86   :  { %1569 = vmatprep.subr.bf16.mxu1 %v1855_v4  ;;  %867 = vmatprep.mubr.bf16.mxu0 %v1787_v32  ;;  %v1797_v4 = vld [vmem:[%s2420_s0 + $0xf4] ss:$20 sps:$4 sm:$0xff]  }
  0x87   :  { %916 = vmatprep.mubr.bf16.mxu1 %v1789_v33 }
  0x88   :  { %1676 = vmatpush3.bf16.msra.mxu0 %v2042_v37 }
  0x89   :  { %1570 = vmatpush3.bf16.msra.mxu1 %v1867_v6  ;;  %1677 = vmatprep.subr.bf16.mxu0 %v2052_v38  ;;  %v1794_v6 = vld [vmem:[%s2420_s0 + $0xd8] ss:$20 sps:$4 sm:$0xff]  }
  0x8a   :  { %1571 = vmatprep.subr.bf16.mxu1 %v1879_v8  ;;  %v1795_v8 = vld [vmem:[%s2420_s0 + $0xf0] ss:$20 sps:$4 sm:$0xff]  }
  0x8b   :  { %868 = vmatmul.mubr.bf16.gmra.mxu0 %v1791_v0 }
  0x8c   :  { %917 = vmatmul.mubr.bf16.gmra.mxu1 %v1792_v34  ;;  %1678 = vmatpush3.bf16.msra.mxu0 %v2052_v38 }
  0x8d   :  { %1572 = vmatpush3.bf16.msra.mxu1 %v1891_v10  ;;  %1679 = vmatprep.subr.bf16.mxu0 %v2073_v43  ;;  %v1798_v10 = vld [vmem:[%s2420_s0 + $0x11c] ss:$20 sps:$4 sm:$0xff]  }
  0x8e   :  { %1573 = vmatprep.subr.bf16.mxu1 %v1903_v12  ;;  %1689 = vmatprep.mubr.bf16.mxu0 %v1793_v2  ;;  %v1803_v12 = vld [vmem:[%s2420_s0 + $0xfc] ss:$20 sps:$4 sm:$0xff]  }
  0x8f   :  { %1075 = vmatprep.mubr.bf16.mxu1 %v1797_v4 }
  0x90   :  { %1680 = vmatpush3.bf16.msra.mxu0 %v2073_v43 }
  0x91   :  { %1574 = vmatpush3.bf16.msra.mxu1 %v1915_v14  ;;  %1681 = vmatprep.subr.bf16.mxu0 %v2085_v45 }
  0x92   :  { %1575 = vmatprep.subr.bf16.mxu1 %v1927_v16 }
  0x94   :  { %1682 = vmatpush3.bf16.msra.mxu0 %v2085_v45 }
  0x95   :  { %1576 = vmatpush3.bf16.msra.mxu1 %v1939_v18  ;;  %1683 = vmatprep.subr.bf16.mxu0 %v2097_v47 }
  0x96   :  { %1577 = vmatprep.subr.bf16.mxu1 %v1951_v20 }
  0x98   :  { %1684 = vmatpush3.bf16.msra.mxu0 %v2097_v47 }
  0x99   :  { %1578 = vmatpush3.bf16.msra.mxu1 %v1963_v22  ;;  %1685 = vmatprep.subr.bf16.mxu0 %v2106_v48 }
  0x9a   :  { %1579 = vmatprep.subr.bf16.mxu1 %v1975_v24 }
  0x9c   :  { %1686 = vmatpush3.bf16.msra.mxu0 %v2106_v48 }
  0x9d   :  { %1580 = vmatpush3.bf16.msra.mxu1 %v1987_v26  ;;  %1687 = vmatprep.subr.bf16.mxu0 %v2115_v49 }
  0x9e   :  { %1581 = vmatprep.subr.bf16.mxu1 %v1999_v28 }
  0xa0   :  { %1688 = vmatpush3.bf16.msra.mxu0 %v2115_v49 }
  0xa1   :  { %1582 = vmatpush3.bf16.msra.mxu1 %v2011_v30  ;;  %1595 = vmatprep.subr.bf16.mxu0 %v1837_v1  ;;  %v1800_v1 = vld [vmem:[%s2420_s0 + $0x118] ss:$20 sps:$4 sm:$0xff]  }
  0xa2   :  { %1693 = vmatprep.subr.bf16.mxu1 %v2037_v36 }
  0xa3   :  { %1690 = vmatmul.mubr.bf16.vlgmr.msra.gmra.mxu0 %v1794_v6 }
  0xa4   :  { %1076 = vmatmul.mubr.bf16.vlgmr.msra.gmra.mxu1 %v1795_v8  ;;  %1596 = vmatpush3.bf16.msra.mxu0 %v1849_v3  ;;  %v1804_v3 = vld [vmem:[%s2420_s0 + $0x100] ss:$20 sps:$4 sm:$0xff]  }
  0xa5   :  { %1694 = vmatpush3.bf16.msra.mxu1 %v2037_v36  ;;  %1597 = vmatprep.subr.bf16.mxu0 %v1861_v5  ;;  %v1801_v5 = vld [vmem:[%s2420_s0 + $0xf8] ss:$20 sps:$4 sm:$0xff]  }
  0xa6   :  { %1695 = vmatprep.subr.bf16.mxu1 %v2042_v37  ;;  %1083 = vmatprep.mubr.bf16.mxu1 %v1798_v10 }
  0xa7   :  { %1124 = vmatprep.mubr.bf16.mxu0 %v1803_v12 }
  0xa8   :  { %1598 = vmatpush3.bf16.msra.mxu0 %v1873_v7  ;;  %v1805_v7 = vld [vmem:[%s2420_s0 + $0x128] ss:$20 sps:$4 sm:$0xff]  }
  0xa9   :  { %1696 = vmatpush3.bf16.msra.mxu1 %v2042_v37  ;;  %1599 = vmatprep.subr.bf16.mxu0 %v1885_v9  ;;  %v1806_v9 = vld [vmem:[%s2420_s0 + $0x124] ss:$20 sps:$4 sm:$0xff]  }
  0xaa   :  { %1697 = vmatprep.subr.bf16.mxu1 %v2052_v38 }
  0xac   :  { %1084 = vmatmul.mubr.bf16.gmra.mxu1 %v1800_v1  ;;  %1600 = vmatpush3.bf16.msra.mxu0 %v1897_v11  ;;  %v1808_v11 = vld [vmem:[%s2420_s0 + $0x120] ss:$20 sps:$4 sm:$0xff]  }
  0xad   :  { %1698 = vmatpush3.bf16.msra.mxu1 %v2052_v38  ;;  %1601 = vmatprep.subr.bf16.mxu0 %v1909_v13 }
  0xae   :  { %1699 = vmatprep.subr.bf16.mxu1 %v2073_v43  ;;  %1709 = vmatprep.mubr.bf16.mxu1 %v1804_v3 }
  0xb0   :  { %1602 = vmatpush3.bf16.msra.mxu0 %v1921_v15 }
  0xb1   :  { %1700 = vmatpush3.bf16.msra.mxu1 %v2073_v43  ;;  %1603 = vmatprep.subr.bf16.mxu0 %v1933_v17 }
  0xb2   :  { %1701 = vmatprep.subr.bf16.mxu1 %v2085_v45 }
  0xb4   :  { %1604 = vmatpush3.bf16.msra.mxu0 %v1945_v19 }
  0xb5   :  { %1702 = vmatpush3.bf16.msra.mxu1 %v2085_v45  ;;  %1605 = vmatprep.subr.bf16.mxu0 %v1957_v21 }
  0xb6   :  { %1703 = vmatprep.subr.bf16.mxu1 %v2097_v47 }
  0xb8   :  { %1606 = vmatpush3.bf16.msra.mxu0 %v1969_v23 }
  0xb9   :  { %1704 = vmatpush3.bf16.msra.mxu1 %v2097_v47  ;;  %1607 = vmatprep.subr.bf16.mxu0 %v1981_v25 }
  0xba   :  { %1705 = vmatprep.subr.bf16.mxu1 %v2106_v48 }
  0xbc   :  { %1608 = vmatpush3.bf16.msra.mxu0 %v1993_v27 }
  0xbd   :  { %1706 = vmatpush3.bf16.msra.mxu1 %v2106_v48  ;;  %1609 = vmatprep.subr.bf16.mxu0 %v2005_v29 }
  0xbe   :  { %1707 = vmatprep.subr.bf16.mxu1 %v2115_v49 }
  0xc0   :  { %1610 = vmatpush3.bf16.msra.mxu0 %v2017_v31 }
  0xc1   :  { %1708 = vmatpush3.bf16.msra.mxu1 %v2115_v49 }
  0xc3   :  { %1125 = vmatmul.mubr.bf16.vlgmr.msra.gmra.mxu0 %v1801_v5 }
  0xc4   :  { %1710 = vmatmul.mubr.bf16.vlgmr.msra.gmra.mxu1 %v1805_v7  ;;  %1132 = vmatprep.mubr.bf16.mxu0 %v1806_v9 }
  0xcb   :  { %1133 = vmatmul.mubr.bf16.gmra.mxu0 %v1808_v11 }
  0xe3   :  { %v1385_v13 = vpop.f32.mrf.mxu0 }
  0xe4   :  { %v1413_v14 = vpop.f32.mrf.mxu1 }
  0xe5   :  { %v1386_v15 = vpop.f32.mrf.mxu0 }
  0xe6   :  { %v1387_v16 = vadd.f32 %v1386_v15, %v1385_v13  ;;  %v1414_v17 = vpop.f32.mrf.mxu1 }
  0xe7   :  { %v1415_v18 = vadd.f32 %v1414_v17, %v1413_v14  ;;  %v2341_v19 = vpop.f32.mrf.mxu0 }
  0xe8   :  { %v1416_v20 = vpop.f32.mrf.mxu1 }
  0xe9   :  { %v2343_v21 = vadd.f32 %v1415_v18, %v1387_v16  ;;  %v2345_v22 = vpop.f32.mrf.mxu0 }
  0xea   :  { %v1417_v23 = vpop.f32.mrf.mxu1 }
  0xeb   :  { %v2347_v24 = vadd.f32 %v1417_v23, %v1416_v20  ;;  %v1391_v25 = vpop.f32.mrf.mxu0 }
  0xec   :  { %v1419_v26 = vpop.f32.mrf.mxu1 }
  0xed   :  { %v1392_v27 = vpop.f32.mrf.mxu0 }
  0xee   :  { %v1420_v28 = vpop.f32.mrf.mxu1  ;;  %v1393_v29 = vadd.f32 %v1392_v27, %v1391_v25 }
  0xef   :  { %v1421_v30 = vadd.f32 %v1420_v28, %v1419_v26  ;;  %v2353_v41 = vpop.f32.mrf.mxu0 }
  0xf0   :  { %v1422_v31 = vpop.f32.mrf.mxu1 }
  0xf1   :  { %v2349_v35 = vadd.f32 %v1421_v30, %v1393_v29  ;;  %v2355_v43 = vpop.f32.mrf.mxu0 }
  0xf2   :  { %v1423_v36 = vpop.f32.mrf.mxu1 }
  0xf3   :  { %2423 = vst [vmem:[#allocation2_spill] sm:$0xff] %v2349_v35  ;;  %v2351_v37 = vadd.f32 %v1423_v36, %v1422_v31 }
  0xf5   :  { %2424 = vst [vmem:[#allocation3_spill] sm:$0xff] %v2351_v37 }
 0x103   :  { %v2357_v45 = vpop.f32.mrf.mxu0 }
 0x104   :  { %v1451_v38 = vpop.f32.mrf.mxu1  ;;  %2425 = vst [vmem:[#allocation4_spill] sm:$0xff] %v2357_v45 }
 0x105   :  { %v531_v47 = vpop.f32.mrf.mxu0 }
 0x106   :  { %v1452_v39 = vpop.f32.mrf.mxu1 }
 0x107   :  { %v2361_v49 = vpop.f32.mrf.mxu0  ;;  %v1453_v27 = vadd.f32 %v1452_v39, %v1451_v38 }
 0x108   :  { %v1454_v40 = vpop.f32.mrf.mxu1  ;;  %2426 = vst [vmem:[#allocation5_spill] sm:$0xff] %v2361_v49 }
 0x109   :  { %v2365_v51 = vpop.f32.mrf.mxu0 }
 0x10a   :  { %v1455_v42 = vpop.f32.mrf.mxu1 }
 0x10b   :  { %v1456_v45 = vadd.f32 %v1455_v42, %v1454_v40 }
 0x10c   :  { %v1457_v44 = vpop.f32.mrf.mxu1 }
 0x10e   :  { %v1458_v46 = vpop.f32.mrf.mxu1 }
 0x110   :  { %v2359_v48 = vpop.f32.mrf.mxu1 }
 0x112   :  { %v2363_v50 = vpop.f32.mrf.mxu1 }
 0x123   :  { %v1479_v52 = vpop.f32.mrf.mxu0 }
 0x124   :  { %v2367_v53 = vpop.f32.mrf.mxu1 }
 0x125   :  { %v1480_v54 = vpop.f32.mrf.mxu0 }
 0x126   :  { %v743_v55 = vpop.f32.mrf.mxu1  ;;  %v1481_v25 = vadd.f32 %v1480_v54, %v1479_v52 }
 0x127   :  { %v1482_v56 = vpop.f32.mrf.mxu0 }
 0x128   :  { %v2369_v57 = vpop.f32.mrf.mxu1  ;;  %v695_v29 = vadd.f32 %v1481_v25, %v1453_v27 }
 0x129   :  { %2427 = vst [vmem:[#allocation6_spill] sm:$0xff] %v2369_v57  ;;  %v1483_v58 = vpop.f32.mrf.mxu0 }
 0x12a   :  { %v2371_v59 = vpop.f32.mrf.mxu1  ;;  %v1484_v49 = vadd.f32 %v1483_v58, %v1482_v56  ;;  %v744_v35 = vadd.f32 %v743_v55, %v695_v29 }
 0x12b   :  { %v1485_v61 = vpop.f32.mrf.mxu0 }
 0x12c   :  { %v698_v38 = vadd.f32 %v1484_v49, %v1456_v45  ;;  %v1396_v45 = vadd.f32 %v2355_v43, %v2353_v41 }
 0x12d   :  { %v1486_v63 = vpop.f32.mrf.mxu0 }
 0x12e   :  { %v1487_v57 = vadd.f32 %v1486_v63, %v1485_v61  ;;  %v747_v49 = vadd.f32 %v2371_v59, %v698_v38 }
 0x12f   :  { %v1488_v33 = vpop.f32.mrf.mxu0 }
 0x131   :  { %v1489_v34 = vpop.f32.mrf.mxu0 }
 0x143   :  { %v1517_v4 = vpop.f32.mrf.mxu0 }
 0x144   :  { %v1545_v60 = vpop.f32.mrf.mxu1 }
 0x145   :  { %v1518_v8 = vpop.f32.mrf.mxu0 }
 0x146   :  { %v1546_v62 = vpop.f32.mrf.mxu1  ;;  %v1519_v30 = vadd.f32 %v1518_v8, %v1517_v4  ;;  %v532_v4 = vadd.f32 %v531_v47, %v2343_v21 }
 0x147   :  { %v1520_v12 = vpop.f32.mrf.mxu0  ;;  %v1547_v31 = vadd.f32 %v1546_v62, %v1545_v60 }
 0x148   :  { %v1548_v32 = vpop.f32.mrf.mxu1 }
 0x149   :  { %v1521_v3 = vpop.f32.mrf.mxu0  ;;  %v911_v52 = vadd.f32 %v1547_v31, %v1519_v30 }
 0x14a   :  { %v1549_v0 = vpop.f32.mrf.mxu1  ;;  %v1522_v39 = vadd.f32 %v1521_v3, %v1520_v12 }
 0x14b   :  { %v1523_v7 = vpop.f32.mrf.mxu0 }
 0x14c   :  { %v1551_v2 = vpop.f32.mrf.mxu1 }
 0x14d   :  { %v1524_v11 = vpop.f32.mrf.mxu0 }
 0x14e   :  { %v1552_v6 = vpop.f32.mrf.mxu1  ;;  %v1525_v40 = vadd.f32 %v1524_v11, %v1523_v7 }
 0x14f   :  { %v1526_v14 = vpop.f32.mrf.mxu0  ;;  %v1553_v42 = vadd.f32 %v1552_v6, %v1551_v2 }
 0x150   :  { %v2373_v10 = vpop.f32.mrf.mxu1 }
 0x151   :  { %v1527_v16 = vpop.f32.mrf.mxu0  ;;  %v919_v43 = vadd.f32 %v1553_v42, %v1525_v40 }
 0x152   :  { %v2375_v1 = vpop.f32.mrf.mxu1  ;;  %v1528_v12 = vadd.f32 %v1527_v16, %v1526_v14 }
 0x153   :  { %v1556_v41 = vadd.f32 %v2375_v1, %v2373_v10 }
 0x163   :  { %v1691_v18 = vpop.f32.mrf.mxu0 }
 0x164   :  { %v1583_v5 = vpop.f32.mrf.mxu1 }
 0x165   :  { %v959_v23 = vpop.f32.mrf.mxu0 }
 0x166   :  { %v1584_v9 = vpop.f32.mrf.mxu1  ;;  %v960_v62 = vadd.f32 %v959_v23, %v911_v52  ;;  %v2437_v23 = vld [vmem:[#allocation6_spill] sm:$0xff]  ;;  %v2438_v52 = vld [vmem:[#allocation5_spill] sm:$0xff] }
 0x167   :  { %v2383_v28 = vpop.f32.mrf.mxu0  ;;  %v1585_v61 = vadd.f32 %v1584_v9, %v1583_v5  ;;  %v968_v9 = vadd.f32 %v1691_v18, %v919_v43 }
 0x168   :  { %v1586_v13 = vpop.f32.mrf.mxu1  ;;  %2431 = vst [vmem:[#allocation10_spill] sm:$0xff] %v2383_v28  ;;  %v1550_v28 = vadd.f32 %v1549_v0, %v1548_v32 }
 0x169   :  { %v962_v37 = vpop.f32.mrf.mxu0 }
 0x16a   :  { %v1587_v15 = vpop.f32.mrf.mxu1  ;;  %v914_v21 = vadd.f32 %v1550_v28, %v1522_v39  ;;  %v922_v28 = vadd.f32 %v1556_v41, %v1528_v12 }
 0x16b   :  { %v1588_v0 = vadd.f32 %v1587_v15, %v1586_v13 }
 0x16c   :  { %v2377_v17 = vpop.f32.mrf.mxu1 }
 0x16d   :  { %2428 = vst [vmem:[#allocation7_spill] sm:$0xff] %v2377_v17  ;;  %v1390_v17 = vadd.f32 %v2345_v22, %v2341_v19  ;;  %v758_v19 = vmax.f32 %v532_v4, %v744_v35  ;;  %v1490_v22 = vadd.f32 %v1489_v34, %v1488_v33  ;;  %v963_v33 = vadd.f32 %v962_v37, %v914_v21  ;;  %v1349_v37 = vld [vmem:[%s2421_s2] ss:$0 sm:$0xff] }
 0x16e   :  { %v2379_v20 = vpop.f32.mrf.mxu1 }
 0x16f   :  { %2429 = vst [vmem:[#allocation8_spill] sm:$0xff] %v2379_v20  ;;  %v1459_v20 = vadd.f32 %v1458_v46, %v1457_v44  ;;  %v486_v58 = vadd.f32 %v2347_v24, %v1390_v17  ;;  %v1462_v24 = vadd.f32 %v2363_v50, %v2359_v48  ;;  %v974_v35 = vmax.f32 %v758_v19, %v960_v62  ;;  %v2432_v48 = vld [vmem:[#allocation2_spill] sm:$0xff]  ;;  %v2433_v50 = vld [vmem:[#allocation4_spill] sm:$0xff]  ;;  %v2436_v17 = vld [vmem:[#allocation3_spill] sm:$0xff] }
 0x170   :  { %v2381_v26 = vpop.f32.mrf.mxu1  ;;  %v2439_v39 = vld [vmem:[#allocation10_spill] sm:$0xff] }
 0x171   :  { %2430 = vst [vmem:[#allocation9_spill] sm:$0xff] %v2381_v26  ;;  %v703_v60 = vadd.f32 %v1487_v57, %v1459_v20  ;;  %v535_v55 = vadd.f32 %v2365_v51, %v486_v58  ;;  %v706_v6 = vadd.f32 %v1490_v22, %v1462_v24  ;;  %v494_v20 = vadd.f32 %v2436_v17, %v1396_v45 }
 0x172   :  { %v2385_v36 = vpop.f32.mrf.mxu1  ;;  %v971_v4 = vadd.f32 %v2439_v39, %v922_v28 }
 0x173   :  { %v752_v57 = vadd.f32 %v2367_v53, %v703_v60  ;;  %v759_v51 = vmax.f32 %v535_v55, %v747_v49  ;;  %v540_v53 = vadd.f32 %v2433_v50, %v2432_v48  ;;  %v755_v25 = vadd.f32 %v2437_v23, %v706_v6 }
 0x174   :  { %v2434_v14 = vld [vmem:[#allocation7_spill] sm:$0xff] }
 0x175   :  { %v975_v13 = vmax.f32 %v759_v51, %v963_v33  ;;  %v760_v27 = vmax.f32 %v540_v53, %v752_v57 }
 0x176   :  { %v2435_v15 = vld [vmem:[#allocation8_spill] sm:$0xff] }
 0x177   :  { %v1591_v16 = vadd.f32 %v2435_v15, %v2434_v14  ;;  %v976_v38 = vmax.f32 %v760_v27, %v968_v9 }
 0x178   :  { %v2440_v62 = vld [vmem:[#allocation9_spill] sm:$0xff] }
 0x183   :  { %v1611_v54 = vpop.f32.mrf.mxu0 }
 0x184   :  { %v1711_v26 = vpop.f32.mrf.mxu1 }
 0x185   :  { %v1612_v8 = vpop.f32.mrf.mxu0 }
 0x186   :  { %v1175_v56 = vpop.f32.mrf.mxu1  ;;  %v1613_v63 = vadd.f32 %v1612_v8, %v1611_v54  ;;  %v543_v54 = vadd.f32 %v2438_v52, %v494_v20  ;;  %v1594_v8 = vadd.f32 %v2385_v36, %v2440_v62 }
 0x187   :  { %v1614_v44 = vpop.f32.mrf.mxu0 }
 0x188   :  { %v1712_v46 = vpop.f32.mrf.mxu1  ;;  %v1127_v47 = vadd.f32 %v1613_v63, %v1585_v61  ;;  %v761_v63 = vmax.f32 %v543_v54, %v755_v25 }
 0x189   :  { %v1615_v32 = vpop.f32.mrf.mxu0 }
 0x18a   :  { %v1616_v34 = vadd.f32 %v1615_v32, %v1614_v44  ;;  %v1176_v2 = vadd.f32 %v1175_v56, %v1127_v47  ;;  %v1178_v3 = vpop.f32.mrf.mxu1  ;;  %v977_v44 = vmax.f32 %v761_v63, %v971_v4 }
 0x18b   :  { %v1617_v59 = vpop.f32.mrf.mxu0 }
 0x18c   :  { %v1190_v5 = vmax.f32 %v974_v35, %v1176_v2  ;;  %v1130_v7 = vadd.f32 %v1616_v34, %v1588_v0 }
 0x18d   :  { %v1618_v11 = vpop.f32.mrf.mxu0 }
 0x18e   :  { %v1619_v10 = vadd.f32 %v1618_v11, %v1617_v59  ;;  %v1179_v1 = vadd.f32 %v1178_v3, %v1130_v7  ;;  %v1201_v30 = vadd.f32 %v1349_v37, %v1190_v5 }
 0x18f   :  { %v1620_v29 = vpop.f32.mrf.mxu0 }
 0x190   :  { %v1135_v18 = vadd.f32 %v1619_v10, %v1591_v16  ;;  %v1191_v31 = vmax.f32 %v975_v13, %v1179_v1  ;;  %v1205_v19 = vmax.f32 %v1201_v30, 0.0 }
 0x191   :  { %v1621_v60 = vpop.f32.mrf.mxu0 }
 0x192   :  { %v1184_v56 = vadd.f32 %v1711_v26, %v1135_v18  ;;  %v1202_v58 = vadd.f32 %v1349_v37, %v1191_v31  ;;  %v1622_v61 = vadd.f32 %v1621_v60, %v1620_v29 }
 0x194   :  { %v1192_v22 = vmax.f32 %v976_v38, %v1184_v56  ;;  %v1206_v40 = vmax.f32 %v1202_v58, 0.0  ;;  %v1138_v42 = vadd.f32 %v1622_v61, %v1594_v8 }
 0x196   :  { %v1361_v45 = vpack.c.bf16 %v1206_v40, %v1205_v19  ;;  %v1187_v49 = vadd.f32 %v1712_v46, %v1138_v42  ;;  %v1203_v21 = vadd.f32 %v1349_v37, %v1192_v22 }
 0x198   :  { %1362 = vst [vmem:[%s2422_s3] sm:$0xff] %v1361_v45   ;;  %v1193_v47 = vmax.f32 %v977_v44, %v1187_v49  ;;  %v1207_v24 = vmax.f32 %v1203_v21, 0.0 }
 0x19a   :  { %v1204_v55 = vadd.f32 %v1349_v37, %v1193_v47 }
 0x19c   :  { %v1208_v36 = vmax.f32 %v1204_v55, 0.0 }
 0x19e   :  { %v1366_v26 = vpack.c.bf16 %v1208_v36, %v1207_v24 }
 0x1a0   :  { %1368 = vst [vmem:[%s2422_s3 + $0x8] sm:$0xff] %v1366_v26  }

// kernel: dwg_keypoints_forward.7
= control target key start
LH: loop header
LB: loop body
LE: loop exit
PB: predicated region body
PF: predicated region fallthrough
CT: control target
= control target key end

     0   :  { %v543_v36 = vlaneseq  ;;  %v6213_v37 = vmov 1966171168   ;;  %vm6216_vm0 = vmmov 0   ;;  %s8200_s1 = inlined_call_operand.vmem [shape: bf16[2048,512], index: 1, kind: input, shape index: {}]   ;;  %s8201_s0 = inlined_call_operand.vmem [shape: bf16[2,2048], index: 0, kind: input, shape index: {}]   ;;  %s8202_s2 = inlined_call_operand.vmem [shape: f32[1,512], index: 2, kind: input, shape index: {}]   ;;  %s8203_s3 = inlined_call_operand.vmem [shape: bf16[512,128], index: 3, kind: input, shape index: {}]   ;;  %s8204_s5 = inlined_call_operand.vmem [shape: bf16[128,640], index: 5, kind: input, shape index: {}]   ;;  %s8205_s4 = inlined_call_operand.vmem [shape: f32[1,128], index: 4, kind: input, shape index: {}]   ;;  %s8206_s6 = inlined_call_operand.vmem [shape: f32[1,640], index: 6, kind: input, shape index: {}]   ;;  %s8207_s7 = inlined_call_operand.vmem [shape: f32[2,640], index: 7, kind: output, shape index: {}]  }
   0x1   :  { %v5354_v0 = vld [vmem:[%s8200_s1 + $0xe4] ss:$16 sps:$4 sm:$0xff]   ;;  %v5358_v2 = vld [vmem:[%s8200_s1 + $0xe0] ss:$16 sps:$4 sm:$0xff]   ;;  %v567_v38 = vunpack.c.l.s4 %v6213_v37 }
   0x2   :  { %v5356_v1 = vld [vmem:[%s8200_s1 + $0x2e4] ss:$16 sps:$4 sm:$0xff]   ;;  %3239 = vmatprep.subr.bf16.mxu0 %v5354_v0  ;;  %v5359_v3 = vld [vmem:[%s8200_s1 + $0x2e0] ss:$16 sps:$4 sm:$0xff]   ;;  %v6375_v42 = vshrl.u32 %v543_v36, 7 }
   0x3   :  { %3280 = vmatprep.subr.bf16.mxu1 %v5356_v1  ;;  %v5360_v4 = vld [vmem:[%s8200_s1 + $0xc4] ss:$16 sps:$4 sm:$0xff]   ;;  %3240 = vmatpush1.bf16.msra.mxu0 %v5358_v2  ;;  %v5364_v6 = vld [vmem:[%s8200_s1 + $0xc0] ss:$16 sps:$4 sm:$0xff]   ;;  %v568_v43 = vunpack.c.0.s8 %v567_v38 }
   0x4   :  { %3281 = vmatpush1.bf16.msra.mxu1 %v5359_v3  ;;  %v5362_v5 = vld [vmem:[%s8200_s1 + $0x2c4] ss:$16 sps:$4 sm:$0xff]   ;;  %3241 = vmatprep.subr.bf16.mxu0 %v5360_v4  ;;  %v5365_v7 = vld [vmem:[%s8200_s1 + $0x2c0] ss:$16 sps:$4 sm:$0xff]  }
   0x5   :  { %3282 = vmatprep.subr.bf16.mxu1 %v5362_v5  ;;  %v5366_v8 = vld [vmem:[%s8200_s1 + $0xa4] ss:$16 sps:$4 sm:$0xff]   ;;  %v5370_v10 = vld [vmem:[%s8200_s1 + $0xa0] ss:$16 sps:$4 sm:$0xff]   ;;  %v6393_v49 = vsub.s32 %v568_v43, %v6375_v42 }
   0x6   :  { %v5368_v9 = vld [vmem:[%s8200_s1 + $0x2a4] ss:$16 sps:$4 sm:$0xff]   ;;  %v5371_v11 = vld [vmem:[%s8200_s1 + $0x2a0] ss:$16 sps:$4 sm:$0xff]  }
   0x7   :  { %3242 = vmatpush1.bf16.msra.mxu0 %v5364_v6  ;;  %v5372_v12 = vld [vmem:[%s8200_s1 + $0x84] ss:$16 sps:$4 sm:$0xff]   ;;  %v5376_v14 = vld [vmem:[%s8200_s1 + $0x80] ss:$16 sps:$4 sm:$0xff]  }
   0x8   :  { %3283 = vmatpush1.bf16.msra.mxu1 %v5365_v7  ;;  %3243 = vmatprep.subr.bf16.mxu0 %v5366_v8  ;;  %v5374_v13 = vld [vmem:[%s8200_s1 + $0x284] ss:$16 sps:$4 sm:$0xff]   ;;  %v5377_v15 = vld [vmem:[%s8200_s1 + $0x280] ss:$16 sps:$4 sm:$0xff]  }
   0x9   :  { %3284 = vmatprep.subr.bf16.mxu1 %v5368_v9  ;;  %v5378_v16 = vld [vmem:[%s8200_s1 + $0x64] ss:$16 sps:$4 sm:$0xff]   ;;  %v5382_v18 = vld [vmem:[%s8200_s1 + $0x60] ss:$16 sps:$4 sm:$0xff]  }
   0xa   :  { %v5380_v17 = vld [vmem:[%s8200_s1 + $0x264] ss:$16 sps:$4 sm:$0xff]   ;;  %v5383_v19 = vld [vmem:[%s8200_s1 + $0x260] ss:$16 sps:$4 sm:$0xff]  }
   0xb   :  { %3244 = vmatpush1.bf16.msra.mxu0 %v5370_v10  ;;  %v5384_v20 = vld [vmem:[%s8200_s1 + $0x44] ss:$16 sps:$4 sm:$0xff]   ;;  %v5388_v22 = vld [vmem:[%s8200_s1 + $0x40] ss:$16 sps:$4 sm:$0xff]  }
   0xc   :  { %3285 = vmatpush1.bf16.msra.mxu1 %v5371_v11  ;;  %3245 = vmatprep.subr.bf16.mxu0 %v5372_v12  ;;  %v5386_v21 = vld [vmem:[%s8200_s1 + $0x244] ss:$16 sps:$4 sm:$0xff]   ;;  %v5389_v23 = vld [vmem:[%s8200_s1 + $0x240] ss:$16 sps:$4 sm:$0xff]  }
   0xd   :  { %3286 = vmatprep.subr.bf16.mxu1 %v5374_v13  ;;  %v5390_v24 = vld [vmem:[%s8200_s1 + $0x24] ss:$16 sps:$4 sm:$0xff]   ;;  %v5394_v26 = vld [vmem:[%s8200_s1 + $0x20] ss:$16 sps:$4 sm:$0xff]  }
   0xe   :  { %v5392_v25 = vld [vmem:[%s8200_s1 + $0x224] ss:$16 sps:$4 sm:$0xff]   ;;  %v5395_v27 = vld [vmem:[%s8200_s1 + $0x220] ss:$16 sps:$4 sm:$0xff]  }
   0xf   :  { %3246 = vmatpush1.bf16.msra.mxu0 %v5376_v14  ;;  %v5396_v28 = vld [vmem:[%s8200_s1 + $0x4] ss:$16 sps:$4 sm:$0xff]   ;;  %v5400_v30 = vld [vmem:[%s8200_s1] ss:$16 sps:$4 sm:$0xff]  }
  0x10   :  { %3287 = vmatpush1.bf16.msra.mxu1 %v5377_v15  ;;  %3247 = vmatprep.subr.bf16.mxu0 %v5378_v16  ;;  %v5398_v29 = vld [vmem:[%s8200_s1 + $0x204] ss:$16 sps:$4 sm:$0xff]   ;;  %v5401_v31 = vld [vmem:[%s8200_s1 + $0x200] ss:$16 sps:$4 sm:$0xff]  }
  0x11   :  { %3288 = vmatprep.subr.bf16.mxu1 %v5380_v17  ;;  %v5402_v32 = vld [vmem:[%s8200_s1 + $0x1e4] ss:$16 sps:$4 sm:$0xff]   ;;  %v5406_v34 = vld [vmem:[%s8200_s1 + $0x1e0] ss:$16 sps:$4 sm:$0xff]  }
  0x12   :  { %v5404_v33 = vld [vmem:[%s8200_s1 + $0x3e4] ss:$16 sps:$4 sm:$0xff]   ;;  %v5407_v35 = vld [vmem:[%s8200_s1 + $0x3e0] ss:$16 sps:$4 sm:$0xff]  }
  0x13   :  { %3248 = vmatpush1.bf16.msra.mxu0 %v5382_v18  ;;  %v5408_v39 = vld [vmem:[%s8200_s1 + $0x1c4] ss:$16 sps:$4 sm:$0xff]   ;;  %v5412_v41 = vld [vmem:[%s8200_s1 + $0x1c0] ss:$16 sps:$4 sm:$0xff]  }
  0x14   :  { %3289 = vmatpush1.bf16.msra.mxu1 %v5383_v19  ;;  %3249 = vmatprep.subr.bf16.mxu0 %v5384_v20  ;;  %v5410_v40 = vld [vmem:[%s8200_s1 + $0x3c4] ss:$16 sps:$4 sm:$0xff]   ;;  %v5413_v44 = vld [vmem:[%s8200_s1 + $0x3c0] ss:$16 sps:$4 sm:$0xff]  }
  0x15   :  { %3290 = vmatprep.subr.bf16.mxu1 %v5386_v21  ;;  %v5414_v45 = vld [vmem:[%s8200_s1 + $0x1a4] ss:$16 sps:$4 sm:$0xff]   ;;  %v5418_v47 = vld [vmem:[%s8200_s1 + $0x1a0] ss:$16 sps:$4 sm:$0xff]  }
  0x16   :  { %v5416_v46 = vld [vmem:[%s8200_s1 + $0x3a4] ss:$16 sps:$4 sm:$0xff]   ;;  %v5419_v48 = vld [vmem:[%s8200_s1 + $0x3a0] ss:$16 sps:$4 sm:$0xff]  }
  0x17   :  { %3250 = vmatpush1.bf16.msra.mxu0 %v5388_v22  ;;  %v5420_v50 = vld [vmem:[%s8200_s1 + $0x184] ss:$16 sps:$4 sm:$0xff]   ;;  %v5424_v53 = vld [vmem:[%s8200_s1 + $0x180] ss:$16 sps:$4 sm:$0xff]  }
  0x18   :  { %3291 = vmatpush1.bf16.msra.mxu1 %v5389_v23  ;;  %3251 = vmatprep.subr.bf16.mxu0 %v5390_v24  ;;  %v5422_v51 = vld [vmem:[%s8200_s1 + $0x384] ss:$16 sps:$4 sm:$0xff]   ;;  %v5425_v55 = vld [vmem:[%s8200_s1 + $0x380] ss:$16 sps:$4 sm:$0xff]  }
  0x19   :  { %3292 = vmatprep.subr.bf16.mxu1 %v5392_v25  ;;  %v27_v52 = vld [vmem:[%s8201_s0] sm:$0xff] }
  0x1a   :  { %v572_v54 = vrot.slane %v27_v52, %v6393_v49  ;;  %v5426_v56 = vld [vmem:[%s8200_s1 + $0x164] ss:$16 sps:$4 sm:$0xff]   ;;  %v5430_v59 = vld [vmem:[%s8200_s1 + $0x160] ss:$16 sps:$4 sm:$0xff]   ;;  %v565_v1 = vcombine.high %v27_v52, %v27_v52 }
  0x1b   :  { %3252 = vmatpush1.bf16.msra.mxu0 %v5394_v26  ;;  %v5428_v57 = vld [vmem:[%s8200_s1 + $0x364] ss:$16 sps:$4 sm:$0xff]   ;;  %v5431_v61 = vld [vmem:[%s8200_s1 + $0x360] ss:$16 sps:$4 sm:$0xff]  }
  0x1c   :  { %3293 = vmatpush1.bf16.msra.mxu1 %v5395_v27  ;;  %3253 = vmatprep.subr.bf16.mxu0 %v5396_v28  ;;  %v580_v58 = vcombine.high %v572_v54, %v572_v54  ;;  %v5432_v62 = vld [vmem:[%s8200_s1 + $0x144] ss:$16 sps:$4 sm:$0xff]   ;;  %v5436_v2 = vld [vmem:[%s8200_s1 + $0x140] ss:$16 sps:$4 sm:$0xff]   ;;  %v6451_v6 = vrot.slane %v565_v1, %v6393_v49  ;;  %v6471_v13 = vrot.slane %v572_v54, %v6393_v49 }
  0x1d   :  { %3294 = vmatprep.subr.bf16.mxu1 %v5398_v29  ;;  %v5434_v63 = vld [vmem:[%s8200_s1 + $0x344] ss:$16 sps:$4 sm:$0xff]   ;;  %v5437_v3 = vld [vmem:[%s8200_s1 + $0x340] ss:$16 sps:$4 sm:$0xff]  }
  0x1e   :  { %v6421_v60 = vrot.slane %v580_v58, %v6393_v49  ;;  %v5438_v4 = vld [vmem:[%s8200_s1 + $0x124] ss:$16 sps:$4 sm:$0xff]   ;;  %v5442_v7 = vld [vmem:[%s8200_s1 + $0x120] ss:$16 sps:$4 sm:$0xff]   ;;  %v581_v11 = vcombine.high %v6451_v6, %v6451_v6  ;;  %v6487_v18 = vcombine.high %v6471_v13, %v6471_v13 }
  0x1f   :  { %3254 = vmatpush1.bf16.msra.mxu0 %v5400_v30  ;;  %v5440_v5 = vld [vmem:[%s8200_s1 + $0x324] ss:$16 sps:$4 sm:$0xff]   ;;  %v5443_v8 = vld [vmem:[%s8200_s1 + $0x320] ss:$16 sps:$4 sm:$0xff]  }
  0x20   :  { %3295 = vmatpush1.bf16.msra.mxu1 %v5401_v31  ;;  %3255 = vmatprep.subr.bf16.mxu0 %v5402_v32  ;;  %v6434_v0 = vcombine.high %v6421_v60, %v6421_v60  ;;  %v5444_v9 = vld [vmem:[%s8200_s1 + $0x104] ss:$16 sps:$4 sm:$0xff]   ;;  %v5448_v12 = vld [vmem:[%s8200_s1 + $0x100] ss:$16 sps:$4 sm:$0xff]   ;;  %v6483_v17 = vrot.slane %v581_v11, %v6393_v49 }
  0x21   :  { %3296 = vmatprep.subr.bf16.mxu1 %v5404_v33  ;;  %3271 = vmatprep.mubr.bf16.mxu0 %v6421_v60  ;;  %v5446_v10 = vld [vmem:[%s8200_s1 + $0x304] ss:$16 sps:$4 sm:$0xff]   ;;  %v5449_v14 = vld [vmem:[%s8200_s1 + $0x300] ss:$16 sps:$4 sm:$0xff]  }
  0x22   :  { %3312 = vmatprep.mubr.bf16.mxu1 %v6434_v0  ;;  %v5452_v15 = vld [vmem:[%s8200_s1 + $0x4e4] ss:$16 sps:$4 sm:$0xff]   ;;  %v5450_v19 = vld [vmem:[%s8200_s1 + $0x4e0] ss:$16 sps:$4 sm:$0xff]   ;;  %v6503_v23 = vcombine.high %v6483_v17, %v6483_v17 }
  0x23   :  { %3256 = vmatpush2.bf16.msra.mxu0 %v5406_v34  ;;  %v5455_v16 = vld [vmem:[%s8200_s1 + $0x6e4] ss:$16 sps:$4 sm:$0xff]   ;;  %v5453_v20 = vld [vmem:[%s8200_s1 + $0x6e0] ss:$16 sps:$4 sm:$0xff]  }
  0x24   :  { %3297 = vmatpush2.bf16.msra.mxu1 %v5407_v35  ;;  %3257 = vmatprep.subr.bf16.mxu0 %v5408_v39  ;;  %v5458_v21 = vld [vmem:[%s8200_s1 + $0x4c4] ss:$16 sps:$4 sm:$0xff]   ;;  %v5456_v24 = vld [vmem:[%s8200_s1 + $0x4c0] ss:$16 sps:$4 sm:$0xff]  }
  0x25   :  { %3298 = vmatprep.subr.bf16.mxu1 %v5410_v40  ;;  %v5461_v22 = vld [vmem:[%s8200_s1 + $0x6c4] ss:$16 sps:$4 sm:$0xff]   ;;  %v5459_v25 = vld [vmem:[%s8200_s1 + $0x6c0] ss:$16 sps:$4 sm:$0xff]  }
  0x26   :  { %v5464_v26 = vld [vmem:[%s8200_s1 + $0x4a4] ss:$16 sps:$4 sm:$0xff]   ;;  %v5462_v28 = vld [vmem:[%s8200_s1 + $0x4a0] ss:$16 sps:$4 sm:$0xff]  }
  0x27   :  { %3258 = vmatpush2.bf16.msra.mxu0 %v5412_v41  ;;  %v5467_v27 = vld [vmem:[%s8200_s1 + $0x6a4] ss:$16 sps:$4 sm:$0xff]   ;;  %v5465_v29 = vld [vmem:[%s8200_s1 + $0x6a0] ss:$16 sps:$4 sm:$0xff]  }
  0x28   :  { %3299 = vmatpush2.bf16.msra.mxu1 %v5413_v44  ;;  %3259 = vmatprep.subr.bf16.mxu0 %v5414_v45  ;;  %v5470_v30 = vld [vmem:[%s8200_s1 + $0x484] ss:$16 sps:$4 sm:$0xff]   ;;  %v5468_v32 = vld [vmem:[%s8200_s1 + $0x480] ss:$16 sps:$4 sm:$0xff]  }
  0x29   :  { %3300 = vmatprep.subr.bf16.mxu1 %v5416_v46  ;;  %v5473_v31 = vld [vmem:[%s8200_s1 + $0x684] ss:$16 sps:$4 sm:$0xff]   ;;  %v5471_v33 = vld [vmem:[%s8200_s1 + $0x680] ss:$16 sps:$4 sm:$0xff]  }
  0x2a   :  { %v5476_v34 = vld [vmem:[%s8200_s1 + $0x464] ss:$16 sps:$4 sm:$0xff]   ;;  %v5474_v36 = vld [vmem:[%s8200_s1 + $0x460] ss:$16 sps:$4 sm:$0xff]  }
  0x2b   :  { %3260 = vmatpush2.bf16.msra.mxu0 %v5418_v47  ;;  %v5479_v35 = vld [vmem:[%s8200_s1 + $0x664] ss:$16 sps:$4 sm:$0xff]   ;;  %v5477_v37 = vld [vmem:[%s8200_s1 + $0x660] ss:$16 sps:$4 sm:$0xff]  }
  0x2c   :  { %3301 = vmatpush2.bf16.msra.mxu1 %v5419_v48  ;;  %3261 = vmatprep.subr.bf16.mxu0 %v5420_v50  ;;  %v5482_v38 = vld [vmem:[%s8200_s1 + $0x444] ss:$16 sps:$4 sm:$0xff]   ;;  %v5480_v40 = vld [vmem:[%s8200_s1 + $0x440] ss:$16 sps:$4 sm:$0xff]  }
  0x2d   :  { %3302 = vmatprep.subr.bf16.mxu1 %v5422_v51  ;;  %v5485_v39 = vld [vmem:[%s8200_s1 + $0x644] ss:$16 sps:$4 sm:$0xff]   ;;  %v5483_v41 = vld [vmem:[%s8200_s1 + $0x640] ss:$16 sps:$4 sm:$0xff]  }
  0x2e   :  { %v5488_v43 = vld [vmem:[%s8200_s1 + $0x424] ss:$16 sps:$4 sm:$0xff]   ;;  %v5486_v45 = vld [vmem:[%s8200_s1 + $0x420] ss:$16 sps:$4 sm:$0xff]  }
  0x2f   :  { %3262 = vmatpush2.bf16.msra.mxu0 %v5424_v53  ;;  %v5491_v44 = vld [vmem:[%s8200_s1 + $0x624] ss:$16 sps:$4 sm:$0xff]   ;;  %v5489_v46 = vld [vmem:[%s8200_s1 + $0x620] ss:$16 sps:$4 sm:$0xff]  }
  0x30   :  { %3303 = vmatpush2.bf16.msra.mxu1 %v5425_v55  ;;  %3263 = vmatprep.subr.bf16.mxu0 %v5426_v56  ;;  %v5494_v47 = vld [vmem:[%s8200_s1 + $0x404] ss:$16 sps:$4 sm:$0xff]   ;;  %v5492_v50 = vld [vmem:[%s8200_s1 + $0x400] ss:$16 sps:$4 sm:$0xff]  }
  0x31   :  { %3304 = vmatprep.subr.bf16.mxu1 %v5428_v57  ;;  %v5497_v48 = vld [vmem:[%s8200_s1 + $0x604] ss:$16 sps:$4 sm:$0xff]   ;;  %v5495_v51 = vld [vmem:[%s8200_s1 + $0x600] ss:$16 sps:$4 sm:$0xff]  }
  0x32   :  { %v5500_v52 = vld [vmem:[%s8200_s1 + $0x5e4] ss:$16 sps:$4 sm:$0xff]   ;;  %v5498_v54 = vld [vmem:[%s8200_s1 + $0x5e0] ss:$16 sps:$4 sm:$0xff]  }
  0x33   :  { %3264 = vmatpush2.bf16.msra.mxu0 %v5430_v59  ;;  %v5503_v53 = vld [vmem:[%s8200_s1 + $0x7e4] ss:$16 sps:$4 sm:$0xff]   ;;  %v5501_v55 = vld [vmem:[%s8200_s1 + $0x7e0] ss:$16 sps:$4 sm:$0xff]  }
  0x34   :  { %3305 = vmatpush2.bf16.msra.mxu1 %v5431_v61  ;;  %3265 = vmatprep.subr.bf16.mxu0 %v5432_v62  ;;  %v5506_v56 = vld [vmem:[%s8200_s1 + $0x5c4] ss:$16 sps:$4 sm:$0xff]   ;;  %v5504_v58 = vld [vmem:[%s8200_s1 + $0x5c0] ss:$16 sps:$4 sm:$0xff]  }
  0x35   :  { %3306 = vmatprep.subr.bf16.mxu1 %v5434_v63  ;;  %v5509_v57 = vld [vmem:[%s8200_s1 + $0x7c4] ss:$16 sps:$4 sm:$0xff]   ;;  %v5507_v59 = vld [vmem:[%s8200_s1 + $0x7c0] ss:$16 sps:$4 sm:$0xff]  }
  0x36   :  { %v5512_v61 = vld [vmem:[%s8200_s1 + $0x5a4] ss:$16 sps:$4 sm:$0xff]   ;;  %v5510_v63 = vld [vmem:[%s8200_s1 + $0x5a0] ss:$16 sps:$4 sm:$0xff]  }
  0x37   :  { %3266 = vmatpush2.bf16.msra.mxu0 %v5436_v2  ;;  %v5515_v62 = vld [vmem:[%s8200_s1 + $0x7a4] ss:$16 sps:$4 sm:$0xff]   ;;  %v5513_v1 = vld [vmem:[%s8200_s1 + $0x7a0] ss:$16 sps:$4 sm:$0xff]  }
  0x38   :  { %3307 = vmatpush2.bf16.msra.mxu1 %v5437_v3  ;;  %3267 = vmatprep.subr.bf16.mxu0 %v5438_v4  ;;  %v5518_v2 = vld [vmem:[%s8200_s1 + $0x584] ss:$16 sps:$4 sm:$0xff]   ;;  %v5516_v4 = vld [vmem:[%s8200_s1 + $0x580] ss:$16 sps:$4 sm:$0xff]  }
  0x39   :  { %3308 = vmatprep.subr.bf16.mxu1 %v5440_v5  ;;  %v5521_v3 = vld [vmem:[%s8200_s1 + $0x784] ss:$16 sps:$4 sm:$0xff]   ;;  %v5519_v5 = vld [vmem:[%s8200_s1 + $0x780] ss:$16 sps:$4 sm:$0xff]  }
  0x3a   :  { %v5530_v11 = vld [vmem:[%s8200_s1 + $0x544] ss:$16 sps:$4 sm:$0xff]  }
  0x3b   :  { %3268 = vmatpush2.bf16.msra.mxu0 %v5442_v7  ;;  %v5524_v7 = vld [vmem:[%s8200_s1 + $0x564] ss:$16 sps:$4 sm:$0xff]  }
  0x3c   :  { %3309 = vmatpush2.bf16.msra.mxu1 %v5443_v8  ;;  %3269 = vmatprep.subr.bf16.mxu0 %v5444_v9  ;;  %v5527_v8 = vld [vmem:[%s8200_s1 + $0x764] ss:$16 sps:$4 sm:$0xff]   ;;  %v5522_v9 = vld [vmem:[%s8200_s1 + $0x560] ss:$16 sps:$4 sm:$0xff]  }
  0x3d   :  { %3310 = vmatprep.subr.bf16.mxu1 %v5446_v10  ;;  %v5525_v10 = vld [vmem:[%s8200_s1 + $0x760] ss:$16 sps:$4 sm:$0xff]  }
  0x3f   :  { %3270 = vmatpush2.bf16.msra.mxu0 %v5448_v12  ;;  %v5533_v12 = vld [vmem:[%s8200_s1 + $0x744] ss:$16 sps:$4 sm:$0xff]  }
  0x40   :  { %3311 = vmatpush2.bf16.msra.mxu1 %v5449_v14  ;;  %3321 = vmatprep.subr.bf16.mxu0 %v5452_v15  ;;  %v5528_v14 = vld [vmem:[%s8200_s1 + $0x540] ss:$16 sps:$4 sm:$0xff]  }
  0x41   :  { %3362 = vmatprep.subr.bf16.mxu1 %v5455_v16  ;;  %v5531_v15 = vld [vmem:[%s8200_s1 + $0x740] ss:$16 sps:$4 sm:$0xff]   ;;  %v5536_v16 = vld [vmem:[%s8200_s1 + $0x524] ss:$16 sps:$4 sm:$0xff]  }
  0x42   :  { %3272 = vmatmul.mubr.bf16.vlgmr.msra.gmra.mxu0 %v6471_v13 }
  0x43   :  { %3313 = vmatmul.mubr.bf16.vlgmr.msra.gmra.mxu1 %v6487_v18  ;;  %3322 = vmatpush1.bf16.msra.mxu0 %v5450_v19  ;;  %v5539_v19 = vld [vmem:[%s8200_s1 + $0x724] ss:$16 sps:$4 sm:$0xff]  }
  0x44   :  { %3363 = vmatpush1.bf16.msra.mxu1 %v5453_v20  ;;  %3323 = vmatprep.subr.bf16.mxu0 %v5458_v21  ;;  %v5534_v20 = vld [vmem:[%s8200_s1 + $0x520] ss:$16 sps:$4 sm:$0xff]  }
  0x45   :  { %3364 = vmatprep.subr.bf16.mxu1 %v5461_v22  ;;  %3353 = vmatprep.mubr.bf16.mxu0 %v6483_v17  ;;  %v5537_v21 = vld [vmem:[%s8200_s1 + $0x720] ss:$16 sps:$4 sm:$0xff]   ;;  %v5542_v22 = vld [vmem:[%s8200_s1 + $0x504] ss:$16 sps:$4 sm:$0xff]  }
  0x46   :  { %3394 = vmatprep.mubr.bf16.mxu1 %v6503_v23 }
  0x47   :  { %3324 = vmatpush1.bf16.msra.mxu0 %v5456_v24  ;;  %v5545_v24 = vld [vmem:[%s8200_s1 + $0x704] ss:$16 sps:$4 sm:$0xff]  }
  0x48   :  { %3365 = vmatpush1.bf16.msra.mxu1 %v5459_v25  ;;  %3325 = vmatprep.subr.bf16.mxu0 %v5464_v26  ;;  %v5540_v25 = vld [vmem:[%s8200_s1 + $0x500] ss:$16 sps:$4 sm:$0xff]   ;;  %v6682_v26 = vrot.slane %v6451_v6, %v6393_v49 }
  0x49   :  { %3366 = vmatprep.subr.bf16.mxu1 %v5467_v27  ;;  %v5543_v27 = vld [vmem:[%s8200_s1 + $0x700] ss:$16 sps:$4 sm:$0xff]  }
  0x4a   :  { %v6695_v6 = vcombine.high %v6682_v26, %v6682_v26 }
  0x4b   :  { %3326 = vmatpush1.bf16.msra.mxu0 %v5462_v28  ;;  %v5549_v28 = vld [vmem:[%s8200_s1 + $0x8e4] ss:$16 sps:$4 sm:$0xff]  }
  0x4c   :  { %3367 = vmatpush1.bf16.msra.mxu1 %v5465_v29  ;;  %3327 = vmatprep.subr.bf16.mxu0 %v5470_v30  ;;  %v5552_v29 = vld [vmem:[%s8200_s1 + $0xae4] ss:$16 sps:$4 sm:$0xff]   ;;  %v5547_v30 = vld [vmem:[%s8200_s1 + $0x8e0] ss:$16 sps:$4 sm:$0xff]  }
  0x4d   :  { %3368 = vmatprep.subr.bf16.mxu1 %v5473_v31  ;;  %v5550_v31 = vld [vmem:[%s8200_s1 + $0xae0] ss:$16 sps:$4 sm:$0xff]  }
  0x4f   :  { %3328 = vmatpush1.bf16.msra.mxu0 %v5468_v32  ;;  %v6706_v32 = vld [vmem:[%s8201_s0 + $0x8] sm:$0xff] }
  0x50   :  { %3369 = vmatpush1.bf16.msra.mxu1 %v5471_v33  ;;  %3329 = vmatprep.subr.bf16.mxu0 %v5476_v34  ;;  %v5555_v33 = vld [vmem:[%s8200_s1 + $0x8c4] ss:$16 sps:$4 sm:$0xff]  }
  0x51   :  { %3370 = vmatprep.subr.bf16.mxu1 %v5479_v35  ;;  %v5558_v34 = vld [vmem:[%s8200_s1 + $0xac4] ss:$16 sps:$4 sm:$0xff]   ;;  %v6716_v35 = vrot.slane %v6706_v32, %v6393_v49 }
  0x53   :  { %3330 = vmatpush1.bf16.msra.mxu0 %v5474_v36  ;;  %v629_v36 = vcombine.high %v6716_v35, %v6716_v35 }
  0x54   :  { %3371 = vmatpush1.bf16.msra.mxu1 %v5477_v37  ;;  %3331 = vmatprep.subr.bf16.mxu0 %v5482_v38  ;;  %v5553_v37 = vld [vmem:[%s8200_s1 + $0x8c0] ss:$16 sps:$4 sm:$0xff]  }
  0x55   :  { %3372 = vmatprep.subr.bf16.mxu1 %v5485_v39  ;;  %v5556_v38 = vld [vmem:[%s8200_s1 + $0xac0] ss:$16 sps:$4 sm:$0xff]   ;;  %v5561_v39 = vld [vmem:[%s8200_s1 + $0x8a4] ss:$16 sps:$4 sm:$0xff]  }
  0x57   :  { %3332 = vmatpush1.bf16.msra.mxu0 %v5480_v40  ;;  %v5564_v40 = vld [vmem:[%s8200_s1 + $0xaa4] ss:$16 sps:$4 sm:$0xff]  }
  0x58   :  { %3373 = vmatpush1.bf16.msra.mxu1 %v5483_v41  ;;  %3333 = vmatprep.subr.bf16.mxu0 %v5488_v43  ;;  %v6735_v41 = vrot.slane %v629_v36, %v6393_v49  ;;  %v5625_v36 = vld [vmem:[%s8200_s1 + $0x940] ss:$16 sps:$4 sm:$0xff]  }
  0x59   :  { %3374 = vmatprep.subr.bf16.mxu1 %v5491_v44  ;;  %v5559_v44 = vld [vmem:[%s8200_s1 + $0x8a0] ss:$16 sps:$4 sm:$0xff]  }
  0x5a   :  { %v6740_v43 = vcombine.high %v6735_v41, %v6735_v41 }
  0x5b   :  { %3334 = vmatpush1.bf16.msra.mxu0 %v5486_v45  ;;  %v5562_v45 = vld [vmem:[%s8200_s1 + $0xaa0] ss:$16 sps:$4 sm:$0xff]  }
  0x5c   :  { %3375 = vmatpush1.bf16.msra.mxu1 %v5489_v46  ;;  %3335 = vmatprep.subr.bf16.mxu0 %v5494_v47  ;;  %v5567_v46 = vld [vmem:[%s8200_s1 + $0x884] ss:$16 sps:$4 sm:$0xff]  }
  0x5d   :  { %3376 = vmatprep.subr.bf16.mxu1 %v5497_v48  ;;  %v5570_v47 = vld [vmem:[%s8200_s1 + $0xa84] ss:$16 sps:$4 sm:$0xff]   ;;  %v5565_v48 = vld [vmem:[%s8200_s1 + $0x880] ss:$16 sps:$4 sm:$0xff]  }
  0x5f   :  { %3336 = vmatpush1.bf16.msra.mxu0 %v5492_v50  ;;  %v5568_v50 = vld [vmem:[%s8200_s1 + $0xa80] ss:$16 sps:$4 sm:$0xff]  }
  0x60   :  { %3377 = vmatpush1.bf16.msra.mxu1 %v5495_v51  ;;  %3337 = vmatprep.subr.bf16.mxu0 %v5500_v52  ;;  %v5573_v51 = vld [vmem:[%s8200_s1 + $0x864] ss:$16 sps:$4 sm:$0xff]  }
  0x61   :  { %3378 = vmatprep.subr.bf16.mxu1 %v5503_v53  ;;  %v5576_v52 = vld [vmem:[%s8200_s1 + $0xa64] ss:$16 sps:$4 sm:$0xff]   ;;  %v5571_v53 = vld [vmem:[%s8200_s1 + $0x860] ss:$16 sps:$4 sm:$0xff]  }
  0x63   :  { %3338 = vmatpush2.bf16.msra.mxu0 %v5498_v54  ;;  %v5574_v54 = vld [vmem:[%s8200_s1 + $0xa60] ss:$16 sps:$4 sm:$0xff]  }
  0x64   :  { %3379 = vmatpush2.bf16.msra.mxu1 %v5501_v55  ;;  %3339 = vmatprep.subr.bf16.mxu0 %v5506_v56  ;;  %v5579_v55 = vld [vmem:[%s8200_s1 + $0x844] ss:$16 sps:$4 sm:$0xff]  }
  0x65   :  { %3380 = vmatprep.subr.bf16.mxu1 %v5509_v57  ;;  %v5582_v56 = vld [vmem:[%s8200_s1 + $0xa44] ss:$16 sps:$4 sm:$0xff]   ;;  %v5577_v57 = vld [vmem:[%s8200_s1 + $0x840] ss:$16 sps:$4 sm:$0xff]  }
  0x67   :  { %3340 = vmatpush2.bf16.msra.mxu0 %v5504_v58  ;;  %v5580_v58 = vld [vmem:[%s8200_s1 + $0xa40] ss:$16 sps:$4 sm:$0xff]  }
  0x68   :  { %3381 = vmatpush2.bf16.msra.mxu1 %v5507_v59  ;;  %3341 = vmatprep.subr.bf16.mxu0 %v5512_v61  ;;  %v5585_v59 = vld [vmem:[%s8200_s1 + $0x824] ss:$16 sps:$4 sm:$0xff]  }
  0x69   :  { %3382 = vmatprep.subr.bf16.mxu1 %v5515_v62  ;;  %v5588_v61 = vld [vmem:[%s8200_s1 + $0xa24] ss:$16 sps:$4 sm:$0xff]   ;;  %v5583_v62 = vld [vmem:[%s8200_s1 + $0x820] ss:$16 sps:$4 sm:$0xff]  }
  0x6b   :  { %3342 = vmatpush2.bf16.msra.mxu0 %v5510_v63  ;;  %v5586_v63 = vld [vmem:[%s8200_s1 + $0xa20] ss:$16 sps:$4 sm:$0xff]  }
  0x6c   :  { %3383 = vmatpush2.bf16.msra.mxu1 %v5513_v1  ;;  %3343 = vmatprep.subr.bf16.mxu0 %v5518_v2  ;;  %v5591_v1 = vld [vmem:[%s8200_s1 + $0x804] ss:$16 sps:$4 sm:$0xff]  }
  0x6d   :  { %3384 = vmatprep.subr.bf16.mxu1 %v5521_v3  ;;  %v5594_v2 = vld [vmem:[%s8200_s1 + $0xa04] ss:$16 sps:$4 sm:$0xff]   ;;  %v5589_v3 = vld [vmem:[%s8200_s1 + $0x800] ss:$16 sps:$4 sm:$0xff]  }
  0x6f   :  { %3344 = vmatpush2.bf16.msra.mxu0 %v5516_v4  ;;  %v5592_v4 = vld [vmem:[%s8200_s1 + $0xa00] ss:$16 sps:$4 sm:$0xff]  }
  0x70   :  { %3385 = vmatpush2.bf16.msra.mxu1 %v5519_v5  ;;  %3345 = vmatprep.subr.bf16.mxu0 %v5524_v7  ;;  %v5597_v5 = vld [vmem:[%s8200_s1 + $0x9e4] ss:$16 sps:$4 sm:$0xff]  }
  0x71   :  { %3386 = vmatprep.subr.bf16.mxu1 %v5527_v8  ;;  %v5600_v7 = vld [vmem:[%s8200_s1 + $0xbe4] ss:$16 sps:$4 sm:$0xff]   ;;  %v5595_v8 = vld [vmem:[%s8200_s1 + $0x9e0] ss:$16 sps:$4 sm:$0xff]  }
  0x73   :  { %3346 = vmatpush2.bf16.msra.mxu0 %v5522_v9  ;;  %v5598_v9 = vld [vmem:[%s8200_s1 + $0xbe0] ss:$16 sps:$4 sm:$0xff]  }
  0x74   :  { %3387 = vmatpush2.bf16.msra.mxu1 %v5525_v10  ;;  %3347 = vmatprep.subr.bf16.mxu0 %v5530_v11  ;;  %v5603_v10 = vld [vmem:[%s8200_s1 + $0x9c4] ss:$16 sps:$4 sm:$0xff]  }
  0x75   :  { %3388 = vmatprep.subr.bf16.mxu1 %v5533_v12  ;;  %v5606_v11 = vld [vmem:[%s8200_s1 + $0xbc4] ss:$16 sps:$4 sm:$0xff]   ;;  %v5601_v12 = vld [vmem:[%s8200_s1 + $0x9c0] ss:$16 sps:$4 sm:$0xff]  }
  0x77   :  { %3348 = vmatpush2.bf16.msra.mxu0 %v5528_v14  ;;  %v5604_v14 = vld [vmem:[%s8200_s1 + $0xbc0] ss:$16 sps:$4 sm:$0xff]  }
  0x78   :  { %3389 = vmatpush2.bf16.msra.mxu1 %v5531_v15  ;;  %3349 = vmatprep.subr.bf16.mxu0 %v5536_v16  ;;  %v5609_v15 = vld [vmem:[%s8200_s1 + $0x9a4] ss:$16 sps:$4 sm:$0xff]  }
  0x79   :  { %3390 = vmatprep.subr.bf16.mxu1 %v5539_v19  ;;  %v5612_v16 = vld [vmem:[%s8200_s1 + $0xba4] ss:$16 sps:$4 sm:$0xff]   ;;  %v5607_v19 = vld [vmem:[%s8200_s1 + $0x9a0] ss:$16 sps:$4 sm:$0xff]  }
  0x7b   :  { %3350 = vmatpush2.bf16.msra.mxu0 %v5534_v20  ;;  %v5610_v20 = vld [vmem:[%s8200_s1 + $0xba0] ss:$16 sps:$4 sm:$0xff]  }
  0x7c   :  { %3391 = vmatpush2.bf16.msra.mxu1 %v5537_v21  ;;  %3351 = vmatprep.subr.bf16.mxu0 %v5542_v22  ;;  %v5615_v21 = vld [vmem:[%s8200_s1 + $0x984] ss:$16 sps:$4 sm:$0xff]  }
  0x7d   :  { %3392 = vmatprep.subr.bf16.mxu1 %v5545_v24  ;;  %v5618_v22 = vld [vmem:[%s8200_s1 + $0xb84] ss:$16 sps:$4 sm:$0xff]   ;;  %v5613_v24 = vld [vmem:[%s8200_s1 + $0x980] ss:$16 sps:$4 sm:$0xff]  }
  0x7f   :  { %3352 = vmatpush2.bf16.msra.mxu0 %v5540_v25  ;;  %v5616_v25 = vld [vmem:[%s8200_s1 + $0xb80] ss:$16 sps:$4 sm:$0xff]  }
  0x80   :  { %3393 = vmatpush2.bf16.msra.mxu1 %v5543_v27  ;;  %3403 = vmatprep.subr.bf16.mxu0 %v5549_v28  ;;  %v5621_v27 = vld [vmem:[%s8200_s1 + $0x964] ss:$16 sps:$4 sm:$0xff]  }
  0x81   :  { %3444 = vmatprep.subr.bf16.mxu1 %v5552_v29  ;;  %v5624_v28 = vld [vmem:[%s8200_s1 + $0xb64] ss:$16 sps:$4 sm:$0xff]   ;;  %v5619_v29 = vld [vmem:[%s8200_s1 + $0x960] ss:$16 sps:$4 sm:$0xff]  }
  0x82   :  { %3354 = vmatmul.mubr.bf16.vlgmr.msra.gmra.mxu0 %v6682_v26 }
  0x83   :  { %3395 = vmatmul.mubr.bf16.vlgmr.msra.gmra.mxu1 %v6695_v6  ;;  %3404 = vmatpush1.bf16.msra.mxu0 %v5547_v30  ;;  %v5622_v30 = vld [vmem:[%s8200_s1 + $0xb60] ss:$16 sps:$4 sm:$0xff]  }
  0x84   :  { %3445 = vmatpush1.bf16.msra.mxu1 %v5550_v31  ;;  %3405 = vmatprep.subr.bf16.mxu0 %v5555_v33  ;;  %v5627_v31 = vld [vmem:[%s8200_s1 + $0x944] ss:$16 sps:$4 sm:$0xff]  }
  0x85   :  { %3446 = vmatprep.subr.bf16.mxu1 %v5558_v34  ;;  %3435 = vmatprep.mubr.bf16.mxu0 %v6735_v41  ;;  %v5630_v33 = vld [vmem:[%s8200_s1 + $0xb44] ss:$16 sps:$4 sm:$0xff]   ;;  %v614_v34 = vcombine.high %v6706_v32, %v6706_v32 }
  0x86   :  { %3476 = vmatprep.mubr.bf16.mxu1 %v6740_v43  ;;  %v5636_v32 = vld [vmem:[%s8200_s1 + $0xb24] ss:$16 sps:$4 sm:$0xff]  }
  0x87   :  { %3406 = vmatpush1.bf16.msra.mxu0 %v5553_v37  ;;  %v5628_v37 = vld [vmem:[%s8200_s1 + $0xb40] ss:$16 sps:$4 sm:$0xff]  }
  0x88   :  { %3447 = vmatpush1.bf16.msra.mxu1 %v5556_v38  ;;  %3407 = vmatprep.subr.bf16.mxu0 %v5561_v39  ;;  %v5633_v38 = vld [vmem:[%s8200_s1 + $0x924] ss:$16 sps:$4 sm:$0xff]   ;;  %v6890_v39 = vrot.slane %v614_v34, %v6393_v49  ;;  %v5694_v34 = vld [vmem:[%s8200_s1 + $0xfe0] ss:$16 sps:$4 sm:$0xff]  }
  0x89   :  { %3448 = vmatprep.subr.bf16.mxu1 %v5564_v40  ;;  %v5631_v40 = vld [vmem:[%s8200_s1 + $0x920] ss:$16 sps:$4 sm:$0xff]  }
  0x8b   :  { %3408 = vmatpush1.bf16.msra.mxu0 %v5559_v44  ;;  %v5634_v44 = vld [vmem:[%s8200_s1 + $0xb20] ss:$16 sps:$4 sm:$0xff]  }
  0x8c   :  { %3449 = vmatpush1.bf16.msra.mxu1 %v5562_v45  ;;  %3409 = vmatprep.subr.bf16.mxu0 %v5567_v46  ;;  %v5639_v45 = vld [vmem:[%s8200_s1 + $0x904] ss:$16 sps:$4 sm:$0xff]  }
  0x8d   :  { %3450 = vmatprep.subr.bf16.mxu1 %v5570_v47  ;;  %v5642_v46 = vld [vmem:[%s8200_s1 + $0xb04] ss:$16 sps:$4 sm:$0xff]   ;;  %v630_v47 = vcombine.high %v6890_v39, %v6890_v39 }
  0x8f   :  { %3410 = vmatpush1.bf16.msra.mxu0 %v5565_v48  ;;  %v5637_v48 = vld [vmem:[%s8200_s1 + $0x900] ss:$16 sps:$4 sm:$0xff]  }
  0x90   :  { %3451 = vmatpush1.bf16.msra.mxu1 %v5568_v50  ;;  %3411 = vmatprep.subr.bf16.mxu0 %v5573_v51  ;;  %v6911_v50 = vrot.slane %v6716_v35, %v6393_v49  ;;  %v5640_v51 = vld [vmem:[%s8200_s1 + $0xb00] ss:$16 sps:$4 sm:$0xff]  }
  0x91   :  { %3452 = vmatprep.subr.bf16.mxu1 %v5576_v52  ;;  %v5645_v52 = vld [vmem:[%s8200_s1 + $0xce4] ss:$16 sps:$4 sm:$0xff]  }
  0x92   :  { %v6927_v35 = vcombine.high %v6911_v50, %v6911_v50 }
  0x93   :  { %3412 = vmatpush1.bf16.msra.mxu0 %v5571_v53  ;;  %v5648_v53 = vld [vmem:[%s8200_s1 + $0xee4] ss:$16 sps:$4 sm:$0xff]  }
  0x94   :  { %3453 = vmatpush1.bf16.msra.mxu1 %v5574_v54  ;;  %3413 = vmatprep.subr.bf16.mxu0 %v5579_v55  ;;  %v6923_v54 = vrot.slane %v630_v47, %v6393_v49  ;;  %v5643_v55 = vld [vmem:[%s8200_s1 + $0xce0] ss:$16 sps:$4 sm:$0xff]   ;;  %v5711_v47 = vld [vmem:[%s8200_s1 + $0xd84] ss:$16 sps:$4 sm:$0xff]  }
  0x95   :  { %3454 = vmatprep.subr.bf16.mxu1 %v5582_v56  ;;  %v5646_v56 = vld [vmem:[%s8200_s1 + $0xee0] ss:$16 sps:$4 sm:$0xff]  }
  0x97   :  { %3414 = vmatpush1.bf16.msra.mxu0 %v5577_v57  ;;  %v5651_v57 = vld [vmem:[%s8200_s1 + $0xcc4] ss:$16 sps:$4 sm:$0xff]  }
  0x98   :  { %3455 = vmatpush1.bf16.msra.mxu1 %v5580_v58  ;;  %3415 = vmatprep.subr.bf16.mxu0 %v5585_v59  ;;  %v5654_v58 = vld [vmem:[%s8200_s1 + $0xec4] ss:$16 sps:$4 sm:$0xff]   ;;  %v6943_v59 = vcombine.high %v6923_v54, %v6923_v54 }
  0x99   :  { %3456 = vmatprep.subr.bf16.mxu1 %v5588_v61  ;;  %v5649_v61 = vld [vmem:[%s8200_s1 + $0xcc0] ss:$16 sps:$4 sm:$0xff]  }
  0x9b   :  { %3416 = vmatpush1.bf16.msra.mxu0 %v5583_v62  ;;  %v5652_v62 = vld [vmem:[%s8200_s1 + $0xec0] ss:$16 sps:$4 sm:$0xff]  }
  0x9c   :  { %3457 = vmatpush1.bf16.msra.mxu1 %v5586_v63  ;;  %3417 = vmatprep.subr.bf16.mxu0 %v5591_v1  ;;  %v5657_v63 = vld [vmem:[%s8200_s1 + $0xca4] ss:$16 sps:$4 sm:$0xff]  }
  0x9d   :  { %3458 = vmatprep.subr.bf16.mxu1 %v5594_v2  ;;  %v5660_v1 = vld [vmem:[%s8200_s1 + $0xea4] ss:$16 sps:$4 sm:$0xff]   ;;  %v5655_v2 = vld [vmem:[%s8200_s1 + $0xca0] ss:$16 sps:$4 sm:$0xff]  }
  0x9f   :  { %3418 = vmatpush1.bf16.msra.mxu0 %v5589_v3  ;;  %v5658_v3 = vld [vmem:[%s8200_s1 + $0xea0] ss:$16 sps:$4 sm:$0xff]  }
  0xa0   :  { %3459 = vmatpush1.bf16.msra.mxu1 %v5592_v4  ;;  %3419 = vmatprep.subr.bf16.mxu0 %v5597_v5  ;;  %v5663_v4 = vld [vmem:[%s8200_s1 + $0xc84] ss:$16 sps:$4 sm:$0xff]  }
  0xa1   :  { %3460 = vmatprep.subr.bf16.mxu1 %v5600_v7  ;;  %v5666_v5 = vld [vmem:[%s8200_s1 + $0xe84] ss:$16 sps:$4 sm:$0xff]   ;;  %v5661_v7 = vld [vmem:[%s8200_s1 + $0xc80] ss:$16 sps:$4 sm:$0xff]  }
  0xa3   :  { %3420 = vmatpush2.bf16.msra.mxu0 %v5595_v8  ;;  %v5664_v8 = vld [vmem:[%s8200_s1 + $0xe80] ss:$16 sps:$4 sm:$0xff]  }
  0xa4   :  { %3461 = vmatpush2.bf16.msra.mxu1 %v5598_v9  ;;  %3421 = vmatprep.subr.bf16.mxu0 %v5603_v10  ;;  %v5669_v9 = vld [vmem:[%s8200_s1 + $0xc64] ss:$16 sps:$4 sm:$0xff]  }
  0xa5   :  { %3462 = vmatprep.subr.bf16.mxu1 %v5606_v11  ;;  %v5672_v10 = vld [vmem:[%s8200_s1 + $0xe64] ss:$16 sps:$4 sm:$0xff]   ;;  %v5667_v11 = vld [vmem:[%s8200_s1 + $0xc60] ss:$16 sps:$4 sm:$0xff]  }
  0xa7   :  { %3422 = vmatpush2.bf16.msra.mxu0 %v5601_v12  ;;  %v5670_v12 = vld [vmem:[%s8200_s1 + $0xe60] ss:$16 sps:$4 sm:$0xff]  }
  0xa8   :  { %3463 = vmatpush2.bf16.msra.mxu1 %v5604_v14  ;;  %3423 = vmatprep.subr.bf16.mxu0 %v5609_v15  ;;  %v5675_v14 = vld [vmem:[%s8200_s1 + $0xc44] ss:$16 sps:$4 sm:$0xff]  }
  0xa9   :  { %3464 = vmatprep.subr.bf16.mxu1 %v5612_v16  ;;  %v5678_v15 = vld [vmem:[%s8200_s1 + $0xe44] ss:$16 sps:$4 sm:$0xff]   ;;  %v5673_v16 = vld [vmem:[%s8200_s1 + $0xc40] ss:$16 sps:$4 sm:$0xff]  }
  0xab   :  { %3424 = vmatpush2.bf16.msra.mxu0 %v5607_v19  ;;  %v5676_v19 = vld [vmem:[%s8200_s1 + $0xe40] ss:$16 sps:$4 sm:$0xff]  }
  0xac   :  { %3465 = vmatpush2.bf16.msra.mxu1 %v5610_v20  ;;  %3425 = vmatprep.subr.bf16.mxu0 %v5615_v21  ;;  %v5681_v20 = vld [vmem:[%s8200_s1 + $0xc24] ss:$16 sps:$4 sm:$0xff]  }
  0xad   :  { %3466 = vmatprep.subr.bf16.mxu1 %v5618_v22  ;;  %v5684_v21 = vld [vmem:[%s8200_s1 + $0xe24] ss:$16 sps:$4 sm:$0xff]   ;;  %v5679_v22 = vld [vmem:[%s8200_s1 + $0xc20] ss:$16 sps:$4 sm:$0xff]  }
  0xaf   :  { %3426 = vmatpush2.bf16.msra.mxu0 %v5613_v24  ;;  %v5682_v24 = vld [vmem:[%s8200_s1 + $0xe20] ss:$16 sps:$4 sm:$0xff]  }
  0xb0   :  { %3467 = vmatpush2.bf16.msra.mxu1 %v5616_v25  ;;  %3427 = vmatprep.subr.bf16.mxu0 %v5621_v27  ;;  %v5687_v25 = vld [vmem:[%s8200_s1 + $0xc04] ss:$16 sps:$4 sm:$0xff]  }
  0xb1   :  { %3468 = vmatprep.subr.bf16.mxu1 %v5624_v28  ;;  %v5690_v27 = vld [vmem:[%s8200_s1 + $0xe04] ss:$16 sps:$4 sm:$0xff]   ;;  %v5685_v28 = vld [vmem:[%s8200_s1 + $0xc00] ss:$16 sps:$4 sm:$0xff]  }
  0xb3   :  { %3428 = vmatpush2.bf16.msra.mxu0 %v5619_v29  ;;  %v5688_v29 = vld [vmem:[%s8200_s1 + $0xe00] ss:$16 sps:$4 sm:$0xff]  }
  0xb4   :  { %3469 = vmatpush2.bf16.msra.mxu1 %v5622_v30  ;;  %3429 = vmatprep.subr.bf16.mxu0 %v5627_v31  ;;  %v5693_v30 = vld [vmem:[%s8200_s1 + $0xde4] ss:$16 sps:$4 sm:$0xff]  }
  0xb5   :  { %3470 = vmatprep.subr.bf16.mxu1 %v5630_v33  ;;  %v5696_v31 = vld [vmem:[%s8200_s1 + $0xfe4] ss:$16 sps:$4 sm:$0xff]   ;;  %v5691_v33 = vld [vmem:[%s8200_s1 + $0xde0] ss:$16 sps:$4 sm:$0xff]  }
  0xb7   :  { %3430 = vmatpush2.bf16.msra.mxu0 %v5625_v36  ;;  %v5699_v36 = vld [vmem:[%s8200_s1 + $0xdc4] ss:$16 sps:$4 sm:$0xff]  }
  0xb8   :  { %3471 = vmatpush2.bf16.msra.mxu1 %v5628_v37  ;;  %3431 = vmatprep.subr.bf16.mxu0 %v5633_v38  ;;  %v5702_v37 = vld [vmem:[%s8200_s1 + $0xfc4] ss:$16 sps:$4 sm:$0xff]   ;;  %v5697_v38 = vld [vmem:[%s8200_s1 + $0xdc0] ss:$16 sps:$4 sm:$0xff]  }
  0xb9   :  { %3472 = vmatprep.subr.bf16.mxu1 %v5636_v32  ;;  %v5700_v32 = vld [vmem:[%s8200_s1 + $0xfc0] ss:$16 sps:$4 sm:$0xff]  }
  0xbb   :  { %3432 = vmatpush2.bf16.msra.mxu0 %v5631_v40  ;;  %v5705_v40 = vld [vmem:[%s8200_s1 + $0xda4] ss:$16 sps:$4 sm:$0xff]  }
  0xbc   :  { %3473 = vmatpush2.bf16.msra.mxu1 %v5634_v44  ;;  %3433 = vmatprep.subr.bf16.mxu0 %v5639_v45  ;;  %v5708_v44 = vld [vmem:[%s8200_s1 + $0xfa4] ss:$16 sps:$4 sm:$0xff]   ;;  %v5703_v45 = vld [vmem:[%s8200_s1 + $0xda0] ss:$16 sps:$4 sm:$0xff]  }
  0xbd   :  { %3474 = vmatprep.subr.bf16.mxu1 %v5642_v46  ;;  %v5706_v46 = vld [vmem:[%s8200_s1 + $0xfa0] ss:$16 sps:$4 sm:$0xff]  }
  0xbf   :  { %3434 = vmatpush2.bf16.msra.mxu0 %v5637_v48  ;;  %v5714_v48 = vld [vmem:[%s8200_s1 + $0xf84] ss:$16 sps:$4 sm:$0xff]  }
  0xc0   :  { %3475 = vmatpush2.bf16.msra.mxu1 %v5640_v51  ;;  %3485 = vmatprep.subr.bf16.mxu0 %v5645_v52  ;;  %v5709_v51 = vld [vmem:[%s8200_s1 + $0xd80] ss:$16 sps:$4 sm:$0xff]  }
  0xc1   :  { %3526 = vmatprep.subr.bf16.mxu1 %v5648_v53  ;;  %v5712_v52 = vld [vmem:[%s8200_s1 + $0xf80] ss:$16 sps:$4 sm:$0xff]   ;;  %v5717_v53 = vld [vmem:[%s8200_s1 + $0xd64] ss:$16 sps:$4 sm:$0xff]  }
  0xc2   :  { %3436 = vmatmul.mubr.bf16.vlgmr.msra.gmra.mxu0 %v6911_v50 }
  0xc3   :  { %3477 = vmatmul.mubr.bf16.vlgmr.msra.gmra.mxu1 %v6927_v35  ;;  %3486 = vmatpush1.bf16.msra.mxu0 %v5643_v55  ;;  %v5720_v55 = vld [vmem:[%s8200_s1 + $0xf64] ss:$16 sps:$4 sm:$0xff]  }
  0xc4   :  { %3527 = vmatpush1.bf16.msra.mxu1 %v5646_v56  ;;  %3487 = vmatprep.subr.bf16.mxu0 %v5651_v57  ;;  %v5715_v56 = vld [vmem:[%s8200_s1 + $0xd60] ss:$16 sps:$4 sm:$0xff]  }
  0xc5   :  { %3528 = vmatprep.subr.bf16.mxu1 %v5654_v58  ;;  %3517 = vmatprep.mubr.bf16.mxu0 %v6923_v54  ;;  %v5718_v57 = vld [vmem:[%s8200_s1 + $0xf60] ss:$16 sps:$4 sm:$0xff]   ;;  %v5723_v58 = vld [vmem:[%s8200_s1 + $0xd44] ss:$16 sps:$4 sm:$0xff]  }
  0xc6   :  { %3558 = vmatprep.mubr.bf16.mxu1 %v6943_v59 }
  0xc7   :  { %3488 = vmatpush1.bf16.msra.mxu0 %v5649_v61  ;;  %v5726_v61 = vld [vmem:[%s8200_s1 + $0xf44] ss:$16 sps:$4 sm:$0xff]  }
  0xc8   :  { %3529 = vmatpush1.bf16.msra.mxu1 %v5652_v62  ;;  %3489 = vmatprep.subr.bf16.mxu0 %v5657_v63  ;;  %v5721_v62 = vld [vmem:[%s8200_s1 + $0xd40] ss:$16 sps:$4 sm:$0xff]  }
  0xc9   :  { %3530 = vmatprep.subr.bf16.mxu1 %v5660_v1  ;;  %v5724_v63 = vld [vmem:[%s8200_s1 + $0xf40] ss:$16 sps:$4 sm:$0xff]   ;;  %v5729_v1 = vld [vmem:[%s8200_s1 + $0xd24] ss:$16 sps:$4 sm:$0xff]  }
  0xcb   :  { %3490 = vmatpush1.bf16.msra.mxu0 %v5655_v2  ;;  %v5732_v2 = vld [vmem:[%s8200_s1 + $0xf24] ss:$16 sps:$4 sm:$0xff]  }
  0xcc   :  { %3531 = vmatpush1.bf16.msra.mxu1 %v5658_v3  ;;  %3491 = vmatprep.subr.bf16.mxu0 %v5663_v4  ;;  %v5727_v3 = vld [vmem:[%s8200_s1 + $0xd20] ss:$16 sps:$4 sm:$0xff]  }
  0xcd   :  { %3532 = vmatprep.subr.bf16.mxu1 %v5666_v5  ;;  %v5730_v4 = vld [vmem:[%s8200_s1 + $0xf20] ss:$16 sps:$4 sm:$0xff]   ;;  %v5735_v5 = vld [vmem:[%s8200_s1 + $0xd04] ss:$16 sps:$4 sm:$0xff]  }
  0xcf   :  { %3492 = vmatpush1.bf16.msra.mxu0 %v5661_v7  ;;  %v5738_v7 = vld [vmem:[%s8200_s1 + $0xf04] ss:$16 sps:$4 sm:$0xff]  }
  0xd0   :  { %3533 = vmatpush1.bf16.msra.mxu1 %v5664_v8  ;;  %3493 = vmatprep.subr.bf16.mxu0 %v5669_v9  ;;  %v5733_v8 = vld [vmem:[%s8200_s1 + $0xd00] ss:$16 sps:$4 sm:$0xff]  }
  0xd1   :  { %3534 = vmatprep.subr.bf16.mxu1 %v5672_v10  ;;  %v5736_v9 = vld [vmem:[%s8200_s1 + $0xf00] ss:$16 sps:$4 sm:$0xff]   ;;  %v7125_v10 = vrot.slane %v6890_v39, %v6393_v49  ;;  %v549_v49 = vsub.s32 1, %v6375_v42 }
  0xd3   :  { %3494 = vmatpush1.bf16.msra.mxu0 %v5667_v11  ;;  %v541_v11 = vld [vmem:[%s8202_s2] sm:$0xf]  ;;  %v7140_v39 = vcombine.high %v7125_v10, %v7125_v10 }
  0xd4   :  { %3535 = vmatpush1.bf16.msra.mxu1 %v5670_v12  ;;  %3495 = vmatprep.subr.bf16.mxu0 %v5675_v14  ;;  %v545_v12 = vsub.s32 0, %v6375_v42  ;;  %v5742_v14 = vld [vmem:[%s8200_s1 + $0xec] ss:$16 sps:$4 sm:$0xff]  }
  0xd5   :  { %3536 = vmatprep.subr.bf16.mxu1 %v5678_v15  ;;  %v5745_v15 = vld [vmem:[%s8200_s1 + $0x2ec] ss:$16 sps:$4 sm:$0xff]  }
  0xd7   :  { %3496 = vmatpush1.bf16.msra.mxu0 %v5673_v16  ;;  %v5740_v16 = vld [vmem:[%s8200_s1 + $0xe8] ss:$16 sps:$4 sm:$0xff]  }
  0xd8   :  { %3537 = vmatpush1.bf16.msra.mxu1 %v5676_v19  ;;  %3497 = vmatprep.subr.bf16.mxu0 %v5681_v20  ;;  %v546_v19 = vrot.slane %v541_v11, %v545_v12  ;;  %v5743_v20 = vld [vmem:[%s8200_s1 + $0x2e8] ss:$16 sps:$4 sm:$0xff]  }
  0xd9   :  { %3538 = vmatprep.subr.bf16.mxu1 %v5684_v21  ;;  %v5748_v21 = vld [vmem:[%s8200_s1 + $0xcc] ss:$16 sps:$4 sm:$0xff]  }
  0xdb   :  { %3498 = vmatpush1.bf16.msra.mxu0 %v5679_v22  ;;  %v5751_v22 = vld [vmem:[%s8200_s1 + $0x2cc] ss:$16 sps:$4 sm:$0xff]  }
  0xdc   :  { %3539 = vmatpush1.bf16.msra.mxu1 %v5682_v24  ;;  %3499 = vmatprep.subr.bf16.mxu0 %v5687_v25  ;;  %v550_v24 = vrot.slane %v541_v11, %v549_v49  ;;  %v5790_v11 = vld [vmem:[%s8200_s1 + $0x1ec] ss:$16 sps:$4 sm:$0xff]  }
  0xdd   :  { %3540 = vmatprep.subr.bf16.mxu1 %v5690_v27 }
  0xdf   :  { %3500 = vmatpush1.bf16.msra.mxu0 %v5685_v28  ;;  %v5746_v28 = vld [vmem:[%s8200_s1 + $0xc8] ss:$16 sps:$4 sm:$0xff]  }
  0xe0   :  { %3541 = vmatpush1.bf16.msra.mxu1 %v5688_v29  ;;  %3501 = vmatprep.subr.bf16.mxu0 %v5693_v30  ;;  %v5749_v29 = vld [vmem:[%s8200_s1 + $0x2c8] ss:$16 sps:$4 sm:$0xff]  }
  0xe1   :  { %3542 = vmatprep.subr.bf16.mxu1 %v5696_v31 }
  0xe3   :  { %3502 = vmatpush2.bf16.msra.mxu0 %v5691_v33 }
  0xe4   :  { %3543 = vmatpush2.bf16.msra.mxu1 %v5694_v34  ;;  %3503 = vmatprep.subr.bf16.mxu0 %v5699_v36  ;;  %v5754_v34 = vld [vmem:[%s8200_s1 + $0xac] ss:$16 sps:$4 sm:$0xff]  }
  0xe5   :  { %3544 = vmatprep.subr.bf16.mxu1 %v5702_v37  ;;  %v5757_v36 = vld [vmem:[%s8200_s1 + $0x2ac] ss:$16 sps:$4 sm:$0xff]  }
  0xe7   :  { %3504 = vmatpush2.bf16.msra.mxu0 %v5697_v38 }
  0xe8   :  { %3545 = vmatpush2.bf16.msra.mxu1 %v5700_v32  ;;  %3505 = vmatprep.subr.bf16.mxu0 %v5705_v40  ;;  %v5752_v32 = vld [vmem:[%s8200_s1 + $0xa8] ss:$16 sps:$4 sm:$0xff]  }
  0xe9   :  { %3546 = vmatprep.subr.bf16.mxu1 %v5708_v44  ;;  %v5755_v40 = vld [vmem:[%s8200_s1 + $0x2a8] ss:$16 sps:$4 sm:$0xff]  }
  0xeb   :  { %3506 = vmatpush2.bf16.msra.mxu0 %v5703_v45 }
  0xec   :  { %3547 = vmatpush2.bf16.msra.mxu1 %v5706_v46  ;;  %3507 = vmatprep.subr.bf16.mxu0 %v5711_v47 }
  0xed   :  { %3548 = vmatprep.subr.bf16.mxu1 %v5714_v48 }
  0xef   :  { %3508 = vmatpush2.bf16.msra.mxu0 %v5709_v51  ;;  %v5760_v51 = vld [vmem:[%s8200_s1 + $0x8c] ss:$16 sps:$4 sm:$0xff]  }
  0xf0   :  { %3549 = vmatpush2.bf16.msra.mxu1 %v5712_v52  ;;  %3509 = vmatprep.subr.bf16.mxu0 %v5717_v53  ;;  %v5761_v52 = vld [vmem:[%s8200_s1 + $0x288] ss:$16 sps:$4 sm:$0xff]   ;;  %v5766_v53 = vld [vmem:[%s8200_s1 + $0x6c] ss:$16 sps:$4 sm:$0xff]  }
  0xf1   :  { %3550 = vmatprep.subr.bf16.mxu1 %v5720_v55  ;;  %v5769_v55 = vld [vmem:[%s8200_s1 + $0x26c] ss:$16 sps:$4 sm:$0xff]  }
  0xf3   :  { %3510 = vmatpush2.bf16.msra.mxu0 %v5715_v56  ;;  %v5764_v56 = vld [vmem:[%s8200_s1 + $0x68] ss:$16 sps:$4 sm:$0xff]  }
  0xf4   :  { %3551 = vmatpush2.bf16.msra.mxu1 %v5718_v57  ;;  %3511 = vmatprep.subr.bf16.mxu0 %v5723_v58  ;;  %v5767_v57 = vld [vmem:[%s8200_s1 + $0x268] ss:$16 sps:$4 sm:$0xff]   ;;  %v5772_v58 = vld [vmem:[%s8200_s1 + $0x4c] ss:$16 sps:$4 sm:$0xff]  }
  0xf5   :  { %3552 = vmatprep.subr.bf16.mxu1 %v5726_v61  ;;  %v5775_v61 = vld [vmem:[%s8200_s1 + $0x24c] ss:$16 sps:$4 sm:$0xff]  }
  0xf7   :  { %3512 = vmatpush2.bf16.msra.mxu0 %v5721_v62  ;;  %v5770_v62 = vld [vmem:[%s8200_s1 + $0x48] ss:$16 sps:$4 sm:$0xff]  }
  0xf8   :  { %3553 = vmatpush2.bf16.msra.mxu1 %v5724_v63  ;;  %3513 = vmatprep.subr.bf16.mxu0 %v5729_v1  ;;  %v5773_v63 = vld [vmem:[%s8200_s1 + $0x248] ss:$16 sps:$4 sm:$0xff]   ;;  %v5778_v1 = vld [vmem:[%s8200_s1 + $0x2c] ss:$16 sps:$4 sm:$0xff]  }
  0xf9   :  { %3554 = vmatprep.subr.bf16.mxu1 %v5732_v2  ;;  %v5781_v2 = vld [vmem:[%s8200_s1 + $0x22c] ss:$16 sps:$4 sm:$0xff]  }
  0xfb   :  { %3514 = vmatpush2.bf16.msra.mxu0 %v5727_v3  ;;  %v5776_v3 = vld [vmem:[%s8200_s1 + $0x28] ss:$16 sps:$4 sm:$0xff]  }
  0xfc   :  { %3555 = vmatpush2.bf16.msra.mxu1 %v5730_v4  ;;  %3515 = vmatprep.subr.bf16.mxu0 %v5735_v5  ;;  %v5779_v4 = vld [vmem:[%s8200_s1 + $0x228] ss:$16 sps:$4 sm:$0xff]   ;;  %v5784_v5 = vld [vmem:[%s8200_s1 + $0xc] ss:$16 sps:$4 sm:$0xff]  }
  0xfd   :  { %3556 = vmatprep.subr.bf16.mxu1 %v5738_v7  ;;  %v5787_v7 = vld [vmem:[%s8200_s1 + $0x20c] ss:$16 sps:$4 sm:$0xff]  }
  0xff   :  { %3516 = vmatpush2.bf16.msra.mxu0 %v5733_v8  ;;  %v5782_v8 = vld [vmem:[%s8200_s1 + $0x8] ss:$16 sps:$4 sm:$0xff]  }
 0x100   :  { %3557 = vmatpush2.bf16.msra.mxu1 %v5736_v9  ;;  %3567 = vmatprep.subr.bf16.mxu0 %v5742_v14  ;;  %v5785_v9 = vld [vmem:[%s8200_s1 + $0x208] ss:$16 sps:$4 sm:$0xff]   ;;  %v5793_v14 = vld [vmem:[%s8200_s1 + $0x3ec] ss:$16 sps:$4 sm:$0xff]  }
 0x101   :  { %3608 = vmatprep.subr.bf16.mxu1 %v5745_v15  ;;  %v5788_v15 = vld [vmem:[%s8200_s1 + $0x1e8] ss:$16 sps:$4 sm:$0xff]  }
 0x102   :  { %v3273_v25 = vpop.f32.mrf.mxu0  ;;  %3518 = vmatmul.mubr.bf16.vlgmr.msra.gmra.mxu0 %v7125_v10 }
 0x103   :  { %v3314_v27 = vpop.f32.mrf.mxu1  ;;  %3559 = vmatmul.mubr.bf16.vlgmr.msra.gmra.mxu1 %v7140_v39  ;;  %v3274_v30 = vadd.f32 %v3273_v25, %v546_v19  ;;  %3568 = vmatpush1.bf16.msra.mxu0 %v5740_v16  ;;  %v5791_v16 = vld [vmem:[%s8200_s1 + $0x3e8] ss:$16 sps:$4 sm:$0xff]   ;;  %v5796_v19 = vld [vmem:[%s8200_s1 + $0x1cc] ss:$16 sps:$4 sm:$0xff]  }
 0x104   :  { %3609 = vmatpush1.bf16.msra.mxu1 %v5743_v20  ;;  %v3275_v31 = vpop.f32.mrf.mxu0  ;;  %3569 = vmatprep.subr.bf16.mxu0 %v5748_v21  ;;  %v5799_v20 = vld [vmem:[%s8200_s1 + $0x3cc] ss:$16 sps:$4 sm:$0xff]   ;;  %v5794_v21 = vld [vmem:[%s8200_s1 + $0x1c8] ss:$16 sps:$4 sm:$0xff]  }
 0x105   :  { %v3316_v33 = vpop.f32.mrf.mxu1  ;;  %3610 = vmatprep.subr.bf16.mxu1 %v5751_v22  ;;  %v7172_v37 = vadd.f32 %v3314_v27, %v3274_v30  ;;  %v3276_v38 = vadd.f32 %v3275_v31, %v550_v24  ;;  %3599 = vmatprep.mubr.bf16.mxu0 %v6421_v60  ;;  %v5763_v60 = vld [vmem:[%s8200_s1 + $0x28c] ss:$16 sps:$4 sm:$0xff]   ;;  %v5797_v22 = vld [vmem:[%s8200_s1 + $0x3c8] ss:$16 sps:$4 sm:$0xff]  }
 0x106   :  { %3640 = vmatprep.mubr.bf16.mxu1 %v6434_v0  ;;  %v3277_v44 = vpop.f32.mrf.mxu0  ;;  %v5758_v0 = vld [vmem:[%s8200_s1 + $0x88] ss:$16 sps:$4 sm:$0xff]   ;;  %v5802_v24 = vld [vmem:[%s8200_s1 + $0x1ac] ss:$16 sps:$4 sm:$0xff]  }
 0x107   :  { %v3318_v45 = vpop.f32.mrf.mxu1  ;;  %v7182_v46 = vadd.f32 %v3316_v33, %v3276_v38  ;;  %3570 = vmatpush1.bf16.msra.mxu0 %v5746_v28  ;;  %v5805_v25 = vld [vmem:[%s8200_s1 + $0x3ac] ss:$16 sps:$4 sm:$0xff]   ;;  %v5800_v27 = vld [vmem:[%s8200_s1 + $0x1a8] ss:$16 sps:$4 sm:$0xff]  }
 0x108   :  { %3611 = vmatpush1.bf16.msra.mxu1 %v5749_v29  ;;  %v3278_v47 = vpop.f32.mrf.mxu0  ;;  %3571 = vmatprep.subr.bf16.mxu0 %v5754_v34  ;;  %v5803_v28 = vld [vmem:[%s8200_s1 + $0x3a8] ss:$16 sps:$4 sm:$0xff]   ;;  %v5808_v29 = vld [vmem:[%s8200_s1 + $0x18c] ss:$16 sps:$4 sm:$0xff]  }
 0x109   :  { %v3319_v48 = vpop.f32.mrf.mxu1  ;;  %3612 = vmatprep.subr.bf16.mxu1 %v5757_v36  ;;  %v5811_v30 = vld [vmem:[%s8200_s1 + $0x38c] ss:$16 sps:$4 sm:$0xff]   ;;  %v5806_v31 = vld [vmem:[%s8200_s1 + $0x188] ss:$16 sps:$4 sm:$0xff]  }
 0x10a   :  { %v5809_v33 = vld [vmem:[%s8200_s1 + $0x388] ss:$16 sps:$4 sm:$0xff]   ;;  %v5814_v34 = vld [vmem:[%s8200_s1 + $0x16c] ss:$16 sps:$4 sm:$0xff]  }
 0x10b   :  { %3572 = vmatpush1.bf16.msra.mxu0 %v5752_v32  ;;  %v5817_v36 = vld [vmem:[%s8200_s1 + $0x36c] ss:$16 sps:$4 sm:$0xff]   ;;  %v5812_v38 = vld [vmem:[%s8200_s1 + $0x168] ss:$16 sps:$4 sm:$0xff]  }
 0x10c   :  { %3613 = vmatpush1.bf16.msra.mxu1 %v5755_v40  ;;  %3573 = vmatprep.subr.bf16.mxu0 %v5760_v51  ;;  %v5815_v32 = vld [vmem:[%s8200_s1 + $0x368] ss:$16 sps:$4 sm:$0xff]   ;;  %v5820_v40 = vld [vmem:[%s8200_s1 + $0x14c] ss:$16 sps:$4 sm:$0xff]  }
 0x10d   :  { %3614 = vmatprep.subr.bf16.mxu1 %v5763_v60  ;;  %v5823_v44 = vld [vmem:[%s8200_s1 + $0x34c] ss:$16 sps:$4 sm:$0xff]   ;;  %v5818_v45 = vld [vmem:[%s8200_s1 + $0x148] ss:$16 sps:$4 sm:$0xff]  }
 0x10e   :  { %v5821_v47 = vld [vmem:[%s8200_s1 + $0x348] ss:$16 sps:$4 sm:$0xff]   ;;  %v5826_v48 = vld [vmem:[%s8200_s1 + $0x12c] ss:$16 sps:$4 sm:$0xff]  }
 0x10f   :  { %3574 = vmatpush1.bf16.msra.mxu0 %v5758_v0  ;;  %v5829_v51 = vld [vmem:[%s8200_s1 + $0x32c] ss:$16 sps:$4 sm:$0xff]   ;;  %v5824_v60 = vld [vmem:[%s8200_s1 + $0x128] ss:$16 sps:$4 sm:$0xff]  }
 0x110   :  { %3615 = vmatpush1.bf16.msra.mxu1 %v5761_v52  ;;  %3575 = vmatprep.subr.bf16.mxu0 %v5766_v53  ;;  %v5827_v0 = vld [vmem:[%s8200_s1 + $0x328] ss:$16 sps:$4 sm:$0xff]   ;;  %v5832_v52 = vld [vmem:[%s8200_s1 + $0x10c] ss:$16 sps:$4 sm:$0xff]  }
 0x111   :  { %3616 = vmatprep.subr.bf16.mxu1 %v5769_v55  ;;  %v5835_v53 = vld [vmem:[%s8200_s1 + $0x30c] ss:$16 sps:$4 sm:$0xff]   ;;  %v5830_v55 = vld [vmem:[%s8200_s1 + $0x108] ss:$16 sps:$4 sm:$0xff]  }
 0x113   :  { %3576 = vmatpush1.bf16.msra.mxu0 %v5764_v56  ;;  %v5833_v56 = vld [vmem:[%s8200_s1 + $0x308] ss:$16 sps:$4 sm:$0xff]  }
 0x114   :  { %3617 = vmatpush1.bf16.msra.mxu1 %v5767_v57  ;;  %3577 = vmatprep.subr.bf16.mxu0 %v5772_v58  ;;  %v5838_v57 = vld [vmem:[%s8200_s1 + $0x4ec] ss:$16 sps:$4 sm:$0xff]  }
 0x115   :  { %3618 = vmatprep.subr.bf16.mxu1 %v5775_v61  ;;  %v5841_v58 = vld [vmem:[%s8200_s1 + $0x6ec] ss:$16 sps:$4 sm:$0xff]   ;;  %v5836_v61 = vld [vmem:[%s8200_s1 + $0x4e8] ss:$16 sps:$4 sm:$0xff]  }
 0x117   :  { %3578 = vmatpush1.bf16.msra.mxu0 %v5770_v62  ;;  %v5839_v62 = vld [vmem:[%s8200_s1 + $0x6e8] ss:$16 sps:$4 sm:$0xff]  }
 0x118   :  { %3619 = vmatpush1.bf16.msra.mxu1 %v5773_v63  ;;  %3579 = vmatprep.subr.bf16.mxu0 %v5778_v1  ;;  %v5844_v63 = vld [vmem:[%s8200_s1 + $0x4cc] ss:$16 sps:$4 sm:$0xff]  }
 0x119   :  { %3620 = vmatprep.subr.bf16.mxu1 %v5781_v2  ;;  %v5847_v1 = vld [vmem:[%s8200_s1 + $0x6cc] ss:$16 sps:$4 sm:$0xff]  }
 0x11b   :  { %3580 = vmatpush1.bf16.msra.mxu0 %v5776_v3 }
 0x11c   :  { %3621 = vmatpush1.bf16.msra.mxu1 %v5779_v4  ;;  %3581 = vmatprep.subr.bf16.mxu0 %v5784_v5  ;;  %v5842_v5 = vld [vmem:[%s8200_s1 + $0x4c8] ss:$16 sps:$4 sm:$0xff]  }
 0x11d   :  { %3622 = vmatprep.subr.bf16.mxu1 %v5787_v7  ;;  %v5845_v7 = vld [vmem:[%s8200_s1 + $0x6c8] ss:$16 sps:$4 sm:$0xff]  }
 0x11f   :  { %3582 = vmatpush1.bf16.msra.mxu0 %v5782_v8 }
 0x120   :  { %3623 = vmatpush1.bf16.msra.mxu1 %v5785_v9  ;;  %3583 = vmatprep.subr.bf16.mxu0 %v5790_v11 }
 0x121   :  { %3624 = vmatprep.subr.bf16.mxu1 %v5793_v14 }
 0x123   :  { %3584 = vmatpush2.bf16.msra.mxu0 %v5788_v15 }
 0x124   :  { %3625 = vmatpush2.bf16.msra.mxu1 %v5791_v16  ;;  %3585 = vmatprep.subr.bf16.mxu0 %v5796_v19  ;;  %v5848_v19 = vld [vmem:[%s8200_s1 + $0x4a8] ss:$16 sps:$4 sm:$0xff]  }
 0x125   :  { %3626 = vmatprep.subr.bf16.mxu1 %v5799_v20  ;;  %v5851_v20 = vld [vmem:[%s8200_s1 + $0x6a8] ss:$16 sps:$4 sm:$0xff]  }
 0x127   :  { %3586 = vmatpush2.bf16.msra.mxu0 %v5794_v21 }
 0x128   :  { %3627 = vmatpush2.bf16.msra.mxu1 %v5797_v22  ;;  %3587 = vmatprep.subr.bf16.mxu0 %v5802_v24  ;;  %v5854_v22 = vld [vmem:[%s8200_s1 + $0x488] ss:$16 sps:$4 sm:$0xff]  }
 0x129   :  { %3628 = vmatprep.subr.bf16.mxu1 %v5805_v25  ;;  %v5857_v24 = vld [vmem:[%s8200_s1 + $0x688] ss:$16 sps:$4 sm:$0xff]   ;;  %v5862_v25 = vld [vmem:[%s8200_s1 + $0x46c] ss:$16 sps:$4 sm:$0xff]  }
 0x12b   :  { %3588 = vmatpush2.bf16.msra.mxu0 %v5800_v27  ;;  %v5865_v27 = vld [vmem:[%s8200_s1 + $0x66c] ss:$16 sps:$4 sm:$0xff]  }
 0x12c   :  { %3629 = vmatpush2.bf16.msra.mxu1 %v5803_v28  ;;  %3589 = vmatprep.subr.bf16.mxu0 %v5808_v29  ;;  %v5860_v28 = vld [vmem:[%s8200_s1 + $0x468] ss:$16 sps:$4 sm:$0xff]  }
 0x12d   :  { %3630 = vmatprep.subr.bf16.mxu1 %v5811_v30  ;;  %v5863_v29 = vld [vmem:[%s8200_s1 + $0x668] ss:$16 sps:$4 sm:$0xff]   ;;  %v5868_v30 = vld [vmem:[%s8200_s1 + $0x44c] ss:$16 sps:$4 sm:$0xff]  }
 0x12f   :  { %3590 = vmatpush2.bf16.msra.mxu0 %v5806_v31  ;;  %v5871_v31 = vld [vmem:[%s8200_s1 + $0x64c] ss:$16 sps:$4 sm:$0xff]  }
 0x130   :  { %3631 = vmatpush2.bf16.msra.mxu1 %v5809_v33  ;;  %3591 = vmatprep.subr.bf16.mxu0 %v5814_v34  ;;  %v5866_v33 = vld [vmem:[%s8200_s1 + $0x448] ss:$16 sps:$4 sm:$0xff]  }
 0x131   :  { %3632 = vmatprep.subr.bf16.mxu1 %v5817_v36  ;;  %v5869_v34 = vld [vmem:[%s8200_s1 + $0x648] ss:$16 sps:$4 sm:$0xff]   ;;  %v5874_v36 = vld [vmem:[%s8200_s1 + $0x42c] ss:$16 sps:$4 sm:$0xff]  }
 0x133   :  { %3592 = vmatpush2.bf16.msra.mxu0 %v5812_v38  ;;  %v5877_v38 = vld [vmem:[%s8200_s1 + $0x62c] ss:$16 sps:$4 sm:$0xff]  }
 0x134   :  { %3633 = vmatpush2.bf16.msra.mxu1 %v5815_v32  ;;  %3593 = vmatprep.subr.bf16.mxu0 %v5820_v40  ;;  %v5872_v32 = vld [vmem:[%s8200_s1 + $0x428] ss:$16 sps:$4 sm:$0xff]  }
 0x135   :  { %3634 = vmatprep.subr.bf16.mxu1 %v5823_v44  ;;  %v5875_v40 = vld [vmem:[%s8200_s1 + $0x628] ss:$16 sps:$4 sm:$0xff]   ;;  %v5880_v44 = vld [vmem:[%s8200_s1 + $0x40c] ss:$16 sps:$4 sm:$0xff]  }
 0x137   :  { %3594 = vmatpush2.bf16.msra.mxu0 %v5818_v45  ;;  %v5883_v45 = vld [vmem:[%s8200_s1 + $0x60c] ss:$16 sps:$4 sm:$0xff]  }
 0x138   :  { %3635 = vmatpush2.bf16.msra.mxu1 %v5821_v47  ;;  %3595 = vmatprep.subr.bf16.mxu0 %v5826_v48  ;;  %v5878_v47 = vld [vmem:[%s8200_s1 + $0x408] ss:$16 sps:$4 sm:$0xff]  }
 0x139   :  { %3636 = vmatprep.subr.bf16.mxu1 %v5829_v51  ;;  %v5881_v48 = vld [vmem:[%s8200_s1 + $0x608] ss:$16 sps:$4 sm:$0xff]   ;;  %v5886_v51 = vld [vmem:[%s8200_s1 + $0x5ec] ss:$16 sps:$4 sm:$0xff]  }
 0x13b   :  { %3596 = vmatpush2.bf16.msra.mxu0 %v5824_v60  ;;  %v5889_v60 = vld [vmem:[%s8200_s1 + $0x7ec] ss:$16 sps:$4 sm:$0xff]  }
 0x13c   :  { %3637 = vmatpush2.bf16.msra.mxu1 %v5827_v0  ;;  %3597 = vmatprep.subr.bf16.mxu0 %v5832_v52  ;;  %v5884_v0 = vld [vmem:[%s8200_s1 + $0x5e8] ss:$16 sps:$4 sm:$0xff]  }
 0x13d   :  { %3638 = vmatprep.subr.bf16.mxu1 %v5835_v53  ;;  %v5887_v52 = vld [vmem:[%s8200_s1 + $0x7e8] ss:$16 sps:$4 sm:$0xff]   ;;  %v5892_v53 = vld [vmem:[%s8200_s1 + $0x5cc] ss:$16 sps:$4 sm:$0xff]  }
 0x13f   :  { %3598 = vmatpush2.bf16.msra.mxu0 %v5830_v55  ;;  %v5895_v55 = vld [vmem:[%s8200_s1 + $0x7cc] ss:$16 sps:$4 sm:$0xff]  }
 0x140   :  { %3639 = vmatpush2.bf16.msra.mxu1 %v5833_v56  ;;  %3649 = vmatprep.subr.bf16.mxu0 %v5838_v57  ;;  %v5890_v56 = vld [vmem:[%s8200_s1 + $0x5c8] ss:$16 sps:$4 sm:$0xff]  }
 0x141   :  { %3690 = vmatprep.subr.bf16.mxu1 %v5841_v58  ;;  %v5893_v57 = vld [vmem:[%s8200_s1 + $0x7c8] ss:$16 sps:$4 sm:$0xff]   ;;  %v5898_v58 = vld [vmem:[%s8200_s1 + $0x5ac] ss:$16 sps:$4 sm:$0xff]  }
 0x142   :  { %v3355_v2 = vpop.f32.mrf.mxu0  ;;  %3600 = vmatmul.mubr.bf16.vlgmr.msra.gmra.mxu0 %v6471_v13  ;;  %v5850_v13 = vld [vmem:[%s8200_s1 + $0x4ac] ss:$16 sps:$4 sm:$0xff]  }
 0x143   :  { %v3396_v3 = vpop.f32.mrf.mxu1  ;;  %3641 = vmatmul.mubr.bf16.vlgmr.msra.gmra.mxu1 %v6487_v18  ;;  %v3356_v4 = vadd.f32 %v3355_v2, %v7172_v37  ;;  %3650 = vmatpush1.bf16.msra.mxu0 %v5836_v61  ;;  %v5853_v18 = vld [vmem:[%s8200_s1 + $0x6ac] ss:$16 sps:$4 sm:$0xff]  }
 0x144   :  { %3691 = vmatpush1.bf16.msra.mxu1 %v5839_v62  ;;  %v3357_v8 = vpop.f32.mrf.mxu0  ;;  %3651 = vmatprep.subr.bf16.mxu0 %v5844_v63  ;;  %v5901_v61 = vld [vmem:[%s8200_s1 + $0x7ac] ss:$16 sps:$4 sm:$0xff]   ;;  %v5896_v62 = vld [vmem:[%s8200_s1 + $0x5a8] ss:$16 sps:$4 sm:$0xff]  }
 0x145   :  { %v3398_v9 = vpop.f32.mrf.mxu1  ;;  %3692 = vmatprep.subr.bf16.mxu1 %v5847_v1  ;;  %v7373_v37 = vadd.f32 %v3396_v3, %v3356_v4  ;;  %v3358_v11 = vadd.f32 %v3357_v8, %v7182_v46  ;;  %3681 = vmatprep.mubr.bf16.mxu0 %v6483_v17  ;;  %v5856_v17 = vld [vmem:[%s8200_s1 + $0x48c] ss:$16 sps:$4 sm:$0xff]   ;;  %v5899_v63 = vld [vmem:[%s8200_s1 + $0x7a8] ss:$16 sps:$4 sm:$0xff]  }
 0x146   :  { %3722 = vmatprep.mubr.bf16.mxu1 %v6503_v23  ;;  %v3359_v14 = vpop.f32.mrf.mxu0  ;;  %v5859_v23 = vld [vmem:[%s8200_s1 + $0x68c] ss:$16 sps:$4 sm:$0xff]   ;;  %v5902_v3 = vld [vmem:[%s8200_s1 + $0x588] ss:$16 sps:$4 sm:$0xff]  }
 0x147   :  { %v3400_v15 = vpop.f32.mrf.mxu1  ;;  %v7378_v16 = vadd.f32 %v3398_v9, %v3358_v11  ;;  %3652 = vmatpush1.bf16.msra.mxu0 %v5842_v5  ;;  %v5904_v1 = vld [vmem:[%s8200_s1 + $0x58c] ss:$16 sps:$4 sm:$0xff]   ;;  %v5905_v4 = vld [vmem:[%s8200_s1 + $0x788] ss:$16 sps:$4 sm:$0xff]  }
 0x148   :  { %3693 = vmatpush1.bf16.msra.mxu1 %v5845_v7  ;;  %v3360_v21 = vpop.f32.mrf.mxu0  ;;  %3653 = vmatprep.subr.bf16.mxu0 %v5850_v13  ;;  %v5907_v2 = vld [vmem:[%s8200_s1 + $0x78c] ss:$16 sps:$4 sm:$0xff]   ;;  %v5908_v8 = vld [vmem:[%s8200_s1 + $0x568] ss:$16 sps:$4 sm:$0xff]  }
 0x149   :  { %v3401_v46 = vpop.f32.mrf.mxu1  ;;  %3694 = vmatprep.subr.bf16.mxu1 %v5853_v18  ;;  %v5910_v5 = vld [vmem:[%s8200_s1 + $0x56c] ss:$16 sps:$4 sm:$0xff]   ;;  %v5911_v9 = vld [vmem:[%s8200_s1 + $0x768] ss:$16 sps:$4 sm:$0xff]  }
 0x14a   :  { %v5913_v7 = vld [vmem:[%s8200_s1 + $0x76c] ss:$16 sps:$4 sm:$0xff]   ;;  %v5914_v11 = vld [vmem:[%s8200_s1 + $0x548] ss:$16 sps:$4 sm:$0xff]  }
 0x14b   :  { %3654 = vmatpush1.bf16.msra.mxu0 %v5848_v19  ;;  %v5916_v13 = vld [vmem:[%s8200_s1 + $0x54c] ss:$16 sps:$4 sm:$0xff]   ;;  %v5917_v14 = vld [vmem:[%s8200_s1 + $0x748] ss:$16 sps:$4 sm:$0xff]  }
 0x14c   :  { %3695 = vmatpush1.bf16.msra.mxu1 %v5851_v20  ;;  %3655 = vmatprep.subr.bf16.mxu0 %v5856_v17  ;;  %v5919_v18 = vld [vmem:[%s8200_s1 + $0x74c] ss:$16 sps:$4 sm:$0xff]   ;;  %v5920_v20 = vld [vmem:[%s8200_s1 + $0x528] ss:$16 sps:$4 sm:$0xff]  }
 0x14d   :  { %3696 = vmatprep.subr.bf16.mxu1 %v5859_v23  ;;  %v5922_v15 = vld [vmem:[%s8200_s1 + $0x52c] ss:$16 sps:$4 sm:$0xff]   ;;  %v5923_v21 = vld [vmem:[%s8200_s1 + $0x728] ss:$16 sps:$4 sm:$0xff]  }
 0x14e   :  { %v5925_v19 = vld [vmem:[%s8200_s1 + $0x72c] ss:$16 sps:$4 sm:$0xff]   ;;  %v5926_v23 = vld [vmem:[%s8200_s1 + $0x508] ss:$16 sps:$4 sm:$0xff]  }
 0x14f   :  { %3656 = vmatpush1.bf16.msra.mxu0 %v5854_v22  ;;  %v5928_v46 = vld [vmem:[%s8200_s1 + $0x50c] ss:$16 sps:$4 sm:$0xff]   ;;  %v5929_v22 = vld [vmem:[%s8200_s1 + $0x708] ss:$16 sps:$4 sm:$0xff]  }
 0x150   :  { %3697 = vmatpush1.bf16.msra.mxu1 %v5857_v24  ;;  %3657 = vmatprep.subr.bf16.mxu0 %v5862_v25  ;;  %v5931_v17 = vld [vmem:[%s8200_s1 + $0x70c] ss:$16 sps:$4 sm:$0xff]  }
 0x151   :  { %3698 = vmatprep.subr.bf16.mxu1 %v5865_v27  ;;  %v5934_v24 = vld [vmem:[%s8200_s1 + $0x8ec] ss:$16 sps:$4 sm:$0xff]   ;;  %v5932_v27 = vld [vmem:[%s8200_s1 + $0x8e8] ss:$16 sps:$4 sm:$0xff]  }
 0x152   :  { %v5937_v25 = vld [vmem:[%s8200_s1 + $0xaec] ss:$16 sps:$4 sm:$0xff]  }
 0x153   :  { %3658 = vmatpush1.bf16.msra.mxu0 %v5860_v28  ;;  %v5935_v28 = vld [vmem:[%s8200_s1 + $0xae8] ss:$16 sps:$4 sm:$0xff]  }
 0x154   :  { %3699 = vmatpush1.bf16.msra.mxu1 %v5863_v29  ;;  %3659 = vmatprep.subr.bf16.mxu0 %v5868_v30  ;;  %v5940_v29 = vld [vmem:[%s8200_s1 + $0x8cc] ss:$16 sps:$4 sm:$0xff]  }
 0x155   :  { %3700 = vmatprep.subr.bf16.mxu1 %v5871_v31  ;;  %v5943_v30 = vld [vmem:[%s8200_s1 + $0xacc] ss:$16 sps:$4 sm:$0xff]   ;;  %v5938_v31 = vld [vmem:[%s8200_s1 + $0x8c8] ss:$16 sps:$4 sm:$0xff]  }
 0x157   :  { %3660 = vmatpush1.bf16.msra.mxu0 %v5866_v33  ;;  %v5941_v33 = vld [vmem:[%s8200_s1 + $0xac8] ss:$16 sps:$4 sm:$0xff]  }
 0x158   :  { %3701 = vmatpush1.bf16.msra.mxu1 %v5869_v34  ;;  %3661 = vmatprep.subr.bf16.mxu0 %v5874_v36 }
 0x159   :  { %3702 = vmatprep.subr.bf16.mxu1 %v5877_v38  ;;  %v5946_v38 = vld [vmem:[%s8200_s1 + $0x8ac] ss:$16 sps:$4 sm:$0xff]  }
 0x15b   :  { %3662 = vmatpush1.bf16.msra.mxu0 %v5872_v32 }
 0x15c   :  { %3703 = vmatpush1.bf16.msra.mxu1 %v5875_v40  ;;  %3663 = vmatprep.subr.bf16.mxu0 %v5880_v44 }
 0x15d   :  { %3704 = vmatprep.subr.bf16.mxu1 %v5883_v45  ;;  %v5949_v45 = vld [vmem:[%s8200_s1 + $0xaac] ss:$16 sps:$4 sm:$0xff]  }
 0x15f   :  { %3664 = vmatpush1.bf16.msra.mxu0 %v5878_v47 }
 0x160   :  { %3705 = vmatpush1.bf16.msra.mxu1 %v5881_v48  ;;  %3665 = vmatprep.subr.bf16.mxu0 %v5886_v51 }
 0x161   :  { %3706 = vmatprep.subr.bf16.mxu1 %v5889_v60 }
 0x163   :  { %3666 = vmatpush2.bf16.msra.mxu0 %v5884_v0 }
 0x164   :  { %3707 = vmatpush2.bf16.msra.mxu1 %v5887_v52  ;;  %3667 = vmatprep.subr.bf16.mxu0 %v5892_v53  ;;  %v5952_v52 = vld [vmem:[%s8200_s1 + $0x88c] ss:$16 sps:$4 sm:$0xff]   ;;  %v5953_v53 = vld [vmem:[%s8200_s1 + $0xa88] ss:$16 sps:$4 sm:$0xff]  }
 0x165   :  { %3708 = vmatprep.subr.bf16.mxu1 %v5895_v55  ;;  %v5958_v55 = vld [vmem:[%s8200_s1 + $0x86c] ss:$16 sps:$4 sm:$0xff]  }
 0x167   :  { %3668 = vmatpush2.bf16.msra.mxu0 %v5890_v56  ;;  %v5961_v56 = vld [vmem:[%s8200_s1 + $0xa6c] ss:$16 sps:$4 sm:$0xff]  }
 0x168   :  { %3709 = vmatpush2.bf16.msra.mxu1 %v5893_v57  ;;  %3669 = vmatprep.subr.bf16.mxu0 %v5898_v58  ;;  %v5956_v57 = vld [vmem:[%s8200_s1 + $0x868] ss:$16 sps:$4 sm:$0xff]  }
 0x169   :  { %3710 = vmatprep.subr.bf16.mxu1 %v5901_v61  ;;  %v5959_v58 = vld [vmem:[%s8200_s1 + $0xa68] ss:$16 sps:$4 sm:$0xff]   ;;  %v5964_v61 = vld [vmem:[%s8200_s1 + $0x84c] ss:$16 sps:$4 sm:$0xff]  }
 0x16b   :  { %3670 = vmatpush2.bf16.msra.mxu0 %v5896_v62  ;;  %v5967_v62 = vld [vmem:[%s8200_s1 + $0xa4c] ss:$16 sps:$4 sm:$0xff]  }
 0x16c   :  { %3711 = vmatpush2.bf16.msra.mxu1 %v5899_v63  ;;  %3671 = vmatprep.subr.bf16.mxu0 %v5904_v1  ;;  %v5962_v63 = vld [vmem:[%s8200_s1 + $0x848] ss:$16 sps:$4 sm:$0xff]  }
 0x16d   :  { %3712 = vmatprep.subr.bf16.mxu1 %v5907_v2  ;;  %v5965_v1 = vld [vmem:[%s8200_s1 + $0xa48] ss:$16 sps:$4 sm:$0xff]   ;;  %v5970_v2 = vld [vmem:[%s8200_s1 + $0x82c] ss:$16 sps:$4 sm:$0xff]  }
 0x16f   :  { %3672 = vmatpush2.bf16.msra.mxu0 %v5902_v3  ;;  %v5973_v3 = vld [vmem:[%s8200_s1 + $0xa2c] ss:$16 sps:$4 sm:$0xff]  }
 0x170   :  { %3713 = vmatpush2.bf16.msra.mxu1 %v5905_v4  ;;  %3673 = vmatprep.subr.bf16.mxu0 %v5910_v5  ;;  %v5968_v4 = vld [vmem:[%s8200_s1 + $0x828] ss:$16 sps:$4 sm:$0xff]  }
 0x171   :  { %3714 = vmatprep.subr.bf16.mxu1 %v5913_v7  ;;  %v5971_v5 = vld [vmem:[%s8200_s1 + $0xa28] ss:$16 sps:$4 sm:$0xff]   ;;  %v5976_v7 = vld [vmem:[%s8200_s1 + $0x80c] ss:$16 sps:$4 sm:$0xff]  }
 0x173   :  { %3674 = vmatpush2.bf16.msra.mxu0 %v5908_v8  ;;  %v5979_v8 = vld [vmem:[%s8200_s1 + $0xa0c] ss:$16 sps:$4 sm:$0xff]  }
 0x174   :  { %3715 = vmatpush2.bf16.msra.mxu1 %v5911_v9  ;;  %3675 = vmatprep.subr.bf16.mxu0 %v5916_v13  ;;  %v5974_v9 = vld [vmem:[%s8200_s1 + $0x808] ss:$16 sps:$4 sm:$0xff]  }
 0x175   :  { %3716 = vmatprep.subr.bf16.mxu1 %v5919_v18  ;;  %v5977_v13 = vld [vmem:[%s8200_s1 + $0xa08] ss:$16 sps:$4 sm:$0xff]   ;;  %v5982_v18 = vld [vmem:[%s8200_s1 + $0x9ec] ss:$16 sps:$4 sm:$0xff]  }
 0x177   :  { %3676 = vmatpush2.bf16.msra.mxu0 %v5914_v11  ;;  %v5985_v11 = vld [vmem:[%s8200_s1 + $0xbec] ss:$16 sps:$4 sm:$0xff]  }
 0x178   :  { %3717 = vmatpush2.bf16.msra.mxu1 %v5917_v14  ;;  %3677 = vmatprep.subr.bf16.mxu0 %v5922_v15  ;;  %v5980_v14 = vld [vmem:[%s8200_s1 + $0x9e8] ss:$16 sps:$4 sm:$0xff]  }
 0x179   :  { %3718 = vmatprep.subr.bf16.mxu1 %v5925_v19  ;;  %v5983_v15 = vld [vmem:[%s8200_s1 + $0xbe8] ss:$16 sps:$4 sm:$0xff]   ;;  %v5988_v19 = vld [vmem:[%s8200_s1 + $0x9cc] ss:$16 sps:$4 sm:$0xff]  }
 0x17b   :  { %3678 = vmatpush2.bf16.msra.mxu0 %v5920_v20  ;;  %v5991_v20 = vld [vmem:[%s8200_s1 + $0xbcc] ss:$16 sps:$4 sm:$0xff]  }
 0x17c   :  { %3719 = vmatpush2.bf16.msra.mxu1 %v5923_v21  ;;  %3679 = vmatprep.subr.bf16.mxu0 %v5928_v46  ;;  %v5986_v21 = vld [vmem:[%s8200_s1 + $0x9c8] ss:$16 sps:$4 sm:$0xff]  }
 0x17d   :  { %3720 = vmatprep.subr.bf16.mxu1 %v5931_v17  ;;  %v5989_v46 = vld [vmem:[%s8200_s1 + $0xbc8] ss:$16 sps:$4 sm:$0xff]   ;;  %v5994_v17 = vld [vmem:[%s8200_s1 + $0x9ac] ss:$16 sps:$4 sm:$0xff]  }
 0x17f   :  { %3680 = vmatpush2.bf16.msra.mxu0 %v5926_v23  ;;  %v5997_v23 = vld [vmem:[%s8200_s1 + $0xbac] ss:$16 sps:$4 sm:$0xff]  }
 0x180   :  { %3721 = vmatpush2.bf16.msra.mxu1 %v5929_v22  ;;  %3731 = vmatprep.subr.bf16.mxu0 %v5934_v24  ;;  %v5992_v22 = vld [vmem:[%s8200_s1 + $0x9a8] ss:$16 sps:$4 sm:$0xff]  }
 0x181   :  { %3772 = vmatprep.subr.bf16.mxu1 %v5937_v25  ;;  %v5995_v24 = vld [vmem:[%s8200_s1 + $0xba8] ss:$16 sps:$4 sm:$0xff]   ;;  %v6000_v25 = vld [vmem:[%s8200_s1 + $0x98c] ss:$16 sps:$4 sm:$0xff]  }
 0x182   :  { %v3437_v34 = vpop.f32.mrf.mxu0  ;;  %3682 = vmatmul.mubr.bf16.vlgmr.msra.gmra.mxu0 %v6682_v26 }
 0x183   :  { %v3478_v36 = vpop.f32.mrf.mxu1  ;;  %3723 = vmatmul.mubr.bf16.vlgmr.msra.gmra.mxu1 %v6695_v6  ;;  %v3438_v32 = vadd.f32 %v3437_v34, %v7373_v37  ;;  %3732 = vmatpush1.bf16.msra.mxu0 %v5932_v27  ;;  %v5944_v6 = vld [vmem:[%s8200_s1 + $0x8a8] ss:$16 sps:$4 sm:$0xff]   ;;  %v6003_v27 = vld [vmem:[%s8200_s1 + $0xb8c] ss:$16 sps:$4 sm:$0xff]  }
 0x184   :  { %3773 = vmatpush1.bf16.msra.mxu1 %v5935_v28  ;;  %v3439_v40 = vpop.f32.mrf.mxu0  ;;  %3733 = vmatprep.subr.bf16.mxu0 %v5940_v29  ;;  %v5947_v37 = vld [vmem:[%s8200_s1 + $0xaa8] ss:$16 sps:$4 sm:$0xff]  }
 0x185   :  { %v3480_v44 = vpop.f32.mrf.mxu1  ;;  %3774 = vmatprep.subr.bf16.mxu1 %v5943_v30  ;;  %v7575_v47 = vadd.f32 %v3478_v36, %v3438_v32  ;;  %v3440_v26 = vadd.f32 %v3439_v40, %v7378_v16  ;;  %3763 = vmatprep.mubr.bf16.mxu0 %v6735_v41  ;;  %v5955_v41 = vld [vmem:[%s8200_s1 + $0xa8c] ss:$16 sps:$4 sm:$0xff]   ;;  %v5998_v28 = vld [vmem:[%s8200_s1 + $0x988] ss:$16 sps:$4 sm:$0xff]  }
 0x186   :  { %3804 = vmatprep.mubr.bf16.mxu1 %v6740_v43  ;;  %v3441_v48 = vpop.f32.mrf.mxu0  ;;  %v5950_v43 = vld [vmem:[%s8200_s1 + $0x888] ss:$16 sps:$4 sm:$0xff]   ;;  %v6006_v30 = vld [vmem:[%s8200_s1 + $0x96c] ss:$16 sps:$4 sm:$0xff]  }
 0x187   :  { %v3482_v51 = vpop.f32.mrf.mxu1  ;;  %v7586_v60 = vadd.f32 %v3480_v44, %v3440_v26  ;;  %3734 = vmatpush1.bf16.msra.mxu0 %v5938_v31  ;;  %v6001_v29 = vld [vmem:[%s8200_s1 + $0xb88] ss:$16 sps:$4 sm:$0xff]   ;;  %v6009_v31 = vld [vmem:[%s8200_s1 + $0xb6c] ss:$16 sps:$4 sm:$0xff]  }
 0x188   :  { %3775 = vmatpush1.bf16.msra.mxu1 %v5941_v33  ;;  %v3442_v0 = vpop.f32.mrf.mxu0  ;;  %3735 = vmatprep.subr.bf16.mxu0 %v5946_v38  ;;  %v6004_v33 = vld [vmem:[%s8200_s1 + $0x968] ss:$16 sps:$4 sm:$0xff]   ;;  %v6012_v36 = vld [vmem:[%s8200_s1 + $0x94c] ss:$16 sps:$4 sm:$0xff]  }
 0x189   :  { %v3483_v16 = vpop.f32.mrf.mxu1  ;;  %3776 = vmatprep.subr.bf16.mxu1 %v5949_v45  ;;  %v6007_v34 = vld [vmem:[%s8200_s1 + $0xb68] ss:$16 sps:$4 sm:$0xff]   ;;  %v6015_v38 = vld [vmem:[%s8200_s1 + $0xb4c] ss:$16 sps:$4 sm:$0xff]  }
 0x18a   :  { %v6010_v32 = vld [vmem:[%s8200_s1 + $0x948] ss:$16 sps:$4 sm:$0xff]   ;;  %v6018_v44 = vld [vmem:[%s8200_s1 + $0x92c] ss:$16 sps:$4 sm:$0xff]  }
 0x18b   :  { %3736 = vmatpush1.bf16.msra.mxu0 %v5944_v6  ;;  %v6013_v40 = vld [vmem:[%s8200_s1 + $0xb48] ss:$16 sps:$4 sm:$0xff]   ;;  %v6021_v45 = vld [vmem:[%s8200_s1 + $0xb2c] ss:$16 sps:$4 sm:$0xff]  }
 0x18c   :  { %3777 = vmatpush1.bf16.msra.mxu1 %v5947_v37  ;;  %3737 = vmatprep.subr.bf16.mxu0 %v5952_v52  ;;  %v6016_v26 = vld [vmem:[%s8200_s1 + $0x928] ss:$16 sps:$4 sm:$0xff]   ;;  %v6024_v37 = vld [vmem:[%s8200_s1 + $0x90c] ss:$16 sps:$4 sm:$0xff]  }
 0x18d   :  { %3778 = vmatprep.subr.bf16.mxu1 %v5955_v41  ;;  %v6019_v6 = vld [vmem:[%s8200_s1 + $0xb28] ss:$16 sps:$4 sm:$0xff]   ;;  %v6027_v48 = vld [vmem:[%s8200_s1 + $0xb0c] ss:$16 sps:$4 sm:$0xff]  }
 0x18e   :  { %v6022_v51 = vld [vmem:[%s8200_s1 + $0x908] ss:$16 sps:$4 sm:$0xff]   ;;  %v6030_v16 = vld [vmem:[%s8200_s1 + $0xcec] ss:$16 sps:$4 sm:$0xff]  }
 0x18f   :  { %3738 = vmatpush1.bf16.msra.mxu0 %v5950_v43  ;;  %v6025_v0 = vld [vmem:[%s8200_s1 + $0xb08] ss:$16 sps:$4 sm:$0xff]   ;;  %v6033_v52 = vld [vmem:[%s8200_s1 + $0xeec] ss:$16 sps:$4 sm:$0xff]  }
 0x190   :  { %3779 = vmatpush1.bf16.msra.mxu1 %v5953_v53  ;;  %3739 = vmatprep.subr.bf16.mxu0 %v5958_v55  ;;  %v6028_v41 = vld [vmem:[%s8200_s1 + $0xce8] ss:$16 sps:$4 sm:$0xff]   ;;  %v6036_v53 = vld [vmem:[%s8200_s1 + $0xccc] ss:$16 sps:$4 sm:$0xff]  }
 0x191   :  { %3780 = vmatprep.subr.bf16.mxu1 %v5961_v56  ;;  %v6031_v43 = vld [vmem:[%s8200_s1 + $0xee8] ss:$16 sps:$4 sm:$0xff]   ;;  %v6039_v55 = vld [vmem:[%s8200_s1 + $0xecc] ss:$16 sps:$4 sm:$0xff]  }
 0x193   :  { %3740 = vmatpush1.bf16.msra.mxu0 %v5956_v57 }
 0x194   :  { %3781 = vmatpush1.bf16.msra.mxu1 %v5959_v58  ;;  %3741 = vmatprep.subr.bf16.mxu0 %v5964_v61  ;;  %v6034_v61 = vld [vmem:[%s8200_s1 + $0xcc8] ss:$16 sps:$4 sm:$0xff]  }
 0x195   :  { %3782 = vmatprep.subr.bf16.mxu1 %v5967_v62  ;;  %v6037_v62 = vld [vmem:[%s8200_s1 + $0xec8] ss:$16 sps:$4 sm:$0xff]  }
 0x197   :  { %3742 = vmatpush1.bf16.msra.mxu0 %v5962_v63 }
 0x198   :  { %3783 = vmatpush1.bf16.msra.mxu1 %v5965_v1  ;;  %3743 = vmatprep.subr.bf16.mxu0 %v5970_v2 }
 0x199   :  { %3784 = vmatprep.subr.bf16.mxu1 %v5973_v3 }
 0x19b   :  { %3744 = vmatpush1.bf16.msra.mxu0 %v5968_v4  ;;  %v6040_v4 = vld [vmem:[%s8200_s1 + $0xca8] ss:$16 sps:$4 sm:$0xff]  }
 0x19c   :  { %3785 = vmatpush1.bf16.msra.mxu1 %v5971_v5  ;;  %3745 = vmatprep.subr.bf16.mxu0 %v5976_v7  ;;  %v6043_v5 = vld [vmem:[%s8200_s1 + $0xea8] ss:$16 sps:$4 sm:$0xff]  }
 0x19d   :  { %3786 = vmatprep.subr.bf16.mxu1 %v5979_v8 }
 0x19f   :  { %3746 = vmatpush1.bf16.msra.mxu0 %v5974_v9  ;;  %v6046_v9 = vld [vmem:[%s8200_s1 + $0xc88] ss:$16 sps:$4 sm:$0xff]  }
 0x1a0   :  { %3787 = vmatpush1.bf16.msra.mxu1 %v5977_v13  ;;  %3747 = vmatprep.subr.bf16.mxu0 %v5982_v18  ;;  %v6049_v13 = vld [vmem:[%s8200_s1 + $0xe88] ss:$16 sps:$4 sm:$0xff]   ;;  %v6054_v18 = vld [vmem:[%s8200_s1 + $0xc6c] ss:$16 sps:$4 sm:$0xff]  }
 0x1a1   :  { %3788 = vmatprep.subr.bf16.mxu1 %v5985_v11  ;;  %v6057_v11 = vld [vmem:[%s8200_s1 + $0xe6c] ss:$16 sps:$4 sm:$0xff]  }
 0x1a3   :  { %3748 = vmatpush2.bf16.msra.mxu0 %v5980_v14  ;;  %v6052_v14 = vld [vmem:[%s8200_s1 + $0xc68] ss:$16 sps:$4 sm:$0xff]  }
 0x1a4   :  { %3789 = vmatpush2.bf16.msra.mxu1 %v5983_v15  ;;  %3749 = vmatprep.subr.bf16.mxu0 %v5988_v19  ;;  %v6055_v15 = vld [vmem:[%s8200_s1 + $0xe68] ss:$16 sps:$4 sm:$0xff]   ;;  %v6060_v19 = vld [vmem:[%s8200_s1 + $0xc4c] ss:$16 sps:$4 sm:$0xff]  }
 0x1a5   :  { %3790 = vmatprep.subr.bf16.mxu1 %v5991_v20  ;;  %v6063_v20 = vld [vmem:[%s8200_s1 + $0xe4c] ss:$16 sps:$4 sm:$0xff]  }
 0x1a7   :  { %3750 = vmatpush2.bf16.msra.mxu0 %v5986_v21  ;;  %v6058_v21 = vld [vmem:[%s8200_s1 + $0xc48] ss:$16 sps:$4 sm:$0xff]  }
 0x1a8   :  { %3791 = vmatpush2.bf16.msra.mxu1 %v5989_v46  ;;  %3751 = vmatprep.subr.bf16.mxu0 %v5994_v17  ;;  %v6061_v46 = vld [vmem:[%s8200_s1 + $0xe48] ss:$16 sps:$4 sm:$0xff]   ;;  %v6066_v17 = vld [vmem:[%s8200_s1 + $0xc2c] ss:$16 sps:$4 sm:$0xff]  }
 0x1a9   :  { %3792 = vmatprep.subr.bf16.mxu1 %v5997_v23  ;;  %v6069_v23 = vld [vmem:[%s8200_s1 + $0xe2c] ss:$16 sps:$4 sm:$0xff]  }
 0x1ab   :  { %3752 = vmatpush2.bf16.msra.mxu0 %v5992_v22  ;;  %v6064_v22 = vld [vmem:[%s8200_s1 + $0xc28] ss:$16 sps:$4 sm:$0xff]  }
 0x1ac   :  { %3793 = vmatpush2.bf16.msra.mxu1 %v5995_v24  ;;  %3753 = vmatprep.subr.bf16.mxu0 %v6000_v25  ;;  %v6067_v24 = vld [vmem:[%s8200_s1 + $0xe28] ss:$16 sps:$4 sm:$0xff]   ;;  %v6072_v25 = vld [vmem:[%s8200_s1 + $0xc0c] ss:$16 sps:$4 sm:$0xff]  }
 0x1ad   :  { %3794 = vmatprep.subr.bf16.mxu1 %v6003_v27  ;;  %v6075_v27 = vld [vmem:[%s8200_s1 + $0xe0c] ss:$16 sps:$4 sm:$0xff]  }
 0x1af   :  { %3754 = vmatpush2.bf16.msra.mxu0 %v5998_v28  ;;  %v6070_v28 = vld [vmem:[%s8200_s1 + $0xc08] ss:$16 sps:$4 sm:$0xff]  }
 0x1b0   :  { %3795 = vmatpush2.bf16.msra.mxu1 %v6001_v29  ;;  %3755 = vmatprep.subr.bf16.mxu0 %v6006_v30  ;;  %v6073_v29 = vld [vmem:[%s8200_s1 + $0xe08] ss:$16 sps:$4 sm:$0xff]   ;;  %v6078_v30 = vld [vmem:[%s8200_s1 + $0xdec] ss:$16 sps:$4 sm:$0xff]  }
 0x1b1   :  { %3796 = vmatprep.subr.bf16.mxu1 %v6009_v31  ;;  %v6081_v31 = vld [vmem:[%s8200_s1 + $0xfec] ss:$16 sps:$4 sm:$0xff]  }
 0x1b3   :  { %3756 = vmatpush2.bf16.msra.mxu0 %v6004_v33  ;;  %v6076_v33 = vld [vmem:[%s8200_s1 + $0xde8] ss:$16 sps:$4 sm:$0xff]  }
 0x1b4   :  { %3797 = vmatpush2.bf16.msra.mxu1 %v6007_v34  ;;  %3757 = vmatprep.subr.bf16.mxu0 %v6012_v36  ;;  %v6079_v34 = vld [vmem:[%s8200_s1 + $0xfe8] ss:$16 sps:$4 sm:$0xff]   ;;  %v6084_v36 = vld [vmem:[%s8200_s1 + $0xdcc] ss:$16 sps:$4 sm:$0xff]  }
 0x1b5   :  { %3798 = vmatprep.subr.bf16.mxu1 %v6015_v38  ;;  %v6087_v38 = vld [vmem:[%s8200_s1 + $0xfcc] ss:$16 sps:$4 sm:$0xff]  }
 0x1b7   :  { %3758 = vmatpush2.bf16.msra.mxu0 %v6010_v32  ;;  %v6082_v32 = vld [vmem:[%s8200_s1 + $0xdc8] ss:$16 sps:$4 sm:$0xff]  }
 0x1b8   :  { %3799 = vmatpush2.bf16.msra.mxu1 %v6013_v40  ;;  %3759 = vmatprep.subr.bf16.mxu0 %v6018_v44  ;;  %v6085_v40 = vld [vmem:[%s8200_s1 + $0xfc8] ss:$16 sps:$4 sm:$0xff]   ;;  %v6090_v44 = vld [vmem:[%s8200_s1 + $0xdac] ss:$16 sps:$4 sm:$0xff]  }
 0x1b9   :  { %3800 = vmatprep.subr.bf16.mxu1 %v6021_v45  ;;  %v6093_v45 = vld [vmem:[%s8200_s1 + $0xfac] ss:$16 sps:$4 sm:$0xff]  }
 0x1bb   :  { %3760 = vmatpush2.bf16.msra.mxu0 %v6016_v26  ;;  %v6088_v26 = vld [vmem:[%s8200_s1 + $0xda8] ss:$16 sps:$4 sm:$0xff]  }
 0x1bc   :  { %3801 = vmatpush2.bf16.msra.mxu1 %v6019_v6  ;;  %3761 = vmatprep.subr.bf16.mxu0 %v6024_v37  ;;  %v6091_v6 = vld [vmem:[%s8200_s1 + $0xfa8] ss:$16 sps:$4 sm:$0xff]   ;;  %v6096_v37 = vld [vmem:[%s8200_s1 + $0xd8c] ss:$16 sps:$4 sm:$0xff]  }
 0x1bd   :  { %3802 = vmatprep.subr.bf16.mxu1 %v6027_v48  ;;  %v6099_v48 = vld [vmem:[%s8200_s1 + $0xf8c] ss:$16 sps:$4 sm:$0xff]  }
 0x1bf   :  { %3762 = vmatpush2.bf16.msra.mxu0 %v6022_v51  ;;  %v6094_v51 = vld [vmem:[%s8200_s1 + $0xd88] ss:$16 sps:$4 sm:$0xff]  }
 0x1c0   :  { %3803 = vmatpush2.bf16.msra.mxu1 %v6025_v0  ;;  %3813 = vmatprep.subr.bf16.mxu0 %v6030_v16  ;;  %v6097_v0 = vld [vmem:[%s8200_s1 + $0xf88] ss:$16 sps:$4 sm:$0xff]   ;;  %v6102_v16 = vld [vmem:[%s8200_s1 + $0xd6c] ss:$16 sps:$4 sm:$0xff]  }
 0x1c1   :  { %3854 = vmatprep.subr.bf16.mxu1 %v6033_v52  ;;  %v6105_v52 = vld [vmem:[%s8200_s1 + $0xf6c] ss:$16 sps:$4 sm:$0xff]  }
 0x1c2   :  { %v3519_v56 = vpop.f32.mrf.mxu0  ;;  %3764 = vmatmul.mubr.bf16.vlgmr.msra.gmra.mxu0 %v6911_v50  ;;  %v6042_v50 = vld [vmem:[%s8200_s1 + $0xcac] ss:$16 sps:$4 sm:$0xff]  }
 0x1c3   :  { %v3560_v57 = vpop.f32.mrf.mxu1  ;;  %3805 = vmatmul.mubr.bf16.vlgmr.msra.gmra.mxu1 %v6927_v35  ;;  %v3520_v58 = vadd.f32 %v3519_v56, %v7575_v47  ;;  %3814 = vmatpush1.bf16.msra.mxu0 %v6028_v41  ;;  %v6045_v35 = vld [vmem:[%s8200_s1 + $0xeac] ss:$16 sps:$4 sm:$0xff]   ;;  %v6100_v41 = vld [vmem:[%s8200_s1 + $0xd68] ss:$16 sps:$4 sm:$0xff]  }
 0x1c4   :  { %3855 = vmatpush1.bf16.msra.mxu1 %v6031_v43  ;;  %v7771_v63 = vpop.f32.mrf.mxu0  ;;  %3815 = vmatprep.subr.bf16.mxu0 %v6036_v53  ;;  %v6103_v43 = vld [vmem:[%s8200_s1 + $0xf68] ss:$16 sps:$4 sm:$0xff]   ;;  %v6108_v53 = vld [vmem:[%s8200_s1 + $0xd4c] ss:$16 sps:$4 sm:$0xff]  }
 0x1c5   :  { %v7773_v1 = vpop.f32.mrf.mxu1  ;;  %3856 = vmatprep.subr.bf16.mxu1 %v6039_v55  ;;  %v7781_v47 = vadd.f32 %v3560_v57, %v3520_v58  ;;  %3845 = vmatprep.mubr.bf16.mxu0 %v6923_v54  ;;  %v6048_v54 = vld [vmem:[%s8200_s1 + $0xc8c] ss:$16 sps:$4 sm:$0xff]   ;;  %v6106_v56 = vld [vmem:[%s8200_s1 + $0xd48] ss:$16 sps:$4 sm:$0xff]  }
 0x1c6   :  { %3886 = vmatprep.mubr.bf16.mxu1 %v6943_v59  ;;  %v3523_v2 = vpop.f32.mrf.mxu0  ;;  %v6051_v59 = vld [vmem:[%s8200_s1 + $0xe8c] ss:$16 sps:$4 sm:$0xff]   ;;  %v6109_v57 = vld [vmem:[%s8200_s1 + $0xf48] ss:$16 sps:$4 sm:$0xff]  }
 0x1c7   :  { %v3564_v3 = vpop.f32.mrf.mxu1  ;;  %3816 = vmatpush1.bf16.msra.mxu0 %v6034_v61  ;;  %v6111_v55 = vld [vmem:[%s8200_s1 + $0xf4c] ss:$16 sps:$4 sm:$0xff]  }
 0x1c8   :  { %3857 = vmatpush1.bf16.msra.mxu1 %v6037_v62  ;;  %v3524_v7 = vpop.f32.mrf.mxu0  ;;  %3817 = vmatprep.subr.bf16.mxu0 %v6042_v50  ;;  %v6114_v58 = vld [vmem:[%s8200_s1 + $0xd2c] ss:$16 sps:$4 sm:$0xff]   ;;  %v3522_v62 = vadd.f32 %v7771_v63, %v7586_v60  ;;  %v6112_v50 = vld [vmem:[%s8200_s1 + $0xd28] ss:$16 sps:$4 sm:$0xff]  }
 0x1c9   :  { %v3565_v8 = vpop.f32.mrf.mxu1  ;;  %3858 = vmatprep.subr.bf16.mxu1 %v6045_v35  ;;  %v6117_v61 = vld [vmem:[%s8200_s1 + $0xf2c] ss:$16 sps:$4 sm:$0xff]   ;;  %v6115_v35 = vld [vmem:[%s8200_s1 + $0xf28] ss:$16 sps:$4 sm:$0xff]  }
 0x1ca   :  { %v6120_v2 = vld [vmem:[%s8200_s1 + $0xd0c] ss:$16 sps:$4 sm:$0xff]   ;;  %v3563_v63 = vadd.f32 %v7773_v1, %v3522_v62  ;;  %v6118_v3 = vld [vmem:[%s8200_s1 + $0xd08] ss:$16 sps:$4 sm:$0xff]   ;;  %v557_v1 = vsub.s32 3, %v6375_v42 }
 0x1cb   :  { %3818 = vmatpush1.bf16.msra.mxu0 %v6040_v4  ;;  %v6123_v60 = vld [vmem:[%s8200_s1 + $0xf0c] ss:$16 sps:$4 sm:$0xff]   ;;  %v6121_v4 = vld [vmem:[%s8200_s1 + $0xf08] ss:$16 sps:$4 sm:$0xff]  }
 0x1cc   :  { %3859 = vmatpush1.bf16.msra.mxu1 %v6043_v5  ;;  %3819 = vmatprep.subr.bf16.mxu0 %v6048_v54  ;;  %v553_v5 = vsub.s32 2, %v6375_v42  ;;  %v6124_v7 = vld [vmem:[%s8203_s3 + $0x78] sm:$0xff]   ;;  %v3896_v8 = vmax.f32 %v3563_v63, 0.0  ;;  %v6212_v54 = vld [vmem:[%s8202_s2] sm:$0xf] }
 0x1cd   :  { %3860 = vmatprep.subr.bf16.mxu1 %v6051_v59 }
 0x1ce   :  { %v554_v59 = vrot.slane %v6212_v54, %v553_v5 }
 0x1cf   :  { %3820 = vmatpush1.bf16.msra.mxu0 %v6046_v9  ;;  %v6125_v9 = vld [vmem:[%s8203_s3 + $0x38] sm:$0xff]  }
 0x1d0   :  { %3861 = vmatpush1.bf16.msra.mxu1 %v6049_v13  ;;  %3821 = vmatprep.subr.bf16.mxu0 %v6054_v18  ;;  %v6126_v13 = vld [vmem:[%s8203_s3 + $0x70] sm:$0xff]   ;;  %v3900_v18 = vpack.c.bf16 %v3896_v8, %v3896_v8 }
 0x1d1   :  { %3862 = vmatprep.subr.bf16.mxu1 %v6057_v11  ;;  %v558_v11 = vrot.slane %v6212_v54, %v557_v1  ;;  %v6154_v54 = vld [vmem:[%s8203_s3 + $0xc0] sm:$0xff]  }
 0x1d3   :  { %3822 = vmatpush1.bf16.msra.mxu0 %v6052_v14 }
 0x1d4   :  { %3863 = vmatpush1.bf16.msra.mxu1 %v6055_v15  ;;  %3823 = vmatprep.subr.bf16.mxu0 %v6060_v19 }
 0x1d5   :  { %3864 = vmatprep.subr.bf16.mxu1 %v6063_v20  ;;  %v6127_v20 = vld [vmem:[%s8203_s3 + $0x30] sm:$0xff]  }
 0x1d7   :  { %3824 = vmatpush1.bf16.msra.mxu0 %v6058_v21 }
 0x1d8   :  { %3865 = vmatpush1.bf16.msra.mxu1 %v6061_v46  ;;  %3825 = vmatprep.subr.bf16.mxu0 %v6066_v17  ;;  %v6128_v17 = vld [vmem:[%s8203_s3 + $0x68] sm:$0xff]  }
 0x1d9   :  { %3866 = vmatprep.subr.bf16.mxu1 %v6069_v23 }
 0x1db   :  { %3826 = vmatpush1.bf16.msra.mxu0 %v6064_v22 }
 0x1dc   :  { %3867 = vmatpush1.bf16.msra.mxu1 %v6067_v24  ;;  %3827 = vmatprep.subr.bf16.mxu0 %v6072_v25 }
 0x1dd   :  { %3868 = vmatprep.subr.bf16.mxu1 %v6075_v27  ;;  %v6130_v27 = vld [vmem:[%s8203_s3 + $0x60] sm:$0xff]  }
 0x1df   :  { %3828 = vmatpush1.bf16.msra.mxu0 %v6070_v28 }
 0x1e0   :  { %3869 = vmatpush1.bf16.msra.mxu1 %v6073_v29  ;;  %3829 = vmatprep.subr.bf16.mxu0 %v6078_v30  ;;  %v6140_v30 = vld [vmem:[%s8203_s3 + $0xf8] sm:$0xff]  }
 0x1e1   :  { %3870 = vmatprep.subr.bf16.mxu1 %v6081_v31  ;;  %v6141_v31 = vld [vmem:[%s8203_s3 + $0xb8] sm:$0xff]  }
 0x1e3   :  { %3830 = vmatpush2.bf16.msra.mxu0 %v6076_v33  ;;  %v6142_v33 = vld [vmem:[%s8203_s3 + $0xf0] sm:$0xff]  }
 0x1e4   :  { %3871 = vmatpush2.bf16.msra.mxu1 %v6079_v34  ;;  %3831 = vmatprep.subr.bf16.mxu0 %v6084_v36  ;;  %v6131_v34 = vld [vmem:[%s8203_s3 + $0x20] sm:$0xff]   ;;  %v6143_v36 = vld [vmem:[%s8203_s3 + $0xb0] sm:$0xff]  }
 0x1e5   :  { %3872 = vmatprep.subr.bf16.mxu1 %v6087_v38  ;;  %v6132_v38 = vld [vmem:[%s8203_s3 + $0x58] sm:$0xff]  }
 0x1e7   :  { %3832 = vmatpush2.bf16.msra.mxu0 %v6082_v32  ;;  %v6144_v32 = vld [vmem:[%s8203_s3 + $0xe8] sm:$0xff]  }
 0x1e8   :  { %3873 = vmatpush2.bf16.msra.mxu1 %v6085_v40  ;;  %3833 = vmatprep.subr.bf16.mxu0 %v6090_v44  ;;  %v6133_v40 = vld [vmem:[%s8203_s3 + $0x18] sm:$0xff]   ;;  %v6145_v44 = vld [vmem:[%s8203_s3 + $0xa8] sm:$0xff]  }
 0x1e9   :  { %3874 = vmatprep.subr.bf16.mxu1 %v6093_v45  ;;  %v6134_v45 = vld [vmem:[%s8203_s3 + $0x50] sm:$0xff]  }
 0x1eb   :  { %3834 = vmatpush2.bf16.msra.mxu0 %v6088_v26  ;;  %v6146_v26 = vld [vmem:[%s8203_s3 + $0xe0] sm:$0xff]  }
 0x1ec   :  { %3875 = vmatpush2.bf16.msra.mxu1 %v6091_v6  ;;  %3835 = vmatprep.subr.bf16.mxu0 %v6096_v37  ;;  %v6135_v6 = vld [vmem:[%s8203_s3 + $0x10] sm:$0xff]   ;;  %v6147_v37 = vld [vmem:[%s8203_s3 + $0xa0] sm:$0xff]  }
 0x1ed   :  { %3876 = vmatprep.subr.bf16.mxu1 %v6099_v48  ;;  %v6136_v48 = vld [vmem:[%s8203_s3 + $0x48] sm:$0xff]  }
 0x1ef   :  { %3836 = vmatpush2.bf16.msra.mxu0 %v6094_v51  ;;  %v6148_v51 = vld [vmem:[%s8203_s3 + $0xd8] sm:$0xff]  }
 0x1f0   :  { %3877 = vmatpush2.bf16.msra.mxu1 %v6097_v0  ;;  %3837 = vmatprep.subr.bf16.mxu0 %v6102_v16  ;;  %v6137_v0 = vld [vmem:[%s8203_s3 + $0x8] sm:$0xff]   ;;  %v6149_v16 = vld [vmem:[%s8203_s3 + $0x98] sm:$0xff]  }
 0x1f1   :  { %3878 = vmatprep.subr.bf16.mxu1 %v6105_v52  ;;  %v6138_v52 = vld [vmem:[%s8203_s3 + $0x40] sm:$0xff]  }
 0x1f3   :  { %3838 = vmatpush2.bf16.msra.mxu0 %v6100_v41  ;;  %v6139_v41 = vld [vmem:[%s8203_s3] sm:$0xff]  }
 0x1f4   :  { %3879 = vmatpush2.bf16.msra.mxu1 %v6103_v43  ;;  %3839 = vmatprep.subr.bf16.mxu0 %v6108_v53  ;;  %v3895_v43 = vmax.f32 %v7781_v47, 0.0  ;;  %v6152_v47 = vld [vmem:[%s8203_s3 + $0xc8] sm:$0xff]  }
 0x1f5   :  { %3880 = vmatprep.subr.bf16.mxu1 %v6111_v55  ;;  %v6150_v55 = vld [vmem:[%s8203_s3 + $0xd0] sm:$0xff]  }
 0x1f6   :  { %v3899_v53 = vpack.c.bf16 %v3895_v43, %v3895_v43 }
 0x1f7   :  { %3840 = vmatpush2.bf16.msra.mxu0 %v6106_v56  ;;  %v6151_v56 = vld [vmem:[%s8203_s3 + $0x90] sm:$0xff]  }
 0x1f8   :  { %3881 = vmatpush2.bf16.msra.mxu1 %v6109_v57  ;;  %3841 = vmatprep.subr.bf16.mxu0 %v6114_v58 }
 0x1f9   :  { %3882 = vmatprep.subr.bf16.mxu1 %v6117_v61 }
 0x1fb   :  { %3842 = vmatpush2.bf16.msra.mxu0 %v6112_v50 }
 0x1fc   :  { %3883 = vmatpush2.bf16.msra.mxu1 %v6115_v35  ;;  %3843 = vmatprep.subr.bf16.mxu0 %v6120_v2 }
 0x1fd   :  { %3884 = vmatprep.subr.bf16.mxu1 %v6123_v60  ;;  %v6153_v60 = vld [vmem:[%s8203_s3 + $0x88] sm:$0xff]  }
 0x1ff   :  { %3844 = vmatpush2.bf16.msra.mxu0 %v6118_v3 }
 0x200   :  { %3885 = vmatpush2.bf16.msra.mxu1 %v6121_v4  ;;  %5276 = vmatprep.subr.bf16.mxu0 %v6124_v7 }
 0x201   :  { %5298 = vmatprep.subr.bf16.mxu1 %v6140_v30 }
 0x202   :  { %v3601_v14 = vpop.f32.mrf.mxu0  ;;  %3846 = vmatmul.mubr.bf16.vlgmr.msra.gmra.mxu0 %v7125_v10 }
 0x203   :  { %v3642_v15 = vpop.f32.mrf.mxu1  ;;  %3887 = vmatmul.mubr.bf16.vlgmr.msra.gmra.mxu1 %v7140_v39  ;;  %v3602_v19 = vadd.f32 %v3601_v14, %v554_v59  ;;  %5277 = vmatpush3.bf16.msra.mxu0 %v6125_v9  ;;  %v6129_v39 = vld [vmem:[%s8203_s3 + $0x28] sm:$0xff]   ;;  %v6155_v59 = vld [vmem:[%s8203_s3 + $0x80] sm:$0xff]  }
 0x204   :  { %4198 = vmatprep.mubr.bf16.mxu0 %v3900_v18  ;;  %v3603_v21 = vpop.f32.mrf.mxu0  ;;  %5278 = vmatprep.subr.bf16.mxu0 %v6126_v13  ;;  %v6156_v9 = vld [vmem:[%s8204_s5 + $0x118] ss:$20 sps:$4 sm:$0xff]   ;;  %v6158_v13 = vld [vmem:[%s8204_s5 + $0x11c] ss:$20 sps:$4 sm:$0xff]  }
 0x205   :  { %v3644_v46 = vpop.f32.mrf.mxu1  ;;  %v3643_v23 = vadd.f32 %v3642_v15, %v3602_v19  ;;  %v3604_v22 = vadd.f32 %v3603_v21, %v558_v11  ;;  %5299 = vmatpush3.bf16.msra.mxu1 %v6141_v31  ;;  %v6161_v18 = vld [vmem:[%s8204_s5 + $0x124] ss:$20 sps:$4 sm:$0xff]   ;;  %v6164_v11 = vld [vmem:[%s8204_s5 + $0xf4] ss:$20 sps:$4 sm:$0xff]   ;;  %v6170_v15 = vld [vmem:[%s8204_s5 + $0xcc] ss:$20 sps:$4 sm:$0xff]  }
 0x206   :  { %v3605_v24 = vpop.f32.mrf.mxu0  ;;  %5300 = vmatprep.subr.bf16.mxu1 %v6142_v33  ;;  %v6162_v14 = vld [vmem:[%s8204_s5 + $0xf0] ss:$20 sps:$4 sm:$0xff]   ;;  %v6168_v19 = vld [vmem:[%s8204_s5 + $0xc8] ss:$20 sps:$4 sm:$0xff]   ;;  %v6174_v21 = vld [vmem:[%s8204_s5 + $0xa0] ss:$20 sps:$4 sm:$0xff]  }
 0x207   :  { %v3646_v10 = vpop.f32.mrf.mxu1  ;;  %v3645_v25 = vadd.f32 %v3644_v46, %v3604_v22  ;;  %5279 = vmatpush3.bf16.msra.mxu0 %v6127_v20  ;;  %v6176_v20 = vld [vmem:[%s8204_s5 + $0xa4] ss:$20 sps:$4 sm:$0xff]   ;;  %v6182_v46 = vld [vmem:[%s8204_s5 + $0x7c] ss:$20 sps:$4 sm:$0xff]  }
 0x208   :  { %v3606_v28 = vpop.f32.mrf.mxu0  ;;  %5280 = vmatprep.subr.bf16.mxu0 %v6128_v17  ;;  %v6180_v17 = vld [vmem:[%s8204_s5 + $0x78] ss:$20 sps:$4 sm:$0xff]   ;;  %v6186_v22 = vld [vmem:[%s8204_s5 + $0x50] ss:$20 sps:$4 sm:$0xff]  }
 0x209   :  { %v3647_v29 = vpop.f32.mrf.mxu1  ;;  %5301 = vmatpush3.bf16.msra.mxu1 %v6143_v36 }
 0x20a   :  { %5302 = vmatprep.subr.bf16.mxu1 %v6144_v32 }
 0x20b   :  { %5281 = vmatpush3.bf16.msra.mxu0 %v6129_v39 }
 0x20c   :  { %5282 = vmatprep.subr.bf16.mxu0 %v6130_v27 }
 0x20d   :  { %5303 = vmatpush3.bf16.msra.mxu1 %v6145_v44 }
 0x20e   :  { %5304 = vmatprep.subr.bf16.mxu1 %v6146_v26 }
 0x20f   :  { %5283 = vmatpush3.bf16.msra.mxu0 %v6131_v34 }
 0x210   :  { %5284 = vmatprep.subr.bf16.mxu0 %v6132_v38 }
 0x211   :  { %5305 = vmatpush3.bf16.msra.mxu1 %v6147_v37 }
 0x212   :  { %5306 = vmatprep.subr.bf16.mxu1 %v6148_v51 }
 0x213   :  { %5285 = vmatpush3.bf16.msra.mxu0 %v6133_v40 }
 0x214   :  { %5286 = vmatprep.subr.bf16.mxu0 %v6134_v45 }
 0x215   :  { %5307 = vmatpush3.bf16.msra.mxu1 %v6149_v16 }
 0x216   :  { %5308 = vmatprep.subr.bf16.mxu1 %v6150_v55 }
 0x217   :  { %5287 = vmatpush3.bf16.msra.mxu0 %v6135_v6 }
 0x218   :  { %5288 = vmatprep.subr.bf16.mxu0 %v6136_v48 }
 0x219   :  { %5309 = vmatpush3.bf16.msra.mxu1 %v6151_v56  ;;  %v6167_v56 = vld [vmem:[%s8204_s5 + $0xfc] ss:$20 sps:$4 sm:$0xff]  }
 0x21a   :  { %5310 = vmatprep.subr.bf16.mxu1 %v6152_v47  ;;  %v6185_v47 = vld [vmem:[%s8204_s5 + $0x84] ss:$20 sps:$4 sm:$0xff]  }
 0x21b   :  { %5289 = vmatpush3.bf16.msra.mxu0 %v6137_v0 }
 0x21c   :  { %5290 = vmatprep.subr.bf16.mxu0 %v6138_v52 }
 0x21d   :  { %5311 = vmatpush3.bf16.msra.mxu1 %v6153_v60  ;;  %v6189_v60 = vld [vmem:[%s8204_s5 + $0x58] ss:$20 sps:$4 sm:$0xff]  }
 0x21e   :  { %5312 = vmatprep.subr.bf16.mxu1 %v6154_v54  ;;  %v6194_v54 = vld [vmem:[%s8204_s5 + $0x2c] ss:$20 sps:$4 sm:$0xff]  }
 0x21f   :  { %5291 = vmatpush3.bf16.msra.mxu0 %v6139_v41 }
 0x220   :  { %4531 = vmatprep.subr.bf16.mxu0 %v6158_v13  ;;  %v6195_v13 = vld [vmem:[%s8204_s5 + $0x30] ss:$20 sps:$4 sm:$0xff]  }
 0x221   :  { %5313 = vmatpush3.bf16.msra.mxu1 %v6155_v59  ;;  %v6192_v59 = vld [vmem:[%s8204_s5 + $0x28] ss:$20 sps:$4 sm:$0xff]  }
 0x222   :  { %4199 = vmatmul.mubr.bf16.vlgmr.msra.gmra.mxu0 %v3899_v53  ;;  %4572 = vmatprep.subr.bf16.mxu1 %v6161_v18  ;;  %v6159_v53 = vld [vmem:[%s8204_s5 + $0x120] ss:$20 sps:$4 sm:$0xff]   ;;  %v6200_v18 = vld [vmem:[%s8204_s5 + $0x4] ss:$20 sps:$4 sm:$0xff]  }
 0x223   :  { %4532 = vmatpush1.bf16.msra.mxu0 %v6156_v9  ;;  %v6197_v9 = vld [vmem:[%s8204_s5 + $0x34] ss:$20 sps:$4 sm:$0xff]  }
 0x224   :  { %4533 = vmatprep.subr.bf16.mxu0 %v6164_v11  ;;  %v6198_v11 = vld [vmem:[%s8204_s5] ss:$20 sps:$4 sm:$0xff]  }
 0x227   :  { %4534 = vmatpush1.bf16.msra.mxu0 %v6162_v14  ;;  %v6203_v14 = vld [vmem:[%s8204_s5 + $0xc] ss:$20 sps:$4 sm:$0xff]  }
 0x228   :  { %4535 = vmatprep.subr.bf16.mxu0 %v6170_v15  ;;  %v6201_v15 = vld [vmem:[%s8204_s5 + $0x8] ss:$20 sps:$4 sm:$0xff]  }
 0x22b   :  { %4536 = vmatpush1.bf16.msra.mxu0 %v6168_v19  ;;  %v6214_v19 = vmov 0  }
 0x22c   :  { %4537 = vmatprep.subr.bf16.mxu0 %v6176_v20  ;;  %4563 = vmatprep.mubr.bf16.mxu0 %v6214_v19  ;;  %v6215_v20 = vmov 0.0  }
 0x22f   :  { %4538 = vmatpush1.bf16.msra.mxu0 %v6174_v21  ;;  %v5202_v21 = vld [vmem:[%s8205_s4] ss:$0 sm:$0xff] }
 0x230   :  { %4539 = vmatprep.subr.bf16.mxu0 %v6182_v46 }
 0x233   :  { %4540 = vmatpush1.bf16.msra.mxu0 %v6180_v17 }
 0x242   :  { %v3683_v57 = vpop.f32.mrf.mxu0 }
 0x243   :  { %v3724_v58 = vpop.f32.mrf.mxu1  ;;  %v3684_v61 = vadd.f32 %v3683_v57, %v3643_v23  ;;  %v6188_v23 = vld [vmem:[%s8204_s5 + $0x54] ss:$20 sps:$4 sm:$0xff]   ;;  %v6165_v57 = vld [vmem:[%s8204_s5 + $0xf8] ss:$20 sps:$4 sm:$0xff]  }
 0x244   :  { %v3685_v62 = vpop.f32.mrf.mxu0  ;;  %4541 = vmatprep.subr.bf16.mxu0 %v6188_v23 }
 0x245   :  { %v3726_v50 = vpop.f32.mrf.mxu1  ;;  %v3725_v35 = vadd.f32 %v3724_v58, %v3684_v61  ;;  %v3686_v2 = vadd.f32 %v3685_v62, %v3645_v25  ;;  %4542 = vmatpush1.bf16.msra.mxu0 %v6186_v22  ;;  %v6173_v58 = vld [vmem:[%s8204_s5 + $0xd4] ss:$20 sps:$4 sm:$0xff]   ;;  %v6171_v61 = vld [vmem:[%s8204_s5 + $0xd0] ss:$20 sps:$4 sm:$0xff]   ;;  %v6179_v62 = vld [vmem:[%s8204_s5 + $0xac] ss:$20 sps:$4 sm:$0xff]  }
 0x246   :  { %v3687_v63 = vpop.f32.mrf.mxu0  ;;  %4543 = vmatprep.subr.bf16.mxu0 %v6194_v54 }
 0x247   :  { %v3728_v3 = vpop.f32.mrf.mxu1  ;;  %v3727_v4 = vadd.f32 %v3726_v50, %v3686_v2  ;;  %v6177_v50 = vld [vmem:[%s8204_s5 + $0xa8] ss:$20 sps:$4 sm:$0xff]  }
 0x248   :  { %v3688_v7 = vpop.f32.mrf.mxu0  ;;  %v6191_v2 = vld [vmem:[%s8204_s5 + $0x5c] ss:$20 sps:$4 sm:$0xff]  }
 0x249   :  { %v3729_v8 = vpop.f32.mrf.mxu1  ;;  %4544 = vmatpush1.bf16.msra.mxu0 %v6192_v59 }
 0x24a   :  { %4545 = vmatprep.subr.bf16.mxu0 %v6200_v18 }
 0x24d   :  { %4546 = vmatpush1.bf16.msra.mxu0 %v6198_v11 }
 0x24e   :  { %5329 = vmatprep.subr.bf16.mxu0 %v6215_v20 }
 0x282   :  { %v3765_v24 = vpop.f32.mrf.mxu0 }
 0x283   :  { %v3806_v10 = vpop.f32.mrf.mxu1  ;;  %v3766_v25 = vadd.f32 %v3765_v24, %v3725_v35  ;;  %v6183_v35 = vld [vmem:[%s8204_s5 + $0x80] ss:$20 sps:$4 sm:$0xff]  }
 0x284   :  { %v3767_v39 = vpop.f32.mrf.mxu0 }
 0x285   :  { %v3808_v27 = vpop.f32.mrf.mxu1  ;;  %v3807_v28 = vadd.f32 %v3806_v10, %v3766_v25  ;;  %v3768_v34 = vadd.f32 %v3767_v39, %v3727_v4 }
 0x286   :  { %v3769_v29 = vpop.f32.mrf.mxu0 }
 0x287   :  { %v3810_v30 = vpop.f32.mrf.mxu1  ;;  %v3809_v32 = vadd.f32 %v3808_v27, %v3768_v34  ;;  %v6204_v27 = vld [vmem:[%s8204_s5 + $0x128] ss:$20 sps:$4 sm:$0xff]   ;;  %v6205_v29 = vld [vmem:[%s8204_s5 + $0x100] ss:$20 sps:$4 sm:$0xff]  }
 0x288   :  { %v3770_v31 = vpop.f32.mrf.mxu0  ;;  %v6206_v30 = vld [vmem:[%s8204_s5 + $0xd8] ss:$20 sps:$4 sm:$0xff]   ;;  %v6209_v34 = vld [vmem:[%s8204_s5 + $0x60] ss:$20 sps:$4 sm:$0xff]  }
 0x289   :  { %v3811_v33 = vpop.f32.mrf.mxu1  ;;  %v6207_v31 = vld [vmem:[%s8204_s5 + $0xb0] ss:$20 sps:$4 sm:$0xff]  }
 0x28a   :  { %v6208_v33 = vld [vmem:[%s8204_s5 + $0x88] ss:$20 sps:$4 sm:$0xff]  }
 0x2c2   :  { %v3847_v36 = vpop.f32.mrf.mxu0 }
 0x2c3   :  { %v3888_v38 = vpop.f32.mrf.mxu1  ;;  %v3848_v40 = vadd.f32 %v3847_v36, %v3807_v28  ;;  %v6210_v36 = vld [vmem:[%s8204_s5 + $0x38] ss:$20 sps:$4 sm:$0xff]  }
 0x2c4   :  { %v3849_v44 = vpop.f32.mrf.mxu0 }
 0x2c5   :  { %v3890_v45 = vpop.f32.mrf.mxu1  ;;  %v3889_v26 = vadd.f32 %v3888_v38, %v3848_v40  ;;  %v3850_v6 = vadd.f32 %v3849_v44, %v3809_v32  ;;  %v6211_v38 = vld [vmem:[%s8204_s5 + $0x10] ss:$20 sps:$4 sm:$0xff]   ;;  %v6217_v32 = vmov 1983009808  }
 0x2c6   :  { %v3851_v37 = vpop.f32.mrf.mxu0  ;;  %v4661_v40 = vunpack.c.l.s4 %v6217_v32  ;;  %v4296_v44 = vld [vmem:[%s8206_s6] sm:$0x1f] }
 0x2c7   :  { %v3892_v48 = vpop.f32.mrf.mxu1  ;;  %v3891_v51 = vadd.f32 %v3890_v45, %v3850_v6  ;;  %v3897_v0 = vmax.f32 %v3889_v26, 0.0  ;;  %v4301_v26 = vrot.slane %v4296_v44, %v545_v12  ;;  %v4309_v6 = vrot.slane %v4296_v44, %v553_v5 }
 0x2c8   :  { %v3852_v16 = vpop.f32.mrf.mxu0  ;;  %v4662_v45 = vunpack.c.0.s8 %v4661_v40  ;;  %v4305_v37 = vrot.slane %v4296_v44, %v549_v49  ;;  %v4313_v48 = vrot.slane %v4296_v44, %v557_v1  ;;  %v4316_v1 = vsub.s32 4, %v6375_v42 }
 0x2c9   :  { %v3893_v52 = vpop.f32.mrf.mxu1  ;;  %v3898_v41 = vmax.f32 %v3891_v51, 0.0  ;;  %v3901_v55 = vpack.c.bf16 %v3897_v0, %v3897_v0 }
 0x2ca   :  { %v4665_v52 = vsub.s32 %v4662_v45, %v6375_v42 }
 0x2cb   :  { %v3902_v43 = vpack.c.bf16 %v3898_v41, %v3898_v41 }
 0x2cd   :  { %4238 = vmatprep.mubr.bf16.mxu1 %v3902_v43 }
 0x2ce   :  { %4239 = vmatmul.mubr.bf16.vlgmr.msra.gmra.mxu1 %v3901_v55 }
 0x2cf   :  { %4573 = vmatpush1.bf16.msra.mxu1 %v6159_v53  ;;  %4604 = vmatprep.mubr.bf16.mxu1 %v6214_v19 }
 0x2d0   :  { %4574 = vmatprep.subr.bf16.mxu1 %v6167_v56 }
 0x2d3   :  { %4575 = vmatpush1.bf16.msra.mxu1 %v6165_v57 }
 0x2d4   :  { %4576 = vmatprep.subr.bf16.mxu1 %v6173_v58 }
 0x2d7   :  { %4577 = vmatpush1.bf16.msra.mxu1 %v6171_v61 }
 0x2d8   :  { %4578 = vmatprep.subr.bf16.mxu1 %v6179_v62 }
 0x2db   :  { %4579 = vmatpush1.bf16.msra.mxu1 %v6177_v50 }
 0x2dc   :  { %4580 = vmatprep.subr.bf16.mxu1 %v6185_v47 }
 0x2df   :  { %4581 = vmatpush1.bf16.msra.mxu1 %v6183_v35  ;;  %v4317_v35 = vrot.slane %v4296_v44, %v4316_v1 }
 0x2e0   :  { %4582 = vmatprep.subr.bf16.mxu1 %v6191_v2 }
 0x2e2   :  { %v5292_v63 = vpop.f32.mrf.mxu0 }
 0x2e3   :  { %4583 = vmatpush1.bf16.msra.mxu1 %v6189_v60 }
 0x2e4   :  { %v5293_v3 = vpop.f32.mrf.mxu0  ;;  %4584 = vmatprep.subr.bf16.mxu1 %v6197_v9 }
 0x2e5   :  { %v5294_v4 = vadd.f32 %v5293_v3, %v5292_v63 }
 0x2e6   :  { %v5295_v7 = vpop.f32.mrf.mxu0 }
 0x2e7   :  { %4585 = vmatpush1.bf16.msra.mxu1 %v6195_v13  ;;  %v4201_v23 = vadd.f32 %v5294_v4, %v5202_v21 }
 0x2e8   :  { %v5296_v8 = vpop.f32.mrf.mxu0  ;;  %4586 = vmatprep.subr.bf16.mxu1 %v6203_v14 }
 0x2eb   :  { %4587 = vmatpush1.bf16.msra.mxu1 %v6201_v15 }
 0x38e   :  { %v5314_v46 = vpop.f32.mrf.mxu1 }
 0x390   :  { %v5315_v17 = vpop.f32.mrf.mxu1 }
 0x391   :  { %v5316_v22 = vadd.f32 %v5315_v17, %v5314_v46 }
 0x392   :  { %v5317_v24 = vpop.f32.mrf.mxu1 }
 0x393   :  { %v4241_v10 = vadd.f32 %v5316_v22, %v4201_v23 }
 0x394   :  { %v5318_v25 = vpop.f32.mrf.mxu1 }
 0x395   :  { %v4246_v39 = vmax.f32 %v4241_v10, 0.0 }
 0x397   :  { %v4247_v28 = vpack.c.bf16 %v4246_v39, %v4246_v39 }
 0x399   :  { %4564 = vmatmul.mubr.bf16.vlgmr.msra.gmra.mxu0 %v4247_v28  ;;  %4605 = vmatmul.mubr.bf16.vlgmr.msra.gmra.mxu1 %v4247_v28 }
 0x39a   :  { %5330 = vmatpush3.bf16.msra.mxu0 %v6204_v27  ;;  %5345 = vmatprep.mubr.msk.bf16.mxu0 %vm6216_vm0, %v6215_v20 }
 0x39b   :  { %5331 = vmatprep.subr.bf16.mxu0 %v6215_v20 }
 0x39e   :  { %5332 = vmatpush3.bf16.msra.mxu0 %v6205_v29 }
 0x39f   :  { %5333 = vmatprep.subr.bf16.mxu0 %v6215_v20 }
 0x3a2   :  { %5334 = vmatpush3.bf16.msra.mxu0 %v6206_v30 }
 0x3a3   :  { %5335 = vmatprep.subr.bf16.mxu0 %v6215_v20 }
 0x3a6   :  { %5336 = vmatpush3.bf16.msra.mxu0 %v6207_v31 }
 0x3a7   :  { %5337 = vmatprep.subr.bf16.mxu0 %v6215_v20 }
 0x3aa   :  { %5338 = vmatpush3.bf16.msra.mxu0 %v6208_v33 }
 0x3ab   :  { %5339 = vmatprep.subr.bf16.mxu0 %v6215_v20 }
 0x3ae   :  { %5340 = vmatpush3.bf16.msra.mxu0 %v6209_v34 }
 0x3af   :  { %5341 = vmatprep.subr.bf16.mxu0 %v6215_v20 }
 0x3b2   :  { %5342 = vmatpush3.bf16.msra.mxu0 %v6210_v36 }
 0x3b3   :  { %5343 = vmatprep.subr.bf16.mxu0 %v6215_v20 }
 0x3b6   :  { %5344 = vmatpush3.bf16.msra.mxu0 %v6211_v38 }
 0x3b9   :  { %5346 = vmatmul.mubr.bf16.vlgmr.msra.gmra.mxu0 %v4247_v28 }
 0x459   :  { %v4565_v51 = vpop.f32.mrf.mxu0  ;;  %v4606_v0 = vpop.f32.mrf.mxu1 }
 0x45a   :  { %v4566_v43 = vadd.f32 %v4565_v51, %v4301_v26  ;;  %v4607_v53 = vadd.f32 %v4606_v0, %v4309_v6 }
 0x45b   :  { %v4567_v16 = vpop.f32.mrf.mxu0  ;;  %v4608_v41 = vpop.f32.mrf.mxu1 }
 0x45c   :  { %v4568_v55 = vadd.f32 %v4567_v16, %v4305_v37  ;;  %v4609_v56 = vadd.f32 %v4608_v41, %v4313_v48 }
 0x45d   :  { %v4569_v12 = vpop.f32.mrf.mxu0  ;;  %v4610_v57 = vpop.f32.mrf.mxu1 }
 0x45e   :  { %v4658_v58 = vcombine.low %v4566_v43, %v4568_v55  ;;  %v4659_v5 = vcombine.low %v4607_v53, %v4609_v56 }
 0x45f   :  { %v4570_v61 = vpop.f32.mrf.mxu0  ;;  %v4611_v62 = vpop.f32.mrf.mxu1 }
 0x460   :  { %v4666_v49 = vrot.slane %v4658_v58, %v4665_v52  ;;  %v4673_v50 = vrot.slane %v4659_v5, %v4665_v52 }
 0x462   :  { %v4674_v47 = vcombine.low %v4666_v49, %v4673_v50 }
 0x464   :  { %4684 = vst [vmem:[%s8207_s7] sm:$0xff] %v4674_v47 }
 0x479   :  { %v4647_v2 = vpop.f32.mrf.mxu0 }
 0x47a   :  { %v4648_v60 = vadd.f32 %v4647_v2, %v4317_v35 }
 0x47b   :  { %v5347_v63 = vpop.f32.mrf.mxu0 }
 0x47c   :  { %5275 = vst.sshfl [vmem:[%s8207_s7 + $0x8] sm:$0x3 pattern:$0x76325410] %v4648_v60 }
 0x47d   :  { %v4650_v3 = vpop.f32.mrf.mxu0 }
 0x47f   :  { %v5348_v4 = vpop.f32.mrf.mxu0 }

</bundles_post_ra>
